<compile_context>
chip_gen: v7x
topology: tpu7x:2x2x1
jax: 0.10.0
libtpu: 0.0.40
codegen_flags: <defaults>
</compile_context>

<pallas_src>
import jax
import jax.numpy as jnp
from jax.experimental import pallas as pl
from jax.experimental.pallas import tpu as pltpu


# -----------------------------------------------------------------------------
# Fused forward kernel.  Input resolution is the module's probe size (1, 24, 32).
# Activations live in a (rows = (n, h), lanes = (w, c)) layout throughout.
# -----------------------------------------------------------------------------
def _thermal_cnn_kernel(
    x_ref,                      # (nb, 1, 24, 32) f32, NCHW
    w1_ref, b1_ref,             # (5, 32, 512)  bf16, (1, 512) f32   conv1 baked-dx
    w2_ref, b2_ref,             # (5, 256, 512) bf16, (1, 512) f32   conv2 baked-dx
    w3_ref, b3_ref,             # (5, 256, 512) bf16, (1, 512) f32   conv3 baked-dx
    wf1_ref, bf1_ref,           # (3, 256, 128) bf16, (1, 128) f32   fc1 (per output-row h)
    wf2_ref, bf2_ref,           # (128, 256)    bf16, (1, 256) f32
    wf3_ref, bf3_ref,           # (256, C)      bf16, (1, C)   f32
    out_ref,                    # (nb, C) f32
    hp1, hp2, hp3,              # VMEM scratch: height-padded activations (f32)
):
    n = x_ref.shape[0]
    f32, bf16 = jnp.float32, jnp.bfloat16

    def conv_relu_pool(hp, w_ref, b_ref, h_out):
        """5x5 same-conv (baked-dx weights) + bias + ReLU + 2x2 maxpool."""
        k = hp.shape[-1]                      # W_in * Cin lanes

        def taps(dy):                         # rows h..h+4 of the height-padded input
            return hp[:, dy:dy + h_out, :].reshape(n * h_out, k).astype(bf16)

        acc = jnp.dot(taps(0), w_ref[0], preferred_element_type=f32)
        for dy in range(1, 5):
            acc = acc + jnp.dot(taps(dy), w_ref[dy], preferred_element_type=f32)
        acc = jnp.maximum(acc + b_ref[...], 0.0)          # (n*h_out, 512), permuted lanes
        # Pool over h: adjacent (n, h) row pairs.
        th = acc.reshape((n * h_out) // 2, 2, 512).max(axis=1)
        # Pool over w: weight columns were permuted so partners are 256 lanes apart;
        # the result is already in standard (w', cout) lane order for the next layer.
        return jnp.maximum(th[:, 0:256], th[:, 256:512])  # (n*h_out/2, 256)

    # ---------------- Layer 1: conv(1->16) + ReLU + maxpool --------------------
    zh = jnp.zeros((n, 2, 32), f32)
    hp1[:, 0:2, :] = zh                      # height halo only; width pad baked in weights
    hp1[:, 26:28, :] = zh
    hp1[:, 2:26, :] = x_ref[:, 0, :, :]
    p1 = conv_relu_pool(hp1, w1_ref, b1_ref, 24)          # (n*12, 256) lanes (w0..15, c0..15)

    # ---------------- Layer 2: conv(16->32) + ReLU + maxpool -------------------
    zh = jnp.zeros((n, 2, 256), f32)
    hp2[:, 0:2, :] = zh
    hp2[:, 14:16, :] = zh
    hp2[:, 2:14, :] = p1.reshape(n, 12, 256)
    p2 = conv_relu_pool(hp2, w2_ref, b2_ref, 12)          # (n*6, 256) lanes (w0..7, c0..31)

    # ---------------- Layer 3: conv(32->64) + ReLU + maxpool -------------------
    hp3[:, 0:2, :] = zh
    hp3[:, 8:10, :] = zh
    hp3[:, 2:8, :] = p2.reshape(n, 6, 256)
    p3 = conv_relu_pool(hp3, w3_ref, b3_ref, 6)           # (n*3, 256) lanes (w0..3, c0..63)

    # ---------------- Classifier (dropout = identity at inference) -------------
    # fc1 directly from the lane-resident pooled value: sum over the 3 output rows.
    feat = p3.astype(bf16).reshape(n, 3, 256)
    h = jnp.dot(feat[:, 0, :], wf1_ref[0], preferred_element_type=f32)
    for r in range(1, 3):
        h = h + jnp.dot(feat[:, r, :], wf1_ref[r], preferred_element_type=f32)
    h = jnp.maximum(h + bf1_ref[...], 0.0)
    h = jnp.maximum(
        jnp.dot(h.astype(bf16), wf2_ref[...], preferred_element_type=f32) + bf2_ref[...], 0.0)
    y = jnp.dot(h.astype(bf16), wf3_ref[...], preferred_element_type=f32) + bf3_ref[...]
    out_ref[...] = y.astype(out_ref.dtype)


def thermal_cnn_forward(x, kp, *, batch_block=None):
    """x: (N, 1, 24, 32) NCHW float32; kp: prepared kernel params.

    batch_block: optional per-grid-step batch (must divide N; if < N it should be a
    multiple of 8 for the output block).  With >1 block the grid axis is "parallel"
    so both v7x TensorCores are used and per-core scratch stays bounded.
    """
    N = x.shape[0]
    C = kp["wf3"].shape[-1]
    nb = N if batch_block is None else batch_block
    assert N % nb == 0, "batch must be divisible by batch_block"
    assert nb == N or nb % 8 == 0, "batch_block < N must be a multiple of 8"

    vmem = pltpu.MemorySpace.VMEM

    def full_spec(arr):
        nd = arr.ndim
        return pl.BlockSpec(arr.shape, lambda i: (0,) * nd, memory_space=vmem)

    weights = (kp["w1"], kp["b1"], kp["w2"], kp["b2"], kp["w3"], kp["b3"],
               kp["wf1"], kp["bf1"], kp["wf2"], kp["bf2"], kp["wf3"], kp["bf3"])

    # VMEM budget: ~3.2 MiB bf16 weights (+ double buffering) + ~1 MiB per sample
    # of scratch / live values; capped below v7x's 64 MiB physical VMEM.
    vmem_limit = int(min(64, 16 + nb) * 2 ** 20)

    return pl.pallas_call(
        _thermal_cnn_kernel,
        out_shape=jax.ShapeDtypeStruct((N, C), jnp.float32),
        grid=(N // nb,),
        in_specs=[pl.BlockSpec((nb, 1, 24, 32), lambda i: (i, 0, 0, 0), memory_space=vmem)]
                 + [full_spec(w) for w in weights],
        out_specs=pl.BlockSpec((nb, C), lambda i: (i, 0), memory_space=vmem),
        scratch_shapes=[
            pltpu.VMEM((nb, 28, 32), jnp.float32),    # hp1: height-padded input
            pltpu.VMEM((nb, 16, 256), jnp.float32),   # hp2: height-padded act1 (w, c) lanes
            pltpu.VMEM((nb, 10, 256), jnp.float32),   # hp3: height-padded act2 (w, c) lanes
        ],
        compiler_params=pltpu.CompilerParams(
            dimension_semantics=("parallel",),
            vmem_limit_bytes=vmem_limit,
        ),
    )(x, *weights)


# -----------------------------------------------------------------------------
# Parameters: PyTorch layouts (Conv OIHW, Linear (out, in)) + one-time conversion
# to the kernel's baked / permuted layouts.
# -----------------------------------------------------------------------------
def init_params(key, num_classes):
    ks = jax.random.split(key, 12)

    def u(k, shape, fan_in):
        b = 1.0 / float(fan_in) ** 0.5
        return jax.random.uniform(k, shape, jnp.float32, -b, b)

    return {
        "conv1_w": u(ks[0], (16, 1, 5, 5), 1 * 25),   "conv1_b": u(ks[1], (16,), 1 * 25),
        "conv2_w": u(ks[2], (32, 16, 5, 5), 16 * 25), "conv2_b": u(ks[3], (32,), 16 * 25),
        "conv3_w": u(ks[4], (64, 32, 5, 5), 32 * 25), "conv3_b": u(ks[5], (64,), 32 * 25),
        "fc1_w": u(ks[6], (128, 768), 768),  "fc1_b": u(ks[7], (128,), 768),
        "fc2_w": u(ks[8], (256, 128), 128),  "fc2_b": u(ks[9], (256,), 128),
        "fc3_w": u(ks[10], (num_classes, 256), 256), "fc3_b": u(ks[11], (num_classes,), 256),
    }


def prepare_params(p):
    """One-time conversion (outside the kernel) of PyTorch-layout parameters."""
    bf16 = jnp.bfloat16

    def bake_conv(conv_w, conv_b, width):
        # Per-dy matrix Wdy[(win, cin), (wout, cout)] = conv_w[cout, cin, dy, win-wout+2]
        # (zero outside the 5-tap window) -> width padding is baked into the weight.
        cout, cin = int(conv_w.shape[0]), int(conv_w.shape[1])
        assert width * cout == 512
        win = jnp.arange(width)[:, None]
        wout = jnp.arange(width)[None, :]
        dx = win - wout + 2                                        # kernel column tap
        valid = ((dx >= 0) & (dx < 5)).astype(jnp.float32)
        wt = jnp.transpose(conv_w, (2, 3, 1, 0))                   # (ky, kx, cin, cout)
        g = wt[:, jnp.clip(dx, 0, 4)] * valid[None, :, :, None, None]   # (5, win, wout, cin, cout)
        g = jnp.transpose(g, (0, 1, 3, 2, 4)).reshape(5, width * cin, width * cout)
        # Column permutation: lane = (w % 2) * 256 + (w // 2) * cout + c, so the two
        # 2x-maxpool partners along w are exactly 256 lanes apart and the pooled
        # result comes out in standard (w', cout) lane order.
        j = jnp.arange(width * cout)
        src = (2 * ((j % 256) // cout) + j // 256) * cout + (j % cout)
        w_b = g[:, :, src].astype(bf16)
        b_b = jnp.tile(conv_b, width)[src].reshape(1, 512).astype(jnp.float32)
        return w_b, b_b

    w1, b1 = bake_conv(p["conv1_w"], p["conv1_b"], 32)
    w2, b2 = bake_conv(p["conv2_w"], p["conv2_b"], 16)
    w3, b3 = bake_conv(p["conv3_w"], p["conv3_b"], 8)

    # fc1: rows permuted from PyTorch flatten order (c, h, w) to the kernel's
    # (h, w, c), split per output row h -> (3, 256, 128).
    wf1 = jnp.transpose(p["fc1_w"].reshape(128, 64, 3, 4), (2, 3, 1, 0)).reshape(3, 256, 128)

    return {
        "w1": w1, "b1": b1, "w2": w2, "b2": b2, "w3": w3, "b3": b3,
        "wf1": wf1.astype(bf16), "bf1": p["fc1_b"].reshape(1, 128).astype(jnp.float32),
        "wf2": p["fc2_w"].T.astype(bf16), "bf2": p["fc2_b"].reshape(1, 256).astype(jnp.float32),
        "wf3": p["fc3_w"].T.astype(bf16), "bf3": p["fc3_b"].reshape(1, -1).astype(jnp.float32),
    }


# -----------------------------------------------------------------------------
# Pure-JAX reference (PyTorch semantics) for self-verification.
# -----------------------------------------------------------------------------
def _reference_forward(x, p):
    hi = jax.lax.Precision.HIGHEST

    def block(h, wc, bc):
        h = jax.lax.conv_general_dilated(
            h, wc, window_strides=(1, 1), padding=((2, 2), (2, 2)),
            dimension_numbers=("NCHW", "OIHW", "NCHW"), precision=hi)
        h = jax.nn.relu(h + bc[None, :, None, None])
        return jax.lax.reduce_window(h, -jnp.inf, jax.lax.max,
                                     (1, 1, 2, 2), (1, 1, 2, 2), "VALID")

    h = block(x, p["conv1_w"], p["conv1_b"])
    h = block(h, p["conv2_w"], p["conv2_b"])
    h = block(h, p["conv3_w"], p["conv3_b"])
    h = h.reshape(h.shape[0], -1)                                   # (N, 768), (c,h,w) order
    h = jax.nn.relu(jnp.dot(h, p["fc1_w"].T, precision=hi) + p["fc1_b"])
    h = jax.nn.relu(jnp.dot(h, p["fc2_w"].T, precision=hi) + p["fc2_b"])
    return jnp.dot(h, p["fc3_w"].T, precision=hi) + p["fc3_b"]


if __name__ == "__main__":
    num_classes = 10
    key = jax.random.PRNGKey(0)
    kx, kpkey = jax.random.split(key)

    # Input at the module's probe resolution: NCHW (N=2, C=1, H=24, W=32).
    x = jax.random.normal(kx, (2, 1, 24, 32), jnp.float32)
    torch_params = init_params(kpkey, num_classes)
    kparams = prepare_params(torch_params)

    fwd = jax.jit(thermal_cnn_forward)
    y = fwd(x, kparams)
    jax.block_until_ready(y)
    assert y.shape == (2, num_classes), y.shape

    # Self-check against a plain-JAX reference of the PyTorch forward.
    # Tolerance covers bf16 matmul operands (f32 accumulation) vs f32 reference.
    y_ref = _reference_forward(x, torch_params)
    err = float(jnp.max(jnp.abs(y - y_ref)))
    assert jnp.allclose(y, y_ref, atol=2e-2, rtol=2e-2), err

    print("KERNEL_OK")
</pallas_src>

<mosaic_0001>
module attributes {stable_mosaic.version = 11 : i64} {
  func.func @_thermal_cnn_kernel(%arg0: i32, %arg1: memref<2x1x24x32xf32, #tpu.memory_space<vmem>>, %arg2: memref<5x32x512xbf16, #tpu.memory_space<vmem>>, %arg3: memref<1x512xf32, #tpu.memory_space<vmem>>, %arg4: memref<5x256x512xbf16, #tpu.memory_space<vmem>>, %arg5: memref<1x512xf32, #tpu.memory_space<vmem>>, %arg6: memref<5x256x512xbf16, #tpu.memory_space<vmem>>, %arg7: memref<1x512xf32, #tpu.memory_space<vmem>>, %arg8: memref<3x256x128xbf16, #tpu.memory_space<vmem>>, %arg9: memref<1x128xf32, #tpu.memory_space<vmem>>, %arg10: memref<128x256xbf16, #tpu.memory_space<vmem>>, %arg11: memref<1x256xf32, #tpu.memory_space<vmem>>, %arg12: memref<256x10xbf16, #tpu.memory_space<vmem>>, %arg13: memref<1x10xf32, #tpu.memory_space<vmem>>, %arg14: memref<2x10xf32, #tpu.memory_space<vmem>>, %arg15: memref<2x28x32xf32, #tpu.memory_space<vmem>>, %arg16: memref<2x16x256xf32, #tpu.memory_space<vmem>>, %arg17: memref<2x10x256xf32, #tpu.memory_space<vmem>>) attributes {dimension_semantics = [#tpu.dimension_semantics<parallel>], iteration_bounds = array<i64: 1>, scalar_prefetch = 0 : i64, scratch_operands = 3 : i64, tpu.core_type = #tpu.core_type<tc>, window_params = [{transform_indices = @transform_0, window_bounds = array<i64: 2, 1, 24, 32>}, {pipeline_mode = #tpu.pipeline_mode<synchronous>, transform_indices = @transform_1, window_bounds = array<i64: 5, 32, 512>}, {pipeline_mode = #tpu.pipeline_mode<synchronous>, transform_indices = @transform_2, window_bounds = array<i64: 1, 512>}, {pipeline_mode = #tpu.pipeline_mode<synchronous>, transform_indices = @transform_3, window_bounds = array<i64: 5, 256, 512>}, {pipeline_mode = #tpu.pipeline_mode<synchronous>, transform_indices = @transform_4, window_bounds = array<i64: 1, 512>}, {pipeline_mode = #tpu.pipeline_mode<synchronous>, transform_indices = @transform_5, window_bounds = array<i64: 5, 256, 512>}, {pipeline_mode = #tpu.pipeline_mode<synchronous>, transform_indices = @transform_6, window_bounds = array<i64: 1, 512>}, {pipeline_mode = #tpu.pipeline_mode<synchronous>, transform_indices = @transform_7, window_bounds = array<i64: 3, 256, 128>}, {pipeline_mode = #tpu.pipeline_mode<synchronous>, transform_indices = @transform_8, window_bounds = array<i64: 1, 128>}, {pipeline_mode = #tpu.pipeline_mode<synchronous>, transform_indices = @transform_9, window_bounds = array<i64: 128, 256>}, {pipeline_mode = #tpu.pipeline_mode<synchronous>, transform_indices = @transform_10, window_bounds = array<i64: 1, 256>}, {pipeline_mode = #tpu.pipeline_mode<synchronous>, transform_indices = @transform_11, window_bounds = array<i64: 256, 10>}, {pipeline_mode = #tpu.pipeline_mode<synchronous>, transform_indices = @transform_12, window_bounds = array<i64: 1, 10>}, {transform_indices = @transform_13, window_bounds = array<i64: 2, 10>}]} {
    %cst = arith.constant 0.000000e+00 : f32
    %0 = vector.broadcast %cst : f32 to vector<2x2x32xf32>
    %c0 = arith.constant 0 : index
    %c0_0 = arith.constant 0 : index
    %c0_1 = arith.constant 0 : index
    %1 = vector.load %arg15[%c0, %c0_0, %c0_1] : memref<2x28x32xf32, #tpu.memory_space<vmem>>, vector<2x2x32xf32>
    tpu.vector_store %arg15[%c0, %c0_0, %c0_1], %0 {strides = array<i32>} : memref<2x28x32xf32, #tpu.memory_space<vmem>>, vector<2x2x32xf32>,
    %c0_2 = arith.constant 0 : index
    %c26 = arith.constant 26 : index
    %c0_3 = arith.constant 0 : index
    %2 = vector.load %arg15[%c0_2, %c26, %c0_3] : memref<2x28x32xf32, #tpu.memory_space<vmem>>, vector<2x2x32xf32>
    tpu.vector_store %arg15[%c0_2, %c26, %c0_3], %0 {strides = array<i32>} : memref<2x28x32xf32, #tpu.memory_space<vmem>>, vector<2x2x32xf32>,
    %c0_4 = arith.constant 0 : index
    %c0_5 = arith.constant 0 : index
    %c0_6 = arith.constant 0 : index
    %c0_7 = arith.constant 0 : index
    %3 = vector.load %arg1[%c0_4, %c0_5, %c0_6, %c0_7] : memref<2x1x24x32xf32, #tpu.memory_space<vmem>>, vector<2x1x24x32xf32>
    %4 = vector.shape_cast %3 : vector<2x1x24x32xf32> to vector<2x24x32xf32>
    %c0_8 = arith.constant 0 : index
    %c2 = arith.constant 2 : index
    %c0_9 = arith.constant 0 : index
    %5 = vector.load %arg15[%c0_8, %c2, %c0_9] : memref<2x28x32xf32, #tpu.memory_space<vmem>>, vector<2x24x32xf32>
    tpu.vector_store %arg15[%c0_8, %c2, %c0_9], %4 {strides = array<i32>} : memref<2x28x32xf32, #tpu.memory_space<vmem>>, vector<2x24x32xf32>,
    %c0_10 = arith.constant 0 : index
    %c0_11 = arith.constant 0 : index
    %c0_12 = arith.constant 0 : index
    %6 = vector.load %arg15[%c0_10, %c0_11, %c0_12] : memref<2x28x32xf32, #tpu.memory_space<vmem>>, vector<2x24x32xf32>
    %7 = vector.shape_cast %6 : vector<2x24x32xf32> to vector<48x32xf32>
    %8 = arith.truncf %7 : vector<48x32xf32> to vector<48x32xbf16>
    %c0_13 = arith.constant 0 : index
    %c0_14 = arith.constant 0 : index
    %c0_15 = arith.constant 0 : index
    %9 = vector.load %arg2[%c0_13, %c0_14, %c0_15] : memref<5x32x512xbf16, #tpu.memory_space<vmem>>, vector<1x32x512xbf16>
    %10 = vector.shape_cast %9 : vector<1x32x512xbf16> to vector<32x512xbf16>
    %cst_16 = arith.constant dense<0.000000e+00> : vector<48x512xf32>
    %11 = tpu.matmul %8, %10, %cst_16 {dimension_numbers = #tpu.dot_dimension_numbers<[1], [0], [0], [1], [0, 0, 1, 1], [], []>} : vector<48x32xbf16>, vector<32x512xbf16>, vector<48x512xf32> -> vector<48x512xf32>
    %c0_17 = arith.constant 0 : index
    %c1 = arith.constant 1 : index
    %c0_18 = arith.constant 0 : index
    %12 = vector.load %arg15[%c0_17, %c1, %c0_18] : memref<2x28x32xf32, #tpu.memory_space<vmem>>, vector<2x24x32xf32>
    %13 = vector.shape_cast %12 : vector<2x24x32xf32> to vector<48x32xf32>
    %14 = arith.truncf %13 : vector<48x32xf32> to vector<48x32xbf16>
    %c1_19 = arith.constant 1 : index
    %c0_20 = arith.constant 0 : index
    %c0_21 = arith.constant 0 : index
    %15 = vector.load %arg2[%c1_19, %c0_20, %c0_21] : memref<5x32x512xbf16, #tpu.memory_space<vmem>>, vector<1x32x512xbf16>
    %16 = vector.shape_cast %15 : vector<1x32x512xbf16> to vector<32x512xbf16>
    %cst_22 = arith.constant dense<0.000000e+00> : vector<48x512xf32>
    %17 = tpu.matmul %14, %16, %cst_22 {dimension_numbers = #tpu.dot_dimension_numbers<[1], [0], [0], [1], [0, 0, 1, 1], [], []>} : vector<48x32xbf16>, vector<32x512xbf16>, vector<48x512xf32> -> vector<48x512xf32>
    %18 = arith.addf %11, %17 : vector<48x512xf32>
    %c0_23 = arith.constant 0 : index
    %c2_24 = arith.constant 2 : index
    %c0_25 = arith.constant 0 : index
    %19 = vector.load %arg15[%c0_23, %c2_24, %c0_25] : memref<2x28x32xf32, #tpu.memory_space<vmem>>, vector<2x24x32xf32>
    %20 = vector.shape_cast %19 : vector<2x24x32xf32> to vector<48x32xf32>
    %21 = arith.truncf %20 : vector<48x32xf32> to vector<48x32xbf16>
    %c2_26 = arith.constant 2 : index
    %c0_27 = arith.constant 0 : index
    %c0_28 = arith.constant 0 : index
    %22 = vector.load %arg2[%c2_26, %c0_27, %c0_28] : memref<5x32x512xbf16, #tpu.memory_space<vmem>>, vector<1x32x512xbf16>
    %23 = vector.shape_cast %22 : vector<1x32x512xbf16> to vector<32x512xbf16>
    %cst_29 = arith.constant dense<0.000000e+00> : vector<48x512xf32>
    %24 = tpu.matmul %21, %23, %cst_29 {dimension_numbers = #tpu.dot_dimension_numbers<[1], [0], [0], [1], [0, 0, 1, 1], [], []>} : vector<48x32xbf16>, vector<32x512xbf16>, vector<48x512xf32> -> vector<48x512xf32>
    %25 = arith.addf %18, %24 : vector<48x512xf32>
    %c0_30 = arith.constant 0 : index
    %c3 = arith.constant 3 : index
    %c0_31 = arith.constant 0 : index
    %26 = vector.load %arg15[%c0_30, %c3, %c0_31] : memref<2x28x32xf32, #tpu.memory_space<vmem>>, vector<2x24x32xf32>
    %27 = vector.shape_cast %26 : vector<2x24x32xf32> to vector<48x32xf32>
    %28 = arith.truncf %27 : vector<48x32xf32> to vector<48x32xbf16>
    %c3_32 = arith.constant 3 : index
    %c0_33 = arith.constant 0 : index
    %c0_34 = arith.constant 0 : index
    %29 = vector.load %arg2[%c3_32, %c0_33, %c0_34] : memref<5x32x512xbf16, #tpu.memory_space<vmem>>, vector<1x32x512xbf16>
    %30 = vector.shape_cast %29 : vector<1x32x512xbf16> to vector<32x512xbf16>
    %cst_35 = arith.constant dense<0.000000e+00> : vector<48x512xf32>
    %31 = tpu.matmul %28, %30, %cst_35 {dimension_numbers = #tpu.dot_dimension_numbers<[1], [0], [0], [1], [0, 0, 1, 1], [], []>} : vector<48x32xbf16>, vector<32x512xbf16>, vector<48x512xf32> -> vector<48x512xf32>
    %32 = arith.addf %25, %31 : vector<48x512xf32>
    %c0_36 = arith.constant 0 : index
    %c4 = arith.constant 4 : index
    %c0_37 = arith.constant 0 : index
    %33 = vector.load %arg15[%c0_36, %c4, %c0_37] : memref<2x28x32xf32, #tpu.memory_space<vmem>>, vector<2x24x32xf32>
    %34 = vector.shape_cast %33 : vector<2x24x32xf32> to vector<48x32xf32>
    %35 = arith.truncf %34 : vector<48x32xf32> to vector<48x32xbf16>
    %c4_38 = arith.constant 4 : index
    %c0_39 = arith.constant 0 : index
    %c0_40 = arith.constant 0 : index
    %36 = vector.load %arg2[%c4_38, %c0_39, %c0_40] : memref<5x32x512xbf16, #tpu.memory_space<vmem>>, vector<1x32x512xbf16>
    %37 = vector.shape_cast %36 : vector<1x32x512xbf16> to vector<32x512xbf16>
    %cst_41 = arith.constant dense<0.000000e+00> : vector<48x512xf32>
    %38 = tpu.matmul %35, %37, %cst_41 {dimension_numbers = #tpu.dot_dimension_numbers<[1], [0], [0], [1], [0, 0, 1, 1], [], []>} : vector<48x32xbf16>, vector<32x512xbf16>, vector<48x512xf32> -> vector<48x512xf32>
    %39 = arith.addf %32, %38 : vector<48x512xf32>
    %c0_42 = arith.constant 0 : index
    %c0_43 = arith.constant 0 : index
    %40 = vector.load %arg3[%c0_42, %c0_43] : memref<1x512xf32, #tpu.memory_space<vmem>>, vector<1x512xf32>
    %41 = vector.broadcast %40 : vector<1x512xf32> to vector<48x512xf32>
    %42 = arith.addf %39, %41 : vector<48x512xf32>
    %cst_44 = arith.constant 0.000000e+00 : f32
    %43 = vector.broadcast %cst_44 : f32 to vector<48x512xf32>
    %44 = arith.maximumf %42, %43 : vector<48x512xf32>
    %45 = vector.shape_cast %44 : vector<48x512xf32> to vector<24x2x512xf32>
    %cst_45 = arith.constant dense<0xFF800000> : vector<24x512xf32>
    %46 = vector.multi_reduction <maximumf>, %45, %cst_45 [1] : vector<24x2x512xf32> to vector<24x512xf32>
    %47 = vector.extract_strided_slice %46 {offsets = [0, 0], sizes = [24, 256], strides = [1, 1]} : vector<24x512xf32> to vector<24x256xf32>
    %48 = vector.extract_strided_slice %46 {offsets = [0, 256], sizes = [24, 256], strides = [1, 1]} : vector<24x512xf32> to vector<24x256xf32>
    %49 = arith.maximumf %47, %48 : vector<24x256xf32>
    %cst_46 = arith.constant 0.000000e+00 : f32
    %50 = vector.broadcast %cst_46 : f32 to vector<2x2x256xf32>
    %c0_47 = arith.constant 0 : index
    %c0_48 = arith.constant 0 : index
    %c0_49 = arith.constant 0 : index
    %51 = vector.load %arg16[%c0_47, %c0_48, %c0_49] : memref<2x16x256xf32, #tpu.memory_space<vmem>>, vector<2x2x256xf32>
    tpu.vector_store %arg16[%c0_47, %c0_48, %c0_49], %50 {strides = array<i32>} : memref<2x16x256xf32, #tpu.memory_space<vmem>>, vector<2x2x256xf32>,
    %c0_50 = arith.constant 0 : index
    %c14 = arith.constant 14 : index
    %c0_51 = arith.constant 0 : index
    %52 = vector.load %arg16[%c0_50, %c14, %c0_51] : memref<2x16x256xf32, #tpu.memory_space<vmem>>, vector<2x2x256xf32>
    tpu.vector_store %arg16[%c0_50, %c14, %c0_51], %50 {strides = array<i32>} : memref<2x16x256xf32, #tpu.memory_space<vmem>>, vector<2x2x256xf32>,
    %53 = vector.shape_cast %49 : vector<24x256xf32> to vector<2x12x256xf32>
    %c0_52 = arith.constant 0 : index
    %c2_53 = arith.constant 2 : index
    %c0_54 = arith.constant 0 : index
    %54 = vector.load %arg16[%c0_52, %c2_53, %c0_54] : memref<2x16x256xf32, #tpu.memory_space<vmem>>, vector<2x12x256xf32>
    tpu.vector_store %arg16[%c0_52, %c2_53, %c0_54], %53 {strides = array<i32>} : memref<2x16x256xf32, #tpu.memory_space<vmem>>, vector<2x12x256xf32>,
    %c0_55 = arith.constant 0 : index
    %c0_56 = arith.constant 0 : index
    %c0_57 = arith.constant 0 : index
    %55 = vector.load %arg16[%c0_55, %c0_56, %c0_57] : memref<2x16x256xf32, #tpu.memory_space<vmem>>, vector<2x12x256xf32>
    %56 = vector.shape_cast %55 : vector<2x12x256xf32> to vector<24x256xf32>
    %57 = arith.truncf %56 : vector<24x256xf32> to vector<24x256xbf16>
    %c0_58 = arith.constant 0 : index
    %c0_59 = arith.constant 0 : index
    %c0_60 = arith.constant 0 : index
    %58 = vector.load %arg4[%c0_58, %c0_59, %c0_60] : memref<5x256x512xbf16, #tpu.memory_space<vmem>>, vector<1x256x512xbf16>
    %59 = vector.shape_cast %58 : vector<1x256x512xbf16> to vector<256x512xbf16>
    %cst_61 = arith.constant dense<0.000000e+00> : vector<24x512xf32>
    %60 = tpu.matmul %57, %59, %cst_61 {dimension_numbers = #tpu.dot_dimension_numbers<[1], [0], [0], [1], [0, 0, 1, 1], [], []>} : vector<24x256xbf16>, vector<256x512xbf16>, vector<24x512xf32> -> vector<24x512xf32>
    %c0_62 = arith.constant 0 : index
    %c1_63 = arith.constant 1 : index
    %c0_64 = arith.constant 0 : index
    %61 = vector.load %arg16[%c0_62, %c1_63, %c0_64] : memref<2x16x256xf32, #tpu.memory_space<vmem>>, vector<2x12x256xf32>
    %62 = vector.shape_cast %61 : vector<2x12x256xf32> to vector<24x256xf32>
    %63 = arith.truncf %62 : vector<24x256xf32> to vector<24x256xbf16>
    %c1_65 = arith.constant 1 : index
    %c0_66 = arith.constant 0 : index
    %c0_67 = arith.constant 0 : index
    %64 = vector.load %arg4[%c1_65, %c0_66, %c0_67] : memref<5x256x512xbf16, #tpu.memory_space<vmem>>, vector<1x256x512xbf16>
    %65 = vector.shape_cast %64 : vector<1x256x512xbf16> to vector<256x512xbf16>
    %cst_68 = arith.constant dense<0.000000e+00> : vector<24x512xf32>
    %66 = tpu.matmul %63, %65, %cst_68 {dimension_numbers = #tpu.dot_dimension_numbers<[1], [0], [0], [1], [0, 0, 1, 1], [], []>} : vector<24x256xbf16>, vector<256x512xbf16>, vector<24x512xf32> -> vector<24x512xf32>
    %67 = arith.addf %60, %66 : vector<24x512xf32>
    %c0_69 = arith.constant 0 : index
    %c2_70 = arith.constant 2 : index
    %c0_71 = arith.constant 0 : index
    %68 = vector.load %arg16[%c0_69, %c2_70, %c0_71] : memref<2x16x256xf32, #tpu.memory_space<vmem>>, vector<2x12x256xf32>
    %69 = vector.shape_cast %68 : vector<2x12x256xf32> to vector<24x256xf32>
    %70 = arith.truncf %69 : vector<24x256xf32> to vector<24x256xbf16>
    %c2_72 = arith.constant 2 : index
    %c0_73 = arith.constant 0 : index
    %c0_74 = arith.constant 0 : index
    %71 = vector.load %arg4[%c2_72, %c0_73, %c0_74] : memref<5x256x512xbf16, #tpu.memory_space<vmem>>, vector<1x256x512xbf16>
    %72 = vector.shape_cast %71 : vector<1x256x512xbf16> to vector<256x512xbf16>
    %cst_75 = arith.constant dense<0.000000e+00> : vector<24x512xf32>
    %73 = tpu.matmul %70, %72, %cst_75 {dimension_numbers = #tpu.dot_dimension_numbers<[1], [0], [0], [1], [0, 0, 1, 1], [], []>} : vector<24x256xbf16>, vector<256x512xbf16>, vector<24x512xf32> -> vector<24x512xf32>
    %74 = arith.addf %67, %73 : vector<24x512xf32>
    %c0_76 = arith.constant 0 : index
    %c3_77 = arith.constant 3 : index
    %c0_78 = arith.constant 0 : index
    %75 = vector.load %arg16[%c0_76, %c3_77, %c0_78] : memref<2x16x256xf32, #tpu.memory_space<vmem>>, vector<2x12x256xf32>
    %76 = vector.shape_cast %75 : vector<2x12x256xf32> to vector<24x256xf32>
    %77 = arith.truncf %76 : vector<24x256xf32> to vector<24x256xbf16>
    %c3_79 = arith.constant 3 : index
    %c0_80 = arith.constant 0 : index
    %c0_81 = arith.constant 0 : index
    %78 = vector.load %arg4[%c3_79, %c0_80, %c0_81] : memref<5x256x512xbf16, #tpu.memory_space<vmem>>, vector<1x256x512xbf16>
    %79 = vector.shape_cast %78 : vector<1x256x512xbf16> to vector<256x512xbf16>
    %cst_82 = arith.constant dense<0.000000e+00> : vector<24x512xf32>
    %80 = tpu.matmul %77, %79, %cst_82 {dimension_numbers = #tpu.dot_dimension_numbers<[1], [0], [0], [1], [0, 0, 1, 1], [], []>} : vector<24x256xbf16>, vector<256x512xbf16>, vector<24x512xf32> -> vector<24x512xf32>
    %81 = arith.addf %74, %80 : vector<24x512xf32>
    %c0_83 = arith.constant 0 : index
    %c4_84 = arith.constant 4 : index
    %c0_85 = arith.constant 0 : index
    %82 = vector.load %arg16[%c0_83, %c4_84, %c0_85] : memref<2x16x256xf32, #tpu.memory_space<vmem>>, vector<2x12x256xf32>
    %83 = vector.shape_cast %82 : vector<2x12x256xf32> to vector<24x256xf32>
    %84 = arith.truncf %83 : vector<24x256xf32> to vector<24x256xbf16>
    %c4_86 = arith.constant 4 : index
    %c0_87 = arith.constant 0 : index
    %c0_88 = arith.constant 0 : index
    %85 = vector.load %arg4[%c4_86, %c0_87, %c0_88] : memref<5x256x512xbf16, #tpu.memory_space<vmem>>, vector<1x256x512xbf16>
    %86 = vector.shape_cast %85 : vector<1x256x512xbf16> to vector<256x512xbf16>
    %cst_89 = arith.constant dense<0.000000e+00> : vector<24x512xf32>
    %87 = tpu.matmul %84, %86, %cst_89 {dimension_numbers = #tpu.dot_dimension_numbers<[1], [0], [0], [1], [0, 0, 1, 1], [], []>} : vector<24x256xbf16>, vector<256x512xbf16>, vector<24x512xf32> -> vector<24x512xf32>
    %88 = arith.addf %81, %87 : vector<24x512xf32>
    %c0_90 = arith.constant 0 : index
    %c0_91 = arith.constant 0 : index
    %89 = vector.load %arg5[%c0_90, %c0_91] : memref<1x512xf32, #tpu.memory_space<vmem>>, vector<1x512xf32>
    %90 = vector.broadcast %89 : vector<1x512xf32> to vector<24x512xf32>
    %91 = arith.addf %88, %90 : vector<24x512xf32>
    %cst_92 = arith.constant 0.000000e+00 : f32
    %92 = vector.broadcast %cst_92 : f32 to vector<24x512xf32>
    %93 = arith.maximumf %91, %92 : vector<24x512xf32>
    %94 = vector.shape_cast %93 : vector<24x512xf32> to vector<12x2x512xf32>
    %cst_93 = arith.constant dense<0xFF800000> : vector<12x512xf32>
    %95 = vector.multi_reduction <maximumf>, %94, %cst_93 [1] : vector<12x2x512xf32> to vector<12x512xf32>
    %96 = vector.extract_strided_slice %95 {offsets = [0, 0], sizes = [12, 256], strides = [1, 1]} : vector<12x512xf32> to vector<12x256xf32>
    %97 = vector.extract_strided_slice %95 {offsets = [0, 256], sizes = [12, 256], strides = [1, 1]} : vector<12x512xf32> to vector<12x256xf32>
    %98 = arith.maximumf %96, %97 : vector<12x256xf32>
    %c0_94 = arith.constant 0 : index
    %c0_95 = arith.constant 0 : index
    %c0_96 = arith.constant 0 : index
    %99 = vector.load %arg17[%c0_94, %c0_95, %c0_96] : memref<2x10x256xf32, #tpu.memory_space<vmem>>, vector<2x2x256xf32>
    tpu.vector_store %arg17[%c0_94, %c0_95, %c0_96], %50 {strides = array<i32>} : memref<2x10x256xf32, #tpu.memory_space<vmem>>, vector<2x2x256xf32>,
    %c0_97 = arith.constant 0 : index
    %c8 = arith.constant 8 : index
    %c0_98 = arith.constant 0 : index
    %100 = vector.load %arg17[%c0_97, %c8, %c0_98] : memref<2x10x256xf32, #tpu.memory_space<vmem>>, vector<2x2x256xf32>
    tpu.vector_store %arg17[%c0_97, %c8, %c0_98], %50 {strides = array<i32>} : memref<2x10x256xf32, #tpu.memory_space<vmem>>, vector<2x2x256xf32>,
    %101 = vector.shape_cast %98 : vector<12x256xf32> to vector<2x6x256xf32>
    %c0_99 = arith.constant 0 : index
    %c2_100 = arith.constant 2 : index
    %c0_101 = arith.constant 0 : index
    %102 = vector.load %arg17[%c0_99, %c2_100, %c0_101] : memref<2x10x256xf32, #tpu.memory_space<vmem>>, vector<2x6x256xf32>
    tpu.vector_store %arg17[%c0_99, %c2_100, %c0_101], %101 {strides = array<i32>} : memref<2x10x256xf32, #tpu.memory_space<vmem>>, vector<2x6x256xf32>,
    %c0_102 = arith.constant 0 : index
    %c0_103 = arith.constant 0 : index
    %c0_104 = arith.constant 0 : index
    %103 = vector.load %arg17[%c0_102, %c0_103, %c0_104] : memref<2x10x256xf32, #tpu.memory_space<vmem>>, vector<2x6x256xf32>
    %104 = vector.shape_cast %103 : vector<2x6x256xf32> to vector<12x256xf32>
    %105 = arith.truncf %104 : vector<12x256xf32> to vector<12x256xbf16>
    %c0_105 = arith.constant 0 : index
    %c0_106 = arith.constant 0 : index
    %c0_107 = arith.constant 0 : index
    %106 = vector.load %arg6[%c0_105, %c0_106, %c0_107] : memref<5x256x512xbf16, #tpu.memory_space<vmem>>, vector<1x256x512xbf16>
    %107 = vector.shape_cast %106 : vector<1x256x512xbf16> to vector<256x512xbf16>
    %cst_108 = arith.constant dense<0.000000e+00> : vector<12x512xf32>
    %108 = tpu.matmul %105, %107, %cst_108 {dimension_numbers = #tpu.dot_dimension_numbers<[1], [0], [0], [1], [0, 0, 1, 1], [], []>} : vector<12x256xbf16>, vector<256x512xbf16>, vector<12x512xf32> -> vector<12x512xf32>
    %c0_109 = arith.constant 0 : index
    %c1_110 = arith.constant 1 : index
    %c0_111 = arith.constant 0 : index
    %109 = vector.load %arg17[%c0_109, %c1_110, %c0_111] : memref<2x10x256xf32, #tpu.memory_space<vmem>>, vector<2x6x256xf32>
    %110 = vector.shape_cast %109 : vector<2x6x256xf32> to vector<12x256xf32>
    %111 = arith.truncf %110 : vector<12x256xf32> to vector<12x256xbf16>
    %c1_112 = arith.constant 1 : index
    %c0_113 = arith.constant 0 : index
    %c0_114 = arith.constant 0 : index
    %112 = vector.load %arg6[%c1_112, %c0_113, %c0_114] : memref<5x256x512xbf16, #tpu.memory_space<vmem>>, vector<1x256x512xbf16>
    %113 = vector.shape_cast %112 : vector<1x256x512xbf16> to vector<256x512xbf16>
    %cst_115 = arith.constant dense<0.000000e+00> : vector<12x512xf32>
    %114 = tpu.matmul %111, %113, %cst_115 {dimension_numbers = #tpu.dot_dimension_numbers<[1], [0], [0], [1], [0, 0, 1, 1], [], []>} : vector<12x256xbf16>, vector<256x512xbf16>, vector<12x512xf32> -> vector<12x512xf32>
    %115 = arith.addf %108, %114 : vector<12x512xf32>
    %c0_116 = arith.constant 0 : index
    %c2_117 = arith.constant 2 : index
    %c0_118 = arith.constant 0 : index
    %116 = vector.load %arg17[%c0_116, %c2_117, %c0_118] : memref<2x10x256xf32, #tpu.memory_space<vmem>>, vector<2x6x256xf32>
    %117 = vector.shape_cast %116 : vector<2x6x256xf32> to vector<12x256xf32>
    %118 = arith.truncf %117 : vector<12x256xf32> to vector<12x256xbf16>
    %c2_119 = arith.constant 2 : index
    %c0_120 = arith.constant 0 : index
    %c0_121 = arith.constant 0 : index
    %119 = vector.load %arg6[%c2_119, %c0_120, %c0_121] : memref<5x256x512xbf16, #tpu.memory_space<vmem>>, vector<1x256x512xbf16>
    %120 = vector.shape_cast %119 : vector<1x256x512xbf16> to vector<256x512xbf16>
    %cst_122 = arith.constant dense<0.000000e+00> : vector<12x512xf32>
    %121 = tpu.matmul %118, %120, %cst_122 {dimension_numbers = #tpu.dot_dimension_numbers<[1], [0], [0], [1], [0, 0, 1, 1], [], []>} : vector<12x256xbf16>, vector<256x512xbf16>, vector<12x512xf32> -> vector<12x512xf32>
    %122 = arith.addf %115, %121 : vector<12x512xf32>
    %c0_123 = arith.constant 0 : index
    %c3_124 = arith.constant 3 : index
    %c0_125 = arith.constant 0 : index
    %123 = vector.load %arg17[%c0_123, %c3_124, %c0_125] : memref<2x10x256xf32, #tpu.memory_space<vmem>>, vector<2x6x256xf32>
    %124 = vector.shape_cast %123 : vector<2x6x256xf32> to vector<12x256xf32>
    %125 = arith.truncf %124 : vector<12x256xf32> to vector<12x256xbf16>
    %c3_126 = arith.constant 3 : index
    %c0_127 = arith.constant 0 : index
    %c0_128 = arith.constant 0 : index
    %126 = vector.load %arg6[%c3_126, %c0_127, %c0_128] : memref<5x256x512xbf16, #tpu.memory_space<vmem>>, vector<1x256x512xbf16>
    %127 = vector.shape_cast %126 : vector<1x256x512xbf16> to vector<256x512xbf16>
    %cst_129 = arith.constant dense<0.000000e+00> : vector<12x512xf32>
    %128 = tpu.matmul %125, %127, %cst_129 {dimension_numbers = #tpu.dot_dimension_numbers<[1], [0], [0], [1], [0, 0, 1, 1], [], []>} : vector<12x256xbf16>, vector<256x512xbf16>, vector<12x512xf32> -> vector<12x512xf32>
    %129 = arith.addf %122, %128 : vector<12x512xf32>
    %c0_130 = arith.constant 0 : index
    %c4_131 = arith.constant 4 : index
    %c0_132 = arith.constant 0 : index
    %130 = vector.load %arg17[%c0_130, %c4_131, %c0_132] : memref<2x10x256xf32, #tpu.memory_space<vmem>>, vector<2x6x256xf32>
    %131 = vector.shape_cast %130 : vector<2x6x256xf32> to vector<12x256xf32>
    %132 = arith.truncf %131 : vector<12x256xf32> to vector<12x256xbf16>
    %c4_133 = arith.constant 4 : index
    %c0_134 = arith.constant 0 : index
    %c0_135 = arith.constant 0 : index
    %133 = vector.load %arg6[%c4_133, %c0_134, %c0_135] : memref<5x256x512xbf16, #tpu.memory_space<vmem>>, vector<1x256x512xbf16>
    %134 = vector.shape_cast %133 : vector<1x256x512xbf16> to vector<256x512xbf16>
    %cst_136 = arith.constant dense<0.000000e+00> : vector<12x512xf32>
    %135 = tpu.matmul %132, %134, %cst_136 {dimension_numbers = #tpu.dot_dimension_numbers<[1], [0], [0], [1], [0, 0, 1, 1], [], []>} : vector<12x256xbf16>, vector<256x512xbf16>, vector<12x512xf32> -> vector<12x512xf32>
    %136 = arith.addf %129, %135 : vector<12x512xf32>
    %c0_137 = arith.constant 0 : index
    %c0_138 = arith.constant 0 : index
    %137 = vector.load %arg7[%c0_137, %c0_138] : memref<1x512xf32, #tpu.memory_space<vmem>>, vector<1x512xf32>
    %138 = vector.broadcast %137 : vector<1x512xf32> to vector<12x512xf32>
    %139 = arith.addf %136, %138 : vector<12x512xf32>
    %cst_139 = arith.constant 0.000000e+00 : f32
    %140 = vector.broadcast %cst_139 : f32 to vector<12x512xf32>
    %141 = arith.maximumf %139, %140 : vector<12x512xf32>
    %142 = vector.shape_cast %141 : vector<12x512xf32> to vector<6x2x512xf32>
    %cst_140 = arith.constant dense<0xFF800000> : vector<6x512xf32>
    %143 = vector.multi_reduction <maximumf>, %142, %cst_140 [1] : vector<6x2x512xf32> to vector<6x512xf32>
    %144 = vector.extract_strided_slice %143 {offsets = [0, 0], sizes = [6, 256], strides = [1, 1]} : vector<6x512xf32> to vector<6x256xf32>
    %145 = vector.extract_strided_slice %143 {offsets = [0, 256], sizes = [6, 256], strides = [1, 1]} : vector<6x512xf32> to vector<6x256xf32>
    %146 = arith.maximumf %144, %145 : vector<6x256xf32>
    %147 = arith.truncf %146 : vector<6x256xf32> to vector<6x256xbf16>
    %148 = vector.shape_cast %147 : vector<6x256xbf16> to vector<2x3x256xbf16>
    %149 = vector.extract_strided_slice %148 {offsets = [0, 0, 0], sizes = [2, 1, 256], strides = [1, 1, 1]} : vector<2x3x256xbf16> to vector<2x1x256xbf16>
    %150 = vector.shape_cast %149 : vector<2x1x256xbf16> to vector<2x256xbf16>
    %c0_141 = arith.constant 0 : index
    %c0_142 = arith.constant 0 : index
    %c0_143 = arith.constant 0 : index
    %151 = vector.load %arg8[%c0_141, %c0_142, %c0_143] : memref<3x256x128xbf16, #tpu.memory_space<vmem>>, vector<1x256x128xbf16>
    %152 = vector.shape_cast %151 : vector<1x256x128xbf16> to vector<256x128xbf16>
    %cst_144 = arith.constant dense<0.000000e+00> : vector<2x128xf32>
    %153 = tpu.matmul %150, %152, %cst_144 {dimension_numbers = #tpu.dot_dimension_numbers<[1], [0], [0], [1], [0, 0, 1, 1], [], []>} : vector<2x256xbf16>, vector<256x128xbf16>, vector<2x128xf32> -> vector<2x128xf32>
    %154 = vector.extract_strided_slice %148 {offsets = [0, 1, 0], sizes = [2, 1, 256], strides = [1, 1, 1]} : vector<2x3x256xbf16> to vector<2x1x256xbf16>
    %155 = vector.shape_cast %154 : vector<2x1x256xbf16> to vector<2x256xbf16>
    %c1_145 = arith.constant 1 : index
    %c0_146 = arith.constant 0 : index
    %c0_147 = arith.constant 0 : index
    %156 = vector.load %arg8[%c1_145, %c0_146, %c0_147] : memref<3x256x128xbf16, #tpu.memory_space<vmem>>, vector<1x256x128xbf16>
    %157 = vector.shape_cast %156 : vector<1x256x128xbf16> to vector<256x128xbf16>
    %cst_148 = arith.constant dense<0.000000e+00> : vector<2x128xf32>
    %158 = tpu.matmul %155, %157, %cst_148 {dimension_numbers = #tpu.dot_dimension_numbers<[1], [0], [0], [1], [0, 0, 1, 1], [], []>} : vector<2x256xbf16>, vector<256x128xbf16>, vector<2x128xf32> -> vector<2x128xf32>
    %159 = arith.addf %153, %158 : vector<2x128xf32>
    %160 = vector.extract_strided_slice %148 {offsets = [0, 2, 0], sizes = [2, 1, 256], strides = [1, 1, 1]} : vector<2x3x256xbf16> to vector<2x1x256xbf16>
    %161 = vector.shape_cast %160 : vector<2x1x256xbf16> to vector<2x256xbf16>
    %c2_149 = arith.constant 2 : index
    %c0_150 = arith.constant 0 : index
    %c0_151 = arith.constant 0 : index
    %162 = vector.load %arg8[%c2_149, %c0_150, %c0_151] : memref<3x256x128xbf16, #tpu.memory_space<vmem>>, vector<1x256x128xbf16>
    %163 = vector.shape_cast %162 : vector<1x256x128xbf16> to vector<256x128xbf16>
    %cst_152 = arith.constant dense<0.000000e+00> : vector<2x128xf32>
    %164 = tpu.matmul %161, %163, %cst_152 {dimension_numbers = #tpu.dot_dimension_numbers<[1], [0], [0], [1], [0, 0, 1, 1], [], []>} : vector<2x256xbf16>, vector<256x128xbf16>, vector<2x128xf32> -> vector<2x128xf32>
    %165 = arith.addf %159, %164 : vector<2x128xf32>
    %c0_153 = arith.constant 0 : index
    %c0_154 = arith.constant 0 : index
    %166 = vector.load %arg9[%c0_153, %c0_154] : memref<1x128xf32, #tpu.memory_space<vmem>>, vector<1x128xf32>
    %167 = vector.broadcast %166 : vector<1x128xf32> to vector<2x128xf32>
    %168 = arith.addf %165, %167 : vector<2x128xf32>
    %cst_155 = arith.constant 0.000000e+00 : f32
    %169 = vector.broadcast %cst_155 : f32 to vector<2x128xf32>
    %170 = arith.maximumf %168, %169 : vector<2x128xf32>
    %171 = arith.truncf %170 : vector<2x128xf32> to vector<2x128xbf16>
    %c0_156 = arith.constant 0 : index
    %c0_157 = arith.constant 0 : index
    %172 = vector.load %arg10[%c0_156, %c0_157] : memref<128x256xbf16, #tpu.memory_space<vmem>>, vector<128x256xbf16>
    %cst_158 = arith.constant dense<0.000000e+00> : vector<2x256xf32>
    %173 = tpu.matmul %171, %172, %cst_158 {dimension_numbers = #tpu.dot_dimension_numbers<[1], [0], [0], [1], [0, 0, 1, 1], [], []>} : vector<2x128xbf16>, vector<128x256xbf16>, vector<2x256xf32> -> vector<2x256xf32>
    %c0_159 = arith.constant 0 : index
    %c0_160 = arith.constant 0 : index
    %174 = vector.load %arg11[%c0_159, %c0_160] : memref<1x256xf32, #tpu.memory_space<vmem>>, vector<1x256xf32>
    %175 = vector.broadcast %174 : vector<1x256xf32> to vector<2x256xf32>
    %176 = arith.addf %173, %175 : vector<2x256xf32>
    %cst_161 = arith.constant 0.000000e+00 : f32
    %177 = vector.broadcast %cst_161 : f32 to vector<2x256xf32>
    %178 = arith.maximumf %176, %177 : vector<2x256xf32>
    %179 = arith.truncf %178 : vector<2x256xf32> to vector<2x256xbf16>
    %c0_162 = arith.constant 0 : index
    %c0_163 = arith.constant 0 : index
    %180 = vector.load %arg12[%c0_162, %c0_163] : memref<256x10xbf16, #tpu.memory_space<vmem>>, vector<256x10xbf16>
    %cst_164 = arith.constant dense<0.000000e+00> : vector<2x10xf32>
    %181 = tpu.matmul %179, %180, %cst_164 {dimension_numbers = #tpu.dot_dimension_numbers<[1], [0], [0], [1], [0, 0, 1, 1], [], []>} : vector<2x256xbf16>, vector<256x10xbf16>, vector<2x10xf32> -> vector<2x10xf32>
    %c0_165 = arith.constant 0 : index
    %c0_166 = arith.constant 0 : index
    %182 = vector.load %arg13[%c0_165, %c0_166] : memref<1x10xf32, #tpu.memory_space<vmem>>, vector<1x10xf32>
    %183 = vector.broadcast %182 : vector<1x10xf32> to vector<2x10xf32>
    %184 = arith.addf %181, %183 : vector<2x10xf32>
    %c0_167 = arith.constant 0 : index
    %c0_168 = arith.constant 0 : index
    %185 = vector.load %arg14[%c0_167, %c0_168] : memref<2x10xf32, #tpu.memory_space<vmem>>, vector<2x10xf32>
    tpu.vector_store %arg14[%c0_167, %c0_168], %184 {strides = array<i32>} : memref<2x10xf32, #tpu.memory_space<vmem>>, vector<2x10xf32>,
    return
  }
  func.func @transform_0(%arg0: i32) -> (i32, i32, i32, i32) {
    %c0_i32 = arith.constant 0 : i32
    %c0_i32_0 = arith.constant 0 : i32
    %c0_i32_1 = arith.constant 0 : i32
    %c0_i32_2 = arith.constant 0 : i32
    return %arg0, %c0_i32, %c0_i32_0, %c0_i32_1 : i32, i32, i32, i32
  }
  func.func @transform_1(%arg0: i32) -> (i32, i32, i32) {
    %c0_i32 = arith.constant 0 : i32
    %c0_i32_0 = arith.constant 0 : i32
    %c0_i32_1 = arith.constant 0 : i32
    %c0_i32_2 = arith.constant 0 : i32
    return %c0_i32, %c0_i32_0, %c0_i32_1 : i32, i32, i32
  }
  func.func @transform_2(%arg0: i32) -> (i32, i32) {
    %c0_i32 = arith.constant 0 : i32
    %c0_i32_0 = arith.constant 0 : i32
    %c0_i32_1 = arith.constant 0 : i32
    return %c0_i32, %c0_i32_0 : i32, i32
  }
  func.func @transform_3(%arg0: i32) -> (i32, i32, i32) {
    %c0_i32 = arith.constant 0 : i32
    %c0_i32_0 = arith.constant 0 : i32
    %c0_i32_1 = arith.constant 0 : i32
    %c0_i32_2 = arith.constant 0 : i32
    return %c0_i32, %c0_i32_0, %c0_i32_1 : i32, i32, i32
  }
  func.func @transform_4(%arg0: i32) -> (i32, i32) {
    %c0_i32 = arith.constant 0 : i32
    %c0_i32_0 = arith.constant 0 : i32
    %c0_i32_1 = arith.constant 0 : i32
    return %c0_i32, %c0_i32_0 : i32, i32
  }
  func.func @transform_5(%arg0: i32) -> (i32, i32, i32) {
    %c0_i32 = arith.constant 0 : i32
    %c0_i32_0 = arith.constant 0 : i32
    %c0_i32_1 = arith.constant 0 : i32
    %c0_i32_2 = arith.constant 0 : i32
    return %c0_i32, %c0_i32_0, %c0_i32_1 : i32, i32, i32
  }
  func.func @transform_6(%arg0: i32) -> (i32, i32) {
    %c0_i32 = arith.constant 0 : i32
    %c0_i32_0 = arith.constant 0 : i32
    %c0_i32_1 = arith.constant 0 : i32
    return %c0_i32, %c0_i32_0 : i32, i32
  }
  func.func @transform_7(%arg0: i32) -> (i32, i32, i32) {
    %c0_i32 = arith.constant 0 : i32
    %c0_i32_0 = arith.constant 0 : i32
    %c0_i32_1 = arith.constant 0 : i32
    %c0_i32_2 = arith.constant 0 : i32
    return %c0_i32, %c0_i32_0, %c0_i32_1 : i32, i32, i32
  }
  func.func @transform_8(%arg0: i32) -> (i32, i32) {
    %c0_i32 = arith.constant 0 : i32
    %c0_i32_0 = arith.constant 0 : i32
    %c0_i32_1 = arith.constant 0 : i32
    return %c0_i32, %c0_i32_0 : i32, i32
  }
  func.func @transform_9(%arg0: i32) -> (i32, i32) {
    %c0_i32 = arith.constant 0 : i32
    %c0_i32_0 = arith.constant 0 : i32
    %c0_i32_1 = arith.constant 0 : i32
    return %c0_i32, %c0_i32_0 : i32, i32
  }
  func.func @transform_10(%arg0: i32) -> (i32, i32) {
    %c0_i32 = arith.constant 0 : i32
    %c0_i32_0 = arith.constant 0 : i32
    %c0_i32_1 = arith.constant 0 : i32
    return %c0_i32, %c0_i32_0 : i32, i32
  }
  func.func @transform_11(%arg0: i32) -> (i32, i32) {
    %c0_i32 = arith.constant 0 : i32
    %c0_i32_0 = arith.constant 0 : i32
    %c0_i32_1 = arith.constant 0 : i32
    return %c0_i32, %c0_i32_0 : i32, i32
  }
  func.func @transform_12(%arg0: i32) -> (i32, i32) {
    %c0_i32 = arith.constant 0 : i32
    %c0_i32_0 = arith.constant 0 : i32
    %c0_i32_1 = arith.constant 0 : i32
    return %c0_i32, %c0_i32_0 : i32, i32
  }
  func.func @transform_13(%arg0: i32) -> (i32, i32) {
    %c0_i32 = arith.constant 0 : i32
    %c0_i32_0 = arith.constant 0 : i32
    return %arg0, %c0_i32 : i32, i32
  }
}

</mosaic_0001>

<bundles_post_ra>
// kernel: thermal_cnn_forward.1
= control target key start
LH: loop header
LB: loop body
LE: loop exit
PB: predicated region body
PF: predicated region fallthrough
CT: control target
= control target key end

     0   :  { %18 = vsyncpa [#allocation6], 0  ;;  %s15108_s0 = inlined_call_operand.hbm [shape: f32[2,1,24,32], index: 0, kind: input, shape index: {}]   ;;  %s15109_s1 = inlined_call_operand.hbm [shape: bf16[5,32,512], index: 1, kind: input, shape index: {}]   ;;  %s15110_s2 = inlined_call_operand.hbm [shape: f32[1,512], index: 2, kind: input, shape index: {}]   ;;  %s15111_s3 = inlined_call_operand.hbm [shape: bf16[5,256,512], index: 3, kind: input, shape index: {}]   ;;  %s15112_s4 = inlined_call_operand.hbm [shape: f32[1,512], index: 4, kind: input, shape index: {}]   ;;  %s15113_s5 = inlined_call_operand.hbm [shape: bf16[5,256,512], index: 5, kind: input, shape index: {}]   ;;  %s15114_s6 = inlined_call_operand.hbm [shape: f32[1,512], index: 6, kind: input, shape index: {}]   ;;  %s15115_s7 = inlined_call_operand.hbm [shape: bf16[3,256,128], index: 7, kind: input, shape index: {}]   ;;  %s15116_s8 = inlined_call_operand.hbm [shape: f32[1,128], index: 8, kind: input, shape index: {}]   ;;  %s15117_s9 = inlined_call_operand.hbm [shape: bf16[128,256], index: 9, kind: input, shape index: {}]   ;;  %s15118_s10 = inlined_call_operand.hbm [shape: f32[1,256], index: 10, kind: input, shape index: {}]   ;;  %s15119_s11 = inlined_call_operand.vmem [shape: bf16[256,10], index: 11, kind: input, shape index: {}]   ;;  %s15120_s12 = inlined_call_operand.hbm [shape: f32[1,10], index: 12, kind: input, shape index: {}]   ;;  %s15121_s13 = inlined_call_operand.hbm [shape: f32[2,10], index: 13, kind: output, shape index: {}]  }
   0x1   :  { %19 = vsyncpa [#allocation9], 0 }
   0x2   :  { %20 = vsyncpa [#allocation12], 0 }
   0x3   :  { %21 = vsyncpa [#allocation15], 0 }
   0x4   :  { %22 = vsyncpa [#allocation18], 0 }
   0x5   :  { %23 = vsyncpa [#allocation21], 0 }
   0x6   :  { %24 = vsyncpa [#allocation24], 0 }
   0x7   :  { %25 = vsyncpa [#allocation7], 0  ;;  %s13249_s25 = smov [#allocation8]   ;;  %s12947_s29 = scalar_lea.hbm %s15109_s1, 5120 }
   0x8   :  { %s43_s26 = sshll.u32 %s13249_s25, 4  ;;  %p12948_p0 = scmp.ne.s32.totalorder %s15109_s1, %s12947_s29  ;;  %s44_s26 = int_to_ptr.vmem [resolvable:$true] %s43_s26 }
   0x9   :  { %p12951_p1 = scmp.lt.u32.totalorder %s12947_s29, %s15109_s1 }
   0xb   :  { %p12953_p2 = pnand %p12951_p1, %p12948_p0 }
   0xd   :  { %12956 = shalt.err (!%p12953_p2)
}
   0xe   :  { %s12957_s17 = scalar_lea.vmem %s44_s26, 5120  ;;  %p12962_p4 = scmp.lt.s32.totalorder %s44_s26, %s44_s26 }
   0xf   :  { %p12958_p3 = scmp.ne.s32.totalorder %s44_s26, %s12957_s17  ;;  %p12963_p5 = scmp.lt.s32.totalorder %s12957_s17, %s12957_s17 }
  0x11   :  { %p12964_p6 = por %p12963_p5, %p12962_p4 }
  0x13   :  { %p12965_p7 = pnand %p12964_p6, %p12958_p3 }
  0x15   :  { %12968 = shalt.err (!%p12965_p7)
}
  0x16   :  { %s13250_s18 = smov 256   ;;  %s13251_s19 = smov 16  }
  0x17   :  { %49 = dma.hbm_to_vmem [thread:$0]  %s15109_s1, 5120, %s44_s26, [#allocation9], %s13250_s18, %s13250_s18, %s13251_s19  }
  0x18   :  { %s13252_s22 = smov [#allocation11]   ;;  %s13253_s24 = smov [#allocation14]  }
  0x19   :  { %s65_s23 = sshll.u32 %s13252_s22, 4  ;;  %s87_s25 = sshll.u32 %s13253_s24, 4  ;;  %s66_s23 = int_to_ptr.vmem [resolvable:$true] %s65_s23  ;;  %s88_s25 = int_to_ptr.vmem [resolvable:$true] %s87_s25 }
  0x1a   :  { %s12969_s29 = scalar_lea.hbm %s15111_s3, 40960 }
  0x1b   :  { %p12970_p8 = scmp.ne.s32.totalorder %s15111_s3, %s12969_s29  ;;  %p12973_p9 = scmp.lt.u32.totalorder %s12969_s29, %s15111_s3 }
  0x1d   :  { %p12975_p10 = pnand %p12973_p9, %p12970_p8 }
  0x1f   :  { %12978 = shalt.err (!%p12975_p10)
}
  0x20   :  { %s12979_s1 = scalar_lea.vmem %s66_s23, 40960  ;;  %p12984_p12 = scmp.lt.s32.totalorder %s66_s23, %s66_s23 }
  0x21   :  { %p12980_p11 = scmp.ne.s32.totalorder %s66_s23, %s12979_s1  ;;  %p12985_p13 = scmp.lt.s32.totalorder %s12979_s1, %s12979_s1 }
  0x23   :  { %p12986_p0 = por %p12985_p13, %p12984_p12 }
  0x25   :  { %p12987_p1 = pnand %p12986_p0, %p12980_p11 }
  0x27   :  { %12990 = shalt.err (!%p12987_p1)
}
  0x28   :  { %71 = dma.hbm_to_vmem [thread:$0]  %s15111_s3, 40960, %s66_s23, [#allocation12], %s13250_s18, %s13250_s18, %s13251_s19  }
  0x29   :  { %s12991_s22 = scalar_lea.hbm %s15113_s5, 40960 }
  0x2a   :  { %p12992_p2 = scmp.ne.s32.totalorder %s15113_s5, %s12991_s22  ;;  %p12995_p3 = scmp.lt.u32.totalorder %s12991_s22, %s15113_s5 }
  0x2c   :  { %p12997_p4 = pnand %p12995_p3, %p12992_p2 }
  0x2e   :  { %13000 = shalt.err (!%p12997_p4)
}
  0x2f   :  { %s13001_s30 = scalar_lea.vmem %s88_s25, 40960  ;;  %p13006_p6 = scmp.lt.s32.totalorder %s88_s25, %s88_s25 }
  0x30   :  { %p13002_p5 = scmp.ne.s32.totalorder %s88_s25, %s13001_s30  ;;  %p13007_p7 = scmp.lt.s32.totalorder %s13001_s30, %s13001_s30 }
  0x32   :  { %p13008_p8 = por %p13007_p7, %p13006_p6 }
  0x34   :  { %p13009_p9 = pnand %p13008_p8, %p13002_p5 }
  0x36   :  { %13012 = shalt.err (!%p13009_p9)
}
  0x37   :  { %93 = dma.hbm_to_vmem [thread:$0]  %s15113_s5, 40960, %s88_s25, [#allocation15], %s13250_s18, %s13250_s18, %s13251_s19  }
  0x38   :  { %s13254_s14 = smov [#allocation17]   ;;  %s13013_s26 = scalar_lea.hbm %s15115_s7, 6144 }
  0x39   :  { %s109_s15 = sshll.u32 %s13254_s14, 4  ;;  %p13014_p10 = scmp.ne.s32.totalorder %s15115_s7, %s13013_s26  ;;  %s110_s15 = int_to_ptr.vmem [resolvable:$true] %s109_s15 }
  0x3a   :  { %p13017_p11 = scmp.lt.u32.totalorder %s13013_s26, %s15115_s7 }
  0x3c   :  { %p13019_p12 = pnand %p13017_p11, %p13014_p10 }
  0x3e   :  { %13022 = shalt.err (!%p13019_p12)
}
  0x3f   :  { %s13023_s24 = scalar_lea.vmem %s110_s15, 6144  ;;  %p13028_p0 = scmp.lt.s32.totalorder %s110_s15, %s110_s15 }
  0x40   :  { %p13024_p13 = scmp.ne.s32.totalorder %s110_s15, %s13023_s24  ;;  %p13029_p1 = scmp.lt.s32.totalorder %s13023_s24, %s13023_s24 }
  0x42   :  { %p13030_p2 = por %p13029_p1, %p13028_p0 }
  0x44   :  { %p13031_p3 = pnand %p13030_p2, %p13024_p13 }
  0x46   :  { %13034 = shalt.err (!%p13031_p3)
}
  0x47   :  { %s13255_s5 = smov 64   ;;  %s13256_s18 = smov 4  }
  0x48   :  { %115 = dma.hbm_to_vmem [thread:$0]  %s15115_s7, 6144, %s110_s15, [#allocation18], %s13255_s5, %s13255_s5, %s13256_s18  }
  0x49   :  { %s13257_s27 = smov [#allocation20]   ;;  %s13258_s29 = smov [#allocation5]  }
  0x4a   :  { %s131_s28 = sshll.u32 %s13257_s27, 4  ;;  %s31_s30 = sshll.u32 %s13258_s29, 4  ;;  %s132_s28 = int_to_ptr.vmem [resolvable:$true] %s131_s28  ;;  %s13398_s30 = int_to_ptr.vmem [resolvable:$true] %s31_s30 }
  0x4b   :  { %s13035_s14 = scalar_lea.hbm %s15117_s9, 2048 }
  0x4c   :  { %p13036_p4 = scmp.ne.s32.totalorder %s15117_s9, %s13035_s14  ;;  %p13039_p5 = scmp.lt.u32.totalorder %s13035_s14, %s15117_s9 }
  0x4e   :  { %p13041_p6 = pnand %p13039_p5, %p13036_p4 }
  0x50   :  { %13044 = shalt.err (!%p13041_p6)
}
  0x51   :  { %s13045_s7 = scalar_lea.vmem %s132_s28, 2048  ;;  %p13050_p8 = scmp.lt.s32.totalorder %s132_s28, %s132_s28 }
  0x52   :  { %p13046_p7 = scmp.ne.s32.totalorder %s132_s28, %s13045_s7  ;;  %p13051_p9 = scmp.lt.s32.totalorder %s13045_s7, %s13045_s7 }
  0x54   :  { %p13052_p10 = por %p13051_p9, %p13050_p8 }
  0x56   :  { %p13053_p11 = pnand %p13052_p10, %p13046_p7 }
  0x58   :  { %13056 = shalt.err (!%p13053_p11)
}
  0x59   :  { %s13259_s15 = smov 128   ;;  %s13260_s20 = smov 8  }
  0x5a   :  { %137 = dma.hbm_to_vmem [thread:$0]  %s15117_s9, 2048, %s132_s28, [#allocation21], %s13259_s15, %s13259_s15, %s13260_s20  }
  0x5b   :  { %s13057_s18 = scalar_lea.hbm %s15108_s0, 768 }
  0x5c   :  { %p13058_p12 = scmp.ne.s32.totalorder %s15108_s0, %s13057_s18  ;;  %p13061_p13 = scmp.lt.u32.totalorder %s13057_s18, %s15108_s0 }
  0x5e   :  { %p13063_p0 = pnand %p13061_p13, %p13058_p12 }
  0x60   :  { %13066 = shalt.err (!%p13063_p0)
}
  0x61   :  { %s13067_s3 = scalar_lea.vmem %s13398_s30, 768  ;;  %p13072_p2 = scmp.lt.s32.totalorder %s13398_s30, %s13398_s30 }
  0x62   :  { %p13068_p1 = scmp.ne.s32.totalorder %s13398_s30, %s13067_s3  ;;  %p13073_p3 = scmp.lt.s32.totalorder %s13067_s3, %s13067_s3 }
  0x64   :  { %p13074_p4 = por %p13073_p3, %p13072_p2 }
  0x66   :  { %p13075_p5 = pnand %p13074_p4, %p13068_p1 }
  0x68   :  { %13078 = shalt.err (!%p13075_p5)
}
  0x69   :  { %37 = dma.hbm_to_vmem [thread:$0]  %s15108_s0, 768, %s13398_s30, [#allocation6], %s13259_s15, %s13259_s15, %s13260_s20  }
  0x6a   :  { %s13261_s23 = smov [#allocation10]   ;;  %s13262_s16 = smov [#allocation13]  }
  0x6b   :  { %s56_s14 = sshll.u32 %s13261_s23, 4  ;;  %s78_s1 = sshll.u32 %s13262_s16, 4  ;;  %s57_s14 = int_to_ptr.vmem [resolvable:$true] %s56_s14  ;;  %s79_s1 = int_to_ptr.vmem [resolvable:$true] %s78_s1 }
  0x6c   :  { %s13079_s7 = scalar_lea.hbm %s15110_s2, 64 }
  0x6d   :  { %p13080_p6 = scmp.ne.s32.totalorder %s15110_s2, %s13079_s7  ;;  %p13083_p7 = scmp.lt.u32.totalorder %s13079_s7, %s15110_s2 }
  0x6f   :  { %p13085_p8 = pnand %p13083_p7, %p13080_p6 }
  0x71   :  { %13088 = shalt.err (!%p13085_p8)
}
  0x72   :  { %s13089_s0 = scalar_lea.vmem %s57_s14, 64  ;;  %p13094_p10 = scmp.lt.s32.totalorder %s57_s14, %s57_s14 }
  0x73   :  { %p13090_p9 = scmp.ne.s32.totalorder %s57_s14, %s13089_s0  ;;  %p13095_p11 = scmp.lt.s32.totalorder %s13089_s0, %s13089_s0 }
  0x75   :  { %p13096_p12 = por %p13095_p11, %p13094_p10 }
  0x77   :  { %p13097_p13 = pnand %p13096_p12, %p13090_p9 }
  0x79   :  { %13100 = shalt.err (!%p13097_p13)
}
  0x7a   :  { %59 = dma.hbm_to_vmem [thread:$0]  %s15110_s2, 64, %s57_s14, [#allocation9]  }
  0x7b   :  { %s13101_s19 = scalar_lea.hbm %s15112_s4, 64 }
  0x7c   :  { %p13102_p0 = scmp.ne.s32.totalorder %s15112_s4, %s13101_s19  ;;  %p13105_p1 = scmp.lt.u32.totalorder %s13101_s19, %s15112_s4 }
  0x7e   :  { %p13107_p2 = pnand %p13105_p1, %p13102_p0 }
  0x80   :  { %13110 = shalt.err (!%p13107_p2)
}
  0x81   :  { %s13111_s9 = scalar_lea.vmem %s79_s1, 64  ;;  %p13116_p4 = scmp.lt.s32.totalorder %s79_s1, %s79_s1 }
  0x82   :  { %p13112_p3 = scmp.ne.s32.totalorder %s79_s1, %s13111_s9  ;;  %p13117_p5 = scmp.lt.s32.totalorder %s13111_s9, %s13111_s9 }
  0x84   :  { %p13118_p6 = por %p13117_p5, %p13116_p4 }
  0x86   :  { %p13119_p7 = pnand %p13118_p6, %p13112_p3 }
  0x88   :  { %13122 = shalt.err (!%p13119_p7)
}
  0x89   :  { %81 = dma.hbm_to_vmem [thread:$0]  %s15112_s4, 64, %s79_s1, [#allocation12]  }
  0x8a   :  { %s13263_s23 = smov [#allocation16]   ;;  %s13264_s16 = smov [#allocation19]  }
  0x8b   :  { %s100_s14 = sshll.u32 %s13263_s23, 4  ;;  %s122_s26 = sshll.u32 %s13264_s16, 4  ;;  %s101_s14 = int_to_ptr.vmem [resolvable:$true] %s100_s14  ;;  %s123_s26 = int_to_ptr.vmem [resolvable:$true] %s122_s26 }
  0x8c   :  { %s13123_s21 = scalar_lea.hbm %s15114_s6, 64 }
  0x8d   :  { %p13124_p8 = scmp.ne.s32.totalorder %s15114_s6, %s13123_s21  ;;  %p13127_p9 = scmp.lt.u32.totalorder %s13123_s21, %s15114_s6 }
  0x8f   :  { %p13129_p10 = pnand %p13127_p9, %p13124_p8 }
  0x91   :  { %13132 = shalt.err (!%p13129_p10)
}
  0x92   :  { %s13133_s4 = scalar_lea.vmem %s101_s14, 64  ;;  %p13138_p12 = scmp.lt.s32.totalorder %s101_s14, %s101_s14 }
  0x93   :  { %p13134_p11 = scmp.ne.s32.totalorder %s101_s14, %s13133_s4  ;;  %p13139_p13 = scmp.lt.s32.totalorder %s13133_s4, %s13133_s4 }
  0x95   :  { %p13140_p0 = por %p13139_p13, %p13138_p12 }
  0x97   :  { %p13141_p1 = pnand %p13140_p0, %p13134_p11 }
  0x99   :  { %13144 = shalt.err (!%p13141_p1)
}
  0x9a   :  { %103 = dma.hbm_to_vmem [thread:$0]  %s15114_s6, 64, %s101_s14, [#allocation15]  }
  0x9b   :  { %s13145_s18 = scalar_lea.hbm %s15116_s8, 16 }
  0x9c   :  { %p13146_p2 = scmp.ne.s32.totalorder %s15116_s8, %s13145_s18  ;;  %p13149_p3 = scmp.lt.u32.totalorder %s13145_s18, %s15116_s8 }
  0x9e   :  { %p13151_p4 = pnand %p13149_p3, %p13146_p2 }
  0xa0   :  { %13154 = shalt.err (!%p13151_p4)
}
  0xa1   :  { %s13155_s3 = scalar_lea.vmem %s123_s26, 16  ;;  %s13159_s9 = scalar_lea.vmem %s123_s26, 32 }
  0xa2   :  { %p13156_p5 = scmp.ne.s32.totalorder %s123_s26, %s13155_s3  ;;  %p13160_p6 = scmp.lt.s32.totalorder %s123_s26, %s123_s26 }
  0xa3   :  { %p13161_p7 = scmp.lt.s32.totalorder %s13159_s9, %s13155_s3 }
  0xa5   :  { %p13162_p8 = por %p13161_p7, %p13160_p6 }
  0xa7   :  { %p13163_p9 = pnand %p13162_p8, %p13156_p5 }
  0xa9   :  { %13166 = shalt.err (!%p13163_p9)
}
  0xaa   :  { %125 = dma.hbm_to_vmem [thread:$0]  %s15116_s8, 16, %s123_s26, [#allocation18]  }
  0xab   :  { %s13265_s28 = smov [#allocation22]   ;;  %s13266_s14 = smov [#allocation23]  }
  0xac   :  { %s144_s23 = sshll.u32 %s13265_s28, 4  ;;  %s156_s16 = sshll.u32 %s13266_s14, 4  ;;  %s145_s23 = int_to_ptr.vmem [resolvable:$true] %s144_s23  ;;  %s157_s16 = int_to_ptr.vmem [resolvable:$true] %s156_s16 }
  0xad   :  { %s13167_s21 = scalar_lea.hbm %s15118_s10, 32 }
  0xae   :  { %p13168_p10 = scmp.ne.s32.totalorder %s15118_s10, %s13167_s21  ;;  %p13171_p11 = scmp.lt.u32.totalorder %s13167_s21, %s15118_s10 }
  0xb0   :  { %p13173_p12 = pnand %p13171_p11, %p13168_p10 }
  0xb2   :  { %13176 = shalt.err (!%p13173_p12)
}
  0xb3   :  { %s13177_s8 = scalar_lea.vmem %s145_s23, 32  ;;  %p13182_p0 = scmp.lt.s32.totalorder %s145_s23, %s145_s23 }
  0xb4   :  { %p13178_p13 = scmp.ne.s32.totalorder %s145_s23, %s13177_s8  ;;  %p13183_p1 = scmp.lt.s32.totalorder %s13177_s8, %s13177_s8 }
  0xb6   :  { %p13184_p2 = por %p13183_p1, %p13182_p0 }
  0xb8   :  { %p13185_p3 = pnand %p13184_p2, %p13178_p13 }
  0xba   :  { %13188 = shalt.err (!%p13185_p3)
}
  0xbb   :  { %147 = dma.hbm_to_vmem [thread:$0]  %s15118_s10, 32, %s145_s23, [#allocation21]  }
  0xbc   :  { %s13189_s15 = scalar_lea.hbm %s15120_s12, 16 }
  0xbd   :  { %p13190_p4 = scmp.ne.s32.totalorder %s15120_s12, %s13189_s15  ;;  %p13193_p5 = scmp.lt.u32.totalorder %s13189_s15, %s15120_s12 }
  0xbf   :  { %p13195_p6 = pnand %p13193_p5, %p13190_p4 }
  0xc1   :  { %13198 = shalt.err (!%p13195_p6)
}
  0xc2   :  { %s13199_s27 = scalar_lea.vmem %s157_s16, 16  ;;  %s13203_s29 = scalar_lea.vmem %s157_s16, 32 }
  0xc3   :  { %p13200_p7 = scmp.ne.s32.totalorder %s157_s16, %s13199_s27  ;;  %p13204_p8 = scmp.lt.s32.totalorder %s157_s16, %s157_s16 }
  0xc4   :  { %p13205_p9 = scmp.lt.s32.totalorder %s13203_s29, %s13199_s27 }
  0xc6   :  { %p13206_p10 = por %p13205_p9, %p13204_p8 }
  0xc8   :  { %p13207_p11 = pnand %p13206_p10, %p13200_p7 }
  0xca   :  { %13210 = shalt.err (!%p13207_p11)
}
  0xcb   :  { %159 = dma.hbm_to_vmem [thread:$0]  %s15120_s12, 16, %s157_s16, [#allocation24]  }
  0xcc   :  { %13233 = dma.done.wait [#allocation6], 768  }
  0xcd   :  { %13234 = vsyncadd [#allocation6], 4294966528 }
  0xce   :  { %13235 = dma.done.wait [#allocation9], 5184  }
  0xcf   :  { %13236 = vsyncadd [#allocation9], 4294962112 }
  0xd0   :  { %13237 = dma.done.wait [#allocation12], 41024  }
  0xd1   :  { %13238 = vsyncadd [#allocation12], 4294926272 }
  0xd2   :  { %13239 = dma.done.wait [#allocation15], 41024  }
  0xd3   :  { %13240 = vsyncadd [#allocation15], 4294926272 }
  0xd4   :  { %13241 = dma.done.wait [#allocation18], 6160  }
  0xd5   :  { %13242 = vsyncadd [#allocation18], 4294961136 }
  0xd6   :  { %13243 = dma.done.wait [#allocation21], 2080  }
  0xd7   :  { %13244 = vsyncadd [#allocation21], 4294965216 }
  0xd8   :  { %13245 = dma.done.wait [#allocation24], 16  }
  0xd9   :  { %13246 = vsyncadd [#allocation24], 4294967280  ;;  %vm197_vm0 = vcmask 254976   ;;  %v15122_v0 = vmov 0   ;;  %v13268_v1 = vmov 0.0   ;;  %vm208_vm1 = vcmask 261120  }
  0xda   :  { %331 = vmatprep.mubr.bf16.mxu0 %v15122_v0  ;;  %341 = vmatprep.mubr.bf16.mxu1 %v15122_v0  ;;  %198 = vst.msk [vmem:[#allocation2] sm:$0x3] %vm197_vm0, %v13268_v1  ;;  %199 = vst.msk [vmem:[#allocation2 + $0x20] sm:$0x3] %vm197_vm0, %v13268_v1  ;;  %v11765_v2 = vld [vmem:[#allocation8 + $0x44] ss:$16 sps:$4 sm:$0xff]  }
  0xdb   :  { %200 = vst.msk [vmem:[#allocation2 + $0x1a] sm:$0x3] %vm197_vm0, %v13268_v1  ;;  %201 = vst.msk [vmem:[#allocation2 + $0x3a] sm:$0x3] %vm197_vm0, %v13268_v1  ;;  %v11767_v3 = vld [vmem:[#allocation8 + $0x40] ss:$16 sps:$4 sm:$0xff]   ;;  %299 = vmatprep.subr.bf16.mxu0 %v11765_v2  ;;  %11579 = vmatprep.subr.bf16.mxu1 %v11765_v2 }
  0xdc   :  { %2786 = vst [vmem:[#allocation3] sm:$0x3] %v13268_v1  ;;  %2787 = vst [vmem:[#allocation3 + $0x8] sm:$0x3] %v13268_v1  ;;  %v11768_v4 = vld [vmem:[#allocation8 + $0x64] ss:$16 sps:$4 sm:$0xff]   ;;  %300 = vmatpush1.bf16.msra.mxu0 %v11767_v3  ;;  %11581 = vmatpush1.bf16.msra.mxu1 %v11767_v3 }
  0xdd   :  { %2788 = vst [vmem:[#allocation3 + $0x20] sm:$0x3] %v13268_v1  ;;  %2789 = vst [vmem:[#allocation3 + $0x28] sm:$0x3] %v13268_v1  ;;  %v11770_v5 = vld [vmem:[#allocation8 + $0x60] ss:$16 sps:$4 sm:$0xff]   ;;  %301 = vmatprep.subr.bf16.mxu0 %v11768_v4  ;;  %11580 = vmatprep.subr.bf16.mxu1 %v11768_v4 }
  0xde   :  { %2790 = vst [vmem:[#allocation3 + $0x10] sm:$0xc0] %v13268_v1  ;;  %2791 = vst [vmem:[#allocation3 + $0x18] sm:$0xc0] %v13268_v1  ;;  %v202_v6 = vld [vmem:[#allocation5] sm:$0xff]  ;;  %v203_v7 = vld [vmem:[#allocation5 + $0x8] sm:$0xff] }
  0xdf   :  { %2792 = vst [vmem:[#allocation3 + $0x30] sm:$0xc0] %v13268_v1  ;;  %2793 = vst [vmem:[#allocation3 + $0x38] sm:$0xc0] %v13268_v1  ;;  %v204_v8 = vld [vmem:[#allocation5 + $0x10] sm:$0xff]  ;;  %v205_v9 = vld [vmem:[#allocation5 + $0x18] sm:$0xff] }
  0xe0   :  { %6416 = vst [vmem:[#allocation4] sm:$0x3] %v13268_v1  ;;  %6417 = vst [vmem:[#allocation4 + $0x8] sm:$0x3] %v13268_v1  ;;  %v11773_v10 = vld [vmem:[#allocation8 + $0x4c] ss:$16 sps:$4 sm:$0xff]   ;;  %302 = vmatpush1.bf16.msra.mxu0 %v11770_v5  ;;  %11582 = vmatpush1.bf16.msra.mxu1 %v11770_v5 }
  0xe1   :  { %6418 = vst [vmem:[#allocation4 + $0x20] sm:$0x3] %v13268_v1  ;;  %6419 = vst [vmem:[#allocation4 + $0x28] sm:$0x3] %v13268_v1  ;;  %v11776_v11 = vld [vmem:[#allocation8 + $0x4] ss:$16 sps:$4 sm:$0xff]   ;;  %362 = vmatprep.subr.bf16.mxu1 %v11773_v10 }
  0xe2   :  { %6420 = vst [vmem:[#allocation4 + $0x10] sm:$0x3] %v13268_v1  ;;  %6421 = vst [vmem:[#allocation4 + $0x18] sm:$0x3] %v13268_v1  ;;  %v206_v12 = vld [vmem:[#allocation5 + $0x20] sm:$0xff]  ;;  %v207_v13 = vld [vmem:[#allocation5 + $0x28] sm:$0xff]  ;;  %474 = vmatprep.subr.bf16.mxu0 %v11776_v11 }
  0xe3   :  { %6422 = vst [vmem:[#allocation4 + $0x30] sm:$0x3] %v13268_v1  ;;  %6423 = vst [vmem:[#allocation4 + $0x38] sm:$0x3] %v13268_v1  ;;  %v11771_v14 = vld [vmem:[#allocation8 + $0x48] ss:$16 sps:$4 sm:$0xff]  }
  0xe4   :  { %209 = vst.msk [vmem:[#allocation2 + $0x2] sm:$0xff] %vm208_vm1, %v202_v6  ;;  %210 = vst.msk [vmem:[#allocation2 + $0xa] sm:$0xff] %vm208_vm1, %v203_v7  ;;  %v11774_v16 = vld [vmem:[#allocation8] ss:$16 sps:$4 sm:$0xff]   ;;  %v11779_v22 = vld [vmem:[#allocation8 + $0x6c] ss:$16 sps:$4 sm:$0xff]  }
  0xe5   :  { %211 = vst.msk [vmem:[#allocation2 + $0x12] sm:$0xff] %vm208_vm1, %v204_v8  ;;  %212 = vst.msk [vmem:[#allocation2 + $0x22] sm:$0xff] %vm208_vm1, %v205_v9  ;;  %v11782_v23 = vld [vmem:[#allocation8 + $0x24] ss:$16 sps:$4 sm:$0xff]   ;;  %v11777_v24 = vld [vmem:[#allocation8 + $0x68] ss:$16 sps:$4 sm:$0xff]  }
  0xe6   :  { %213 = vst.msk [vmem:[#allocation2 + $0x2a] sm:$0xff] %vm208_vm1, %v206_v12  ;;  %214 = vst.msk [vmem:[#allocation2 + $0x32] sm:$0xff] %vm208_vm1, %v207_v13  ;;  %v11780_v25 = vld [vmem:[#allocation8 + $0x20] ss:$16 sps:$4 sm:$0xff]   ;;  %v11785_v28 = vld [vmem:[#allocation8 + $0xc] ss:$16 sps:$4 sm:$0xff]  }
  0xe7   :  { %v11791_v29 = vld [vmem:[#allocation8 + $0x84] ss:$16 sps:$4 sm:$0xff]   ;;  %v11789_v34 = vld [vmem:[#allocation8 + $0x80] ss:$16 sps:$4 sm:$0xff]   ;;  %v11783_v36 = vld [vmem:[#allocation8 + $0x8] ss:$16 sps:$4 sm:$0xff]  }
  0xe8   :  { %v11794_v35 = vld [vmem:[#allocation8 + $0xa4] ss:$16 sps:$4 sm:$0xff]   ;;  %v11788_v39 = vld [vmem:[#allocation8 + $0x2c] ss:$16 sps:$4 sm:$0xff]   ;;  %v11792_v40 = vld [vmem:[#allocation8 + $0xa0] ss:$16 sps:$4 sm:$0xff]  }
  0xe9   :  { %v11803_v41 = vld [vmem:[#allocation8 + $0xc4] ss:$16 sps:$4 sm:$0xff]   ;;  %v11786_v43 = vld [vmem:[#allocation8 + $0x28] ss:$16 sps:$4 sm:$0xff]   ;;  %v11797_v44 = vld [vmem:[#allocation8 + $0x8c] ss:$16 sps:$4 sm:$0xff]  }
  0xea   :  { %v11801_v50 = vld [vmem:[#allocation8 + $0xc0] ss:$16 sps:$4 sm:$0xff]   ;;  %v11806_v52 = vld [vmem:[#allocation8 + $0xe4] ss:$16 sps:$4 sm:$0xff]   ;;  %v11795_v53 = vld [vmem:[#allocation8 + $0x88] ss:$16 sps:$4 sm:$0xff]  }
  0xeb   :  { %v232_v15 = vld [vmem:[#allocation2 + $0x1] sm:$0xff]  ;;  %v233_v17 = vld [vmem:[#allocation2 + $0x9] sm:$0xff]  ;;  %vm2065_vm2 = vcmask 1041408   ;;  %vm2842_vm3 = vcmask 1043459   ;;  %vm2844_vm4 = vcmask 1044484   ;;  %vm2846_vm5 = vcmask 1045509  }
  0xec   :  { %v234_v18 = vld [vmem:[#allocation2 + $0x11] sm:$0xff]  ;;  %v235_v19 = vld [vmem:[#allocation2 + $0x21] sm:$0xff]  ;;  %v238_v20 = vpack.c.bf16 %v233_v17, %v232_v15  ;;  %v11800_v56 = vld [vmem:[#allocation8 + $0xac] ss:$16 sps:$4 sm:$0xff]   ;;  %vm2848_vm6 = vcmask 1046534   ;;  %vm2850_vm7 = vcmask 1047559  }
  0xed   :  { %v239_v21 = vpack.c.bf16 %v235_v19, %v234_v18  ;;  %v236_v26 = vld [vmem:[#allocation2 + $0x29] sm:$0xff]  ;;  %v237_v27 = vld [vmem:[#allocation2 + $0x31] sm:$0xff]  ;;  %v215_v31 = vld [vmem:[#allocation2] sm:$0xff]  ;;  %vm2857_vm8 = vcmask 1041409   ;;  %vm2859_vm9 = vcmask 1042434   ;;  %vm3031_vm10 = vcmask 1042432  }
  0xee   :  { %10646 = vmatmul.mubr.msk.bf16.vlgmr.msra.gmra.mrb[0].mxu0 %vm208_vm1, %v238_v20  ;;  %v240_v30 = vpack.c.bf16 %v237_v27, %v236_v26  ;;  %v216_v32 = vld [vmem:[#allocation2 + $0x8] sm:$0xff]  ;;  %v217_v37 = vld [vmem:[#allocation2 + $0x10] sm:$0xff]  ;;  %v218_v38 = vld [vmem:[#allocation2 + $0x20] sm:$0xff]  ;;  %vm3032_vm11 = vcmask 1046532   ;;  %vm4003_vm13 = vcmask 1045508   ;;  %vm4564_vm15 = vcmask 1040384  }
  0xef   :  { %10647 = vmatmul.mubr.msk.bf16.vlgmr.msra.gmra.mrb[0].mxu1 %vm208_vm1, %v239_v21  ;;  %475 = vmatpush1.bf16.msra.mxu0 %v11774_v16  ;;  %v221_v33 = vpack.c.bf16 %v216_v32, %v215_v31  ;;  %v222_v42 = vpack.c.bf16 %v218_v38, %v217_v37  ;;  %v219_v45 = vld [vmem:[#allocation2 + $0x28] sm:$0xff]  ;;  %v220_v46 = vld [vmem:[#allocation2 + $0x30] sm:$0xff]  ;;  %vm14294_vm12 = vmor %vm3031_vm10, %vm3032_vm11 }
  0xf0   :  { %363 = vmatpush1.bf16.msra.mxu1 %v11771_v14  ;;  %351 = vmatprep.mubr.bf16.mxu1 %v15122_v0  ;;  %v223_v47 = vpack.c.bf16 %v220_v46, %v219_v45  ;;  %v600_v48 = vld [vmem:[#allocation2 + $0x2] sm:$0xff]  ;;  %v601_v49 = vld [vmem:[#allocation2 + $0xa] sm:$0xff]  ;;  %v602_v54 = vld [vmem:[#allocation2 + $0x12] sm:$0xff]  ;;  %v1253_v46 = vlaneseq }
  0xf1   :  { %364 = vmatprep.subr.bf16.mxu1 %v11779_v22  ;;  %476 = vmatprep.subr.bf16.mxu0 %v11782_v23  ;;  %v606_v51 = vpack.c.bf16 %v601_v49, %v600_v48  ;;  %v603_v55 = vld [vmem:[#allocation2 + $0x22] sm:$0xff]  ;;  %v11809_v61 = vld [vmem:[#allocation8 + $0xcc] ss:$16 sps:$4 sm:$0xff]   ;;  %v605_v63 = vld [vmem:[#allocation2 + $0x32] sm:$0xff] }
  0xf2   :  { %506 = vmatprep.mubr.bf16.mxu0 %v15122_v0  ;;  %v11804_v57 = vld [vmem:[#allocation8 + $0xe0] ss:$16 sps:$4 sm:$0xff]   ;;  %v11815_v58 = vld [vmem:[#allocation8 + $0x104] ss:$16 sps:$4 sm:$0xff]   ;;  %v11798_v59 = vld [vmem:[#allocation8 + $0xa8] ss:$16 sps:$4 sm:$0xff]   ;;  %v607_v60 = vpack.c.bf16 %v603_v55, %v602_v54 }
  0xf3   :  { %477 = vmatpush1.bf16.msra.mxu0 %v11780_v25  ;;  %v604_v62 = vld [vmem:[#allocation2 + $0x2a] sm:$0xff]  ;;  %v11818_v6 = vld [vmem:[#allocation8 + $0x124] ss:$16 sps:$4 sm:$0xff]   ;;  %vm14324_vm14 = vmor %vm2065_vm2, %vm4003_vm13 }
  0xf4   :  { %365 = vmatpush1.bf16.msra.mxu1 %v11777_v24  ;;  %667 = vmatprep.subr.bf16.mxu0 %v11791_v29  ;;  %v608_v1 = vpack.c.bf16 %v605_v63, %v604_v62  ;;  %v817_v2 = vld [vmem:[#allocation2 + $0x3] sm:$0xff]  ;;  %v818_v3 = vld [vmem:[#allocation2 + $0xb] sm:$0xff]  ;;  %v819_v8 = vld [vmem:[#allocation2 + $0x13] sm:$0xff] }
  0xf5   :  { %537 = vmatprep.subr.bf16.mxu1 %v11785_v28  ;;  %v11813_v4 = vld [vmem:[#allocation8 + $0x100] ss:$16 sps:$4 sm:$0xff]   ;;  %v823_v5 = vpack.c.bf16 %v818_v3, %v817_v2  ;;  %v11807_v7 = vld [vmem:[#allocation8 + $0xc8] ss:$16 sps:$4 sm:$0xff]   ;;  %v11812_v10 = vld [vmem:[#allocation8 + $0xec] ss:$16 sps:$4 sm:$0xff]  }
  0xf6   :  { %v820_v9 = vld [vmem:[#allocation2 + $0x23] sm:$0xff]  ;;  %v11821_v14 = vld [vmem:[#allocation8 + $0x10c] ss:$16 sps:$4 sm:$0xff]   ;;  %v822_v16 = vld [vmem:[#allocation2 + $0x33] sm:$0xff] }
  0xf7   :  { %10648 = vmatmul.mubr.msk.bf16.gmra.mrb[4].mxu1 %vm208_vm1, %v240_v30  ;;  %v11816_v11 = vld [vmem:[#allocation8 + $0x120] ss:$16 sps:$4 sm:$0xff]   ;;  %v11810_v12 = vld [vmem:[#allocation8 + $0xe8] ss:$16 sps:$4 sm:$0xff]   ;;  %v824_v13 = vpack.c.bf16 %v820_v9, %v819_v8  ;;  %v11824_v24 = vld [vmem:[#allocation8 + $0x12c] ss:$16 sps:$4 sm:$0xff]  }
  0xf8   :  { %394 = vmatprep.mubr.bf16.mxu1 %v15122_v0  ;;  %v821_v15 = vld [vmem:[#allocation2 + $0x2b] sm:$0xff]  ;;  %v1036_v22 = vld [vmem:[#allocation2 + $0x14] sm:$0xff]  ;;  %vm14365_vm0 = vmor %vm4564_vm15, %vm2844_vm4 }
  0xf9   :  { %v825_v17 = vpack.c.bf16 %v822_v16, %v821_v15  ;;  %v1034_v18 = vld [vmem:[#allocation2 + $0x4] sm:$0xff]  ;;  %v1035_v19 = vld [vmem:[#allocation2 + $0xc] sm:$0xff]  ;;  %v1039_v28 = vld [vmem:[#allocation2 + $0x34] sm:$0xff] }
  0xfa   :  { %10660 = vmatmul.mubr.msk.bf16.vlgmr.msra.gmra.mrb[0].mxu0 %vm208_vm1, %v221_v33  ;;  %v1037_v23 = vld [vmem:[#allocation2 + $0x24] sm:$0xff]  ;;  %v1038_v27 = vld [vmem:[#allocation2 + $0x2c] sm:$0xff] }
  0xfb   :  { %516 = vmatprep.mubr.bf16.mxu0 %v15122_v0  ;;  %668 = vmatpush1.bf16.msra.mxu0 %v11789_v34  ;;  %v11822_v25 = vld [vmem:[#allocation8 + $0x128] ss:$16 sps:$4 sm:$0xff]   ;;  %v1041_v26 = vpack.c.bf16 %v1037_v23, %v1036_v22  ;;  %v1042_v29 = vpack.c.bf16 %v1039_v28, %v1038_v27  ;;  %v11828_v37 = vld [vmem:[#allocation11 + $0x208] ss:$16 sps:$4 sm:$0xff]  }
  0xfc   :  { %669 = vmatprep.subr.bf16.mxu0 %v11794_v35  ;;  %v11827_v34 = vld [vmem:[#allocation11 + $0x204] ss:$16 sps:$4 sm:$0xff]   ;;  %v11830_v35 = vld [vmem:[#allocation11 + $0x20c] ss:$16 sps:$4 sm:$0xff]   ;;  %v11834_v45 = vld [vmem:[#allocation11 + $0x228] ss:$16 sps:$4 sm:$0xff]  }
  0xff   :  { %10649 = vmatmul.mubr.msk.bf16.vlgmr.msra.gmra.mrb[8].mxu1 %vm208_vm1, %v238_v20  ;;  %670 = vmatpush1.bf16.msra.mxu0 %v11792_v40  ;;  %v1040_v20 = vpack.c.bf16 %v1035_v19, %v1034_v18 }
 0x100   :  { %538 = vmatpush1.bf16.msra.mxu1 %v11783_v36  ;;  %404 = vmatprep.mubr.bf16.mxu1 %v15122_v0  ;;  %v11825_v36 = vld [vmem:[#allocation11 + $0x200] ss:$16 sps:$4 sm:$0xff]  }
 0x101   :  { %539 = vmatprep.subr.bf16.mxu1 %v11788_v39  ;;  %884 = vmatprep.subr.bf16.mxu0 %v11803_v41 }
 0x102   :  { %10661 = vmatmul.mubr.msk.bf16.gmra.mrb[4].mxu0 %vm208_vm1, %v222_v42 }
 0x103   :  { %526 = vmatprep.mubr.bf16.mxu0 %v15122_v0 }
 0x104   :  { %540 = vmatpush1.bf16.msra.mxu1 %v11786_v43  ;;  %v11836_v43 = vld [vmem:[#allocation11 + $0x22c] ss:$16 sps:$4 sm:$0xff]  }
 0x105   :  { %730 = vmatprep.subr.bf16.mxu1 %v11797_v44  ;;  %v11831_v44 = vld [vmem:[#allocation11 + $0x220] ss:$16 sps:$4 sm:$0xff]  }
 0x107   :  { %10650 = vmatmul.mubr.msk.bf16.gmra.mrb[12].mxu1 %vm208_vm1, %v239_v21  ;;  %v11819_v21 = vld [vmem:[#allocation8 + $0x108] ss:$16 sps:$4 sm:$0xff]  }
 0x108   :  { %414 = vmatprep.mubr.bf16.mxu1 %v15122_v0 }
 0x10a   :  { %10662 = vmatmul.mubr.msk.bf16.gmra.mrb[8].mxu0 %vm208_vm1, %v223_v47 }
 0x10b   :  { %699 = vmatprep.mubr.bf16.mxu0 %v15122_v0 }
 0x10f   :  { %10651 = vmatmul.mubr.msk.bf16.gmra.mrb[16].mxu1 %vm208_vm1, %v240_v30 }
 0x110   :  { %569 = vmatprep.mubr.bf16.mxu1 %v15122_v0 }
 0x112   :  { %10674 = vmatmul.mubr.msk.bf16.vlgmr.msra.gmra.mrb[0].mxu0 %vm208_vm1, %v606_v51 }
 0x113   :  { %709 = vmatprep.mubr.bf16.mxu0 %v15122_v0  ;;  %885 = vmatpush1.bf16.msra.mxu0 %v11801_v50  ;;  %v13581_v50 = vld [vmem:[#allocation10] sm:$0xf] }
 0x114   :  { %886 = vmatprep.subr.bf16.mxu0 %v11806_v52 }
 0x117   :  { %10663 = vmatmul.mubr.msk.bf16.vlgmr.msra.gmra.mrb[8].mxu1 %vm208_vm1, %v221_v33  ;;  %887 = vmatpush1.bf16.msra.mxu0 %v11804_v57  ;;  %v11842_v57 = vld [vmem:[#allocation11 + $0x24c] ss:$16 sps:$4 sm:$0xff]  }
 0x118   :  { %731 = vmatpush1.bf16.msra.mxu1 %v11795_v53  ;;  %579 = vmatprep.mubr.bf16.mxu1 %v15122_v0 }
 0x119   :  { %732 = vmatprep.subr.bf16.mxu1 %v11800_v56  ;;  %1101 = vmatprep.subr.bf16.mxu0 %v11815_v58  ;;  %v11839_v56 = vld [vmem:[#allocation11 + $0x244] ss:$16 sps:$4 sm:$0xff]  }
 0x11a   :  { %10675 = vmatmul.mubr.msk.bf16.gmra.mrb[4].mxu0 %vm208_vm1, %v607_v60 }
 0x11b   :  { %719 = vmatprep.mubr.bf16.mxu0 %v15122_v0 }
 0x11c   :  { %733 = vmatpush1.bf16.msra.mxu1 %v11798_v59 }
 0x11d   :  { %947 = vmatprep.subr.bf16.mxu1 %v11809_v61  ;;  %v11840_v61 = vld [vmem:[#allocation11 + $0x248] ss:$16 sps:$4 sm:$0xff]  }
 0x11f   :  { %10664 = vmatmul.mubr.msk.bf16.gmra.mrb[12].mxu1 %vm208_vm1, %v222_v42  ;;  %v11833_v42 = vld [vmem:[#allocation11 + $0x224] ss:$16 sps:$4 sm:$0xff]  }
 0x120   :  { %589 = vmatprep.mubr.bf16.mxu1 %v15122_v0 }
 0x122   :  { %10676 = vmatmul.mubr.msk.bf16.gmra.mrb[8].mxu0 %vm208_vm1, %v608_v1 }
 0x123   :  { %916 = vmatprep.mubr.bf16.mxu0 %v15122_v0 }
 0x127   :  { %10665 = vmatmul.mubr.msk.bf16.gmra.mrb[16].mxu1 %vm208_vm1, %v223_v47  ;;  %v13573_v47 = vshrl.u32 %v1253_v46, 7 }
 0x128   :  { %762 = vmatprep.mubr.bf16.mxu1 %v15122_v0 }
 0x129   :  { %v13576_v48 = vsub.s32 0, %v13573_v47  ;;  %v13579_v49 = vsub.s32 1, %v13573_v47 }
 0x12a   :  { %10688 = vmatmul.mubr.msk.bf16.vlgmr.msra.gmra.mrb[0].mxu0 %vm208_vm1, %v823_v5 }
 0x12b   :  { %926 = vmatprep.mubr.bf16.mxu0 %v15122_v0  ;;  %1102 = vmatpush1.bf16.msra.mxu0 %v11813_v4  ;;  %v1260_v52 = vrot.slane %v13581_v50, %v13579_v49 }
 0x12c   :  { %1103 = vmatprep.subr.bf16.mxu0 %v11818_v6 }
 0x12f   :  { %10677 = vmatmul.mubr.msk.bf16.vlgmr.msra.gmra.mrb[8].mxu1 %vm208_vm1, %v606_v51  ;;  %1104 = vmatpush1.bf16.msra.mxu0 %v11816_v11  ;;  %v1256_v51 = vrot.slane %v13581_v50, %v13576_v48 }
 0x130   :  { %948 = vmatpush1.bf16.msra.mxu1 %v11807_v7  ;;  %772 = vmatprep.mubr.bf16.mxu1 %v15122_v0 }
 0x131   :  { %949 = vmatprep.subr.bf16.mxu1 %v11812_v10  ;;  %3455 = vmatprep.subr.bf16.mxu0 %v11827_v34 }
 0x132   :  { %10689 = vmatmul.mubr.msk.bf16.gmra.mrb[4].mxu0 %vm208_vm1, %v824_v13 }
 0x133   :  { %936 = vmatprep.mubr.bf16.mxu0 %v15122_v0 }
 0x134   :  { %950 = vmatpush1.bf16.msra.mxu1 %v11810_v12 }
 0x135   :  { %1164 = vmatprep.subr.bf16.mxu1 %v11821_v14 }
 0x137   :  { %10678 = vmatmul.mubr.msk.bf16.gmra.mrb[12].mxu1 %vm208_vm1, %v607_v60  ;;  %v11837_v60 = vld [vmem:[#allocation11 + $0x240] ss:$16 sps:$4 sm:$0xff]  }
 0x138   :  { %782 = vmatprep.mubr.bf16.mxu1 %v15122_v0 }
 0x13a   :  { %10690 = vmatmul.mubr.msk.bf16.gmra.mrb[8].mxu0 %vm208_vm1, %v825_v17 }
 0x13b   :  { %1133 = vmatprep.mubr.bf16.mxu0 %v15122_v0 }
 0x13f   :  { %10679 = vmatmul.mubr.msk.bf16.gmra.mrb[16].mxu1 %vm208_vm1, %v608_v1 }
 0x140   :  { %979 = vmatprep.mubr.bf16.mxu1 %v15122_v0 }
 0x142   :  { %10702 = vmatmul.mubr.msk.bf16.vlgmr.msra.gmra.mrb[0].mxu0 %vm208_vm1, %v1040_v20 }
 0x143   :  { %1143 = vmatprep.mubr.bf16.mxu0 %v15122_v0  ;;  %3456 = vmatpush1.bf16.msra.mxu0 %v11825_v36 }
 0x144   :  { %3457 = vmatprep.subr.bf16.mxu0 %v11833_v42  ;;  %v13269_v42 = vmov 1983009808  }
 0x147   :  { %10691 = vmatmul.mubr.msk.bf16.vlgmr.msra.gmra.mrb[8].mxu1 %vm208_vm1, %v823_v5  ;;  %3458 = vmatpush1.bf16.msra.mxu0 %v11831_v44 }
 0x148   :  { %1165 = vmatpush1.bf16.msra.mxu1 %v11819_v21  ;;  %989 = vmatprep.mubr.bf16.mxu1 %v15122_v0 }
 0x149   :  { %1166 = vmatprep.subr.bf16.mxu1 %v11824_v24  ;;  %3459 = vmatprep.subr.bf16.mxu0 %v11839_v56 }
 0x14a   :  { %10703 = vmatmul.mubr.msk.bf16.gmra.mrb[4].mxu0 %vm208_vm1, %v1041_v26 }
 0x14b   :  { %1153 = vmatprep.mubr.bf16.mxu0 %v15122_v0  ;;  %3460 = vmatpush1.bf16.msra.mxu0 %v11837_v60 }
 0x14c   :  { %1167 = vmatpush1.bf16.msra.mxu1 %v11822_v25 }
 0x14d   :  { %3506 = vmatprep.subr.bf16.mxu1 %v11830_v35 }
 0x14f   :  { %10692 = vmatmul.mubr.msk.bf16.gmra.mrb[12].mxu1 %vm208_vm1, %v824_v13 }
 0x150   :  { %999 = vmatprep.mubr.bf16.mxu1 %v15122_v0 }
 0x152   :  { %10704 = vmatmul.mubr.msk.bf16.gmra.mrb[8].mxu0 %vm208_vm1, %v1042_v29 }
 0x157   :  { %10693 = vmatmul.mubr.msk.bf16.gmra.mrb[16].mxu1 %vm208_vm1, %v825_v17 }
 0x158   :  { %1196 = vmatprep.mubr.bf16.mxu1 %v15122_v0 }
 0x15f   :  { %10705 = vmatmul.mubr.msk.bf16.vlgmr.msra.gmra.mrb[8].mxu1 %vm208_vm1, %v1040_v20 }
 0x160   :  { %1206 = vmatprep.mubr.bf16.mxu1 %v15122_v0  ;;  %3507 = vmatpush1.bf16.msra.mxu1 %v11828_v37 }
 0x161   :  { %3508 = vmatprep.subr.bf16.mxu1 %v11836_v43  ;;  %v1350_v43 = vunpack.c.l.s4 %v13269_v42 }
 0x164   :  { %3509 = vmatpush1.bf16.msra.mxu1 %v11834_v45 }
 0x165   :  { %3510 = vmatprep.subr.bf16.mxu1 %v11842_v57 }
 0x167   :  { %10706 = vmatmul.mubr.msk.bf16.gmra.mrb[12].mxu1 %vm208_vm1, %v1041_v26 }
 0x168   :  { %1216 = vmatprep.mubr.bf16.mxu1 %v15122_v0  ;;  %3511 = vmatpush1.bf16.msra.mxu1 %v11840_v61 }
 0x16f   :  { %10707 = vmatmul.mubr.msk.bf16.gmra.mrb[16].mxu1 %vm208_vm1, %v1042_v29  ;;  %vm6659_vm1 = vmor %vm4564_vm15, %vm2859_vm9 }
 0x1c2   :  { %v343_v30 = vpop.f32.mrb[0].mxu1 }
 0x1c3   :  { %v345_v31 = vpop.f32.mrb[1].mxu1 }
 0x1c4   :  { %v347_v32 = vpop.f32.mrb[2].mxu1 }
 0x1c5   :  { %v349_v33 = vpop.f32.mrb[3].mxu1 }
 0x1ca   :  { %v353_v38 = vpop.f32.mrb[4].mxu1 }
 0x1cb   :  { %v13567_v39 = vpop.f32.mrb[5].mxu1 }
 0x1cc   :  { %v13569_v40 = vpop.f32.mrb[6].mxu1 }
 0x1cd   :  { %v13571_v41 = vpop.f32.mrb[7].mxu1 }
 0x215   :  { %v1135_v53 = vpop.f32.mrb[0].mxu0 }
 0x216   :  { %v1273_v54 = vadd.f32 %v1256_v51, %v1135_v53  ;;  %v1137_v55 = vpop.f32.mrb[1].mxu0 }
 0x217   :  { %v1274_v58 = vadd.f32 %v1260_v52, %v1137_v55  ;;  %v1139_v59 = vpop.f32.mrb[2].mxu0  ;;  %v13602_v55 = vsub.s32 3, %v13573_v47 }
 0x218   :  { %v1297_v62 = vmax.f32 %v1273_v54, 0.0  ;;  %v1277_v63 = vadd.f32 %v1256_v51, %v1139_v59  ;;  %v1141_v1 = vpop.f32.mrb[3].mxu0  ;;  %v13599_v54 = vsub.s32 2, %v13573_v47 }
 0x219   :  { %v1298_v2 = vmax.f32 %v1274_v58, 0.0  ;;  %v1278_v3 = vadd.f32 %v1260_v52, %v1141_v1  ;;  %15125 = vst [vmem:[#allocation34_spill] sm:$0xff] %v13602_v55  ;;  %v1351_v58 = vunpack.c.0.s8 %v1350_v43 }
 0x21a   :  { %v1301_v4 = vmax.f32 %v1277_v63, 0.0 }
 0x21b   :  { %v13587_v5 = vcombine.low %v1297_v62, %v1298_v2  ;;  %v13589_v6 = vcombine.high %v1297_v62, %v1298_v2  ;;  %v1302_v7 = vmax.f32 %v1278_v3, 0.0  ;;  %v13619_v62 = vsub.s32 %v1351_v58, %v13573_v47 }
 0x21d   :  { %v13591_v8 = vcombine.low %v1301_v4, %v1302_v7  ;;  %v13593_v9 = vcombine.high %v1301_v4, %v1302_v7  ;;  %v1145_v10 = vpop.f32.mrb[4].mxu0  ;;  %v1362_v47 = vrot.slane %v13589_v6, %v13619_v62 }
 0x21e   :  { %v11583_v11 = vadd.f32 %v1145_v10, %v343_v30  ;;  %v1147_v12 = vpop.f32.mrb[5].mxu0 }
 0x21f   :  { %v11584_v13 = vadd.f32 %v1147_v12, %v345_v31  ;;  %v1149_v14 = vpop.f32.mrb[6].mxu0 }
 0x220   :  { %v1281_v15 = vadd.f32 %v11583_v11, %v1256_v51  ;;  %v11585_v16 = vadd.f32 %v1149_v14, %v347_v32  ;;  %v1151_v17 = vpop.f32.mrb[7].mxu0 }
 0x221   :  { %v1282_v18 = vadd.f32 %v11584_v13, %v1260_v52  ;;  %v11586_v19 = vadd.f32 %v1151_v17, %v349_v33  ;;  %v13631_v17 = vrot.slane %v13591_v8, %v13619_v62 }
 0x222   :  { %v1305_v20 = vmax.f32 %v1281_v15, 0.0  ;;  %v1285_v21 = vadd.f32 %v11585_v16, %v1256_v51 }
 0x223   :  { %v1306_v22 = vmax.f32 %v1282_v18, 0.0  ;;  %v1286_v23 = vadd.f32 %v11586_v19, %v1260_v52  ;;  %v13635_v18 = vrot.slane %v13593_v9, %v13619_v62 }
 0x224   :  { %v1309_v24 = vmax.f32 %v1285_v21, 0.0 }
 0x225   :  { %v1417_v25 = vcombine.low %v1305_v20, %v1306_v22  ;;  %v1418_v26 = vcombine.high %v1305_v20, %v1306_v22  ;;  %v1310_v27 = vmax.f32 %v1286_v23, 0.0  ;;  %v1155_v28 = vpop.f32.mrb[8].mxu0 }
 0x226   :  { %v11587_v29 = vadd.f32 %v1155_v28, %v353_v38  ;;  %v1157_v34 = vpop.f32.mrb[9].mxu0 }
 0x227   :  { %v1453_v30 = vcombine.low %v1309_v24, %v1310_v27  ;;  %v1454_v35 = vcombine.high %v1309_v24, %v1310_v27  ;;  %v1159_v31 = vpop.f32.mrb[10].mxu0  ;;  %v11588_v32 = vadd.f32 %v1157_v34, %v13567_v39  ;;  %v13638_v19 = vrot.slane %v1417_v25, %v13619_v62 }
 0x228   :  { %v1289_v36 = vadd.f32 %v11587_v29, %v1256_v51  ;;  %v11589_v37 = vadd.f32 %v1159_v31, %v13569_v40  ;;  %v1161_v33 = vpop.f32.mrb[11].mxu0 }
 0x229   :  { %v11590_v44 = vadd.f32 %v1161_v33, %v13571_v41  ;;  %v1290_v46 = vadd.f32 %v11588_v32, %v1260_v52  ;;  %v13608_v41 = vrot.slane %v13581_v50, %v13599_v54  ;;  %v13650_v23 = vrot.slane %v1453_v30, %v13619_v62 }
 0x22a   :  { %v1313_v45 = vmax.f32 %v1289_v36, 0.0  ;;  %v1293_v53 = vadd.f32 %v11589_v37, %v1256_v51  ;;  %v13653_v9 = vrot.slane %v1454_v35, %v13619_v62 }
 0x22b   :  { %v1294_v38 = vadd.f32 %v11590_v44, %v1260_v52  ;;  %v1314_v56 = vmax.f32 %v1290_v46, 0.0  ;;  %v13616_v52 = vrot.slane %v13581_v50, %v13602_v55  ;;  %v1355_v50 = vrot.slane %v13587_v5, %v13619_v62 }
 0x22c   :  { %v1317_v57 = vmax.f32 %v1293_v53, 0.0  ;;  %v13641_v5 = vrot.slane %v1418_v26, %v13619_v62 }
 0x22d   :  { %v1318_v39 = vmax.f32 %v1294_v38, 0.0  ;;  %v1489_v40 = vcombine.low %v1313_v45, %v1314_v56  ;;  %v13604_v59 = vcombine.high %v1313_v45, %v1314_v56 }
 0x22f   :  { %v13610_v60 = vcombine.low %v1317_v57, %v1318_v39  ;;  %v13612_v51 = vcombine.high %v1317_v57, %v1318_v39  ;;  %v13656_v24 = vrot.slane %v1489_v40, %v13619_v62  ;;  %v11845_v40 = vld [vmem:[#allocation11 + $0x264] ss:$16 sps:$4 sm:$0xff]  }
 0x230   :  { %3461 = vmatprep.subr.bf16.mxu0 %v11845_v40 }
 0x232   :  { %v1198_v61 = vpop.f32.mrb[8].mxu1 }
 0x233   :  { %v1275_v63 = vadd.f32 %v13608_v41, %v1198_v61  ;;  %v1200_v1 = vpop.f32.mrb[9].mxu1  ;;  %v11848_v61 = vld [vmem:[#allocation11 + $0x26c] ss:$16 sps:$4 sm:$0xff]  }
 0x234   :  { %v1276_v2 = vadd.f32 %v13616_v52, %v1200_v1  ;;  %v1202_v3 = vpop.f32.mrb[10].mxu1  ;;  %3512 = vmatprep.subr.bf16.mxu1 %v11848_v61 }
 0x235   :  { %v1299_v4 = vmax.f32 %v1275_v63, 0.0  ;;  %v1279_v7 = vadd.f32 %v13608_v41, %v1202_v3  ;;  %v1204_v10 = vpop.f32.mrb[11].mxu1 }
 0x236   :  { %v1300_v11 = vmax.f32 %v1276_v2, 0.0  ;;  %v1280_v12 = vadd.f32 %v13616_v52, %v1204_v10 }
 0x237   :  { %v1303_v13 = vmax.f32 %v1279_v7, 0.0  ;;  %v11846_v7 = vld [vmem:[#allocation11 + $0x268] ss:$16 sps:$4 sm:$0xff]  }
 0x238   :  { %v1347_v14 = vcombine.low %v1299_v4, %v1300_v11  ;;  %v1348_v15 = vcombine.high %v1299_v4, %v1300_v11  ;;  %v1304_v16 = vmax.f32 %v1280_v12, 0.0  ;;  %v11843_v4 = vld [vmem:[#allocation11 + $0x260] ss:$16 sps:$4 sm:$0xff]   ;;  %3513 = vmatpush1.bf16.msra.mxu1 %v11846_v7 }
 0x239   :  { %3462 = vmatpush1.bf16.msra.mxu0 %v11843_v4 }
 0x23a   :  { %v1369_v20 = vrot.slane %v1347_v14, %v13619_v62  ;;  %v1376_v6 = vrot.slane %v1348_v15, %v13619_v62  ;;  %v13645_v21 = vcombine.low %v1303_v13, %v1304_v16  ;;  %v13647_v22 = vcombine.high %v1303_v13, %v1304_v16  ;;  %v1208_v8 = vpop.f32.mrb[12].mxu1 }
 0x23b   :  { %v13659_v25 = vadd.f32 %v13608_v41, %v1208_v8  ;;  %v13661_v26 = vpop.f32.mrb[13].mxu1 }
 0x23c   :  { %v1377_v27 = vcombine.low %v1355_v50, %v1369_v20  ;;  %v1378_v28 = vcombine.high %v1355_v50, %v1369_v20  ;;  %v1379_v29 = vcombine.low %v1362_v47, %v1376_v6  ;;  %v1380_v34 = vcombine.high %v1362_v47, %v1376_v6  ;;  %v13663_v31 = vpop.f32.mrb[14].mxu1 }
 0x23d   :  { %v10708_v36 = vcombine.low %v1369_v20, %v1369_v20  ;;  %v10709_v30 = vcombine.high %v1369_v20, %v1369_v20  ;;  %v10710_v32 = vcombine.low %v1376_v6, %v1376_v6  ;;  %v10711_v37 = vcombine.high %v1376_v6, %v1376_v6  ;;  %v13665_v35 = vpop.f32.mrb[15].mxu1 }
 0x23e   :  { %v1568_v33 = vrot.slane %v1377_v27, %v13619_v62  ;;  %v1585_v42 = vrot.slane %v1378_v28, %v13619_v62  ;;  %v13670_v43 = vrot.slane %v1379_v29, %v13619_v62  ;;  %v13673_v44 = vrot.slane %v1380_v34, %v13619_v62 }
 0x23f   :  { %v1575_v45 = vrot.slane %v10708_v36, %v13619_v62  ;;  %v1592_v46 = vrot.slane %v10709_v30, %v13619_v62  ;;  %v13678_v53 = vrot.slane %v10710_v32, %v13619_v62  ;;  %v13681_v38 = vrot.slane %v10711_v37, %v13619_v62 }
 0x240   :  { %v1576_v56 = vcombine.high %v1568_v33, %v1568_v33  ;;  %v1593_v57 = vcombine.high %v1585_v42, %v1585_v42  ;;  %v1610_v39 = vcombine.high %v13670_v43, %v13670_v43  ;;  %v2066_v10 = vsel %vm2065_vm2, %v1568_v33, -inf }
 0x241   :  { %v1577_v63 = vcombine.high %v1575_v45, %v1575_v45  ;;  %v1594_v1 = vcombine.high %v1592_v46, %v1592_v46  ;;  %v1611_v2 = vcombine.high %v13678_v53, %v13678_v53  ;;  %v2080_v12 = vsel %vm2065_vm2, %v1575_v45, -inf }
 0x242   :  { %v2073_v11 = vsel %vm2065_vm2, %v1576_v56, -inf  ;;  %v2094_v50 = vsel %vm2065_vm2, %v1585_v42, -inf  ;;  %v2067_v13 = vrot.slane %v2066_v10, 4  ;;  %v2081_v14 = vrot.slane %v2080_v12, 4  ;;  %v13698_v36 = vpop.f32.mrb[16].mxu1 }
 0x243   :  { %v2074_v47 = vrot.slane %v2073_v11, 4  ;;  %v2087_v15 = vsel %vm2065_vm2, %v1577_v63, -inf  ;;  %v2095_v20 = vrot.slane %v2094_v50, 4  ;;  %v2101_v6 = vsel %vm2065_vm2, %v1593_v57, -inf  ;;  %v13701_v42 = vpop.f32.mrb[17].mxu1 }
 0x244   :  { %v2088_v16 = vrot.slane %v2087_v15, 4  ;;  %v2108_v8 = vsel %vm2065_vm2, %v1592_v46, -inf  ;;  %v2068_v27 = vmax.f32 %v2066_v10, %v2067_v13  ;;  %v2082_v29 = vmax.f32 %v2080_v12, %v2081_v14 }
 0x245   :  { %v2075_v28 = vmax.f32 %v2073_v11, %v2074_v47  ;;  %v2102_v34 = vrot.slane %v2101_v6, 4  ;;  %v2096_v32 = vmax.f32 %v2094_v50, %v2095_v20  ;;  %v2109_v37 = vrot.slane %v2108_v8, 4 }
 0x246   :  { %v2089_v30 = vmax.f32 %v2087_v15, %v2088_v16  ;;  %v2115_v33 = vsel %vm2065_vm2, %v1594_v1, -inf  ;;  %v2069_v45 = vrot.slane %v2068_v27, 2  ;;  %v2083_v40 = vrot.slane %v2082_v29, 2 }
 0x247   :  { %v2076_v56 = vrot.slane %v2075_v28, 2  ;;  %v2103_v61 = vmax.f32 %v2101_v6, %v2102_v34  ;;  %v2097_v63 = vrot.slane %v2096_v32, 2  ;;  %v2110_v46 = vmax.f32 %v2108_v8, %v2109_v37 }
 0x248   :  { %v2090_v57 = vrot.slane %v2089_v30, 2  ;;  %v2116_v4 = vrot.slane %v2115_v33, 4  ;;  %v2070_v7 = vmax.f32 %v2068_v27, %v2069_v45  ;;  %v2084_v11 = vmax.f32 %v2082_v29, %v2083_v40 }
 0x249   :  { %v2077_v10 = vmax.f32 %v2075_v28, %v2076_v56  ;;  %v2104_v12 = vrot.slane %v2103_v61, 2  ;;  %v2098_v47 = vmax.f32 %v2096_v32, %v2097_v63  ;;  %v2111_v50 = vrot.slane %v2110_v46, 2 }
 0x24a   :  { %v2091_v13 = vmax.f32 %v2089_v30, %v2090_v57  ;;  %v2117_v14 = vmax.f32 %v2115_v33, %v2116_v4  ;;  %v2071_v15 = vrot.slane %v2070_v7, 1  ;;  %v2085_v16 = vrot.slane %v2084_v11, 1 }
 0x24b   :  { %v2078_v1 = vrot.slane %v2077_v10, 1  ;;  %v2105_v20 = vmax.f32 %v2103_v61, %v2104_v12  ;;  %v2099_v3 = vrot.slane %v2098_v47, 1  ;;  %v2112_v58 = vmax.f32 %v2110_v46, %v2111_v50 }
 0x24c   :  { %v2092_v0 = vrot.slane %v2091_v13, 1  ;;  %v2118_v6 = vrot.slane %v2117_v14, 2  ;;  %v13703_v34 = vmax.f32 %v2070_v7, %v2071_v15  ;;  %v13707_v27 = vmax.f32 %v2084_v11, %v2085_v16 }
 0x24d   :  { %v13705_v8 = vmax.f32 %v2077_v10, %v2078_v1  ;;  %v2106_v28 = vrot.slane %v2105_v20, 1  ;;  %v13711_v30 = vmax.f32 %v2098_v47, %v2099_v3  ;;  %v2113_v32 = vrot.slane %v2112_v58, 1 }
 0x24e   :  { %v13709_v29 = vmax.f32 %v2091_v13, %v2092_v0  ;;  %v2119_v37 = vmax.f32 %v2117_v14, %v2118_v6  ;;  %v2122_v45 = vsel %vm2065_vm2, %v13670_v43, -inf  ;;  %v2129_v56 = vsel %vm2065_vm2, %v1610_v39, -inf }
 0x24f   :  { %v13713_v33 = vmax.f32 %v2105_v20, %v2106_v28  ;;  %v2136_v40 = vsel %vm2065_vm2, %v13678_v53, -inf  ;;  %v13723_v61 = vmax.f32 %v2112_v58, %v2113_v32  ;;  %v2123_v3 = vrot.slane %v2122_v45, 4 }
 0x250   :  { %v2120_v0 = vrot.slane %v2119_v37, 1  ;;  %v2130_v57 = vrot.slane %v2129_v56, 4  ;;  %v2137_v63 = vrot.slane %v2136_v40, 4  ;;  %v2143_v46 = vsel %vm2065_vm2, %v1611_v2, -inf }
 0x251   :  { %v2150_v4 = vsel %vm2065_vm2, %v13673_v44, -inf  ;;  %v15126_v43 = vcombine.high %v13673_v44, %v13673_v44  ;;  %v2124_v58 = vmax.f32 %v2122_v45, %v2123_v3  ;;  %v2144_v11 = vrot.slane %v2143_v46, 4 }
 0x252   :  { %v13735_v7 = vmax.f32 %v2119_v37, %v2120_v0  ;;  %v2131_v10 = vmax.f32 %v2129_v56, %v2130_v57  ;;  %v2138_v12 = vmax.f32 %v2136_v40, %v2137_v63  ;;  %v2151_v13 = vrot.slane %v2150_v4, 4 }
 0x253   :  { %v2157_v39 = vsel %vm2065_vm2, %v15126_v43, -inf  ;;  %v2164_v53 = vsel %vm2065_vm2, %v13681_v38, -inf  ;;  %v2125_v2 = vrot.slane %v2124_v58, 2  ;;  %v2145_v14 = vmax.f32 %v2143_v46, %v2144_v11 }
 0x254   :  { %v2158_v47 = vrot.slane %v2157_v39, 4  ;;  %v2132_v50 = vrot.slane %v2131_v10, 2  ;;  %v2165_v15 = vrot.slane %v2164_v53, 4  ;;  %v2139_v1 = vrot.slane %v2138_v12, 2 }
 0x255   :  { %v2152_v44 = vmax.f32 %v2150_v4, %v2151_v13  ;;  %v15127_v20 = vcombine.high %v13681_v38, %v13681_v38  ;;  %v2126_v28 = vmax.f32 %v2124_v58, %v2125_v2  ;;  %v2146_v37 = vrot.slane %v2145_v14, 2 }
 0x256   :  { %v2159_v16 = vmax.f32 %v2157_v39, %v2158_v47  ;;  %v2133_v32 = vmax.f32 %v2131_v10, %v2132_v50  ;;  %v2166_v45 = vmax.f32 %v2164_v53, %v2165_v15  ;;  %v2140_v56 = vmax.f32 %v2138_v12, %v2139_v1 }
 0x257   :  { %v2171_v6 = vsel %vm2065_vm2, %v15127_v20, -inf  ;;  %v2153_v40 = vrot.slane %v2152_v44, 2  ;;  %v2127_v57 = vrot.slane %v2126_v28, 1  ;;  %v2147_v46 = vmax.f32 %v2145_v14, %v2146_v37 }
 0x258   :  { %v2160_v0 = vrot.slane %v2159_v16, 2  ;;  %v2172_v3 = vrot.slane %v2171_v6, 4  ;;  %v2134_v63 = vrot.slane %v2133_v32, 1  ;;  %v2167_v4 = vrot.slane %v2166_v45, 2 }
 0x259   :  { %v2141_v43 = vrot.slane %v2140_v56, 1  ;;  %v2154_v39 = vmax.f32 %v2152_v44, %v2153_v40  ;;  %v2128_v13 = vmax.f32 %v2126_v28, %v2127_v57  ;;  %v2148_v20 = vrot.slane %v2147_v46, 1 }
 0x25a   :  { %v2161_v11 = vmax.f32 %v2159_v16, %v2160_v0  ;;  %v2173_v38 = vmax.f32 %v2171_v6, %v2172_v3  ;;  %v2135_v47 = vmax.f32 %v2133_v32, %v2134_v63  ;;  %v2168_v58 = vmax.f32 %v2166_v45, %v2167_v4 }
 0x25b   :  { %v2142_v10 = vmax.f32 %v2140_v56, %v2141_v43  ;;  %v2155_v2 = vrot.slane %v2154_v39, 1  ;;  %v2149_v50 = vmax.f32 %v2147_v46, %v2148_v20  ;;  %v2738_v1 = vmax.f32 %v13703_v34, %v13707_v27 }
 0x25c   :  { %v2162_v53 = vrot.slane %v2161_v11, 1  ;;  %v2174_v12 = vrot.slane %v2173_v38, 2  ;;  %v2169_v15 = vrot.slane %v2168_v58, 1  ;;  %v2739_v14 = vmax.f32 %v13705_v8, %v13709_v29 }
 0x25d   :  { %v2156_v37 = vmax.f32 %v2154_v39, %v2155_v2  ;;  %v2740_v6 = vmax.f32 %v13711_v30, %v13723_v61  ;;  %v2741_v32 = vmax.f32 %v13713_v33, %v13735_v7  ;;  %v2742_v45 = vmax.f32 %v2128_v13, %v2142_v10  ;;  %v11854_v13 = vld [vmem:[#allocation11 + $0x28c] ss:$16 sps:$4 sm:$0xff]   ;;  %v11849_v10 = vld [vmem:[#allocation11 + $0x280] ss:$16 sps:$4 sm:$0xff]   ;;  %v11852_v2 = vld [vmem:[#allocation11 + $0x288] ss:$16 sps:$4 sm:$0xff]  }
 0x25e   :  { %v2163_v44 = vmax.f32 %v2161_v11, %v2162_v53  ;;  %v2175_v16 = vmax.f32 %v2173_v38, %v2174_v12  ;;  %v2170_v28 = vmax.f32 %v2168_v58, %v2169_v15  ;;  %v2743_v56 = vmax.f32 %v2135_v47, %v2149_v50  ;;  %v11851_v38 = vld [vmem:[#allocation11 + $0x284] ss:$16 sps:$4 sm:$0xff]   ;;  %3514 = vmatprep.subr.bf16.mxu1 %v11854_v13 }
 0x25f   :  { %v2843_v0 = vsel %vm2842_vm3, %v2740_v6, %v2738_v1  ;;  %v1405_v34 = vrot.slane %v13645_v21, %v13619_v62  ;;  %v1412_v8 = vrot.slane %v13647_v22, %v13619_v62  ;;  %v2852_v30 = vsel %vm2842_vm3, %v2741_v32, %v2739_v14  ;;  %3463 = vmatprep.subr.bf16.mxu0 %v11851_v38 }
 0x260   :  { %v2176_v40 = vrot.slane %v2175_v16, 1  ;;  %v2744_v27 = vmax.f32 %v2156_v37, %v2170_v28  ;;  %v2845_v29 = vsel %vm2844_vm4, %v2742_v45, %v2843_v0  ;;  %v2853_v33 = vsel %vm2844_vm4, %v2743_v56, %v2852_v30  ;;  %3464 = vmatpush1.bf16.msra.mxu0 %v11849_v10  ;;  %3515 = vmatpush1.bf16.msra.mxu1 %v11852_v2 }
 0x261   :  { %v1413_v7 = vcombine.low %v13631_v17, %v1405_v34  ;;  %v1414_v57 = vcombine.high %v13631_v17, %v1405_v34  ;;  %v1415_v21 = vcombine.low %v13635_v18, %v1412_v8  ;;  %v1416_v22 = vcombine.high %v13635_v18, %v1412_v8 }
 0x262   :  { %v2177_v3 = vmax.f32 %v2175_v16, %v2176_v40  ;;  %v13763_v63 = vsel %vm2846_vm5, %v2744_v27, %v2845_v29  ;;  %v10712_v46 = vcombine.low %v1405_v34, %v1405_v34  ;;  %v10713_v39 = vcombine.high %v1405_v34, %v1405_v34 }
 0x263   :  { %v1636_v43 = vrot.slane %v1413_v7, %v13619_v62  ;;  %v1653_v11 = vrot.slane %v1414_v57, %v13619_v62  ;;  %v10714_v20 = vcombine.low %v1412_v8, %v1412_v8  ;;  %v13771_v17 = vrot.slane %v1415_v21, %v13619_v62 }
 0x264   :  { %v2745_v4 = vmax.f32 %v2163_v44, %v2177_v3  ;;  %v1643_v47 = vrot.slane %v10712_v46, %v13619_v62  ;;  %v10715_v58 = vcombine.high %v1412_v8, %v1412_v8  ;;  %v1660_v12 = vrot.slane %v10713_v39, %v13619_v62  ;;  %v13785_v44 = vpop.f32.mrb[18].mxu1 }
 0x265   :  { %v1644_v53 = vcombine.high %v1636_v43, %v1636_v43  ;;  %v1661_v50 = vcombine.high %v1653_v11, %v1653_v11  ;;  %v13778_v1 = vrot.slane %v10714_v20, %v13619_v62  ;;  %v1678_v14 = vcombine.high %v13771_v17, %v13771_v17  ;;  %v13792_v45 = vpop.f32.mrb[19].mxu1 }
 0x266   :  { %v13774_v18 = vsel %vm2846_vm5, %v2745_v4, %v2853_v33  ;;  %v1645_v15 = vcombine.high %v1643_v47, %v1643_v47  ;;  %v13783_v37 = vrot.slane %v1416_v22, %v13619_v62  ;;  %v1662_v16 = vcombine.high %v1660_v12, %v1660_v12 }
 0x267   :  { %v13788_v6 = vrot.slane %v10715_v58, %v13619_v62  ;;  %v2178_v28 = vsel %vm2065_vm2, %v1636_v43, -inf  ;;  %v2185_v32 = vsel %vm2065_vm2, %v1644_v53, -inf  ;;  %v1679_v56 = vcombine.high %v13778_v1, %v13778_v1 }
 0x268   :  { %v2179_v0 = vrot.slane %v2178_v28, 4  ;;  %v2186_v34 = vrot.slane %v2185_v32, 4  ;;  %v2192_v27 = vsel %vm2065_vm2, %v1643_v47, -inf  ;;  %v2199_v29 = vsel %vm2065_vm2, %v1645_v15, -inf }
 0x269   :  { %v2206_v30 = vsel %vm2065_vm2, %v1653_v11, -inf  ;;  %v2193_v7 = vrot.slane %v2192_v27, 4  ;;  %v2200_v57 = vrot.slane %v2199_v29, 4  ;;  %v2213_v22 = vsel %vm2065_vm2, %v1661_v50, -inf }
 0x26a   :  { %v2180_v3 = vmax.f32 %v2178_v28, %v2179_v0  ;;  %v2187_v33 = vmax.f32 %v2185_v32, %v2186_v34  ;;  %v2207_v21 = vrot.slane %v2206_v30, 4  ;;  %v2220_v46 = vsel %vm2065_vm2, %v1660_v12, -inf }
 0x26b   :  { %v2227_v4 = vsel %vm2065_vm2, %v1662_v16, -inf  ;;  %v2194_v38 = vmax.f32 %v2192_v27, %v2193_v7  ;;  %v2201_v13 = vmax.f32 %v2199_v29, %v2200_v57  ;;  %v2214_v20 = vrot.slane %v2213_v22, 4 }
 0x26c   :  { %v2181_v43 = vrot.slane %v2180_v3, 2  ;;  %v2188_v39 = vrot.slane %v2187_v33, 2  ;;  %v2208_v47 = vmax.f32 %v2206_v30, %v2207_v21  ;;  %v2221_v58 = vrot.slane %v2220_v46, 4 }
 0x26d   :  { %v2228_v10 = vrot.slane %v2227_v4, 4  ;;  %v2195_v53 = vrot.slane %v2194_v38, 2  ;;  %v2202_v15 = vrot.slane %v2201_v13, 2  ;;  %v2215_v32 = vmax.f32 %v2213_v22, %v2214_v20 }
 0x26e   :  { %v2182_v11 = vmax.f32 %v2180_v3, %v2181_v43  ;;  %v2189_v2 = vmax.f32 %v2187_v33, %v2188_v39  ;;  %v2209_v28 = vrot.slane %v2208_v47, 2  ;;  %v2222_v0 = vmax.f32 %v2220_v46, %v2221_v58 }
 0x26f   :  { %v2229_v50 = vmax.f32 %v2227_v4, %v2228_v10  ;;  %v2196_v61 = vmax.f32 %v2194_v38, %v2195_v53  ;;  %v2203_v16 = vmax.f32 %v2201_v13, %v2202_v15  ;;  %v2216_v40 = vrot.slane %v2215_v32, 2 }
 0x270   :  { %v2183_v34 = vrot.slane %v2182_v11, 1  ;;  %v2190_v12 = vrot.slane %v2189_v2, 1  ;;  %v2210_v8 = vmax.f32 %v2208_v47, %v2209_v28  ;;  %v2223_v27 = vrot.slane %v2222_v0, 2 }
 0x271   :  { %v2230_v29 = vrot.slane %v2229_v50, 2  ;;  %v2197_v3 = vrot.slane %v2196_v61, 1  ;;  %v2204_v33 = vrot.slane %v2203_v16, 1  ;;  %v2217_v21 = vmax.f32 %v2215_v32, %v2216_v40 }
 0x272   :  { %v13806_v30 = vmax.f32 %v2182_v11, %v2183_v34  ;;  %v13808_v7 = vmax.f32 %v2189_v2, %v2190_v12  ;;  %v2211_v57 = vrot.slane %v2210_v8, 1  ;;  %v2224_v43 = vmax.f32 %v2222_v0, %v2223_v27 }
 0x273   :  { %v2231_v22 = vmax.f32 %v2229_v50, %v2230_v29  ;;  %v13810_v46 = vmax.f32 %v2196_v61, %v2197_v3  ;;  %v13812_v4 = vmax.f32 %v2203_v16, %v2204_v33  ;;  %v2234_v39 = vsel %vm2065_vm2, %v13771_v17, -inf }
 0x274   :  { %v2241_v38 = vsel %vm2065_vm2, %v1678_v14, -inf  ;;  %v13817_v13 = vmax.f32 %v2210_v8, %v2211_v57  ;;  %v2218_v47 = vrot.slane %v2217_v21, 1  ;;  %v2225_v20 = vrot.slane %v2224_v43, 1 }
 0x275   :  { %v2232_v58 = vrot.slane %v2231_v22, 1  ;;  %v2235_v10 = vrot.slane %v2234_v39, 4  ;;  %v2242_v11 = vrot.slane %v2241_v38, 4  ;;  %v2248_v40 = vsel %vm2065_vm2, %v13778_v1, -inf }
 0x276   :  { %v2255_v61 = vsel %vm2065_vm2, %v1679_v56, -inf  ;;  %v13822_v2 = vmax.f32 %v2217_v21, %v2218_v47  ;;  %v13824_v53 = vmax.f32 %v2224_v43, %v2225_v20  ;;  %v2249_v17 = vrot.slane %v2248_v40, 4 }
 0x277   :  { %v13826_v15 = vmax.f32 %v2231_v22, %v2232_v58  ;;  %v2236_v14 = vmax.f32 %v2234_v39, %v2235_v10  ;;  %v2243_v8 = vmax.f32 %v2241_v38, %v2242_v11  ;;  %v2256_v28 = vrot.slane %v2255_v61, 4 }
 0x278   :  { %v2262_v32 = vsel %vm2065_vm2, %v13783_v37, -inf  ;;  %v2250_v0 = vmax.f32 %v2248_v40, %v2249_v17  ;;  %v15128_v1 = vcombine.high %v13783_v37, %v13783_v37  ;;  %v2276_v34 = vsel %vm2065_vm2, %v13788_v6, -inf }
 0x279   :  { %v2263_v50 = vrot.slane %v2262_v32, 4  ;;  %v2237_v12 = vrot.slane %v2236_v14, 2  ;;  %v2244_v16 = vrot.slane %v2243_v8, 2  ;;  %v2257_v27 = vmax.f32 %v2255_v61, %v2256_v28 }
 0x27a   :  { %v2269_v56 = vsel %vm2065_vm2, %v15128_v1, -inf  ;;  %v2251_v3 = vrot.slane %v2250_v0, 2  ;;  %v2277_v57 = vrot.slane %v2276_v34, 4  ;;  %v15129_v21 = vcombine.high %v13788_v6, %v13788_v6 }
 0x27b   :  { %v2270_v29 = vrot.slane %v2269_v56, 4  ;;  %v2264_v33 = vmax.f32 %v2262_v32, %v2263_v50  ;;  %v2238_v37 = vmax.f32 %v2236_v14, %v2237_v12  ;;  %v2245_v22 = vmax.f32 %v2243_v8, %v2244_v16 }
 0x27c   :  { %v2283_v43 = vsel %vm2065_vm2, %v15129_v21, -inf  ;;  %v2258_v39 = vrot.slane %v2257_v27, 2  ;;  %v2252_v47 = vmax.f32 %v2250_v0, %v2251_v3  ;;  %v2278_v58 = vmax.f32 %v2276_v34, %v2277_v57 }
 0x27d   :  { %v2271_v38 = vmax.f32 %v2269_v56, %v2270_v29  ;;  %v2265_v20 = vrot.slane %v2264_v33, 2  ;;  %v2284_v10 = vrot.slane %v2283_v43, 4  ;;  %v2239_v11 = vrot.slane %v2238_v37, 1 }
 0x27e   :  { %v2246_v40 = vrot.slane %v2245_v22, 1  ;;  %v2259_v61 = vmax.f32 %v2257_v27, %v2258_v39  ;;  %v2253_v28 = vrot.slane %v2252_v47, 1  ;;  %v2279_v50 = vrot.slane %v2278_v58, 2 }
 0x27f   :  { %v2272_v17 = vrot.slane %v2271_v38, 2  ;;  %v2266_v32 = vmax.f32 %v2264_v33, %v2265_v20  ;;  %v2285_v6 = vmax.f32 %v2283_v43, %v2284_v10  ;;  %v2240_v1 = vmax.f32 %v2238_v37, %v2239_v11 }
 0x280   :  { %v2247_v21 = vmax.f32 %v2245_v22, %v2246_v40  ;;  %v2260_v55 = vrot.slane %v2259_v61, 1  ;;  %v2254_v8 = vmax.f32 %v2252_v47, %v2253_v28  ;;  %v2280_v56 = vmax.f32 %v2278_v58, %v2279_v50 }
 0x281   :  { %v2273_v14 = vmax.f32 %v2271_v38, %v2272_v17  ;;  %v2267_v12 = vrot.slane %v2266_v32, 1  ;;  %v2286_v0 = vrot.slane %v2285_v6, 2  ;;  %v2746_v29 = vmax.f32 %v13806_v30, %v13810_v46 }
 0x282   :  { %v2261_v16 = vmax.f32 %v2259_v61, %v2260_v55  ;;  %v2747_v27 = vmax.f32 %v13808_v7, %v13812_v4  ;;  %v2281_v33 = vrot.slane %v2280_v56, 1  ;;  %v2748_v43 = vmax.f32 %v13817_v13, %v13824_v53 }
 0x283   :  { %v2274_v34 = vrot.slane %v2273_v14, 1  ;;  %v2268_v3 = vmax.f32 %v2266_v32, %v2267_v12  ;;  %v2287_v57 = vmax.f32 %v2285_v6, %v2286_v0  ;;  %v2749_v22 = vmax.f32 %v13822_v2, %v13826_v15 }
 0x284   :  { %v2750_v39 = vmax.f32 %v2240_v1, %v2254_v8  ;;  %v2751_v38 = vmax.f32 %v2247_v21, %v2261_v16  ;;  %v2282_v55 = vmax.f32 %v2280_v56, %v2281_v33  ;;  %v2849_v30 = vsel %vm2848_vm6, %v2746_v29, %v13763_v63 }
 0x285   :  { %v2275_v37 = vmax.f32 %v2273_v14, %v2274_v34  ;;  %v2288_v47 = vrot.slane %v2287_v57, 1  ;;  %v2855_v7 = vsel %vm2848_vm6, %v2747_v27, %v13774_v18  ;;  %v2851_v46 = vsel %vm2850_vm7, %v2748_v43, %v2849_v30  ;;  %v11855_v27 = vld [vmem:[#allocation11 + $0x2a0] ss:$16 sps:$4 sm:$0xff]  }
 0x286   :  { %v2856_v4 = vsel %vm2850_vm7, %v2749_v22, %v2855_v7  ;;  %v1284_v13 = vadd.f32 %v13616_v52, %v13661_v26  ;;  %v1287_v2 = vadd.f32 %v13608_v41, %v13663_v31  ;;  %v2752_v15 = vmax.f32 %v2268_v3, %v2282_v55  ;;  %2897 = vst [vmem:[#allocation3] sm:$0xfc] %v2851_v46  ;;  %v11858_v3 = vld [vmem:[#allocation11 + $0x2a8] ss:$16 sps:$4 sm:$0xff]   ;;  %v11863_v7 = vld [vmem:[#allocation11 + $0x2c4] ss:$16 sps:$4 sm:$0xff]  }
 0x287   :  { %v2289_v53 = vmax.f32 %v2287_v57, %v2288_v47  ;;  %2898 = vst [vmem:[#allocation3 + $0x8] sm:$0xfc] %v2856_v4  ;;  %v1288_v63 = vadd.f32 %v13616_v52, %v13665_v35  ;;  %v1291_v18 = vadd.f32 %v13608_v41, %v13698_v36  ;;  %v1292_v10 = vadd.f32 %v13616_v52, %v13701_v42  ;;  %v11866_v46 = vld [vmem:[#allocation11 + $0x2cc] ss:$16 sps:$4 sm:$0xff]  }
 0x288   :  { %v1308_v20 = vmax.f32 %v1284_v13, 0.0  ;;  %v1311_v58 = vmax.f32 %v1287_v2, 0.0  ;;  %v13866_v26 = vadd.f32 %v13608_v41, %v13785_v44  ;;  %v13869_v11 = vsel %vm2857_vm8, %v2752_v15, %v2750_v39  ;;  %v11861_v15 = vld [vmem:[#allocation11 + $0x2c0] ss:$16 sps:$4 sm:$0xff]  }
 0x289   :  { %v2753_v31 = vmax.f32 %v2275_v37, %v2289_v53  ;;  %v1312_v40 = vmax.f32 %v1288_v63, 0.0  ;;  %v1315_v61 = vmax.f32 %v1291_v18, 0.0  ;;  %v13873_v35 = vrot.slane %v13604_v59, %v13619_v62  ;;  %v11864_v63 = vld [vmem:[#allocation11 + $0x2c8] ss:$16 sps:$4 sm:$0xff]  }
 0x28a   :  { %v15130_v36 = vmax.f32 %v13659_v25, 0.0  ;;  %v1316_v32 = vmax.f32 %v1292_v10, 0.0  ;;  %v13884_v6 = vadd.f32 %v13616_v52, %v13792_v45  ;;  %v1319_v12 = vmax.f32 %v13866_v26, 0.0  ;;  %v11857_v52 = vld [vmem:[#allocation11 + $0x2a4] ss:$16 sps:$4 sm:$0xff]  }
 0x28b   :  { %v13880_v41 = vsel %vm2857_vm8, %v2753_v31, %v2751_v38  ;;  %v1455_v44 = vcombine.low %v1311_v58, %v1312_v40  ;;  %v1456_v50 = vcombine.high %v1311_v58, %v1312_v40  ;;  %v11860_v45 = vld [vmem:[#allocation11 + $0x2ac] ss:$16 sps:$4 sm:$0xff]   ;;  %3465 = vmatprep.subr.bf16.mxu0 %v11857_v52 }
 0x28c   :  { %v1419_v17 = vcombine.low %v15130_v36, %v1308_v20  ;;  %v15131_v28 = vmov %v15130_v36  ;;  %v13888_v21 = vcombine.low %v1315_v61, %v1316_v32  ;;  %v13890_v14 = vcombine.high %v1315_v61, %v1316_v32  ;;  %3516 = vmatprep.subr.bf16.mxu1 %v11860_v45  ;;  %3466 = vmatpush1.bf16.msra.mxu0 %v11855_v27  ;;  %v11867_v45 = vld [vmem:[#allocation11 + $0x2e0] ss:$16 sps:$4 sm:$0xff]   ;;  %v11870_v27 = vld [vmem:[#allocation11 + $0x2e8] ss:$16 sps:$4 sm:$0xff]  }
 0x28d   :  { %v1420_v42 = vcombine.high %v15131_v28, %v1308_v20  ;;  %v13893_v25 = vrot.slane %v1455_v44, %v13619_v62  ;;  %v13896_v8 = vrot.slane %v1456_v50, %v13619_v62  ;;  %v1320_v56 = vmax.f32 %v13884_v6, 0.0  ;;  %3517 = vmatpush1.bf16.msra.mxu1 %v11858_v3  ;;  %3467 = vmatprep.subr.bf16.mxu0 %v11863_v7  ;;  %v11869_v44 = vld [vmem:[#allocation11 + $0x2e4] ss:$16 sps:$4 sm:$0xff]   ;;  %v11872_v3 = vld [vmem:[#allocation11 + $0x2ec] ss:$16 sps:$4 sm:$0xff]  }
 0x28e   :  { %v1441_v1 = vrot.slane %v1419_v17, %v13619_v62  ;;  %3518 = vmatprep.subr.bf16.mxu1 %v11866_v46 }
 0x28f   :  { %v1448_v59 = vrot.slane %v1420_v42, %v13619_v62 }
 0x290   :  { %v1449_v0 = vcombine.low %v13638_v19, %v1441_v1  ;;  %v1450_v16 = vcombine.high %v13638_v19, %v1441_v1  ;;  %v10716_v33 = vcombine.low %v1441_v1, %v1441_v1  ;;  %v10717_v57 = vcombine.high %v1441_v1, %v1441_v1  ;;  %3468 = vmatpush1.bf16.msra.mxu0 %v11861_v15 }
 0x291   :  { %v1451_v34 = vcombine.low %v13641_v5, %v1448_v59  ;;  %v1452_v29 = vcombine.high %v13641_v5, %v1448_v59  ;;  %v10718_v43 = vcombine.low %v1448_v59, %v1448_v59  ;;  %v10719_v37 = vcombine.high %v1448_v59, %v1448_v59  ;;  %3519 = vmatpush1.bf16.msra.mxu1 %v11864_v63  ;;  %v11873_v63 = vld [vmem:[#allocation11 + $0x300] ss:$16 sps:$4 sm:$0xff]  }
 0x292   :  { %v1704_v22 = vrot.slane %v1449_v0, %v13619_v62  ;;  %v1721_v39 = vrot.slane %v1450_v16, %v13619_v62  ;;  %v1711_v5 = vrot.slane %v10716_v33, %v13619_v62  ;;  %v1728_v55 = vrot.slane %v10717_v57, %v13619_v62  ;;  %3469 = vmatprep.subr.bf16.mxu0 %v11869_v44 }
 0x293   :  { %v13907_v38 = vrot.slane %v1451_v34, %v13619_v62  ;;  %v13910_v19 = vrot.slane %v1452_v29, %v13619_v62  ;;  %v13915_v47 = vrot.slane %v10718_v43, %v13619_v62  ;;  %v13918_v30 = vrot.slane %v10719_v37, %v13619_v62  ;;  %3520 = vmatprep.subr.bf16.mxu1 %v11872_v3 }
 0x294   :  { %v1712_v4 = vcombine.high %v1704_v22, %v1704_v22  ;;  %v1729_v13 = vcombine.high %v1721_v39, %v1721_v39  ;;  %v1713_v18 = vcombine.high %v1711_v5, %v1711_v5  ;;  %v1730_v20 = vcombine.high %v1728_v55, %v1728_v55  ;;  %3470 = vmatpush1.bf16.msra.mxu0 %v11867_v45 }
 0x295   :  { %v1746_v2 = vcombine.high %v13907_v38, %v13907_v38  ;;  %v1763_v53 = vcombine.high %v13910_v19, %v13910_v19  ;;  %v1747_v58 = vcombine.high %v13915_v47, %v13915_v47  ;;  %v1764_v10 = vcombine.high %v13918_v30, %v13918_v30  ;;  %3521 = vmatpush1.bf16.msra.mxu1 %v11870_v27 }
 0x296   :  { %v2290_v31 = vsel %vm2065_vm2, %v1704_v22, -inf  ;;  %v2297_v40 = vsel %vm2065_vm2, %v1712_v4, -inf  ;;  %v2304_v61 = vsel %vm2065_vm2, %v1711_v5, -inf  ;;  %v2318_v36 = vsel %vm2065_vm2, %v1721_v39, -inf }
 0x297   :  { %v2291_v17 = vrot.slane %v2290_v31, 4  ;;  %v2298_v28 = vrot.slane %v2297_v40, 4  ;;  %v2305_v42 = vrot.slane %v2304_v61, 4  ;;  %v2311_v32 = vsel %vm2065_vm2, %v1713_v18, -inf }
 0x298   :  { %v2312_v50 = vrot.slane %v2311_v32, 4  ;;  %v2319_v1 = vrot.slane %v2318_v36, 4  ;;  %v2325_v59 = vsel %vm2065_vm2, %v1729_v13, -inf  ;;  %v2332_v52 = vsel %vm2065_vm2, %v1728_v55, -inf  ;;  %v11875_v55 = vld [vmem:[#allocation11 + $0x304] ss:$16 sps:$4 sm:$0xff]  }
 0x299   :  { %v2292_v0 = vmax.f32 %v2290_v31, %v2291_v17  ;;  %v2299_v16 = vmax.f32 %v2297_v40, %v2298_v28  ;;  %v2306_v34 = vmax.f32 %v2304_v61, %v2305_v42  ;;  %v2326_v29 = vrot.slane %v2325_v59, 4  ;;  %3471 = vmatprep.subr.bf16.mxu0 %v11875_v55 }
 0x29a   :  { %v2313_v33 = vmax.f32 %v2311_v32, %v2312_v50  ;;  %v2320_v57 = vmax.f32 %v2318_v36, %v2319_v1  ;;  %v2333_v43 = vrot.slane %v2332_v52, 4  ;;  %v2339_v37 = vsel %vm2065_vm2, %v1730_v20, -inf  ;;  %v11876_v36 = vld [vmem:[#allocation11 + $0x308] ss:$16 sps:$4 sm:$0xff]   ;;  %v11878_v20 = vld [vmem:[#allocation11 + $0x30c] ss:$16 sps:$4 sm:$0xff]   ;;  %3472 = vmatpush1.bf16.msra.mxu0 %v11873_v63 }
 0x29b   :  { %v2293_v22 = vrot.slane %v2292_v0, 2  ;;  %v2300_v39 = vrot.slane %v2299_v16, 2  ;;  %v2307_v5 = vrot.slane %v2306_v34, 2  ;;  %v2327_v7 = vmax.f32 %v2325_v59, %v2326_v29  ;;  %3522 = vmatprep.subr.bf16.mxu1 %v11878_v20 }
 0x29c   :  { %v2314_v46 = vrot.slane %v2313_v33, 2  ;;  %v2321_v4 = vrot.slane %v2320_v57, 2  ;;  %v2334_v13 = vmax.f32 %v2332_v52, %v2333_v43  ;;  %v2340_v15 = vrot.slane %v2339_v37, 4  ;;  %v11881_v52 = vld [vmem:[#allocation11 + $0x324] ss:$16 sps:$4 sm:$0xff]   ;;  %3523 = vmatpush1.bf16.msra.mxu1 %v11876_v36 }
 0x29d   :  { %v2294_v18 = vmax.f32 %v2292_v0, %v2293_v22  ;;  %v2301_v31 = vmax.f32 %v2299_v16, %v2300_v39  ;;  %v2308_v40 = vmax.f32 %v2306_v34, %v2307_v5  ;;  %v2328_v61 = vrot.slane %v2327_v7, 2  ;;  %v11879_v34 = vld [vmem:[#allocation11 + $0x320] ss:$16 sps:$4 sm:$0xff]   ;;  %3473 = vmatprep.subr.bf16.mxu0 %v11881_v52  ;;  %v11882_v43 = vld [vmem:[#allocation11 + $0x328] ss:$16 sps:$4 sm:$0xff]  }
 0x29e   :  { %v2315_v17 = vmax.f32 %v2313_v33, %v2314_v46  ;;  %v2322_v28 = vmax.f32 %v2320_v57, %v2321_v4  ;;  %v2335_v42 = vrot.slane %v2334_v13, 2  ;;  %v2341_v32 = vmax.f32 %v2339_v37, %v2340_v15  ;;  %v11884_v37 = vld [vmem:[#allocation11 + $0x32c] ss:$16 sps:$4 sm:$0xff]   ;;  %3474 = vmatpush1.bf16.msra.mxu0 %v11879_v34  ;;  %v11887_v15 = vld [vmem:[#allocation11 + $0x344] ss:$16 sps:$4 sm:$0xff]  }
 0x29f   :  { %v2295_v44 = vrot.slane %v2294_v18, 1  ;;  %v2302_v50 = vrot.slane %v2301_v31, 1  ;;  %v2309_v1 = vrot.slane %v2308_v40, 1  ;;  %v2329_v59 = vmax.f32 %v2327_v7, %v2328_v61  ;;  %3524 = vmatprep.subr.bf16.mxu1 %v11884_v37  ;;  %v11885_v61 = vld [vmem:[#allocation11 + $0x340] ss:$16 sps:$4 sm:$0xff]   ;;  %3475 = vmatprep.subr.bf16.mxu0 %v11887_v15 }
 0x2a0   :  { %v2316_v45 = vrot.slane %v2315_v17, 1  ;;  %v2323_v29 = vrot.slane %v2322_v28, 1  ;;  %v2336_v0 = vmax.f32 %v2334_v13, %v2335_v42  ;;  %v2342_v16 = vrot.slane %v2341_v32, 2  ;;  %3525 = vmatpush1.bf16.msra.mxu1 %v11882_v43  ;;  %v11893_v52 = vld [vmem:[#allocation11 + $0x364] ss:$16 sps:$4 sm:$0xff]  }
 0x2a1   :  { %v13936_v27 = vmax.f32 %v2294_v18, %v2295_v44  ;;  %v13938_v3 = vmax.f32 %v2301_v31, %v2302_v50  ;;  %v13940_v33 = vmax.f32 %v2308_v40, %v2309_v1  ;;  %v2330_v57 = vrot.slane %v2329_v59, 1  ;;  %v11890_v50 = vld [vmem:[#allocation11 + $0x34c] ss:$16 sps:$4 sm:$0xff]   ;;  %v11894_v37 = vld [vmem:[#allocation11 + $0x368] ss:$16 sps:$4 sm:$0xff]  }
 0x2a2   :  { %v13942_v22 = vmax.f32 %v2315_v17, %v2316_v45  ;;  %v13944_v39 = vmax.f32 %v2322_v28, %v2323_v29  ;;  %v2337_v5 = vrot.slane %v2336_v0, 1  ;;  %v2343_v7 = vmax.f32 %v2341_v32, %v2342_v16  ;;  %v11888_v17 = vld [vmem:[#allocation11 + $0x348] ss:$16 sps:$4 sm:$0xff]   ;;  %3476 = vmatpush1.bf16.msra.mxu0 %v11885_v61  ;;  %3526 = vmatprep.subr.bf16.mxu1 %v11890_v50  ;;  %v11899_v61 = vld [vmem:[#allocation11 + $0x384] ss:$16 sps:$4 sm:$0xff]  }
 0x2a3   :  { %v13946_v55 = vmax.f32 %v2329_v59, %v2330_v57  ;;  %v2346_v46 = vsel %vm2065_vm2, %v13907_v38, -inf  ;;  %v2353_v4 = vsel %vm2065_vm2, %v1746_v2, -inf  ;;  %v2360_v13 = vsel %vm2065_vm2, %v13915_v47, -inf  ;;  %3477 = vmatprep.subr.bf16.mxu0 %v11893_v52  ;;  %v11905_v52 = vld [vmem:[#allocation11 + $0x3a4] ss:$16 sps:$4 sm:$0xff]  }
 0x2a4   :  { %v13956_v63 = vmax.f32 %v2336_v0, %v2337_v5  ;;  %v2344_v18 = vrot.slane %v2343_v7, 1  ;;  %v2347_v31 = vrot.slane %v2346_v46, 4  ;;  %v2354_v40 = vrot.slane %v2353_v4, 4  ;;  %v11891_v0 = vld [vmem:[#allocation11 + $0x360] ss:$16 sps:$4 sm:$0xff]   ;;  %3527 = vmatpush1.bf16.msra.mxu1 %v11888_v17 }
 0x2a5   :  { %v2361_v36 = vrot.slane %v2360_v13, 4  ;;  %v2367_v38 = vsel %vm2065_vm2, %v1747_v58, -inf  ;;  %v2374_v2 = vsel %vm2065_vm2, %v13910_v19, -inf  ;;  %v2381_v20 = vsel %vm2065_vm2, %v1763_v53, -inf  ;;  %v11896_v5 = vld [vmem:[#allocation11 + $0x36c] ss:$16 sps:$4 sm:$0xff]  }
 0x2a6   :  { %v13968_v28 = vmax.f32 %v2343_v7, %v2344_v18  ;;  %v2348_v42 = vmax.f32 %v2346_v46, %v2347_v31  ;;  %v2355_v32 = vmax.f32 %v2353_v4, %v2354_v40  ;;  %v2368_v44 = vrot.slane %v2367_v38, 4  ;;  %3528 = vmatprep.subr.bf16.mxu1 %v11896_v5  ;;  %3478 = vmatpush1.bf16.msra.mxu0 %v11891_v0 }
 0x2a7   :  { %v2362_v1 = vmax.f32 %v2360_v13, %v2361_v36  ;;  %v2375_v47 = vrot.slane %v2374_v2, 4  ;;  %v2382_v59 = vrot.slane %v2381_v20, 4  ;;  %v2388_v58 = vsel %vm2065_vm2, %v13918_v30, -inf  ;;  %3479 = vmatprep.subr.bf16.mxu0 %v11899_v61 }
 0x2a8   :  { %v2349_v45 = vrot.slane %v2348_v42, 2  ;;  %v2356_v19 = vrot.slane %v2355_v32, 2  ;;  %v2369_v29 = vmax.f32 %v2367_v38, %v2368_v44  ;;  %v2389_v53 = vrot.slane %v2388_v58, 4  ;;  %3529 = vmatpush1.bf16.msra.mxu1 %v11894_v37  ;;  %v11908_v37 = vld [vmem:[#allocation11 + $0x3ac] ss:$16 sps:$4 sm:$0xff]  }
 0x2a9   :  { %v2363_v16 = vrot.slane %v2362_v1, 2  ;;  %v2376_v34 = vmax.f32 %v2374_v2, %v2375_v47  ;;  %v2383_v57 = vmax.f32 %v2381_v20, %v2382_v59  ;;  %v2395_v43 = vsel %vm2065_vm2, %v1764_v10, -inf  ;;  %v11897_v10 = vld [vmem:[#allocation11 + $0x380] ss:$16 sps:$4 sm:$0xff]  }
 0x2aa   :  { %v2350_v7 = vmax.f32 %v2348_v42, %v2349_v45  ;;  %v2357_v46 = vmax.f32 %v2355_v32, %v2356_v19  ;;  %v2370_v4 = vrot.slane %v2369_v29, 2  ;;  %v2390_v13 = vmax.f32 %v2388_v58, %v2389_v53  ;;  %v11900_v42 = vld [vmem:[#allocation11 + $0x388] ss:$16 sps:$4 sm:$0xff]   ;;  %v11902_v32 = vld [vmem:[#allocation11 + $0x38c] ss:$16 sps:$4 sm:$0xff]   ;;  %3480 = vmatpush1.bf16.msra.mxu0 %v11897_v10 }
 0x2ab   :  { %v2364_v15 = vmax.f32 %v2362_v1, %v2363_v16  ;;  %v2377_v18 = vrot.slane %v2376_v34, 2  ;;  %v2384_v31 = vrot.slane %v2383_v57, 2  ;;  %v2396_v40 = vrot.slane %v2395_v43, 4  ;;  %3530 = vmatprep.subr.bf16.mxu1 %v11902_v32  ;;  %3481 = vmatprep.subr.bf16.mxu0 %v11905_v52 }
 0x2ac   :  { %v2351_v36 = vrot.slane %v2350_v7, 1  ;;  %v2358_v38 = vrot.slane %v2357_v46, 1  ;;  %v2371_v30 = vmax.f32 %v2369_v29, %v2370_v4  ;;  %v2391_v2 = vrot.slane %v2390_v13, 2  ;;  %v11903_v29 = vld [vmem:[#allocation11 + $0x3a0] ss:$16 sps:$4 sm:$0xff]   ;;  %3531 = vmatpush1.bf16.msra.mxu1 %v11900_v42 }
 0x2ad   :  { %v2365_v20 = vrot.slane %v2364_v15, 1  ;;  %v2378_v17 = vmax.f32 %v2376_v34, %v2377_v18  ;;  %v2385_v44 = vmax.f32 %v2383_v57, %v2384_v31  ;;  %v2397_v50 = vmax.f32 %v2395_v43, %v2396_v40  ;;  %3532 = vmatprep.subr.bf16.mxu1 %v11908_v37  ;;  %v11920_v42 = vld [vmem:[#allocation11 + $0x3ec] ss:$16 sps:$4 sm:$0xff]  }
 0x2ae   :  { %v2352_v1 = vmax.f32 %v2350_v7, %v2351_v36  ;;  %v2359_v47 = vmax.f32 %v2357_v46, %v2358_v38  ;;  %v2372_v59 = vrot.slane %v2371_v30, 1  ;;  %v2392_v58 = vmax.f32 %v2390_v13, %v2391_v2  ;;  %v11906_v13 = vld [vmem:[#allocation11 + $0x3a8] ss:$16 sps:$4 sm:$0xff]   ;;  %3482 = vmatpush1.bf16.msra.mxu0 %v11903_v29 }
 0x2af   :  { %v2366_v45 = vmax.f32 %v2364_v15, %v2365_v20  ;;  %v2379_v19 = vrot.slane %v2378_v17, 1  ;;  %v2386_v53 = vrot.slane %v2385_v44, 1  ;;  %v2398_v0 = vrot.slane %v2397_v50, 2  ;;  %v11911_v15 = vld [vmem:[#allocation11 + $0x3c4] ss:$16 sps:$4 sm:$0xff]  }
 0x2b0   :  { %v2373_v16 = vmax.f32 %v2371_v30, %v2372_v59  ;;  %v2393_v34 = vrot.slane %v2392_v58, 1  ;;  %v2754_v57 = vmax.f32 %v13936_v27, %v13940_v33  ;;  %v2755_v43 = vmax.f32 %v13938_v3, %v13942_v22  ;;  %v11914_v33 = vld [vmem:[#allocation11 + $0x3cc] ss:$16 sps:$4 sm:$0xff]   ;;  %3483 = vmatprep.subr.bf16.mxu0 %v11911_v15  ;;  %v11917_v30 = vld [vmem:[#allocation11 + $0x3e4] ss:$16 sps:$4 sm:$0xff]   ;;  %3533 = vmatpush1.bf16.msra.mxu1 %v11906_v13 }
 0x2b1   :  { %v2380_v5 = vmax.f32 %v2378_v17, %v2379_v19  ;;  %v2387_v7 = vmax.f32 %v2385_v44, %v2386_v53  ;;  %v2399_v46 = vmax.f32 %v2397_v50, %v2398_v0  ;;  %v2756_v4 = vmax.f32 %v13944_v39, %v13956_v63  ;;  %v11909_v63 = vld [vmem:[#allocation11 + $0x3c0] ss:$16 sps:$4 sm:$0xff]   ;;  %v11912_v20 = vld [vmem:[#allocation11 + $0x3c8] ss:$16 sps:$4 sm:$0xff]   ;;  %3534 = vmatprep.subr.bf16.mxu1 %v11914_v33  ;;  %v11932_v53 = vld [vmem:[#allocation11 + $0x4] ss:$16 sps:$4 sm:$0xff]  }
 0x2b2   :  { %v2394_v18 = vmax.f32 %v2392_v58, %v2393_v34  ;;  %v2757_v31 = vmax.f32 %v13946_v55, %v13968_v28  ;;  %v2758_v40 = vmax.f32 %v2352_v1, %v2366_v45  ;;  %v2759_v27 = vmax.f32 %v2359_v47, %v2373_v16  ;;  %3484 = vmatpush1.bf16.msra.mxu0 %v11909_v63  ;;  %v11915_v58 = vld [vmem:[#allocation11 + $0x3e0] ss:$16 sps:$4 sm:$0xff]   ;;  %v11918_v34 = vld [vmem:[#allocation11 + $0x3e8] ss:$16 sps:$4 sm:$0xff]  }
 0x2b3   :  { %v2400_v3 = vrot.slane %v2399_v46, 1  ;;  %v2860_v22 = vsel %vm2859_vm9, %v2754_v57, %v13869_v11  ;;  %v2865_v61 = vsel %vm2859_vm9, %v2755_v43, %v13880_v41  ;;  %v1485_v39 = vcombine.low %v13650_v23, %v13893_v25  ;;  %3485 = vmatprep.subr.bf16.mxu0 %v11917_v30 }
 0x2b4   :  { %v2760_v36 = vmax.f32 %v2380_v5, %v2394_v18  ;;  %v2861_v38 = vsel %vm2842_vm3, %v2756_v4, %v2860_v22  ;;  %v2866_v55 = vsel %vm2842_vm3, %v2757_v31, %v2865_v61  ;;  %v1486_v28 = vcombine.high %v13650_v23, %v13893_v25  ;;  %3535 = vmatpush1.bf16.msra.mxu1 %v11912_v20  ;;  %v11935_v5 = vld [vmem:[#allocation11 + $0xc] ss:$16 sps:$4 sm:$0xff]  }
 0x2b5   :  { %v2401_v2 = vmax.f32 %v2399_v46, %v2400_v3  ;;  %v2862_v11 = vsel %vm2844_vm4, %v2758_v40, %v2861_v38  ;;  %v2867_v41 = vsel %vm2844_vm4, %v2759_v27, %v2866_v55  ;;  %v1487_v10 = vcombine.low %v13653_v9, %v13896_v8  ;;  %3536 = vmatprep.subr.bf16.mxu1 %v11920_v42 }
 0x2b6   :  { %v2863_v17 = vsel %vm2846_vm5, %v2760_v36, %v2862_v11  ;;  %v1488_v44 = vcombine.high %v13653_v9, %v13896_v8  ;;  %v10720_v23 = vcombine.low %v13893_v25, %v13893_v25  ;;  %v1772_v50 = vrot.slane %v1485_v39, %v13619_v62  ;;  %3486 = vmatpush1.bf16.msra.mxu0 %v11915_v58 }
 0x2b7   :  { %v2761_v32 = vmax.f32 %v2387_v7, %v2401_v2  ;;  %2899 = vst [vmem:[#allocation3 + $0x10] sm:$0x3f] %v2863_v17  ;;  %v10721_v1 = vcombine.high %v13893_v25, %v13893_v25  ;;  %v1789_v47 = vrot.slane %v1486_v28, %v13619_v62  ;;  %v10722_v59 = vcombine.low %v13896_v8, %v13896_v8 }
 0x2b8   :  { %v1779_v9 = vrot.slane %v10720_v23, %v13619_v62  ;;  %v1780_v52 = vcombine.high %v1772_v50, %v1772_v50  ;;  %v14011_v45 = vrot.slane %v1487_v10, %v13619_v62  ;;  %v10723_v19 = vcombine.high %v13896_v8, %v13896_v8  ;;  %3877 = vmatprep.subr.bf16.mxu0 %v11932_v53 }
 0x2b9   :  { %v2868_v25 = vsel %vm2846_vm5, %v2761_v32, %v2867_v41  ;;  %v1796_v0 = vrot.slane %v10721_v1, %v13619_v62  ;;  %v1797_v29 = vcombine.high %v1789_v47, %v1789_v47  ;;  %v14018_v16 = vrot.slane %v10722_v59, %v13619_v62  ;;  %3537 = vmatpush1.bf16.msra.mxu1 %v11918_v34 }
 0x2ba   :  { %2900 = vst [vmem:[#allocation3 + $0x18] sm:$0x3f] %v2868_v25  ;;  %v1781_v57 = vcombine.high %v1779_v9, %v1779_v9  ;;  %v1814_v43 = vcombine.high %v14011_v45, %v14011_v45  ;;  %v14023_v37 = vrot.slane %v1488_v44, %v13619_v62  ;;  %v14026_v8 = vrot.slane %v10723_v19, %v13619_v62 }
 0x2bb   :  { %v1798_v7 = vcombine.high %v1796_v0, %v1796_v0  ;;  %v1815_v46 = vcombine.high %v14018_v16, %v14018_v16  ;;  %v2402_v4 = vsel %vm2065_vm2, %v1772_v50, -inf  ;;  %v2409_v13 = vsel %vm2065_vm2, %v1780_v52, -inf  ;;  %3928 = vmatprep.subr.bf16.mxu1 %v11935_v5 }
 0x2bc   :  { %v1831_v15 = vcombine.high %v14023_v37, %v14023_v37  ;;  %v1832_v18 = vcombine.high %v14026_v8, %v14026_v8  ;;  %v2403_v31 = vrot.slane %v2402_v4, 4  ;;  %v2410_v40 = vrot.slane %v2409_v13, 4 }
 0x2bd   :  { %v2416_v27 = vsel %vm2065_vm2, %v1779_v9, -inf  ;;  %v2423_v33 = vsel %vm2065_vm2, %v1781_v57, -inf  ;;  %v2430_v3 = vsel %vm2065_vm2, %v1789_v47, -inf  ;;  %v2437_v22 = vsel %vm2065_vm2, %v1797_v29, -inf }
 0x2be   :  { %v2404_v61 = vmax.f32 %v2402_v4, %v2403_v31  ;;  %v2411_v39 = vmax.f32 %v2409_v13, %v2410_v40  ;;  %v2417_v63 = vrot.slane %v2416_v27, 4  ;;  %v2424_v36 = vrot.slane %v2423_v33, 4 }
 0x2bf   :  { %v2431_v38 = vrot.slane %v2430_v3, 4  ;;  %v2438_v55 = vrot.slane %v2437_v22, 4  ;;  %v2444_v28 = vsel %vm2065_vm2, %v1796_v0, -inf  ;;  %v2451_v30 = vsel %vm2065_vm2, %v1798_v7, -inf }
 0x2c0   :  { %v2405_v2 = vrot.slane %v2404_v61, 2  ;;  %v2412_v11 = vrot.slane %v2411_v39, 2  ;;  %v2418_v41 = vmax.f32 %v2416_v27, %v2417_v63  ;;  %v2425_v10 = vmax.f32 %v2423_v33, %v2424_v36 }
 0x2c1   :  { %v2432_v20 = vmax.f32 %v2430_v3, %v2431_v38  ;;  %v2439_v17 = vmax.f32 %v2437_v22, %v2438_v55  ;;  %v2445_v44 = vrot.slane %v2444_v28, 4  ;;  %v2452_v23 = vrot.slane %v2451_v30, 4 }
 0x2c2   :  { %v2406_v50 = vmax.f32 %v2404_v61, %v2405_v2  ;;  %v2413_v42 = vmax.f32 %v2411_v39, %v2412_v11  ;;  %v2419_v32 = vrot.slane %v2418_v41, 2  ;;  %v2426_v1 = vrot.slane %v2425_v10, 2 }
 0x2c3   :  { %v2433_v47 = vrot.slane %v2432_v20, 2  ;;  %v2440_v59 = vrot.slane %v2439_v17, 2  ;;  %v2446_v58 = vmax.f32 %v2444_v28, %v2445_v44  ;;  %v2453_v9 = vmax.f32 %v2451_v30, %v2452_v23 }
 0x2c4   :  { %v2407_v52 = vrot.slane %v2406_v50, 1  ;;  %v2414_v19 = vrot.slane %v2413_v42, 1  ;;  %v2420_v53 = vmax.f32 %v2418_v41, %v2419_v32  ;;  %v2427_v25 = vmax.f32 %v2425_v10, %v2426_v1 }
 0x2c5   :  { %v2434_v0 = vmax.f32 %v2432_v20, %v2433_v47  ;;  %v2441_v29 = vmax.f32 %v2439_v17, %v2440_v59  ;;  %v2447_v34 = vrot.slane %v2446_v58, 2  ;;  %v2454_v57 = vrot.slane %v2453_v9, 2 }
 0x2c6   :  { %v14042_v5 = vmax.f32 %v2406_v50, %v2407_v52  ;;  %v14044_v7 = vmax.f32 %v2413_v42, %v2414_v19  ;;  %v2421_v4 = vrot.slane %v2420_v53, 1  ;;  %v2428_v13 = vrot.slane %v2427_v25, 1 }
 0x2c7   :  { %v2435_v31 = vrot.slane %v2434_v0, 1  ;;  %v2442_v40 = vrot.slane %v2441_v29, 1  ;;  %v2448_v27 = vmax.f32 %v2446_v58, %v2447_v34  ;;  %v2455_v33 = vmax.f32 %v2453_v9, %v2454_v57 }
 0x2c8   :  { %v14046_v3 = vmax.f32 %v2420_v53, %v2421_v4  ;;  %v14048_v22 = vmax.f32 %v2427_v25, %v2428_v13  ;;  %v2458_v61 = vsel %vm2065_vm2, %v14011_v45, -inf  ;;  %v2465_v39 = vsel %vm2065_vm2, %v1814_v43, -inf }
 0x2c9   :  { %v14056_v63 = vmax.f32 %v2434_v0, %v2435_v31  ;;  %v14058_v36 = vmax.f32 %v2441_v29, %v2442_v40  ;;  %v2449_v38 = vrot.slane %v2448_v27, 1  ;;  %v2456_v55 = vrot.slane %v2455_v33, 1 }
 0x2ca   :  { %v2459_v28 = vrot.slane %v2458_v61, 4  ;;  %v2466_v30 = vrot.slane %v2465_v39, 4  ;;  %v2472_v2 = vsel %vm2065_vm2, %v14018_v16, -inf  ;;  %v2479_v11 = vsel %vm2065_vm2, %v1815_v46, -inf }
 0x2cb   :  { %v2450_v41 = vmax.f32 %v2448_v27, %v2449_v38  ;;  %v2457_v45 = vmax.f32 %v2455_v33, %v2456_v55  ;;  %v2473_v10 = vrot.slane %v2472_v2, 4  ;;  %v2480_v43 = vrot.slane %v2479_v11, 4 }
 0x2cc   :  { %v2460_v20 = vmax.f32 %v2458_v61, %v2459_v28  ;;  %v2467_v17 = vmax.f32 %v2465_v39, %v2466_v30  ;;  %v2486_v44 = vsel %vm2065_vm2, %v14023_v37, -inf  ;;  %v2493_v23 = vsel %vm2065_vm2, %v1831_v15, -inf }
 0x2cd   :  { %v2474_v50 = vmax.f32 %v2472_v2, %v2473_v10  ;;  %v2481_v42 = vmax.f32 %v2479_v11, %v2480_v43  ;;  %v2487_v32 = vrot.slane %v2486_v44, 4  ;;  %v2494_v16 = vrot.slane %v2493_v23, 4 }
 0x2ce   :  { %v2461_v1 = vrot.slane %v2460_v20, 2  ;;  %v2468_v46 = vrot.slane %v2467_v17, 2  ;;  %v2500_v47 = vsel %vm2065_vm2, %v14026_v8, -inf  ;;  %v2507_v59 = vsel %vm2065_vm2, %v1832_v18, -inf }
 0x2cf   :  { %v2475_v58 = vrot.slane %v2474_v50, 2  ;;  %v2482_v9 = vrot.slane %v2481_v42, 2  ;;  %v2488_v52 = vmax.f32 %v2486_v44, %v2487_v32  ;;  %v2495_v37 = vmax.f32 %v2493_v23, %v2494_v16 }
 0x2d0   :  { %v2462_v19 = vmax.f32 %v2460_v20, %v2461_v1  ;;  %v2469_v15 = vmax.f32 %v2467_v17, %v2468_v46  ;;  %v2501_v53 = vrot.slane %v2500_v47, 4  ;;  %v2508_v25 = vrot.slane %v2507_v59, 4 }
 0x2d1   :  { %v2476_v0 = vmax.f32 %v2474_v50, %v2475_v58  ;;  %v2483_v29 = vmax.f32 %v2481_v42, %v2482_v9  ;;  %v2489_v34 = vrot.slane %v2488_v52, 2  ;;  %v2496_v57 = vrot.slane %v2495_v37, 2 }
 0x2d2   :  { %v2463_v4 = vrot.slane %v2462_v19, 1  ;;  %v2470_v13 = vrot.slane %v2469_v15, 1  ;;  %v2502_v31 = vmax.f32 %v2500_v47, %v2501_v53  ;;  %v2509_v40 = vmax.f32 %v2507_v59, %v2508_v25 }
 0x2d3   :  { %v2477_v27 = vrot.slane %v2476_v0, 1  ;;  %v2484_v8 = vrot.slane %v2483_v29, 1  ;;  %v2490_v33 = vmax.f32 %v2488_v52, %v2489_v34  ;;  %v2497_v18 = vmax.f32 %v2495_v37, %v2496_v57 }
 0x2d4   :  { %v2464_v61 = vmax.f32 %v2462_v19, %v2463_v4  ;;  %v2471_v39 = vmax.f32 %v2469_v15, %v2470_v13  ;;  %v2503_v38 = vrot.slane %v2502_v31, 2  ;;  %v2510_v55 = vrot.slane %v2509_v40, 2 }
 0x2d5   :  { %v2478_v28 = vmax.f32 %v2476_v0, %v2477_v27  ;;  %v2485_v30 = vmax.f32 %v2483_v29, %v2484_v8  ;;  %v2491_v2 = vrot.slane %v2490_v33, 1  ;;  %v2498_v11 = vrot.slane %v2497_v18, 1 }
 0x2d6   :  { %v2504_v10 = vmax.f32 %v2502_v31, %v2503_v38  ;;  %v2511_v43 = vmax.f32 %v2509_v40, %v2510_v55  ;;  %v2762_v20 = vmax.f32 %v14042_v5, %v14046_v3  ;;  %v2763_v17 = vmax.f32 %v14044_v7, %v14048_v22 }
 0x2d7   :  { %v2492_v44 = vmax.f32 %v2490_v33, %v2491_v2  ;;  %v2499_v23 = vmax.f32 %v2497_v18, %v2498_v11  ;;  %v2764_v50 = vmax.f32 %v14056_v63, %v2450_v41  ;;  %v2765_v42 = vmax.f32 %v14058_v36, %v2457_v45 }
 0x2d8   :  { %v2505_v32 = vrot.slane %v2504_v10, 1  ;;  %v2512_v16 = vrot.slane %v2511_v43, 1  ;;  %v2766_v1 = vmax.f32 %v2464_v61, %v2478_v28  ;;  %v2767_v46 = vmax.f32 %v2471_v39, %v2485_v30 }
 0x2d9   :  { %v2869_v47 = vsel %vm2842_vm3, %v2764_v50, %v2762_v20  ;;  %v2874_v59 = vsel %vm2842_vm3, %v2765_v42, %v2763_v17  ;;  %v1513_v5 = vrot.slane %v13888_v21, %v13619_v62  ;;  %v1520_v7 = vrot.slane %v13890_v14, %v13619_v62 }
 0x2da   :  { %v2506_v3 = vmax.f32 %v2504_v10, %v2505_v32  ;;  %v2513_v22 = vmax.f32 %v2511_v43, %v2512_v16  ;;  %v2870_v63 = vsel %vm2844_vm4, %v2766_v1, %v2869_v47  ;;  %v2875_v36 = vsel %vm2844_vm4, %v2767_v46, %v2874_v59 }
 0x2db   :  { %v1521_v41 = vcombine.low %v13656_v24, %v1513_v5  ;;  %v1522_v45 = vcombine.high %v13656_v24, %v1513_v5  ;;  %v1523_v58 = vcombine.low %v13873_v35, %v1520_v7  ;;  %v1524_v9 = vcombine.high %v13873_v35, %v1520_v7 }
 0x2dc   :  { %v2768_v52 = vmax.f32 %v2492_v44, %v2506_v3  ;;  %v2769_v37 = vmax.f32 %v2499_v23, %v2513_v22  ;;  %v10724_v21 = vcombine.low %v1513_v5, %v1513_v5  ;;  %v10725_v19 = vcombine.high %v1513_v5, %v1513_v5 }
 0x2dd   :  { %v1840_v14 = vrot.slane %v1521_v41, %v13619_v62  ;;  %v1857_v15 = vrot.slane %v1522_v45, %v13619_v62  ;;  %v10726_v53 = vcombine.low %v1520_v7, %v1520_v7  ;;  %v14099_v25 = vrot.slane %v1523_v58, %v13619_v62 }
 0x2de   :  { %v14102_v0 = vsel %vm2846_vm5, %v2768_v52, %v2870_v63  ;;  %v14105_v24 = vsel %vm2846_vm5, %v2769_v37, %v2875_v36  ;;  %v1847_v35 = vrot.slane %v10724_v21, %v13619_v62  ;;  %v1864_v29 = vrot.slane %v10725_v19, %v13619_v62 }
 0x2df   :  { %v1848_v34 = vcombine.high %v1840_v14, %v1840_v14  ;;  %v1865_v57 = vcombine.high %v1857_v15, %v1857_v15  ;;  %v14110_v4 = vrot.slane %v10726_v53, %v13619_v62  ;;  %v1882_v13 = vcombine.high %v14099_v25, %v14099_v25 }
 0x2e0   :  { %v1849_v31 = vcombine.high %v1847_v35, %v1847_v35  ;;  %v1866_v40 = vcombine.high %v1864_v29, %v1864_v29  ;;  %v10727_v27 = vcombine.high %v1520_v7, %v1520_v7  ;;  %v14115_v8 = vrot.slane %v1524_v9, %v13619_v62 }
 0x2e1   :  { %v1883_v33 = vcombine.high %v14110_v4, %v14110_v4  ;;  %v2514_v18 = vsel %vm2065_vm2, %v1840_v14, -inf  ;;  %v2521_v61 = vsel %vm2065_vm2, %v1848_v34, -inf  ;;  %v2528_v39 = vsel %vm2065_vm2, %v1847_v35, -inf }
 0x2e2   :  { %v14123_v38 = vrot.slane %v10727_v27, %v13619_v62  ;;  %v1899_v55 = vcombine.high %v14115_v8, %v14115_v8  ;;  %v2515_v28 = vrot.slane %v2514_v18, 4  ;;  %v2522_v30 = vrot.slane %v2521_v61, 4 }
 0x2e3   :  { %v2529_v2 = vrot.slane %v2528_v39, 4  ;;  %v2535_v11 = vsel %vm2065_vm2, %v1849_v31, -inf  ;;  %v2542_v10 = vsel %vm2065_vm2, %v1857_v15, -inf  ;;  %v2549_v43 = vsel %vm2065_vm2, %v1865_v57, -inf }
 0x2e4   :  { %v1900_v20 = vcombine.high %v14123_v38, %v14123_v38  ;;  %v2516_v17 = vmax.f32 %v2514_v18, %v2515_v28  ;;  %v2523_v44 = vmax.f32 %v2521_v61, %v2522_v30  ;;  %v2536_v23 = vrot.slane %v2535_v11, 4 }
 0x2e5   :  { %v2530_v50 = vmax.f32 %v2528_v39, %v2529_v2  ;;  %v2543_v42 = vrot.slane %v2542_v10, 4  ;;  %v2550_v32 = vrot.slane %v2549_v43, 4  ;;  %v2556_v16 = vsel %vm2065_vm2, %v1864_v29, -inf }
 0x2e6   :  { %v2517_v1 = vrot.slane %v2516_v17, 2  ;;  %v2524_v46 = vrot.slane %v2523_v44, 2  ;;  %v2537_v47 = vmax.f32 %v2535_v11, %v2536_v23  ;;  %v2557_v59 = vrot.slane %v2556_v16, 4 }
 0x2e7   :  { %v2531_v5 = vrot.slane %v2530_v50, 2  ;;  %v2544_v7 = vmax.f32 %v2542_v10, %v2543_v42  ;;  %v2551_v3 = vmax.f32 %v2549_v43, %v2550_v32  ;;  %v2563_v22 = vsel %vm2065_vm2, %v1866_v40, -inf }
 0x2e8   :  { %v2518_v63 = vmax.f32 %v2516_v17, %v2517_v1  ;;  %v2525_v36 = vmax.f32 %v2523_v44, %v2524_v46  ;;  %v2538_v41 = vrot.slane %v2537_v47, 2  ;;  %v2558_v45 = vmax.f32 %v2556_v16, %v2557_v59 }
 0x2e9   :  { %v2532_v58 = vmax.f32 %v2530_v50, %v2531_v5  ;;  %v2545_v9 = vrot.slane %v2544_v7, 2  ;;  %v2552_v52 = vrot.slane %v2551_v3, 2  ;;  %v2564_v37 = vrot.slane %v2563_v22, 4 }
 0x2ea   :  { %v2519_v21 = vrot.slane %v2518_v63, 1  ;;  %v2526_v19 = vrot.slane %v2525_v36, 1  ;;  %v2539_v14 = vmax.f32 %v2537_v47, %v2538_v41  ;;  %v2559_v15 = vrot.slane %v2558_v45, 2 }
 0x2eb   :  { %v2533_v53 = vrot.slane %v2532_v58, 1  ;;  %v2546_v35 = vmax.f32 %v2544_v7, %v2545_v9  ;;  %v2553_v29 = vmax.f32 %v2551_v3, %v2552_v52  ;;  %v2565_v34 = vmax.f32 %v2563_v22, %v2564_v37 }
 0x2ec   :  { %v14134_v57 = vmax.f32 %v2518_v63, %v2519_v21  ;;  %v14136_v31 = vmax.f32 %v2525_v36, %v2526_v19  ;;  %v2540_v40 = vrot.slane %v2539_v14, 1  ;;  %v2560_v27 = vmax.f32 %v2558_v45, %v2559_v15 }
 0x2ed   :  { %v14138_v18 = vmax.f32 %v2532_v58, %v2533_v53  ;;  %v2547_v61 = vrot.slane %v2546_v35, 1  ;;  %v2554_v39 = vrot.slane %v2553_v29, 1  ;;  %v2566_v28 = vrot.slane %v2565_v34, 2 }
 0x2ee   :  { %v14140_v30 = vmax.f32 %v2539_v14, %v2540_v40  ;;  %v2561_v2 = vrot.slane %v2560_v27, 1  ;;  %v2570_v11 = vsel %vm2065_vm2, %v14099_v25, -inf  ;;  %v2577_v10 = vsel %vm2065_vm2, %v1882_v13, -inf }
 0x2ef   :  { %v14145_v43 = vmax.f32 %v2546_v35, %v2547_v61  ;;  %v14147_v17 = vmax.f32 %v2553_v29, %v2554_v39  ;;  %v2567_v44 = vmax.f32 %v2565_v34, %v2566_v28  ;;  %v2571_v23 = vrot.slane %v2570_v11, 4 }
 0x2f0   :  { %v14149_v50 = vmax.f32 %v2560_v27, %v2561_v2  ;;  %v2578_v42 = vrot.slane %v2577_v10, 4  ;;  %v2584_v32 = vsel %vm2065_vm2, %v14110_v4, -inf  ;;  %v2591_v16 = vsel %vm2065_vm2, %v1883_v33, -inf }
 0x2f1   :  { %v2568_v25 = vrot.slane %v2567_v44, 1  ;;  %v2572_v1 = vmax.f32 %v2570_v11, %v2571_v23  ;;  %v2585_v13 = vrot.slane %v2584_v32, 4  ;;  %v2592_v46 = vrot.slane %v2591_v16, 4 }
 0x2f2   :  { %v2579_v47 = vmax.f32 %v2577_v10, %v2578_v42  ;;  %v2598_v59 = vsel %vm2065_vm2, %v14115_v8, -inf  ;;  %v2605_v5 = vsel %vm2065_vm2, %v1899_v55, -inf  ;;  %v2612_v7 = vsel %vm2065_vm2, %v14123_v38, -inf }
 0x2f3   :  { %v2569_v3 = vmax.f32 %v2567_v44, %v2568_v25  ;;  %v2573_v4 = vrot.slane %v2572_v1, 2  ;;  %v2586_v22 = vmax.f32 %v2584_v32, %v2585_v13  ;;  %v2593_v33 = vmax.f32 %v2591_v16, %v2592_v46 }
 0x2f4   :  { %v2580_v63 = vrot.slane %v2579_v47, 2  ;;  %v2599_v36 = vrot.slane %v2598_v59, 4  ;;  %v2606_v41 = vrot.slane %v2605_v5, 4  ;;  %v2613_v45 = vrot.slane %v2612_v7, 4 }
 0x2f5   :  { %v2574_v58 = vmax.f32 %v2572_v1, %v2573_v4  ;;  %v2587_v9 = vrot.slane %v2586_v22, 2  ;;  %v2594_v52 = vrot.slane %v2593_v33, 2  ;;  %v2619_v8 = vsel %vm2065_vm2, %v1900_v20, -inf }
 0x2f6   :  { %v2581_v55 = vmax.f32 %v2579_v47, %v2580_v63  ;;  %v2600_v37 = vmax.f32 %v2598_v59, %v2599_v36  ;;  %v2607_v21 = vmax.f32 %v2605_v5, %v2606_v41  ;;  %v2614_v19 = vmax.f32 %v2612_v7, %v2613_v45  ;;  %v14176_v63 = vld [vmem:[#allocation3 + $0x4] ss:$8 sps:$4 sm:$0xff]  }
 0x2f7   :  { %v2575_v14 = vrot.slane %v2574_v58, 1  ;;  %v2588_v15 = vmax.f32 %v2586_v22, %v2587_v9  ;;  %v2595_v53 = vmax.f32 %v2593_v33, %v2594_v52  ;;  %v2620_v35 = vrot.slane %v2619_v8, 4 }
 0x2f8   :  { %v2582_v29 = vrot.slane %v2581_v55, 1  ;;  %v2601_v34 = vrot.slane %v2600_v37, 2  ;;  %v2608_v40 = vrot.slane %v2607_v21, 2  ;;  %v2615_v27 = vrot.slane %v2614_v19, 2 }
 0x2f9   :  { %v2576_v61 = vmax.f32 %v2574_v58, %v2575_v14  ;;  %v2589_v39 = vrot.slane %v2588_v15, 1  ;;  %v2596_v28 = vrot.slane %v2595_v53, 1  ;;  %v2621_v2 = vmax.f32 %v2619_v8, %v2620_v35 }
 0x2fa   :  { %v2583_v11 = vmax.f32 %v2581_v55, %v2582_v29  ;;  %v2602_v38 = vmax.f32 %v2600_v37, %v2601_v34  ;;  %v2609_v10 = vmax.f32 %v2607_v21, %v2608_v40  ;;  %v2616_v20 = vmax.f32 %v2614_v19, %v2615_v27 }
 0x2fb   :  { %v2590_v44 = vmax.f32 %v2588_v15, %v2589_v39  ;;  %v2597_v23 = vmax.f32 %v2595_v53, %v2596_v28  ;;  %v2622_v42 = vrot.slane %v2621_v2, 2  ;;  %v2770_v32 = vmax.f32 %v14134_v57, %v14138_v18 }
 0x2fc   :  { %v2603_v16 = vrot.slane %v2602_v38, 1  ;;  %v2610_v25 = vrot.slane %v2609_v10, 1  ;;  %v2617_v1 = vrot.slane %v2616_v20, 1  ;;  %v2771_v13 = vmax.f32 %v14136_v31, %v14140_v30 }
 0x2fd   :  { %v2623_v46 = vmax.f32 %v2621_v2, %v2622_v42  ;;  %v2772_v47 = vmax.f32 %v14145_v43, %v14149_v50  ;;  %v2773_v59 = vmax.f32 %v14147_v17, %v2569_v3  ;;  %v2774_v5 = vmax.f32 %v2576_v61, %v2590_v44 }
 0x2fe   :  { %v2604_v7 = vmax.f32 %v2602_v38, %v2603_v16  ;;  %v2611_v4 = vmax.f32 %v2609_v10, %v2610_v25  ;;  %v2618_v22 = vmax.f32 %v2616_v20, %v2617_v1  ;;  %v2775_v33 = vmax.f32 %v2583_v11, %v2597_v23 }
 0x2ff   :  { %v2624_v57 = vrot.slane %v2623_v46, 1  ;;  %v2872_v18 = vsel %vm2848_vm6, %v2770_v32, %v14102_v0  ;;  %v2877_v31 = vsel %vm2848_vm6, %v2771_v13, %v14105_v24  ;;  %v1527_v30 = vcombine.low %v1319_v12, %v1320_v56 }
 0x300   :  { %v2776_v43 = vmax.f32 %v2604_v7, %v2618_v22  ;;  %v2873_v17 = vsel %vm2850_vm7, %v2772_v47, %v2872_v18  ;;  %v2878_v50 = vsel %vm2850_vm7, %v2773_v59, %v2877_v31  ;;  %v1528_v3 = vcombine.high %v1319_v12, %v1320_v56 }
 0x301   :  { %v1535_v0 = vrot.slane %v13610_v60, %v13619_v62  ;;  %v2625_v36 = vmax.f32 %v2623_v46, %v2624_v57  ;;  %2901 = vst [vmem:[#allocation3 + $0x20] sm:$0xfc] %v2873_v17  ;;  %2902 = vst [vmem:[#allocation3 + $0x28] sm:$0xfc] %v2878_v50  ;;  %v1549_v24 = vrot.slane %v1527_v30, %v13619_v62  ;;  %v3036_v6 = vrot.slane %v14176_v63, 5 }
 0x302   :  { %v1542_v41 = vrot.slane %v13612_v51, %v13619_v62  ;;  %v14198_v45 = vsel %vm2857_vm8, %v2776_v43, %v2774_v5  ;;  %v1556_v58 = vrot.slane %v1528_v3, %v13619_v62 }
 0x303   :  { %v2777_v26 = vmax.f32 %v2611_v4, %v2625_v36  ;;  %v1557_v12 = vcombine.low %v1535_v0, %v1549_v24  ;;  %v1558_v56 = vcombine.high %v1535_v0, %v1549_v24  ;;  %v10728_v9 = vcombine.low %v1549_v24, %v1549_v24 }
 0x304   :  { %v1559_v60 = vcombine.low %v1542_v41, %v1556_v58  ;;  %v1560_v52 = vcombine.high %v1542_v41, %v1556_v58  ;;  %v10729_v8 = vcombine.high %v1549_v24, %v1549_v24  ;;  %v10730_v55 = vcombine.low %v1556_v58, %v1556_v58 }
 0x305   :  { %v14203_v37 = vsel %vm2857_vm8, %v2777_v26, %v2775_v33  ;;  %v1908_v51 = vrot.slane %v1557_v12, %v13619_v62  ;;  %v1915_v21 = vrot.slane %v10728_v9, %v13619_v62  ;;  %v1925_v19 = vrot.slane %v1558_v56, %v13619_v62 }
 0x306   :  { %v1932_v14 = vrot.slane %v10729_v8, %v13619_v62  ;;  %v14210_v15 = vrot.slane %v1559_v60, %v13619_v62  ;;  %v14213_v53 = vrot.slane %v10730_v55, %v13619_v62  ;;  %v10731_v35 = vcombine.high %v1556_v58, %v1556_v58 }
 0x307   :  { %v1916_v29 = vcombine.high %v1908_v51, %v1908_v51  ;;  %v1917_v34 = vcombine.high %v1915_v21, %v1915_v21  ;;  %v1933_v40 = vcombine.high %v1925_v19, %v1925_v19  ;;  %v14216_v27 = vrot.slane %v1560_v52, %v13619_v62 }
 0x308   :  { %v1934_v61 = vcombine.high %v1932_v14, %v1932_v14  ;;  %v1950_v39 = vcombine.high %v14210_v15, %v14210_v15  ;;  %v1951_v28 = vcombine.high %v14213_v53, %v14213_v53  ;;  %v14223_v2 = vrot.slane %v10731_v35, %v13619_v62 }
 0x309   :  { %v1967_v11 = vcombine.high %v14216_v27, %v14216_v27  ;;  %v2626_v38 = vsel %vm2065_vm2, %v1908_v51, -inf  ;;  %v2633_v10 = vsel %vm2065_vm2, %v1916_v29, -inf  ;;  %v2640_v20 = vsel %vm2065_vm2, %v1915_v21, -inf }
 0x30a   :  { %v1968_v44 = vcombine.high %v14223_v2, %v14223_v2  ;;  %v2627_v23 = vrot.slane %v2626_v38, 4  ;;  %v2634_v42 = vrot.slane %v2633_v10, 4  ;;  %v2641_v32 = vrot.slane %v2640_v20, 4 }
 0x30b   :  { %v2647_v16 = vsel %vm2065_vm2, %v1917_v34, -inf  ;;  %v2654_v25 = vsel %vm2065_vm2, %v1925_v19, -inf  ;;  %v2661_v1 = vsel %vm2065_vm2, %v1933_v40, -inf  ;;  %v2668_v13 = vsel %vm2065_vm2, %v1932_v14, -inf }
 0x30c   :  { %v2628_v46 = vmax.f32 %v2626_v38, %v2627_v23  ;;  %v2635_v47 = vmax.f32 %v2633_v10, %v2634_v42  ;;  %v2642_v59 = vmax.f32 %v2640_v20, %v2641_v32  ;;  %v2648_v5 = vrot.slane %v2647_v16, 4 }
 0x30d   :  { %v2655_v7 = vrot.slane %v2654_v25, 4  ;;  %v2662_v4 = vrot.slane %v2661_v1, 4  ;;  %v2669_v22 = vrot.slane %v2668_v13, 4  ;;  %v2675_v33 = vsel %vm2065_vm2, %v1934_v61, -inf }
 0x30e   :  { %v2629_v57 = vrot.slane %v2628_v46, 2  ;;  %v2636_v18 = vrot.slane %v2635_v47, 2  ;;  %v2643_v31 = vrot.slane %v2642_v59, 2  ;;  %v2649_v30 = vmax.f32 %v2647_v16, %v2648_v5 }
 0x30f   :  { %v2656_v43 = vmax.f32 %v2654_v25, %v2655_v7  ;;  %v2663_v17 = vmax.f32 %v2661_v1, %v2662_v4  ;;  %v2670_v50 = vmax.f32 %v2668_v13, %v2669_v22  ;;  %v2676_v3 = vrot.slane %v2675_v33, 4 }
 0x310   :  { %v2630_v0 = vmax.f32 %v2628_v46, %v2629_v57  ;;  %v2637_v36 = vmax.f32 %v2635_v47, %v2636_v18  ;;  %v2644_v24 = vmax.f32 %v2642_v59, %v2643_v31  ;;  %v2650_v41 = vrot.slane %v2649_v30, 2 }
 0x311   :  { %v2657_v58 = vrot.slane %v2656_v43, 2  ;;  %v2664_v26 = vrot.slane %v2663_v17, 2  ;;  %v2671_v12 = vrot.slane %v2670_v50, 2  ;;  %v2677_v56 = vmax.f32 %v2675_v33, %v2676_v3 }
 0x312   :  { %v2631_v9 = vrot.slane %v2630_v0, 1  ;;  %v2638_v60 = vrot.slane %v2637_v36, 1  ;;  %v2645_v52 = vrot.slane %v2644_v24, 1  ;;  %v2651_v8 = vmax.f32 %v2649_v30, %v2650_v41 }
 0x313   :  { %v2658_v55 = vmax.f32 %v2656_v43, %v2657_v58  ;;  %v2665_v51 = vmax.f32 %v2663_v17, %v2664_v26  ;;  %v2672_v21 = vmax.f32 %v2670_v50, %v2671_v12  ;;  %v2678_v19 = vrot.slane %v2677_v56, 2 }
 0x314   :  { %v14237_v14 = vmax.f32 %v2630_v0, %v2631_v9  ;;  %v14239_v35 = vmax.f32 %v2637_v36, %v2638_v60  ;;  %v14241_v29 = vmax.f32 %v2644_v24, %v2645_v52  ;;  %v2652_v34 = vrot.slane %v2651_v8, 1 }
 0x315   :  { %v2659_v40 = vrot.slane %v2658_v55, 1  ;;  %v2666_v61 = vrot.slane %v2665_v51, 1  ;;  %v2673_v38 = vrot.slane %v2672_v21, 1  ;;  %v2679_v10 = vmax.f32 %v2677_v56, %v2678_v19 }
 0x316   :  { %v14243_v20 = vmax.f32 %v2651_v8, %v2652_v34  ;;  %v2682_v23 = vsel %vm2065_vm2, %v14210_v15, -inf  ;;  %v2689_v42 = vsel %vm2065_vm2, %v1950_v39, -inf  ;;  %v2696_v32 = vsel %vm2065_vm2, %v14213_v53, -inf }
 0x317   :  { %v14250_v16 = vmax.f32 %v2658_v55, %v2659_v40  ;;  %v14252_v25 = vmax.f32 %v2665_v51, %v2666_v61  ;;  %v14254_v1 = vmax.f32 %v2672_v21, %v2673_v38  ;;  %v2680_v13 = vrot.slane %v2679_v10, 1 }
 0x318   :  { %v2683_v46 = vrot.slane %v2682_v23, 4  ;;  %v2690_v47 = vrot.slane %v2689_v42, 4  ;;  %v2697_v59 = vrot.slane %v2696_v32, 4  ;;  %v2703_v15 = vsel %vm2065_vm2, %v1951_v28, -inf }
 0x319   :  { %v14260_v5 = vmax.f32 %v2679_v10, %v2680_v13  ;;  %v2704_v39 = vrot.slane %v2703_v15, 4  ;;  %v2710_v7 = vsel %vm2065_vm2, %v14216_v27, -inf  ;;  %v2717_v4 = vsel %vm2065_vm2, %v1967_v11, -inf }
 0x31a   :  { %v2684_v22 = vmax.f32 %v2682_v23, %v2683_v46  ;;  %v2691_v33 = vmax.f32 %v2689_v42, %v2690_v47  ;;  %v2698_v57 = vmax.f32 %v2696_v32, %v2697_v59  ;;  %v2711_v18 = vrot.slane %v2710_v7, 4 }
 0x31b   :  { %v2705_v31 = vmax.f32 %v2703_v15, %v2704_v39  ;;  %v2718_v30 = vrot.slane %v2717_v4, 4  ;;  %v2724_v53 = vsel %vm2065_vm2, %v14223_v2, -inf  ;;  %v2731_v28 = vsel %vm2065_vm2, %v1968_v44, -inf  ;;  %v11921_v15 = vld [vmem:[#allocation3] ss:$8 sps:$4 sm:$0xee]  }
 0x31c   :  { %v2685_v43 = vrot.slane %v2684_v22, 2  ;;  %v2692_v17 = vrot.slane %v2691_v33, 2  ;;  %v2699_v50 = vrot.slane %v2698_v57, 2  ;;  %v2712_v27 = vmax.f32 %v2710_v7, %v2711_v18  ;;  %v11924_v39 = vld [vmem:[#allocation3 + $0x10] ss:$8 sps:$4 sm:$0xff]  }
 0x31d   :  { %v2706_v3 = vrot.slane %v2705_v31, 2  ;;  %v2719_v11 = vmax.f32 %v2717_v4, %v2718_v30  ;;  %v2725_v0 = vrot.slane %v2724_v53, 4  ;;  %v2732_v36 = vrot.slane %v2731_v28, 4 }
 0x31e   :  { %v2686_v24 = vmax.f32 %v2684_v22, %v2685_v43  ;;  %v2693_v41 = vmax.f32 %v2691_v33, %v2692_v17  ;;  %v2700_v58 = vmax.f32 %v2698_v57, %v2699_v50  ;;  %v2713_v26 = vrot.slane %v2712_v27, 2  ;;  %v11926_v57 = vld [vmem:[#allocation3 + $0x14] ss:$8 sps:$4 sm:$0x11]  }
 0x31f   :  { %v2707_v12 = vmax.f32 %v2705_v31, %v2706_v3  ;;  %v2720_v56 = vrot.slane %v2719_v11, 2  ;;  %v2726_v9 = vmax.f32 %v2724_v53, %v2725_v0  ;;  %v2733_v60 = vmax.f32 %v2731_v28, %v2732_v36 }
 0x320   :  { %v2687_v2 = vrot.slane %v2686_v24, 1  ;;  %v2694_v44 = vrot.slane %v2693_v41, 1  ;;  %v2701_v52 = vrot.slane %v2700_v58, 1  ;;  %v2714_v8 = vmax.f32 %v2712_v27, %v2713_v26 }
 0x321   :  { %v2708_v55 = vrot.slane %v2707_v12, 1  ;;  %v2721_v51 = vmax.f32 %v2719_v11, %v2720_v56  ;;  %v2727_v21 = vrot.slane %v2726_v9, 2  ;;  %v2734_v19 = vrot.slane %v2733_v60, 2 }
 0x322   :  { %v2688_v34 = vmax.f32 %v2686_v24, %v2687_v2  ;;  %v2695_v40 = vmax.f32 %v2693_v41, %v2694_v44  ;;  %v2702_v61 = vmax.f32 %v2700_v58, %v2701_v52  ;;  %v2715_v38 = vrot.slane %v2714_v8, 1 }
 0x323   :  { %v2709_v10 = vmax.f32 %v2707_v12, %v2708_v55  ;;  %v2722_v23 = vrot.slane %v2721_v51, 1  ;;  %v2728_v42 = vmax.f32 %v2726_v9, %v2727_v21  ;;  %v2735_v32 = vmax.f32 %v2733_v60, %v2734_v19  ;;  %v11933_v55 = vld [vmem:[#allocation11 + $0x8] ss:$16 sps:$4 sm:$0xff]   ;;  %v11941_v21 = vld [vmem:[#allocation11 + $0x2c] ss:$16 sps:$4 sm:$0xff]  }
 0x324   :  { %v2716_v13 = vmax.f32 %v2714_v8, %v2715_v38  ;;  %v2778_v46 = vmax.f32 %v14237_v14, %v14241_v29  ;;  %v2779_v47 = vmax.f32 %v14239_v35, %v14243_v20  ;;  %v2780_v59 = vmax.f32 %v14250_v16, %v14254_v1  ;;  %v11927_v29 = vld [vmem:[#allocation3 + $0x20] ss:$8 sps:$4 sm:$0xee]   ;;  %v11929_v20 = vld [vmem:[#allocation3 + $0x24] ss:$8 sps:$4 sm:$0xff]  }
 0x325   :  { %v2723_v7 = vmax.f32 %v2721_v51, %v2722_v23  ;;  %v2729_v4 = vrot.slane %v2728_v42, 1  ;;  %v2736_v22 = vrot.slane %v2735_v32, 1  ;;  %v2781_v33 = vmax.f32 %v14252_v25, %v14260_v5  ;;  %v11930_v8 = vld [vmem:[#allocation11] ss:$16 sps:$4 sm:$0xff]   ;;  %v11938_v51 = vld [vmem:[#allocation11 + $0x24] ss:$16 sps:$4 sm:$0xff]  }
 0x326   :  { %v2782_v18 = vmax.f32 %v2688_v34, %v2702_v61  ;;  %v2783_v31 = vmax.f32 %v2695_v40, %v2709_v10  ;;  %v2880_v14 = vsel %vm2859_vm9, %v2778_v46, %v14198_v45  ;;  %v2885_v35 = vsel %vm2859_vm9, %v2779_v47, %v14203_v37  ;;  %v11936_v19 = vld [vmem:[#allocation11 + $0x20] ss:$16 sps:$4 sm:$0xff]   ;;  %v11947_v61 = vld [vmem:[#allocation11 + $0x44] ss:$16 sps:$4 sm:$0xff]   ;;  %v11950_v38 = vld [vmem:[#allocation11 + $0x4c] ss:$16 sps:$4 sm:$0xff]  }
 0x327   :  { %v2730_v16 = vmax.f32 %v2728_v42, %v2729_v4  ;;  %v2737_v1 = vmax.f32 %v2735_v32, %v2736_v22  ;;  %v2881_v30 = vsel %vm2842_vm3, %v2780_v59, %v2880_v14  ;;  %v2886_v53 = vsel %vm2842_vm3, %v2781_v33, %v2885_v35  ;;  %v14310_v32 = vld [vmem:[#allocation3 + $0x28] sm:$0xff]  ;;  %v11952_v14 = vld [vmem:[#allocation11 + $0x60] ss:$16 sps:$4 sm:$0xff]  }
 0x328   :  { %v2882_v28 = vsel %vm2844_vm4, %v2782_v18, %v2881_v30  ;;  %v2887_v25 = vsel %vm2844_vm4, %v2783_v31, %v2886_v53  ;;  %v10736_v5 = vrot.slane %v11921_v15, 9  ;;  %v3038_v45 = vrot.slane %v3036_v6, 4  ;;  %v11948_v46 = vld [vmem:[#allocation11 + $0x48] ss:$16 sps:$4 sm:$0xff]   ;;  %v2908_v15 = vld [vmem:[#allocation3 + $0x18] sm:$0xf] }
 0x329   :  { %v2784_v43 = vmax.f32 %v2716_v13, %v2730_v16  ;;  %v2785_v17 = vmax.f32 %v2723_v7, %v2737_v1  ;;  %v3039_v50 = vrot.slane %v11924_v39, 5  ;;  %v3042_v27 = vrot.slane %v11926_v57, 5  ;;  %v11945_v13 = vld [vmem:[#allocation11 + $0x40] ss:$16 sps:$4 sm:$0xff]   ;;  %v11954_v39 = vld [vmem:[#allocation11 + $0x64] ss:$16 sps:$4 sm:$0xff]  }
 0x32a   :  { %v10737_v3 = vrot.slane %v11927_v29, 9  ;;  %v3046_v11 = vrot.slane %v11929_v20, 5  ;;  %v3037_v26 = vsel %vm14294_vm12, %v10736_v5, %v3036_v6  ;;  %v11939_v6 = vld [vmem:[#allocation11 + $0x28] ss:$16 sps:$4 sm:$0xff]   ;;  %v11957_v7 = vld [vmem:[#allocation11 + $0x6c] ss:$16 sps:$4 sm:$0xff]   ;;  %v10733_v33 = vcombine.low %v2908_v15, %v14310_v32 }
 0x32b   :  { %v2883_v0 = vsel %vm2846_vm5, %v2784_v43, %v2882_v28  ;;  %v2888_v36 = vsel %vm2846_vm5, %v2785_v17, %v2887_v25  ;;  %v3040_v24 = vsel %vm14294_vm12, %v3038_v45, %v3039_v50  ;;  %v3041_v41 = vrot.slane %v3039_v50, 4  ;;  %v2906_v31 = vld [vmem:[#allocation3 + $0x8] sm:$0xff]  ;;  %v11963_v16 = vld [vmem:[#allocation11 + $0x8c] ss:$16 sps:$4 sm:$0xff]   ;;  %v11958_v1 = vld [vmem:[#allocation11 + $0x80] ss:$16 sps:$4 sm:$0xff]  }
 0x32c   :  { %2903 = vst [vmem:[#allocation3 + $0x30] sm:$0x3f] %v2883_v0  ;;  %2904 = vst [vmem:[#allocation3 + $0x38] sm:$0x3f] %v2888_v36  ;;  %v3047_v58 = vsel %vm14294_vm12, %v10737_v3, %v3046_v11  ;;  %v3054_v56 = vcombine.low %v3037_v26, %v3040_v24  ;;  %v3055_v9 = vcombine.high %v3037_v26, %v3040_v24  ;;  %v3048_v10 = vrot.slane %v3046_v11, 4 }
 0x32d   :  { %v3043_v12 = vsel %vm14294_vm12, %v3041_v41, %v3042_v27  ;;  %v11955_v35 = vld [vmem:[#allocation11 + $0x68] ss:$16 sps:$4 sm:$0xff]   ;;  %v2940_v29 = vpack.c.bf16 %v10733_v33, %v2906_v31  ;;  %v11960_v20 = vld [vmem:[#allocation11 + $0x84] ss:$16 sps:$4 sm:$0xff]   ;;  %v11969_v28 = vld [vmem:[#allocation11 + $0xac] ss:$16 sps:$4 sm:$0xff]  }
 0x32e   :  { %v3056_v60 = vcombine.low %v3043_v12, %v3047_v58  ;;  %v3057_v2 = vcombine.high %v3043_v12, %v3047_v58  ;;  %v11961_v30 = vld [vmem:[#allocation11 + $0x88] ss:$16 sps:$4 sm:$0xff]   ;;  %v11966_v53 = vld [vmem:[#allocation11 + $0xa4] ss:$16 sps:$4 sm:$0xff]   ;;  %v11964_v25 = vld [vmem:[#allocation11 + $0xa0] ss:$16 sps:$4 sm:$0xff]  }
 0x32f   :  { %v11967_v5 = vld [vmem:[#allocation11 + $0xa8] ss:$16 sps:$4 sm:$0xff]   ;;  %v11972_v43 = vld [vmem:[#allocation11 + $0xc4] ss:$16 sps:$4 sm:$0xff]   ;;  %v11975_v17 = vld [vmem:[#allocation11 + $0xcc] ss:$16 sps:$4 sm:$0xff]  }
 0x330   :  { %v3066_v44 = vpack.c.bf16 %v3056_v60, %v3054_v56  ;;  %v3067_v52 = vpack.c.bf16 %v3057_v2, %v3055_v9  ;;  %v11970_v45 = vld [vmem:[#allocation11 + $0xc0] ss:$16 sps:$4 sm:$0xff]   ;;  %v11973_v50 = vld [vmem:[#allocation11 + $0xc8] ss:$16 sps:$4 sm:$0xff]   ;;  %v11978_v37 = vld [vmem:[#allocation11 + $0xe4] ss:$16 sps:$4 sm:$0xff]  }
 0x331   :  { %v11981_v27 = vld [vmem:[#allocation11 + $0xec] ss:$16 sps:$4 sm:$0xff]   ;;  %v11976_v3 = vld [vmem:[#allocation11 + $0xe0] ss:$16 sps:$4 sm:$0xff]   ;;  %v11979_v11 = vld [vmem:[#allocation11 + $0xe8] ss:$16 sps:$4 sm:$0xff]  }
 0x332   :  { %3487 = vmatprep.mubr.bf16.mxu0 %v3067_v52  ;;  %3538 = vmatprep.mubr.bf16.mxu1 %v3067_v52  ;;  %v11984_v0 = vld [vmem:[#allocation11 + $0x104] ss:$16 sps:$4 sm:$0xff]   ;;  %v11987_v36 = vld [vmem:[#allocation11 + $0x10c] ss:$16 sps:$4 sm:$0xff]   ;;  %v11982_v24 = vld [vmem:[#allocation11 + $0x100] ss:$16 sps:$4 sm:$0xff]  }
 0x333   :  { %3488 = vmatmul.mubr.bf16.vlgmr.msra.gmra.mrb[12].mxu0 %v3066_v44  ;;  %3539 = vmatmul.mubr.bf16.vlgmr.msra.gmra.mrb[20].mxu1 %v3066_v44  ;;  %v11942_v63 = vld [vmem:[#allocation3 + $0x30] ss:$8 sps:$4 sm:$0xff]   ;;  %v11944_v34 = vld [vmem:[#allocation3 + $0x34] ss:$8 sps:$4 sm:$0x11]  }
 0x334   :  { %3878 = vmatpush1.bf16.msra.mxu0 %v11930_v8  ;;  %3929 = vmatpush1.bf16.msra.mxu1 %v11933_v55  ;;  %v3049_v40 = vrot.slane %v11942_v63, 5  ;;  %v3052_v42 = vrot.slane %v11944_v34, 5  ;;  %v11985_v41 = vld [vmem:[#allocation11 + $0x108] ss:$16 sps:$4 sm:$0xff]   ;;  %v11990_v58 = vld [vmem:[#allocation11 + $0x124] ss:$16 sps:$4 sm:$0xff]  }
 0x335   :  { %3879 = vmatprep.subr.bf16.mxu0 %v11938_v51  ;;  %3930 = vmatprep.subr.bf16.mxu1 %v11941_v21  ;;  %v11993_v26 = vld [vmem:[#allocation11 + $0x12c] ss:$16 sps:$4 sm:$0xff]   ;;  %v11988_v12 = vld [vmem:[#allocation11 + $0x120] ss:$16 sps:$4 sm:$0xff]   ;;  %v11991_v56 = vld [vmem:[#allocation11 + $0x128] ss:$16 sps:$4 sm:$0xff]  }
 0x336   :  { %v3051_v23 = vrot.slane %v3049_v40, 4  ;;  %v3050_v47 = vsel %vm14294_vm12, %v3048_v10, %v3049_v40  ;;  %v11996_v9 = vld [vmem:[#allocation11 + $0x144] ss:$16 sps:$4 sm:$0xff]   ;;  %v11999_v60 = vld [vmem:[#allocation11 + $0x14c] ss:$16 sps:$4 sm:$0xff]  }
 0x337   :  { %v11994_v2 = vld [vmem:[#allocation11 + $0x140] ss:$16 sps:$4 sm:$0xff]   ;;  %v11997_v44 = vld [vmem:[#allocation11 + $0x148] ss:$16 sps:$4 sm:$0xff]   ;;  %v12002_v52 = vld [vmem:[#allocation11 + $0x164] ss:$16 sps:$4 sm:$0xff]  }
 0x338   :  { %3880 = vmatpush1.bf16.msra.mxu0 %v11936_v19  ;;  %3931 = vmatpush1.bf16.msra.mxu1 %v11939_v6  ;;  %v3053_v59 = vsel %vm14294_vm12, %v3051_v23, %v3052_v42  ;;  %v12005_v8 = vld [vmem:[#allocation11 + $0x16c] ss:$16 sps:$4 sm:$0xff]   ;;  %v12000_v55 = vld [vmem:[#allocation11 + $0x160] ss:$16 sps:$4 sm:$0xff]   ;;  %v12003_v51 = vld [vmem:[#allocation11 + $0x168] ss:$16 sps:$4 sm:$0xff]  }
 0x339   :  { %3881 = vmatprep.subr.bf16.mxu0 %v11947_v61  ;;  %3932 = vmatprep.subr.bf16.mxu1 %v11950_v38  ;;  %v3059_v4 = vcombine.high %v3050_v47, %v3053_v59  ;;  %v3058_v22 = vcombine.low %v3050_v47, %v3053_v59  ;;  %v12008_v21 = vld [vmem:[#allocation11 + $0x184] ss:$16 sps:$4 sm:$0xff]   ;;  %v12011_v19 = vld [vmem:[#allocation11 + $0x18c] ss:$16 sps:$4 sm:$0xff]   ;;  %v12006_v63 = vld [vmem:[#allocation11 + $0x180] ss:$16 sps:$4 sm:$0xff]  }
 0x33a   :  { %v12009_v6 = vld [vmem:[#allocation11 + $0x188] ss:$16 sps:$4 sm:$0xff]   ;;  %v12014_v34 = vld [vmem:[#allocation11 + $0x1a4] ss:$16 sps:$4 sm:$0xff]   ;;  %v12017_v40 = vld [vmem:[#allocation11 + $0x1ac] ss:$16 sps:$4 sm:$0xff]  }
 0x33b   :  { %v3069_v57 = vpack.c.bf16 %v3059_v4, %v3059_v4  ;;  %v3068_v18 = vpack.c.bf16 %v3058_v22, %v3058_v22  ;;  %v12012_v61 = vld [vmem:[#allocation11 + $0x1a0] ss:$16 sps:$4 sm:$0xff]   ;;  %v12015_v38 = vld [vmem:[#allocation11 + $0x1a8] ss:$16 sps:$4 sm:$0xff]   ;;  %v12020_v10 = vld [vmem:[#allocation11 + $0x1c4] ss:$16 sps:$4 sm:$0xff]  }
 0x33c   :  { %3882 = vmatpush1.bf16.msra.mxu0 %v11945_v13  ;;  %3933 = vmatpush1.bf16.msra.mxu1 %v11948_v46  ;;  %v12023_v23 = vld [vmem:[#allocation11 + $0x1cc] ss:$16 sps:$4 sm:$0xff]   ;;  %v2912_v42 = vld [vmem:[#allocation3 + $0x38] sm:$0xf]  ;;  %v12018_v13 = vld [vmem:[#allocation11 + $0x1c0] ss:$16 sps:$4 sm:$0xff]  }
 0x33d   :  { %3883 = vmatprep.subr.bf16.mxu0 %v11954_v39  ;;  %3934 = vmatprep.subr.bf16.mxu1 %v11957_v7  ;;  %v12021_v46 = vld [vmem:[#allocation11 + $0x1c8] ss:$16 sps:$4 sm:$0xff]   ;;  %v12054_v47 = vld [vmem:[#allocation3 + $0x10] ss:$8 sps:$4 sm:$0xff]   ;;  %v2909_v7 = vld [vmem:[#allocation3 + $0x20] sm:$0xff] }
 0x33e   :  { %3497 = vmatprep.mubr.bf16.mxu0 %v3069_v57  ;;  %3548 = vmatprep.mubr.bf16.mxu1 %v3069_v57  ;;  %v12026_v59 = vld [vmem:[#allocation11 + $0x1e4] ss:$16 sps:$4 sm:$0xff]   ;;  %v12029_v15 = vld [vmem:[#allocation11 + $0x1ec] ss:$16 sps:$4 sm:$0xff]   ;;  %v12053_v22 = vld [vmem:[#allocation3 + $0x4] ss:$8 sps:$4 sm:$0xff]  }
 0x33f   :  { %3498 = vmatmul.mubr.bf16.gmra.mrb[16].mxu0 %v3068_v18  ;;  %3549 = vmatmul.mubr.bf16.gmra.mrb[24].mxu1 %v3068_v18  ;;  %v2911_v39 = vld [vmem:[#allocation3 + $0x30] sm:$0xf]  ;;  %v12057_v33 = vld [vmem:[#allocation3 + $0x20] ss:$8 sps:$4 sm:$0xcc]  }
 0x340   :  { %3909 = vmatprep.mubr.bf16.mxu0 %v2940_v29  ;;  %3960 = vmatprep.mubr.bf16.mxu1 %v2940_v29  ;;  %v2926_v4 = vcombine.low %v2911_v39, %v2912_v42  ;;  %v14317_v57 = vld [vmem:[#allocation3 + $0x24] ss:$8 sps:$4 sm:$0xff]   ;;  %v12033_v29 = vld [vmem:[#allocation11 + $0x404] ss:$16 sps:$4 sm:$0xff]  }
 0x341   :  { %3884 = vmatpush1.bf16.msra.mxu0 %v11952_v14  ;;  %3935 = vmatpush1.bf16.msra.mxu1 %v11955_v35  ;;  %v12024_v18 = vld [vmem:[#allocation11 + $0x1e0] ss:$16 sps:$4 sm:$0xff]   ;;  %v12027_v31 = vld [vmem:[#allocation11 + $0x1e8] ss:$16 sps:$4 sm:$0xff]   ;;  %v2907_v14 = vld [vmem:[#allocation3 + $0x10] sm:$0xf] }
 0x342   :  { %3885 = vmatprep.subr.bf16.mxu0 %v11960_v20  ;;  %3936 = vmatprep.subr.bf16.mxu1 %v11963_v16  ;;  %v10732_v35 = vcombine.low %v2907_v14, %v2909_v7  ;;  %v12036_v20 = vld [vmem:[#allocation11 + $0x40c] ss:$16 sps:$4 sm:$0xff]   ;;  %v4010_v16 = vrot.slane %v12054_v47, 6  ;;  %v12069_v42 = vld [vmem:[#allocation11 + $0x488] ss:$16 sps:$4 sm:$0xff]  }
 0x343   :  { %v12072_v47 = vld [vmem:[#allocation11 + $0x4a0] ss:$16 sps:$4 sm:$0xff]   ;;  %v12092_v14 = vld [vmem:[#allocation11 + $0x504] ss:$16 sps:$4 sm:$0xff]  }
 0x345   :  { %3886 = vmatpush1.bf16.msra.mxu0 %v11958_v1  ;;  %3937 = vmatpush1.bf16.msra.mxu1 %v11961_v30  ;;  %v10735_v1 = vcombine.high %v14310_v32, %v2926_v4  ;;  %v12051_v30 = vld [vmem:[#allocation3] ss:$8 sps:$4 sm:$0xcc]   ;;  %v12081_v4 = vld [vmem:[#allocation11 + $0x4c8] ss:$16 sps:$4 sm:$0xff]  }
 0x346   :  { %3887 = vmatprep.subr.bf16.mxu0 %v11966_v53  ;;  %3938 = vmatprep.subr.bf16.mxu1 %v11969_v28  ;;  %v12056_v53 = vld [vmem:[#allocation3 + $0x14] ss:$8 sps:$4 sm:$0x33]   ;;  %v4007_v28 = vrot.slane %v12053_v22, 6  ;;  %v12086_v22 = vld [vmem:[#allocation11 + $0x4e4] ss:$16 sps:$4 sm:$0xff]  }
 0x349   :  { %3888 = vmatpush1.bf16.msra.mxu0 %v11964_v25  ;;  %3939 = vmatpush1.bf16.msra.mxu1 %v11967_v5  ;;  %v10867_v25 = vrot.slane %v12057_v33, 10  ;;  %v4017_v5 = vrot.slane %v14317_v57, 6  ;;  %v12089_v33 = vld [vmem:[#allocation11 + $0x4ec] ss:$16 sps:$4 sm:$0xff]  }
 0x34a   :  { %3889 = vmatprep.subr.bf16.mxu0 %v11972_v43  ;;  %3940 = vmatprep.subr.bf16.mxu1 %v11975_v17  ;;  %v2905_v43 = vld [vmem:[#allocation3] sm:$0xff] }
 0x34b   :  { %v2939_v17 = vpack.c.bf16 %v10732_v35, %v2905_v43  ;;  %v12095_v35 = vld [vmem:[#allocation11 + $0x50c] ss:$16 sps:$4 sm:$0xff]   ;;  %v12102_v43 = vld [vmem:[#allocation11 + $0x540] ss:$16 sps:$4 sm:$0xff]  }
 0x34d   :  { %3890 = vmatpush1.bf16.msra.mxu0 %v11970_v45  ;;  %3941 = vmatpush1.bf16.msra.mxu1 %v11973_v50  ;;  %v12031_v45 = vld [vmem:[#allocation11 + $0x400] ss:$16 sps:$4 sm:$0xff]   ;;  %v12034_v50 = vld [vmem:[#allocation11 + $0x408] ss:$16 sps:$4 sm:$0xff]  }
 0x34e   :  { %3891 = vmatprep.subr.bf16.mxu0 %v11978_v37  ;;  %3942 = vmatprep.subr.bf16.mxu1 %v11981_v27  ;;  %v2925_v37 = vcombine.high %v2909_v7, %v14310_v32  ;;  %v4012_v27 = vrot.slane %v4010_v16, 4  ;;  %v14332_v32 = vsel %vm14324_vm14, %v10867_v25, %v4017_v5  ;;  %v12078_v7 = vld [vmem:[#allocation11 + $0x4c0] ss:$16 sps:$4 sm:$0xff]   ;;  %v12107_v25 = vld [vmem:[#allocation11 + $0x54c] ss:$16 sps:$4 sm:$0xff]  }
 0x351   :  { %3892 = vmatpush1.bf16.msra.mxu0 %v11976_v3  ;;  %3943 = vmatpush1.bf16.msra.mxu1 %v11979_v11  ;;  %v2942_v3 = vpack.c.bf16 %v10735_v1, %v10735_v1  ;;  %v12040_v11 = vld [vmem:[#allocation11 + $0x424] ss:$16 sps:$4 sm:$0xff]   ;;  %v12101_v1 = vld [vmem:[#allocation11 + $0x52c] ss:$16 sps:$4 sm:$0xff]  }
 0x352   :  { %3893 = vmatprep.subr.bf16.mxu0 %v11984_v0  ;;  %3944 = vmatprep.subr.bf16.mxu1 %v11987_v36  ;;  %v12043_v0 = vld [vmem:[#allocation11 + $0x42c] ss:$16 sps:$4 sm:$0xff]  }
 0x355   :  { %3894 = vmatpush1.bf16.msra.mxu0 %v11982_v24  ;;  %3945 = vmatpush1.bf16.msra.mxu1 %v11985_v41  ;;  %v10866_v24 = vrot.slane %v12051_v30, 10  ;;  %v4009_v41 = vrot.slane %v4007_v28, 4  ;;  %v12096_v30 = vld [vmem:[#allocation11 + $0x520] ss:$16 sps:$4 sm:$0xff]  }
 0x356   :  { %3895 = vmatprep.subr.bf16.mxu0 %v11990_v58  ;;  %3946 = vmatprep.subr.bf16.mxu1 %v11993_v26  ;;  %v4013_v58 = vrot.slane %v12056_v53, 6  ;;  %v12038_v26 = vld [vmem:[#allocation11 + $0x420] ss:$16 sps:$4 sm:$0xff]   ;;  %v12099_v53 = vld [vmem:[#allocation11 + $0x528] ss:$16 sps:$4 sm:$0xff]  }
 0x359   :  { %3896 = vmatpush1.bf16.msra.mxu0 %v11988_v12  ;;  %3947 = vmatpush1.bf16.msra.mxu1 %v11991_v56  ;;  %v12041_v12 = vld [vmem:[#allocation11 + $0x428] ss:$16 sps:$4 sm:$0xff]   ;;  %v10734_v56 = vcombine.low %v2925_v37, %v2911_v39  ;;  %v12083_v39 = vld [vmem:[#allocation11 + $0x4cc] ss:$16 sps:$4 sm:$0xff]   ;;  %v12108_v37 = vld [vmem:[#allocation11 + $0x560] ss:$16 sps:$4 sm:$0xff]  }
 0x35a   :  { %3897 = vmatprep.subr.bf16.mxu0 %v11996_v9  ;;  %3948 = vmatprep.subr.bf16.mxu1 %v11999_v60  ;;  %v14336_v9 = vsel %vm14324_vm14, %v4009_v41, %v4010_v16  ;;  %v14340_v60 = vsel %vm14324_vm14, %v4012_v27, %v4013_v58  ;;  %v12098_v16 = vld [vmem:[#allocation11 + $0x524] ss:$16 sps:$4 sm:$0xff]   ;;  %v12111_v27 = vld [vmem:[#allocation11 + $0x568] ss:$16 sps:$4 sm:$0xff]  }
 0x35b   :  { %v12117_v41 = vld [vmem:[#allocation11 + $0x588] ss:$16 sps:$4 sm:$0xff]   ;;  %v12122_v58 = vld [vmem:[#allocation11 + $0x5a4] ss:$16 sps:$4 sm:$0xff]  }
 0x35d   :  { %3898 = vmatpush1.bf16.msra.mxu0 %v11994_v2  ;;  %3949 = vmatpush1.bf16.msra.mxu1 %v11997_v44  ;;  %v12047_v2 = vld [vmem:[#allocation11 + $0x444] ss:$16 sps:$4 sm:$0xff]   ;;  %v12050_v44 = vld [vmem:[#allocation11 + $0x44c] ss:$16 sps:$4 sm:$0xff]  }
 0x35e   :  { %3899 = vmatprep.subr.bf16.mxu0 %v12002_v52  ;;  %3950 = vmatprep.subr.bf16.mxu1 %v12005_v8  ;;  %v4028_v52 = vcombine.high %v14340_v60, %v14332_v32  ;;  %v14346_v8 = vsel %vm14324_vm14, %v10866_v24, %v4007_v28  ;;  %v12104_v28 = vld [vmem:[#allocation11 + $0x544] ss:$16 sps:$4 sm:$0xff]   ;;  %v12114_v24 = vld [vmem:[#allocation11 + $0x580] ss:$16 sps:$4 sm:$0xff]  }
 0x361   :  { %3900 = vmatpush1.bf16.msra.mxu0 %v12000_v55  ;;  %3951 = vmatpush1.bf16.msra.mxu1 %v12003_v51  ;;  %v4026_v55 = vcombine.high %v14346_v8, %v14336_v9  ;;  %v2941_v51 = vpack.c.bf16 %v10734_v56, %v10734_v56  ;;  %v12120_v56 = vld [vmem:[#allocation11 + $0x5a0] ss:$16 sps:$4 sm:$0xff]  }
 0x362   :  { %3901 = vmatprep.subr.bf16.mxu0 %v12008_v21  ;;  %3952 = vmatprep.subr.bf16.mxu1 %v12011_v19  ;;  %v12045_v21 = vld [vmem:[#allocation11 + $0x440] ss:$16 sps:$4 sm:$0xff]   ;;  %v12048_v19 = vld [vmem:[#allocation11 + $0x448] ss:$16 sps:$4 sm:$0xff]  }
 0x365   :  { %3902 = vmatpush1.bf16.msra.mxu0 %v12006_v63  ;;  %3953 = vmatpush1.bf16.msra.mxu1 %v12009_v6  ;;  %v4038_v63 = vpack.c.bf16 %v4028_v52, %v4026_v55  ;;  %v12062_v6 = vld [vmem:[#allocation11 + $0x464] ss:$16 sps:$4 sm:$0xff]   ;;  %v12131_v52 = vld [vmem:[#allocation11 + $0x5cc] ss:$16 sps:$4 sm:$0xff]  }
 0x366   :  { %3903 = vmatprep.subr.bf16.mxu0 %v12014_v34  ;;  %3954 = vmatprep.subr.bf16.mxu1 %v12017_v40  ;;  %v12065_v34 = vld [vmem:[#allocation11 + $0x46c] ss:$16 sps:$4 sm:$0xff]   ;;  %v12060_v40 = vld [vmem:[#allocation11 + $0x460] ss:$16 sps:$4 sm:$0xff]  }
 0x367   :  { %v12146_v55 = vld [vmem:[#allocation3 + $0x34] ss:$8 sps:$4 sm:$0x33]  }
 0x369   :  { %3904 = vmatpush1.bf16.msra.mxu0 %v12012_v61  ;;  %3955 = vmatpush1.bf16.msra.mxu1 %v12015_v38  ;;  %v12063_v61 = vld [vmem:[#allocation11 + $0x468] ss:$16 sps:$4 sm:$0xff]   ;;  %v12068_v38 = vld [vmem:[#allocation11 + $0x484] ss:$16 sps:$4 sm:$0xff]  }
 0x36a   :  { %3905 = vmatprep.subr.bf16.mxu0 %v12020_v10  ;;  %3956 = vmatprep.subr.bf16.mxu1 %v12023_v23  ;;  %v12071_v10 = vld [vmem:[#allocation11 + $0x48c] ss:$16 sps:$4 sm:$0xff]   ;;  %v12066_v23 = vld [vmem:[#allocation11 + $0x480] ss:$16 sps:$4 sm:$0xff]  }
 0x36d   :  { %3906 = vmatpush1.bf16.msra.mxu0 %v12018_v13  ;;  %3957 = vmatpush1.bf16.msra.mxu1 %v12021_v46  ;;  %v12074_v13 = vld [vmem:[#allocation11 + $0x4a4] ss:$16 sps:$4 sm:$0xff]   ;;  %v12077_v46 = vld [vmem:[#allocation11 + $0x4ac] ss:$16 sps:$4 sm:$0xff]  }
 0x36e   :  { %3907 = vmatprep.subr.bf16.mxu0 %v12026_v59  ;;  %3958 = vmatprep.subr.bf16.mxu1 %v12029_v15  ;;  %v12075_v59 = vld [vmem:[#allocation11 + $0x4a8] ss:$16 sps:$4 sm:$0xff]   ;;  %v12080_v15 = vld [vmem:[#allocation11 + $0x4c4] ss:$16 sps:$4 sm:$0xff]  }
 0x371   :  { %3908 = vmatpush1.bf16.msra.mxu0 %v12024_v18  ;;  %3959 = vmatpush1.bf16.msra.mxu1 %v12027_v31  ;;  %v12084_v18 = vld [vmem:[#allocation11 + $0x4e0] ss:$16 sps:$4 sm:$0xff]   ;;  %v12087_v31 = vld [vmem:[#allocation11 + $0x4e8] ss:$16 sps:$4 sm:$0xff]  }
 0x372   :  { %4426 = vmatprep.subr.bf16.mxu0 %v12033_v29  ;;  %4477 = vmatprep.subr.bf16.mxu1 %v12036_v20  ;;  %v12090_v29 = vld [vmem:[#allocation11 + $0x500] ss:$16 sps:$4 sm:$0xff]   ;;  %v12093_v20 = vld [vmem:[#allocation11 + $0x508] ss:$16 sps:$4 sm:$0xff]  }
 0x374   :  { %3910 = vmatmul.mubr.bf16.vlgmr.msra.gmra.mrb[12].mxu0 %v2939_v17  ;;  %3961 = vmatmul.mubr.bf16.vlgmr.msra.gmra.mrb[20].mxu1 %v2939_v17  ;;  %v12105_v17 = vld [vmem:[#allocation11 + $0x548] ss:$16 sps:$4 sm:$0xff]  }
 0x375   :  { %3919 = vmatprep.mubr.bf16.mxu0 %v2942_v3  ;;  %3970 = vmatprep.mubr.bf16.mxu1 %v2942_v3  ;;  %v12116_v3 = vld [vmem:[#allocation11 + $0x584] ss:$16 sps:$4 sm:$0xff]  }
 0x376   :  { %4427 = vmatpush1.bf16.msra.mxu0 %v12031_v45  ;;  %4478 = vmatpush1.bf16.msra.mxu1 %v12034_v50  ;;  %v12110_v45 = vld [vmem:[#allocation11 + $0x564] ss:$16 sps:$4 sm:$0xff]   ;;  %v12113_v50 = vld [vmem:[#allocation11 + $0x56c] ss:$16 sps:$4 sm:$0xff]  }
 0x377   :  { %4428 = vmatprep.subr.bf16.mxu0 %v12040_v11  ;;  %4479 = vmatprep.subr.bf16.mxu1 %v12043_v0  ;;  %v12119_v11 = vld [vmem:[#allocation11 + $0x58c] ss:$16 sps:$4 sm:$0xff]  }
 0x378   :  { %v12144_v0 = vld [vmem:[#allocation3 + $0x30] ss:$8 sps:$4 sm:$0xff]  }
 0x37a   :  { %4429 = vmatpush1.bf16.msra.mxu0 %v12038_v26  ;;  %4480 = vmatpush1.bf16.msra.mxu1 %v12041_v12  ;;  %v12125_v26 = vld [vmem:[#allocation11 + $0x5ac] ss:$16 sps:$4 sm:$0xff]   ;;  %v4020_v12 = vrot.slane %v12144_v0, 6  ;;  %v12153_v0 = vld [vmem:[#allocation11 + $0x640] ss:$16 sps:$4 sm:$0xff]  }
 0x37b   :  { %4430 = vmatprep.subr.bf16.mxu0 %v12047_v2  ;;  %4481 = vmatprep.subr.bf16.mxu1 %v12050_v44  ;;  %v12123_v2 = vld [vmem:[#allocation11 + $0x5a8] ss:$16 sps:$4 sm:$0xff]   ;;  %v12128_v44 = vld [vmem:[#allocation11 + $0x5c4] ss:$16 sps:$4 sm:$0xff]  }
 0x37c   :  { %3920 = vmatmul.mubr.bf16.gmra.mrb[20].mxu0 %v2941_v51  ;;  %3971 = vmatmul.mubr.bf16.gmra.mrb[28].mxu1 %v2941_v51  ;;  %v4022_v51 = vrot.slane %v4020_v12, 4 }
 0x37d   :  { %4458 = vmatprep.mubr.bf16.mxu0 %v4038_v63  ;;  %4509 = vmatprep.mubr.bf16.mxu1 %v4038_v63  ;;  %v12162_v63 = vld [vmem:[#allocation3 + $0x10] ss:$8 sps:$4 sm:$0xff]  }
 0x37e   :  { %4431 = vmatpush1.bf16.msra.mxu0 %v12045_v21  ;;  %4482 = vmatpush1.bf16.msra.mxu1 %v12048_v19  ;;  %v12126_v21 = vld [vmem:[#allocation11 + $0x5c0] ss:$16 sps:$4 sm:$0xff]   ;;  %v12129_v19 = vld [vmem:[#allocation11 + $0x5c8] ss:$16 sps:$4 sm:$0xff]  }
 0x37f   :  { %4432 = vmatprep.subr.bf16.mxu0 %v12062_v6  ;;  %4483 = vmatprep.subr.bf16.mxu1 %v12065_v34  ;;  %v12134_v6 = vld [vmem:[#allocation11 + $0x5e4] ss:$16 sps:$4 sm:$0xff]   ;;  %v12137_v34 = vld [vmem:[#allocation11 + $0x5ec] ss:$16 sps:$4 sm:$0xff]  }
 0x382   :  { %4433 = vmatpush1.bf16.msra.mxu0 %v12060_v40  ;;  %4484 = vmatpush1.bf16.msra.mxu1 %v12063_v61  ;;  %v4023_v40 = vrot.slane %v12146_v55, 6  ;;  %v12161_v61 = vld [vmem:[#allocation3 + $0x4] ss:$8 sps:$4 sm:$0xff]  }
 0x383   :  { %4434 = vmatprep.subr.bf16.mxu0 %v12068_v38  ;;  %4485 = vmatprep.subr.bf16.mxu1 %v12071_v10  ;;  %v4019_v38 = vrot.slane %v4017_v5, 4  ;;  %v4571_v5 = vrot.slane %v12162_v63, 7  ;;  %v12177_v55 = vld [vmem:[#allocation11 + $0x688] ss:$16 sps:$4 sm:$0xff]  }
 0x384   :  { %v4024_v10 = vsel %vm14324_vm14, %v4022_v51, %v4023_v40  ;;  %v12182_v51 = vld [vmem:[#allocation11 + $0x6a4] ss:$16 sps:$4 sm:$0xff]   ;;  %v12183_v63 = vld [vmem:[#allocation11 + $0x6a8] ss:$16 sps:$4 sm:$0xff]   ;;  %v12186_v40 = vld [vmem:[#allocation11 + $0x6c0] ss:$16 sps:$4 sm:$0xff]  }
 0x385   :  { %v4021_v57 = vsel %vm14324_vm14, %v4019_v38, %v4020_v12  ;;  %v4573_v36 = vrot.slane %v4571_v5, 4  ;;  %v12168_v12 = vld [vmem:[#allocation11 + $0x660] ss:$16 sps:$4 sm:$0xff]   ;;  %v12194_v38 = vld [vmem:[#allocation11 + $0x6e4] ss:$16 sps:$4 sm:$0xff]  }
 0x386   :  { %4435 = vmatpush1.bf16.msra.mxu0 %v12066_v23  ;;  %4486 = vmatpush1.bf16.msra.mxu1 %v12069_v42  ;;  %v12165_v23 = vld [vmem:[#allocation3 + $0x20] ss:$8 sps:$4 sm:$0x88]   ;;  %v14354_v42 = vld [vmem:[#allocation3 + $0x24] ss:$8 sps:$4 sm:$0xff]  }
 0x387   :  { %4436 = vmatprep.subr.bf16.mxu0 %v12074_v13  ;;  %4487 = vmatprep.subr.bf16.mxu1 %v12077_v46  ;;  %v12132_v13 = vld [vmem:[#allocation11 + $0x5e0] ss:$16 sps:$4 sm:$0xff]   ;;  %v12135_v46 = vld [vmem:[#allocation11 + $0x5e8] ss:$16 sps:$4 sm:$0xff]  }
 0x38a   :  { %4437 = vmatpush1.bf16.msra.mxu0 %v12072_v47  ;;  %4488 = vmatpush1.bf16.msra.mxu1 %v12075_v59  ;;  %v4027_v47 = vcombine.low %v14340_v60, %v14332_v32  ;;  %v12140_v59 = vld [vmem:[#allocation11 + $0x604] ss:$16 sps:$4 sm:$0xff]   ;;  %v12138_v60 = vld [vmem:[#allocation11 + $0x600] ss:$16 sps:$4 sm:$0xff]  }
 0x38b   :  { %4438 = vmatprep.subr.bf16.mxu0 %v12080_v15  ;;  %4489 = vmatprep.subr.bf16.mxu1 %v12083_v39  ;;  %v12143_v15 = vld [vmem:[#allocation11 + $0x60c] ss:$16 sps:$4 sm:$0xff]   ;;  %v4030_v39 = vcombine.high %v4021_v57, %v4024_v10 }
 0x38e   :  { %4439 = vmatpush1.bf16.msra.mxu0 %v12078_v7  ;;  %4490 = vmatpush1.bf16.msra.mxu1 %v12081_v4  ;;  %v12159_v7 = vld [vmem:[#allocation3] ss:$8 sps:$4 sm:$0x88]   ;;  %v4025_v4 = vcombine.low %v14346_v8, %v14336_v9  ;;  %v5106_v9 = vld [vmem:[#allocation3 + $0x28] sm:$0xf0] }
 0x38f   :  { %4440 = vmatprep.subr.bf16.mxu0 %v12086_v22  ;;  %4491 = vmatprep.subr.bf16.mxu1 %v12089_v33  ;;  %v12164_v22 = vld [vmem:[#allocation3 + $0x14] ss:$8 sps:$4 sm:$0x77]   ;;  %v4568_v33 = vrot.slane %v12161_v61, 7  ;;  %v10932_v8 = vrot.slane %v12159_v7, 11 }
 0x390   :  { %v4037_v32 = vpack.c.bf16 %v4027_v47, %v4025_v4  ;;  %v12189_v61 = vld [vmem:[#allocation11 + $0x6c8] ss:$16 sps:$4 sm:$0xff]   ;;  %v12203_v47 = vld [vmem:[#allocation11 + $0x70c] ss:$16 sps:$4 sm:$0xff]   ;;  %v12212_v4 = vld [vmem:[#allocation11 + $0x744] ss:$16 sps:$4 sm:$0xff]  }
 0x391   :  { %v12207_v7 = vld [vmem:[#allocation11 + $0x728] ss:$16 sps:$4 sm:$0xff]  }
 0x392   :  { %4441 = vmatpush1.bf16.msra.mxu0 %v12084_v18  ;;  %4492 = vmatpush1.bf16.msra.mxu1 %v12087_v31  ;;  %v10933_v18 = vrot.slane %v12165_v23, 11  ;;  %v4578_v31 = vrot.slane %v14354_v42, 7  ;;  %v12192_v23 = vld [vmem:[#allocation11 + $0x6e0] ss:$16 sps:$4 sm:$0xff]  }
 0x393   :  { %4442 = vmatprep.subr.bf16.mxu0 %v12092_v14  ;;  %4493 = vmatprep.subr.bf16.mxu1 %v12095_v35  ;;  %v12141_v14 = vld [vmem:[#allocation11 + $0x608] ss:$16 sps:$4 sm:$0xff]   ;;  %v4040_v35 = vpack.c.bf16 %v4030_v39, %v4030_v39  ;;  %v12204_v39 = vld [vmem:[#allocation11 + $0x720] ss:$16 sps:$4 sm:$0xff]  }
 0x396   :  { %4443 = vmatpush1.bf16.msra.mxu0 %v12090_v29  ;;  %4494 = vmatpush1.bf16.msra.mxu1 %v12093_v20  ;;  %v12149_v29 = vld [vmem:[#allocation11 + $0x624] ss:$16 sps:$4 sm:$0xff]   ;;  %v12152_v20 = vld [vmem:[#allocation11 + $0x62c] ss:$16 sps:$4 sm:$0xff]  }
 0x397   :  { %4444 = vmatprep.subr.bf16.mxu0 %v12098_v16  ;;  %4495 = vmatprep.subr.bf16.mxu1 %v12101_v1  ;;  %v4570_v16 = vrot.slane %v4568_v33, 4  ;;  %v4574_v1 = vrot.slane %v12164_v22, 7  ;;  %v12215_v22 = vld [vmem:[#allocation11 + $0x74c] ss:$16 sps:$4 sm:$0xff]  }
 0x39a   :  { %4445 = vmatpush1.bf16.msra.mxu0 %v12096_v30  ;;  %4496 = vmatpush1.bf16.msra.mxu1 %v12099_v53  ;;  %v14373_v30 = vsel %vm14365_vm0, %v10933_v18, %v4578_v31  ;;  %v12147_v53 = vld [vmem:[#allocation11 + $0x620] ss:$16 sps:$4 sm:$0xff]   ;;  %v12213_v18 = vld [vmem:[#allocation11 + $0x748] ss:$16 sps:$4 sm:$0xff]  }
 0x39b   :  { %4446 = vmatprep.subr.bf16.mxu0 %v12104_v28  ;;  %4497 = vmatprep.subr.bf16.mxu1 %v12107_v25  ;;  %v12150_v28 = vld [vmem:[#allocation11 + $0x628] ss:$16 sps:$4 sm:$0xff]   ;;  %v4029_v25 = vcombine.low %v4021_v57, %v4024_v10  ;;  %v12197_v10 = vld [vmem:[#allocation11 + $0x6ec] ss:$16 sps:$4 sm:$0xff]   ;;  %v12206_v57 = vld [vmem:[#allocation11 + $0x724] ss:$16 sps:$4 sm:$0xff]  }
 0x39e   :  { %4447 = vmatpush1.bf16.msra.mxu0 %v12102_v43  ;;  %4498 = vmatpush1.bf16.msra.mxu1 %v12105_v17  ;;  %v14377_v43 = vsel %vm14365_vm0, %v4570_v16, %v4571_v5  ;;  %v14381_v17 = vsel %vm14365_vm0, %v4573_v36, %v4574_v1  ;;  %v12209_v5 = vld [vmem:[#allocation11 + $0x72c] ss:$16 sps:$4 sm:$0xff]   ;;  %v12219_v36 = vld [vmem:[#allocation11 + $0x768] ss:$16 sps:$4 sm:$0xff]   ;;  %v12230_v1 = vld [vmem:[#allocation11 + $0x7a4] ss:$16 sps:$4 sm:$0xff]  }
 0x39f   :  { %4448 = vmatprep.subr.bf16.mxu0 %v12110_v45  ;;  %4499 = vmatprep.subr.bf16.mxu1 %v12113_v50  ;;  %v12155_v45 = vld [vmem:[#allocation11 + $0x644] ss:$16 sps:$4 sm:$0xff]   ;;  %v12158_v50 = vld [vmem:[#allocation11 + $0x64c] ss:$16 sps:$4 sm:$0xff]   ;;  %v12225_v16 = vld [vmem:[#allocation11 + $0x788] ss:$16 sps:$4 sm:$0xff]  }
 0x3a2   :  { %4449 = vmatpush1.bf16.msra.mxu0 %v12108_v37  ;;  %4500 = vmatpush1.bf16.msra.mxu1 %v12111_v27  ;;  %v4589_v37 = vcombine.high %v14381_v17, %v14373_v30  ;;  %v14387_v27 = vsel %vm14365_vm0, %v10932_v8, %v4568_v33  ;;  %v12210_v33 = vld [vmem:[#allocation11 + $0x740] ss:$16 sps:$4 sm:$0xff]  }
 0x3a3   :  { %4450 = vmatprep.subr.bf16.mxu0 %v12116_v3  ;;  %4501 = vmatprep.subr.bf16.mxu1 %v12119_v11  ;;  %v4587_v3 = vcombine.high %v14387_v27, %v14377_v43  ;;  %v4039_v11 = vpack.c.bf16 %v4029_v25, %v4029_v25  ;;  %v12222_v8 = vld [vmem:[#allocation11 + $0x780] ss:$16 sps:$4 sm:$0xff]   ;;  %v4586_v42 = vcombine.low %v14387_v27, %v14377_v43 }
 0x3a4   :  { %v12255_v27 = vld [vmem:[#allocation11 + $0x820] ss:$16 sps:$4 sm:$0xff]  }
 0x3a6   :  { %4451 = vmatpush1.bf16.msra.mxu0 %v12114_v24  ;;  %4502 = vmatpush1.bf16.msra.mxu1 %v12117_v41  ;;  %v12156_v24 = vld [vmem:[#allocation11 + $0x648] ss:$16 sps:$4 sm:$0xff]   ;;  %v4599_v41 = vpack.c.bf16 %v4589_v37, %v4587_v3  ;;  %v12236_v37 = vld [vmem:[#allocation11 + $0x7c4] ss:$16 sps:$4 sm:$0xff]   ;;  %v12239_v3 = vld [vmem:[#allocation11 + $0x7cc] ss:$16 sps:$4 sm:$0xff]  }
 0x3a7   :  { %4452 = vmatprep.subr.bf16.mxu0 %v12122_v58  ;;  %4503 = vmatprep.subr.bf16.mxu1 %v12125_v26  ;;  %v12170_v58 = vld [vmem:[#allocation11 + $0x664] ss:$16 sps:$4 sm:$0xff]   ;;  %v12173_v26 = vld [vmem:[#allocation11 + $0x66c] ss:$16 sps:$4 sm:$0xff]  }
 0x3aa   :  { %4453 = vmatpush1.bf16.msra.mxu0 %v12120_v56  ;;  %4504 = vmatpush1.bf16.msra.mxu1 %v12123_v2  ;;  %v12171_v56 = vld [vmem:[#allocation11 + $0x668] ss:$16 sps:$4 sm:$0xff]   ;;  %v12176_v2 = vld [vmem:[#allocation11 + $0x684] ss:$16 sps:$4 sm:$0xff]  }
 0x3ab   :  { %4454 = vmatprep.subr.bf16.mxu0 %v12128_v44  ;;  %4505 = vmatprep.subr.bf16.mxu1 %v12131_v52  ;;  %v12179_v44 = vld [vmem:[#allocation11 + $0x68c] ss:$16 sps:$4 sm:$0xff]   ;;  %v12174_v52 = vld [vmem:[#allocation11 + $0x680] ss:$16 sps:$4 sm:$0xff]  }
 0x3ae   :  { %4455 = vmatpush1.bf16.msra.mxu0 %v12126_v21  ;;  %4506 = vmatpush1.bf16.msra.mxu1 %v12129_v19  ;;  %v12185_v21 = vld [vmem:[#allocation11 + $0x6ac] ss:$16 sps:$4 sm:$0xff]   ;;  %v12180_v19 = vld [vmem:[#allocation11 + $0x6a0] ss:$16 sps:$4 sm:$0xff]  }
 0x3af   :  { %4456 = vmatprep.subr.bf16.mxu0 %v12134_v6  ;;  %4507 = vmatprep.subr.bf16.mxu1 %v12137_v34  ;;  %v12188_v6 = vld [vmem:[#allocation11 + $0x6c4] ss:$16 sps:$4 sm:$0xff]   ;;  %v12191_v34 = vld [vmem:[#allocation11 + $0x6cc] ss:$16 sps:$4 sm:$0xff]  }
 0x3b2   :  { %4457 = vmatpush1.bf16.msra.mxu0 %v12132_v13  ;;  %4508 = vmatpush1.bf16.msra.mxu1 %v12135_v46  ;;  %v12195_v13 = vld [vmem:[#allocation11 + $0x6e8] ss:$16 sps:$4 sm:$0xff]   ;;  %v12200_v46 = vld [vmem:[#allocation11 + $0x704] ss:$16 sps:$4 sm:$0xff]  }
 0x3b3   :  { %4987 = vmatprep.subr.bf16.mxu0 %v12140_v59  ;;  %5038 = vmatprep.subr.bf16.mxu1 %v12143_v15  ;;  %v12198_v59 = vld [vmem:[#allocation11 + $0x700] ss:$16 sps:$4 sm:$0xff]   ;;  %v12201_v15 = vld [vmem:[#allocation11 + $0x708] ss:$16 sps:$4 sm:$0xff]  }
 0x3b5   :  { %4459 = vmatmul.mubr.bf16.vlgmr.msra.gmra.mrb[12].mxu0 %v4037_v32  ;;  %4510 = vmatmul.mubr.bf16.vlgmr.msra.gmra.mrb[20].mxu1 %v4037_v32  ;;  %v12218_v32 = vld [vmem:[#allocation11 + $0x764] ss:$16 sps:$4 sm:$0xff]  }
 0x3b6   :  { %4468 = vmatprep.mubr.bf16.mxu0 %v4040_v35  ;;  %4519 = vmatprep.mubr.bf16.mxu1 %v4040_v35  ;;  %v12224_v35 = vld [vmem:[#allocation11 + $0x784] ss:$16 sps:$4 sm:$0xff]  }
 0x3b7   :  { %4988 = vmatpush1.bf16.msra.mxu0 %v12138_v60  ;;  %5039 = vmatpush1.bf16.msra.mxu1 %v12141_v14  ;;  %v12221_v60 = vld [vmem:[#allocation11 + $0x76c] ss:$16 sps:$4 sm:$0xff]   ;;  %v12216_v14 = vld [vmem:[#allocation11 + $0x760] ss:$16 sps:$4 sm:$0xff]  }
 0x3b8   :  { %4989 = vmatprep.subr.bf16.mxu0 %v12149_v29  ;;  %5040 = vmatprep.subr.bf16.mxu1 %v12152_v20  ;;  %v12227_v29 = vld [vmem:[#allocation11 + $0x78c] ss:$16 sps:$4 sm:$0xff]  }
 0x3b9   :  { %v12252_v20 = vld [vmem:[#allocation3 + $0x30] ss:$8 sps:$4 sm:$0xff]  }
 0x3ba   :  { %v4581_v25 = vrot.slane %v12252_v20, 7  ;;  %v12286_v20 = vld [vmem:[#allocation11 + $0x8a8] ss:$16 sps:$4 sm:$0xff]  }
 0x3bb   :  { %4990 = vmatpush1.bf16.msra.mxu0 %v12147_v53  ;;  %5041 = vmatpush1.bf16.msra.mxu1 %v12150_v28  ;;  %v12233_v53 = vld [vmem:[#allocation11 + $0x7ac] ss:$16 sps:$4 sm:$0xff]   ;;  %v12254_v28 = vld [vmem:[#allocation3 + $0x34] ss:$8 sps:$4 sm:$0x77]  }
 0x3bc   :  { %4991 = vmatprep.subr.bf16.mxu0 %v12155_v45  ;;  %5042 = vmatprep.subr.bf16.mxu1 %v12158_v50  ;;  %v12228_v45 = vld [vmem:[#allocation11 + $0x7a0] ss:$16 sps:$4 sm:$0xff]   ;;  %v12231_v50 = vld [vmem:[#allocation11 + $0x7a8] ss:$16 sps:$4 sm:$0xff]  }
 0x3bd   :  { %4469 = vmatmul.mubr.bf16.gmra.mrb[24].mxu0 %v4039_v11  ;;  %4520 = vmatmul.mubr.bf16.gmra.mrb[32].mxu1 %v4039_v11  ;;  %v4583_v11 = vrot.slane %v4581_v25, 4 }
 0x3be   :  { %5019 = vmatprep.mubr.bf16.mxu0 %v4599_v41  ;;  %5070 = vmatprep.mubr.bf16.mxu1 %v4599_v41  ;;  %v12242_v41 = vld [vmem:[#allocation11 + $0x7e4] ss:$16 sps:$4 sm:$0xff]  }
 0x3bf   :  { %4992 = vmatpush1.bf16.msra.mxu0 %v12153_v0  ;;  %5043 = vmatpush1.bf16.msra.mxu1 %v12156_v24  ;;  %v12234_v0 = vld [vmem:[#allocation11 + $0x7c0] ss:$16 sps:$4 sm:$0xff]   ;;  %v12237_v24 = vld [vmem:[#allocation11 + $0x7c8] ss:$16 sps:$4 sm:$0xff]  }
 0x3c0   :  { %4993 = vmatprep.subr.bf16.mxu0 %v12170_v58  ;;  %5044 = vmatprep.subr.bf16.mxu1 %v12173_v26  ;;  %v12245_v58 = vld [vmem:[#allocation11 + $0x7ec] ss:$16 sps:$4 sm:$0xff]   ;;  %v4584_v26 = vrot.slane %v12254_v28, 7  ;;  %v12297_v28 = vld [vmem:[#allocation11 + $0x8e4] ss:$16 sps:$4 sm:$0xff]  }
 0x3c3   :  { %4994 = vmatpush1.bf16.msra.mxu0 %v12168_v12  ;;  %5045 = vmatpush1.bf16.msra.mxu1 %v12171_v56  ;;  %v4580_v12 = vrot.slane %v4578_v31, 4  ;;  %v4585_v56 = vsel %vm14365_vm0, %v4583_v11, %v4584_v26 }
 0x3c4   :  { %4995 = vmatprep.subr.bf16.mxu0 %v12176_v2  ;;  %5046 = vmatprep.subr.bf16.mxu1 %v12179_v44  ;;  %v12240_v2 = vld [vmem:[#allocation11 + $0x7e0] ss:$16 sps:$4 sm:$0xff]   ;;  %v12243_v44 = vld [vmem:[#allocation11 + $0x7e8] ss:$16 sps:$4 sm:$0xff]  }
 0x3c7   :  { %4996 = vmatpush1.bf16.msra.mxu0 %v12174_v52  ;;  %5047 = vmatpush1.bf16.msra.mxu1 %v12177_v55  ;;  %v4588_v52 = vcombine.low %v14381_v17, %v14373_v30  ;;  %v12248_v55 = vld [vmem:[#allocation11 + $0x804] ss:$16 sps:$4 sm:$0xff]  }
 0x3c8   :  { %4997 = vmatprep.subr.bf16.mxu0 %v12182_v51  ;;  %5048 = vmatprep.subr.bf16.mxu1 %v12185_v21  ;;  %v12251_v51 = vld [vmem:[#allocation11 + $0x80c] ss:$16 sps:$4 sm:$0xff]   ;;  %v4582_v21 = vsel %vm14365_vm0, %v4580_v12, %v4581_v25  ;;  %v12257_v17 = vld [vmem:[#allocation11 + $0x824] ss:$16 sps:$4 sm:$0xff]   ;;  %v12301_v12 = vld [vmem:[#allocation11 + $0x900] ss:$16 sps:$4 sm:$0xff]  }
 0x3c9   :  { %v4598_v31 = vpack.c.bf16 %v4588_v52, %v4586_v42  ;;  %v12300_v25 = vld [vmem:[#allocation11 + $0x8ec] ss:$16 sps:$4 sm:$0xff]   ;;  %v12309_v52 = vld [vmem:[#allocation11 + $0x924] ss:$16 sps:$4 sm:$0xff]  }
 0x3ca   :  { %v12318_v42 = vld [vmem:[#allocation11 + $0x94c] ss:$16 sps:$4 sm:$0xff]  }
 0x3cb   :  { %4998 = vmatpush1.bf16.msra.mxu0 %v12180_v19  ;;  %5049 = vmatpush1.bf16.msra.mxu1 %v12183_v63  ;;  %v4591_v19 = vcombine.high %v4582_v21, %v4585_v56  ;;  %v12246_v63 = vld [vmem:[#allocation11 + $0x800] ss:$16 sps:$4 sm:$0xff]  }
 0x3cc   :  { %4999 = vmatprep.subr.bf16.mxu0 %v12188_v6  ;;  %5050 = vmatprep.subr.bf16.mxu1 %v12191_v34  ;;  %v12249_v6 = vld [vmem:[#allocation11 + $0x808] ss:$16 sps:$4 sm:$0xff]  }
 0x3cd   :  { %v5104_v34 = vld [vmem:[#allocation3 + $0x18] sm:$0xff]  ;;  %v4601_v30 = vpack.c.bf16 %v4591_v19, %v4591_v19 }
 0x3ce   :  { %v12315_v19 = vld [vmem:[#allocation11 + $0x944] ss:$16 sps:$4 sm:$0xff]  }
 0x3cf   :  { %5000 = vmatpush1.bf16.msra.mxu0 %v12186_v40  ;;  %5051 = vmatpush1.bf16.msra.mxu1 %v12189_v61  ;;  %v12260_v40 = vld [vmem:[#allocation11 + $0x82c] ss:$16 sps:$4 sm:$0xff]  }
 0x3d0   :  { %5001 = vmatprep.subr.bf16.mxu0 %v12194_v38  ;;  %5052 = vmatprep.subr.bf16.mxu1 %v12197_v10  ;;  %v14401_v61 = vld [vmem:[#allocation3 + $0x10] sm:$0xff]  ;;  %v12258_v38 = vld [vmem:[#allocation11 + $0x828] ss:$16 sps:$4 sm:$0xff]   ;;  %v4590_v10 = vcombine.low %v4582_v21, %v4585_v56 }
 0x3d1   :  { %v5118_v43 = vcombine.low %v14401_v61, %v5104_v34  ;;  %v12304_v56 = vld [vmem:[#allocation11 + $0x908] ss:$16 sps:$4 sm:$0xff]  }
 0x3d2   :  { %v12310_v21 = vld [vmem:[#allocation11 + $0x928] ss:$16 sps:$4 sm:$0xff]  }
 0x3d3   :  { %5002 = vmatpush1.bf16.msra.mxu0 %v12192_v23  ;;  %5053 = vmatpush1.bf16.msra.mxu1 %v12195_v13  ;;  %v12263_v23 = vld [vmem:[#allocation11 + $0x844] ss:$16 sps:$4 sm:$0xff]   ;;  %v12266_v13 = vld [vmem:[#allocation11 + $0x84c] ss:$16 sps:$4 sm:$0xff]  }
 0x3d4   :  { %5003 = vmatprep.subr.bf16.mxu0 %v12200_v46  ;;  %5054 = vmatprep.subr.bf16.mxu1 %v12203_v47  ;;  %v11001_v46 = vcombine.high %v5104_v34, %v5106_v9  ;;  %v14404_v47 = vld [vmem:[#allocation3 + $0x8] sm:$0xf0]  ;;  %v12324_v34 = vld [vmem:[#allocation11 + $0x96c] ss:$16 sps:$4 sm:$0xff]  }
 0x3d5   :  { %v12330_v9 = vld [vmem:[#allocation11 + $0x98c] ss:$16 sps:$4 sm:$0xff]  }
 0x3d7   :  { %5004 = vmatpush1.bf16.msra.mxu0 %v12198_v59  ;;  %5055 = vmatpush1.bf16.msra.mxu1 %v12201_v15  ;;  %v10999_v59 = vcombine.high %v14404_v47, %v5118_v43  ;;  %v4600_v15 = vpack.c.bf16 %v4590_v10, %v4590_v10  ;;  %v12325_v43 = vld [vmem:[#allocation11 + $0x980] ss:$16 sps:$4 sm:$0xff]   ;;  %v12336_v10 = vld [vmem:[#allocation11 + $0x9ac] ss:$16 sps:$4 sm:$0xff]  }
 0x3d8   :  { %5005 = vmatprep.subr.bf16.mxu0 %v12206_v57  ;;  %5056 = vmatprep.subr.bf16.mxu1 %v12209_v5  ;;  %v12261_v57 = vld [vmem:[#allocation11 + $0x840] ss:$16 sps:$4 sm:$0xff]   ;;  %v12264_v5 = vld [vmem:[#allocation11 + $0x848] ss:$16 sps:$4 sm:$0xff]  }
 0x3db   :  { %5006 = vmatpush1.bf16.msra.mxu0 %v12204_v39  ;;  %5057 = vmatpush1.bf16.msra.mxu1 %v12207_v7  ;;  %v5136_v39 = vpack.c.bf16 %v11001_v46, %v10999_v59  ;;  %v12273_v7 = vld [vmem:[#allocation11 + $0x864] ss:$16 sps:$4 sm:$0xff]   ;;  %v12342_v59 = vld [vmem:[#allocation11 + $0x9cc] ss:$16 sps:$4 sm:$0xff]  }
 0x3dc   :  { %5007 = vmatprep.subr.bf16.mxu0 %v12212_v4  ;;  %5058 = vmatprep.subr.bf16.mxu1 %v12215_v22  ;;  %v12276_v4 = vld [vmem:[#allocation11 + $0x86c] ss:$16 sps:$4 sm:$0xff]   ;;  %v12271_v22 = vld [vmem:[#allocation11 + $0x860] ss:$16 sps:$4 sm:$0xff]   ;;  %v12339_v46 = vld [vmem:[#allocation11 + $0x9c4] ss:$16 sps:$4 sm:$0xff]  }
 0x3df   :  { %5008 = vmatpush1.bf16.msra.mxu0 %v12210_v33  ;;  %5059 = vmatpush1.bf16.msra.mxu1 %v12213_v18  ;;  %v12274_v33 = vld [vmem:[#allocation11 + $0x868] ss:$16 sps:$4 sm:$0xff]   ;;  %v12279_v18 = vld [vmem:[#allocation11 + $0x884] ss:$16 sps:$4 sm:$0xff]  }
 0x3e0   :  { %5009 = vmatprep.subr.bf16.mxu0 %v12218_v32  ;;  %5060 = vmatprep.subr.bf16.mxu1 %v12221_v60  ;;  %v12282_v32 = vld [vmem:[#allocation11 + $0x88c] ss:$16 sps:$4 sm:$0xff]   ;;  %v12277_v60 = vld [vmem:[#allocation11 + $0x880] ss:$16 sps:$4 sm:$0xff]  }
 0x3e3   :  { %5010 = vmatpush1.bf16.msra.mxu0 %v12216_v14  ;;  %5061 = vmatpush1.bf16.msra.mxu1 %v12219_v36  ;;  %v12280_v14 = vld [vmem:[#allocation11 + $0x888] ss:$16 sps:$4 sm:$0xff]   ;;  %v12285_v36 = vld [vmem:[#allocation11 + $0x8a4] ss:$16 sps:$4 sm:$0xff]  }
 0x3e4   :  { %5011 = vmatprep.subr.bf16.mxu0 %v12224_v35  ;;  %5062 = vmatprep.subr.bf16.mxu1 %v12227_v29  ;;  %v12288_v35 = vld [vmem:[#allocation11 + $0x8ac] ss:$16 sps:$4 sm:$0xff]   ;;  %v12283_v29 = vld [vmem:[#allocation11 + $0x8a0] ss:$16 sps:$4 sm:$0xff]  }
 0x3e7   :  { %5012 = vmatpush1.bf16.msra.mxu0 %v12222_v8  ;;  %5063 = vmatpush1.bf16.msra.mxu1 %v12225_v16  ;;  %v12291_v8 = vld [vmem:[#allocation11 + $0x8c4] ss:$16 sps:$4 sm:$0xff]   ;;  %v12294_v16 = vld [vmem:[#allocation11 + $0x8cc] ss:$16 sps:$4 sm:$0xff]  }
 0x3e8   :  { %5013 = vmatprep.subr.bf16.mxu0 %v12230_v1  ;;  %5064 = vmatprep.subr.bf16.mxu1 %v12233_v53  ;;  %v12289_v1 = vld [vmem:[#allocation11 + $0x8c0] ss:$16 sps:$4 sm:$0xff]   ;;  %v12292_v53 = vld [vmem:[#allocation11 + $0x8c8] ss:$16 sps:$4 sm:$0xff]  }
 0x3eb   :  { %5014 = vmatpush1.bf16.msra.mxu0 %v12228_v45  ;;  %5065 = vmatpush1.bf16.msra.mxu1 %v12231_v50  ;;  %v12295_v45 = vld [vmem:[#allocation11 + $0x8e0] ss:$16 sps:$4 sm:$0xff]   ;;  %v12298_v50 = vld [vmem:[#allocation11 + $0x8e8] ss:$16 sps:$4 sm:$0xff]  }
 0x3ec   :  { %5015 = vmatprep.subr.bf16.mxu0 %v12236_v37  ;;  %5066 = vmatprep.subr.bf16.mxu1 %v12239_v3  ;;  %v12303_v37 = vld [vmem:[#allocation11 + $0x904] ss:$16 sps:$4 sm:$0xff]   ;;  %v12306_v3 = vld [vmem:[#allocation11 + $0x90c] ss:$16 sps:$4 sm:$0xff]  }
 0x3ef   :  { %5016 = vmatpush1.bf16.msra.mxu0 %v12234_v0  ;;  %5067 = vmatpush1.bf16.msra.mxu1 %v12237_v24 }
 0x3f0   :  { %5017 = vmatprep.subr.bf16.mxu0 %v12242_v41  ;;  %5068 = vmatprep.subr.bf16.mxu1 %v12245_v58 }
 0x3f3   :  { %5018 = vmatpush1.bf16.msra.mxu0 %v12240_v2  ;;  %5069 = vmatpush1.bf16.msra.mxu1 %v12243_v44 }
 0x3f4   :  { %5524 = vmatprep.subr.bf16.mxu0 %v12248_v55  ;;  %5575 = vmatprep.subr.bf16.mxu1 %v12251_v51  ;;  %v12312_v55 = vld [vmem:[#allocation11 + $0x92c] ss:$16 sps:$4 sm:$0xff]   ;;  %v12307_v51 = vld [vmem:[#allocation11 + $0x920] ss:$16 sps:$4 sm:$0xff]  }
 0x3f6   :  { %5020 = vmatmul.mubr.bf16.vlgmr.msra.gmra.mrb[12].mxu0 %v4598_v31  ;;  %5071 = vmatmul.mubr.bf16.vlgmr.msra.gmra.mrb[20].mxu1 %v4598_v31  ;;  %v12313_v31 = vld [vmem:[#allocation11 + $0x940] ss:$16 sps:$4 sm:$0xff]  }
 0x3f7   :  { %5029 = vmatprep.mubr.bf16.mxu0 %v4601_v30  ;;  %5080 = vmatprep.mubr.bf16.mxu1 %v4601_v30  ;;  %v12319_v30 = vld [vmem:[#allocation11 + $0x960] ss:$16 sps:$4 sm:$0xff]  }
 0x3f8   :  { %5525 = vmatpush1.bf16.msra.mxu0 %v12246_v63  ;;  %5576 = vmatpush1.bf16.msra.mxu1 %v12249_v6  ;;  %v12316_v63 = vld [vmem:[#allocation11 + $0x948] ss:$16 sps:$4 sm:$0xff]   ;;  %v12321_v6 = vld [vmem:[#allocation11 + $0x964] ss:$16 sps:$4 sm:$0xff]  }
 0x3f9   :  { %5526 = vmatprep.subr.bf16.mxu0 %v12257_v17  ;;  %5577 = vmatprep.subr.bf16.mxu1 %v12260_v40  ;;  %v12322_v17 = vld [vmem:[#allocation11 + $0x968] ss:$16 sps:$4 sm:$0xff]   ;;  %v12327_v40 = vld [vmem:[#allocation11 + $0x984] ss:$16 sps:$4 sm:$0xff]  }
 0x3fc   :  { %5527 = vmatpush1.bf16.msra.mxu0 %v12255_v27  ;;  %5578 = vmatpush1.bf16.msra.mxu1 %v12258_v38  ;;  %v12328_v27 = vld [vmem:[#allocation11 + $0x988] ss:$16 sps:$4 sm:$0xff]   ;;  %v12333_v38 = vld [vmem:[#allocation11 + $0x9a4] ss:$16 sps:$4 sm:$0xff]  }
 0x3fd   :  { %5528 = vmatprep.subr.bf16.mxu0 %v12263_v23  ;;  %5579 = vmatprep.subr.bf16.mxu1 %v12266_v13  ;;  %v12331_v23 = vld [vmem:[#allocation11 + $0x9a0] ss:$16 sps:$4 sm:$0xff]   ;;  %v12334_v13 = vld [vmem:[#allocation11 + $0x9a8] ss:$16 sps:$4 sm:$0xff]  }
 0x3fe   :  { %5030 = vmatmul.mubr.bf16.gmra.mrb[28].mxu0 %v4600_v15  ;;  %5081 = vmatmul.mubr.bf16.gmra.mrb[36].mxu1 %v4600_v15  ;;  %v12337_v15 = vld [vmem:[#allocation11 + $0x9c0] ss:$16 sps:$4 sm:$0xff]  }
 0x3ff   :  { %5556 = vmatprep.mubr.bf16.mxu0 %v5136_v39  ;;  %5607 = vmatprep.mubr.bf16.mxu1 %v5136_v39  ;;  %v12348_v39 = vld [vmem:[#allocation11 + $0x9ec] ss:$16 sps:$4 sm:$0xff]  }
 0x400   :  { %5529 = vmatpush1.bf16.msra.mxu0 %v12261_v57  ;;  %5580 = vmatpush1.bf16.msra.mxu1 %v12264_v5  ;;  %v12340_v57 = vld [vmem:[#allocation11 + $0x9c8] ss:$16 sps:$4 sm:$0xff]   ;;  %v12345_v5 = vld [vmem:[#allocation11 + $0x9e4] ss:$16 sps:$4 sm:$0xff]  }
 0x401   :  { %5530 = vmatprep.subr.bf16.mxu0 %v12273_v7  ;;  %5581 = vmatprep.subr.bf16.mxu1 %v12276_v4  ;;  %v5105_v7 = vld [vmem:[#allocation3 + $0x20] sm:$0xf0] }
 0x402   :  { %v5101_v4 = vld [vmem:[#allocation3] sm:$0xf0] }
 0x404   :  { %5531 = vmatpush1.bf16.msra.mxu0 %v12271_v22  ;;  %5582 = vmatpush1.bf16.msra.mxu1 %v12274_v33  ;;  %v12343_v22 = vld [vmem:[#allocation11 + $0x9e0] ss:$16 sps:$4 sm:$0xff]   ;;  %v12346_v33 = vld [vmem:[#allocation11 + $0x9e8] ss:$16 sps:$4 sm:$0xff]  }
 0x405   :  { %5532 = vmatprep.subr.bf16.mxu0 %v12279_v18  ;;  %5583 = vmatprep.subr.bf16.mxu1 %v12282_v32  ;;  %v5117_v18 = vcombine.high %v5101_v4, %v14404_v47  ;;  %v11000_v32 = vcombine.high %v14401_v61, %v5105_v7  ;;  %v12369_v7 = vld [vmem:[#allocation14 + $0x264] ss:$16 sps:$4 sm:$0xff]   ;;  %v12372_v4 = vld [vmem:[#allocation14 + $0x26c] ss:$16 sps:$4 sm:$0xff]  }
 0x408   :  { %5533 = vmatpush1.bf16.msra.mxu0 %v12277_v60  ;;  %5584 = vmatpush1.bf16.msra.mxu1 %v12280_v14  ;;  %v10998_v60 = vcombine.low %v5117_v18, %v14401_v61  ;;  %v5108_v14 = vld [vmem:[#allocation3 + $0x38] sm:$0xff] }
 0x409   :  { %5534 = vmatprep.subr.bf16.mxu0 %v12285_v36  ;;  %5585 = vmatprep.subr.bf16.mxu1 %v12288_v35  ;;  %v5138_v35 = vpack.c.bf16 %v5108_v14, %v5108_v14  ;;  %v12375_v18 = vld [vmem:[#allocation14 + $0x284] ss:$16 sps:$4 sm:$0xff]   ;;  %v12376_v14 = vld [vmem:[#allocation14 + $0x288] ss:$16 sps:$4 sm:$0xff]  }
 0x40a   :  { %v5135_v36 = vpack.c.bf16 %v11000_v32, %v10998_v60  ;;  %v12378_v32 = vld [vmem:[#allocation14 + $0x28c] ss:$16 sps:$4 sm:$0xff]   ;;  %v12373_v60 = vld [vmem:[#allocation14 + $0x280] ss:$16 sps:$4 sm:$0xff]  }
 0x40c   :  { %5535 = vmatpush1.bf16.msra.mxu0 %v12283_v29  ;;  %5586 = vmatpush1.bf16.msra.mxu1 %v12286_v20  ;;  %v5107_v29 = vld [vmem:[#allocation3 + $0x30] sm:$0xff] }
 0x40d   :  { %5536 = vmatprep.subr.bf16.mxu0 %v12291_v8  ;;  %5587 = vmatprep.subr.bf16.mxu1 %v12294_v16  ;;  %v5137_v20 = vpack.c.bf16 %v5107_v29, %v5107_v29  ;;  %v5638_v29 = vld [vmem:[#allocation13] sm:$0xf] }
 0x410   :  { %5537 = vmatpush1.bf16.msra.mxu0 %v12289_v1  ;;  %5588 = vmatpush1.bf16.msra.mxu1 %v12292_v53 }
 0x411   :  { %5538 = vmatprep.subr.bf16.mxu0 %v12297_v28  ;;  %5589 = vmatprep.subr.bf16.mxu1 %v12300_v25 }
 0x412   :  { %v14407_v11 = vpop.f32.mrb[16].mxu0  ;;  %v14409_v0 = vpop.f32.mrb[24].mxu1 }
 0x413   :  { %v14411_v24 = vpop.f32.mrb[17].mxu0  ;;  %v14413_v41 = vpop.f32.mrb[25].mxu1 }
 0x414   :  { %5539 = vmatpush1.bf16.msra.mxu0 %v12295_v45  ;;  %5590 = vmatpush1.bf16.msra.mxu1 %v12298_v50  ;;  %v3503_v58 = vpop.f32.mrb[18].mxu0  ;;  %v3554_v26 = vpop.f32.mrb[26].mxu1 }
 0x415   :  { %v3504_v2 = vpop.f32.mrb[19].mxu0  ;;  %v3555_v44 = vpop.f32.mrb[27].mxu1  ;;  %5540 = vmatprep.subr.bf16.mxu0 %v12303_v37  ;;  %5591 = vmatprep.subr.bf16.mxu1 %v12306_v3 }
 0x418   :  { %5541 = vmatpush1.bf16.msra.mxu0 %v12301_v12  ;;  %5592 = vmatpush1.bf16.msra.mxu1 %v12304_v56 }
 0x419   :  { %5542 = vmatprep.subr.bf16.mxu0 %v12309_v52  ;;  %5593 = vmatprep.subr.bf16.mxu1 %v12312_v55 }
 0x41c   :  { %5543 = vmatpush1.bf16.msra.mxu0 %v12307_v51  ;;  %5594 = vmatpush1.bf16.msra.mxu1 %v12310_v21 }
 0x41d   :  { %5544 = vmatprep.subr.bf16.mxu0 %v12315_v19  ;;  %5595 = vmatprep.subr.bf16.mxu1 %v12318_v42 }
 0x420   :  { %5545 = vmatpush1.bf16.msra.mxu0 %v12313_v31  ;;  %5596 = vmatpush1.bf16.msra.mxu1 %v12316_v63 }
 0x421   :  { %5546 = vmatprep.subr.bf16.mxu0 %v12321_v6  ;;  %5597 = vmatprep.subr.bf16.mxu1 %v12324_v34 }
 0x424   :  { %5547 = vmatpush1.bf16.msra.mxu0 %v12319_v30  ;;  %5598 = vmatpush1.bf16.msra.mxu1 %v12322_v17 }
 0x425   :  { %5548 = vmatprep.subr.bf16.mxu0 %v12327_v40  ;;  %5599 = vmatprep.subr.bf16.mxu1 %v12330_v9 }
 0x428   :  { %5549 = vmatpush1.bf16.msra.mxu0 %v12325_v43  ;;  %5600 = vmatpush1.bf16.msra.mxu1 %v12328_v27  ;;  %v12351_v43 = vld [vmem:[#allocation14 + $0x204] ss:$16 sps:$4 sm:$0xff]   ;;  %v12354_v27 = vld [vmem:[#allocation14 + $0x20c] ss:$16 sps:$4 sm:$0xff]  }
 0x429   :  { %5550 = vmatprep.subr.bf16.mxu0 %v12333_v38  ;;  %5601 = vmatprep.subr.bf16.mxu1 %v12336_v10  ;;  %v12349_v38 = vld [vmem:[#allocation14 + $0x200] ss:$16 sps:$4 sm:$0xff]   ;;  %v12352_v10 = vld [vmem:[#allocation14 + $0x208] ss:$16 sps:$4 sm:$0xff]  }
 0x42c   :  { %5551 = vmatpush1.bf16.msra.mxu0 %v12331_v23  ;;  %5602 = vmatpush1.bf16.msra.mxu1 %v12334_v13  ;;  %v12357_v23 = vld [vmem:[#allocation14 + $0x224] ss:$16 sps:$4 sm:$0xff]   ;;  %v12360_v13 = vld [vmem:[#allocation14 + $0x22c] ss:$16 sps:$4 sm:$0xff]  }
 0x42d   :  { %5552 = vmatprep.subr.bf16.mxu0 %v12339_v46  ;;  %5603 = vmatprep.subr.bf16.mxu1 %v12342_v59  ;;  %v12355_v46 = vld [vmem:[#allocation14 + $0x220] ss:$16 sps:$4 sm:$0xff]   ;;  %v12358_v59 = vld [vmem:[#allocation14 + $0x228] ss:$16 sps:$4 sm:$0xff]  }
 0x430   :  { %5553 = vmatpush1.bf16.msra.mxu0 %v12337_v15  ;;  %5604 = vmatpush1.bf16.msra.mxu1 %v12340_v57  ;;  %v12363_v15 = vld [vmem:[#allocation14 + $0x244] ss:$16 sps:$4 sm:$0xff]   ;;  %v12366_v57 = vld [vmem:[#allocation14 + $0x24c] ss:$16 sps:$4 sm:$0xff]  }
 0x431   :  { %5554 = vmatprep.subr.bf16.mxu0 %v12345_v5  ;;  %5605 = vmatprep.subr.bf16.mxu1 %v12348_v39  ;;  %v12361_v5 = vld [vmem:[#allocation14 + $0x240] ss:$16 sps:$4 sm:$0xff]   ;;  %v12364_v39 = vld [vmem:[#allocation14 + $0x248] ss:$16 sps:$4 sm:$0xff]  }
 0x434   :  { %5555 = vmatpush1.bf16.msra.mxu0 %v12343_v22  ;;  %5606 = vmatpush1.bf16.msra.mxu1 %v12346_v33  ;;  %v12367_v22 = vld [vmem:[#allocation14 + $0x260] ss:$16 sps:$4 sm:$0xff]   ;;  %v12370_v33 = vld [vmem:[#allocation14 + $0x268] ss:$16 sps:$4 sm:$0xff]  }
 0x435   :  { %7100 = vmatprep.subr.bf16.mxu0 %v12351_v43  ;;  %7143 = vmatprep.subr.bf16.mxu1 %v12354_v27 }
 0x437   :  { %5557 = vmatmul.mubr.bf16.vlgmr.msra.gmra.mrb[12].mxu0 %v5135_v36  ;;  %5608 = vmatmul.mubr.bf16.vlgmr.msra.gmra.mrb[20].mxu1 %v5135_v36  ;;  %v12381_v36 = vld [vmem:[#allocation14 + $0x2a4] ss:$16 sps:$4 sm:$0xff]  }
 0x438   :  { %5566 = vmatprep.mubr.bf16.mxu0 %v5138_v35  ;;  %5617 = vmatprep.mubr.bf16.mxu1 %v5138_v35  ;;  %v12384_v35 = vld [vmem:[#allocation14 + $0x2ac] ss:$16 sps:$4 sm:$0xff]  }
 0x439   :  { %7101 = vmatpush1.bf16.msra.mxu0 %v12349_v38  ;;  %7144 = vmatpush1.bf16.msra.mxu1 %v12352_v10 }
 0x43a   :  { %7102 = vmatprep.subr.bf16.mxu0 %v12357_v23  ;;  %7145 = vmatprep.subr.bf16.mxu1 %v12360_v13  ;;  %v12399_v23 = vld [vmem:[#allocation14 + $0x304] ss:$16 sps:$4 sm:$0xff]   ;;  %v12402_v13 = vld [vmem:[#allocation14 + $0x30c] ss:$16 sps:$4 sm:$0xff]  }
 0x43d   :  { %7103 = vmatpush1.bf16.msra.mxu0 %v12355_v46  ;;  %7146 = vmatpush1.bf16.msra.mxu1 %v12358_v59 }
 0x43e   :  { %7104 = vmatprep.subr.bf16.mxu0 %v12363_v15  ;;  %7147 = vmatprep.subr.bf16.mxu1 %v12366_v57 }
 0x43f   :  { %5567 = vmatmul.mubr.bf16.gmra.mrb[32].mxu0 %v5137_v20  ;;  %5618 = vmatmul.mubr.bf16.gmra.mrb[40].mxu1 %v5137_v20  ;;  %v12379_v20 = vld [vmem:[#allocation14 + $0x2a0] ss:$16 sps:$4 sm:$0xff]  }
 0x441   :  { %7105 = vmatpush1.bf16.msra.mxu0 %v12361_v5  ;;  %7148 = vmatpush1.bf16.msra.mxu1 %v12364_v39  ;;  %v12397_v5 = vld [vmem:[#allocation14 + $0x300] ss:$16 sps:$4 sm:$0xff]   ;;  %v12400_v39 = vld [vmem:[#allocation14 + $0x308] ss:$16 sps:$4 sm:$0xff]  }
 0x442   :  { %7106 = vmatprep.subr.bf16.mxu0 %v12369_v7  ;;  %7149 = vmatprep.subr.bf16.mxu1 %v12372_v4 }
 0x445   :  { %7107 = vmatpush1.bf16.msra.mxu0 %v12367_v22  ;;  %7150 = vmatpush1.bf16.msra.mxu1 %v12370_v33 }
 0x446   :  { %7108 = vmatprep.subr.bf16.mxu0 %v12375_v18  ;;  %7151 = vmatprep.subr.bf16.mxu1 %v12378_v32 }
 0x449   :  { %7109 = vmatpush1.bf16.msra.mxu0 %v12373_v60  ;;  %7152 = vmatpush1.bf16.msra.mxu1 %v12376_v14 }
 0x44a   :  { %7110 = vmatprep.subr.bf16.mxu0 %v12381_v36  ;;  %7153 = vmatprep.subr.bf16.mxu1 %v12384_v35 }
 0x44d   :  { %7111 = vmatpush1.bf16.msra.mxu0 %v12379_v20 }
 0x44f   :  { %v3921_v47 = vpop.f32.mrb[20].mxu0  ;;  %v3972_v8 = vpop.f32.mrb[28].mxu1 }
 0x450   :  { %v3922_v16 = vadd.f32 %v3921_v47, %v14407_v11  ;;  %v3973_v1 = vadd.f32 %v3972_v8, %v14409_v0  ;;  %v3923_v61 = vpop.f32.mrb[21].mxu0  ;;  %v3974_v53 = vpop.f32.mrb[29].mxu1  ;;  %v12382_v47 = vld [vmem:[#allocation14 + $0x2a8] ss:$16 sps:$4 sm:$0xff]   ;;  %v14431_v8 = vrot.slane %v5638_v29, %v13576_v48 }
 0x451   :  { %v3924_v28 = vadd.f32 %v3923_v61, %v14411_v24  ;;  %v3975_v25 = vadd.f32 %v3974_v53, %v14413_v41  ;;  %v3925_v45 = vpop.f32.mrb[22].mxu0  ;;  %v3976_v50 = vpop.f32.mrb[30].mxu1  ;;  %7154 = vmatpush1.bf16.msra.mxu1 %v12382_v47  ;;  %v12390_v61 = vld [vmem:[#allocation14 + $0x2cc] ss:$16 sps:$4 sm:$0xff]   ;;  %v14437_v53 = vrot.slane %v5638_v29, %v13579_v49 }
 0x452   :  { %v3926_v37 = vpop.f32.mrb[23].mxu0  ;;  %v3977_v3 = vpop.f32.mrb[31].mxu1  ;;  %v12385_v45 = vld [vmem:[#allocation14 + $0x2c0] ss:$16 sps:$4 sm:$0xff]   ;;  %v12388_v50 = vld [vmem:[#allocation14 + $0x2c8] ss:$16 sps:$4 sm:$0xff]   ;;  %7155 = vmatprep.subr.bf16.mxu1 %v12390_v61 }
 0x453   :  { %v12405_v61 = vld [vmem:[#allocation14 + $0x324] ss:$16 sps:$4 sm:$0xff]  }
 0x455   :  { %7156 = vmatpush1.bf16.msra.mxu1 %v12388_v50 }
 0x490   :  { %v4470_v58 = vpop.f32.mrb[24].mxu0  ;;  %v4521_v26 = vpop.f32.mrb[32].mxu1 }
 0x491   :  { %v4536_v12 = vadd.f32 %v4470_v58, %v3922_v16  ;;  %v4538_v56 = vadd.f32 %v4521_v26, %v3973_v1  ;;  %v4472_v2 = vpop.f32.mrb[25].mxu0  ;;  %v4523_v44 = vpop.f32.mrb[33].mxu1  ;;  %v14434_v16 = vrot.slane %v5638_v29, %v13599_v54  ;;  %v12387_v1 = vld [vmem:[#allocation14 + $0x2c4] ss:$16 sps:$4 sm:$0xff]  }
 0x492   :  { %v4537_v52 = vadd.f32 %v4472_v2, %v3924_v28  ;;  %v4539_v11 = vadd.f32 %v4523_v44, %v3975_v25  ;;  %v4474_v55 = vpop.f32.mrb[26].mxu0  ;;  %v4525_v0 = vpop.f32.mrb[34].mxu1  ;;  %v15138_v28 = vld [vmem:[#allocation34_spill] sm:$0xff]  ;;  %7112 = vmatprep.subr.bf16.mxu0 %v12387_v1  ;;  %v12393_v2 = vld [vmem:[#allocation14 + $0x2e4] ss:$16 sps:$4 sm:$0xff]  }
 0x493   :  { %v4475_v51 = vpop.f32.mrb[27].mxu0  ;;  %v4526_v21 = vpop.f32.mrb[35].mxu1  ;;  %v14440_v25 = vrot.slane %v5638_v29, %v15138_v28  ;;  %7113 = vmatpush1.bf16.msra.mxu0 %v12385_v45  ;;  %v12396_v44 = vld [vmem:[#allocation14 + $0x2ec] ss:$16 sps:$4 sm:$0xff]  }
 0x494   :  { %v12391_v51 = vld [vmem:[#allocation14 + $0x2e0] ss:$16 sps:$4 sm:$0xff]   ;;  %v12394_v21 = vld [vmem:[#allocation14 + $0x2e8] ss:$16 sps:$4 sm:$0xff]   ;;  %7114 = vmatprep.subr.bf16.mxu0 %v12393_v2  ;;  %7157 = vmatprep.subr.bf16.mxu1 %v12396_v44  ;;  %v12408_v45 = vld [vmem:[#allocation14 + $0x32c] ss:$16 sps:$4 sm:$0xff]  }
 0x495   :  { %7158 = vmatpush1.bf16.msra.mxu1 %v12394_v21  ;;  %v12406_v2 = vld [vmem:[#allocation14 + $0x328] ss:$16 sps:$4 sm:$0xff]   ;;  %v12411_v21 = vld [vmem:[#allocation14 + $0x344] ss:$16 sps:$4 sm:$0xff]  }
 0x496   :  { %7159 = vmatprep.subr.bf16.mxu1 %v12402_v13 }
 0x497   :  { %7115 = vmatpush1.bf16.msra.mxu0 %v12391_v51 }
 0x498   :  { %7116 = vmatprep.subr.bf16.mxu0 %v12399_v23 }
 0x499   :  { %7160 = vmatpush1.bf16.msra.mxu1 %v12400_v39 }
 0x49a   :  { %7161 = vmatprep.subr.bf16.mxu1 %v12408_v45 }
 0x49b   :  { %7117 = vmatpush1.bf16.msra.mxu0 %v12397_v5 }
 0x49c   :  { %7118 = vmatprep.subr.bf16.mxu0 %v12405_v61 }
 0x49d   :  { %7162 = vmatpush1.bf16.msra.mxu1 %v12406_v2  ;;  %v12423_v2 = vld [vmem:[#allocation14 + $0x384] ss:$16 sps:$4 sm:$0xff]  }
 0x4d1   :  { %v5031_v19 = vpop.f32.mrb[28].mxu0  ;;  %v5082_v24 = vpop.f32.mrb[36].mxu1 }
 0x4d2   :  { %v14422_v42 = vadd.f32 %v5031_v19, %v4536_v12  ;;  %v14424_v41 = vadd.f32 %v5082_v24, %v4538_v56  ;;  %v5033_v31 = vpop.f32.mrb[29].mxu0  ;;  %v5084_v63 = vpop.f32.mrb[37].mxu1 }
 0x4d3   :  { %v14426_v6 = vadd.f32 %v5033_v31, %v4537_v52  ;;  %v14428_v34 = vadd.f32 %v5084_v63, %v4539_v11  ;;  %v5035_v30 = vpop.f32.mrb[30].mxu0  ;;  %v5086_v17 = vpop.f32.mrb[38].mxu1 }
 0x4d4   :  { %v5036_v40 = vpop.f32.mrb[31].mxu0  ;;  %v5087_v9 = vpop.f32.mrb[39].mxu1 }
 0x50a   :  { %v5558_v37 = vpop.f32.mrb[12].mxu0  ;;  %v5609_v3 = vpop.f32.mrb[20].mxu1 }
 0x50b   :  { %v5660_v58 = vadd.f32 %v14431_v8, %v5558_v37  ;;  %v5662_v26 = vadd.f32 %v14434_v16, %v5609_v3  ;;  %v5560_v12 = vpop.f32.mrb[13].mxu0  ;;  %v5611_v56 = vpop.f32.mrb[21].mxu1 }
 0x50c   :  { %v5661_v52 = vadd.f32 %v14437_v53, %v5560_v12  ;;  %v5663_v11 = vadd.f32 %v14440_v25, %v5611_v56  ;;  %v5562_v55 = vpop.f32.mrb[14].mxu0  ;;  %v5613_v0 = vpop.f32.mrb[22].mxu1  ;;  %v12403_v56 = vld [vmem:[#allocation14 + $0x320] ss:$16 sps:$4 sm:$0xff]  }
 0x50d   :  { %v5672_v19 = vmax.f32 %v5660_v58, 0.0  ;;  %v5674_v24 = vmax.f32 %v5662_v26, 0.0  ;;  %v5664_v31 = vadd.f32 %v14431_v8, %v5562_v55  ;;  %v5666_v63 = vadd.f32 %v14434_v16, %v5613_v0  ;;  %v5564_v30 = vpop.f32.mrb[15].mxu0  ;;  %v5615_v17 = vpop.f32.mrb[23].mxu1  ;;  %7119 = vmatpush1.bf16.msra.mxu0 %v12403_v56 }
 0x50e   :  { %v5673_v40 = vmax.f32 %v5661_v52, 0.0  ;;  %v5675_v9 = vmax.f32 %v5663_v11, 0.0  ;;  %v5665_v43 = vadd.f32 %v14437_v53, %v5564_v30  ;;  %v5667_v27 = vadd.f32 %v14440_v25, %v5615_v17  ;;  %v12414_v30 = vld [vmem:[#allocation14 + $0x34c] ss:$16 sps:$4 sm:$0xff]   ;;  %7120 = vmatprep.subr.bf16.mxu0 %v12411_v21 }
 0x50f   :  { %v5676_v38 = vmax.f32 %v5664_v31, 0.0  ;;  %v5678_v10 = vmax.f32 %v5666_v63, 0.0  ;;  %7163 = vmatprep.subr.bf16.mxu1 %v12414_v30  ;;  %v12421_v30 = vld [vmem:[#allocation14 + $0x380] ss:$16 sps:$4 sm:$0xff]  }
 0x510   :  { %v5696_v46 = vcombine.low %v5672_v19, %v5673_v40  ;;  %v5697_v59 = vcombine.high %v5672_v19, %v5673_v40  ;;  %v5698_v15 = vcombine.low %v5674_v24, %v5675_v9  ;;  %v5699_v57 = vcombine.high %v5674_v24, %v5675_v9 }
 0x511   :  { %v5677_v7 = vmax.f32 %v5665_v43, 0.0  ;;  %v5679_v4 = vmax.f32 %v5667_v27, 0.0  ;;  %v12409_v27 = vld [vmem:[#allocation14 + $0x340] ss:$16 sps:$4 sm:$0xff]  }
 0x512   :  { %v5706_v22 = vrot.slane %v5696_v46, %v13619_v62  ;;  %v5713_v33 = vrot.slane %v5697_v59, %v13619_v62  ;;  %v5720_v18 = vrot.slane %v5698_v15, %v13619_v62  ;;  %v5727_v32 = vrot.slane %v5699_v57, %v13619_v62  ;;  %v14454_v60 = vpop.f32.mrb[32].mxu0  ;;  %v14456_v14 = vpop.f32.mrb[40].mxu1  ;;  %v12412_v46 = vld [vmem:[#allocation14 + $0x348] ss:$16 sps:$4 sm:$0xff]   ;;  %v12417_v59 = vld [vmem:[#allocation14 + $0x364] ss:$16 sps:$4 sm:$0xff]   ;;  %7121 = vmatpush1.bf16.msra.mxu0 %v12409_v27 }
 0x513   :  { %v14458_v36 = vcombine.low %v5676_v38, %v5677_v7  ;;  %v14460_v35 = vcombine.high %v5676_v38, %v5677_v7  ;;  %v14462_v29 = vcombine.low %v5678_v10, %v5679_v4  ;;  %v14464_v20 = vcombine.high %v5678_v10, %v5679_v4  ;;  %v14466_v47 = vpop.f32.mrb[33].mxu0  ;;  %v14468_v1 = vpop.f32.mrb[41].mxu1  ;;  %v12420_v7 = vld [vmem:[#allocation14 + $0x36c] ss:$16 sps:$4 sm:$0xff]   ;;  %7164 = vmatpush1.bf16.msra.mxu1 %v12412_v46 }
 0x514   :  { %v5728_v50 = vcombine.low %v5706_v22, %v5720_v18  ;;  %v5729_v37 = vcombine.high %v5706_v22, %v5720_v18  ;;  %v5730_v3 = vcombine.low %v5713_v33, %v5727_v32  ;;  %v5731_v58 = vcombine.high %v5713_v33, %v5727_v32  ;;  %v5572_v26 = vpop.f32.mrb[34].mxu0  ;;  %v5623_v12 = vpop.f32.mrb[42].mxu1  ;;  %7122 = vmatprep.subr.bf16.mxu0 %v12417_v59 }
 0x515   :  { %v11066_v44 = vcombine.low %v5720_v18, %v5720_v18  ;;  %v11067_v52 = vcombine.high %v5720_v18, %v5720_v18  ;;  %v11068_v11 = vcombine.low %v5727_v32, %v5727_v32  ;;  %v11069_v55 = vcombine.high %v5727_v32, %v5727_v32  ;;  %v5573_v0 = vpop.f32.mrb[35].mxu0  ;;  %v5624_v51 = vpop.f32.mrb[43].mxu1  ;;  %v12415_v32 = vld [vmem:[#allocation14 + $0x360] ss:$16 sps:$4 sm:$0xff]   ;;  %7165 = vmatprep.subr.bf16.mxu1 %v12420_v7  ;;  %v12429_v7 = vld [vmem:[#allocation14 + $0x3a4] ss:$16 sps:$4 sm:$0xff]  }
 0x516   :  { %v5811_v19 = vrot.slane %v5728_v50, %v13619_v62  ;;  %v5828_v24 = vrot.slane %v5729_v37, %v13619_v62  ;;  %v14473_v31 = vrot.slane %v5730_v3, %v13619_v62  ;;  %v14476_v63 = vrot.slane %v5731_v58, %v13619_v62  ;;  %v12418_v3 = vld [vmem:[#allocation14 + $0x368] ss:$16 sps:$4 sm:$0xff]   ;;  %v12426_v0 = vld [vmem:[#allocation14 + $0x38c] ss:$16 sps:$4 sm:$0xff]   ;;  %7123 = vmatpush1.bf16.msra.mxu0 %v12415_v32 }
 0x517   :  { %v5818_v17 = vrot.slane %v11066_v44, %v13619_v62  ;;  %v5835_v40 = vrot.slane %v11067_v52, %v13619_v62  ;;  %v14481_v9 = vrot.slane %v11068_v11, %v13619_v62  ;;  %v14484_v43 = vrot.slane %v11069_v55, %v13619_v62  ;;  %7166 = vmatpush1.bf16.msra.mxu1 %v12418_v3 }
 0x518   :  { %v5819_v38 = vcombine.high %v5811_v19, %v5811_v19  ;;  %v5836_v10 = vcombine.high %v5828_v24, %v5828_v24  ;;  %v5853_v23 = vcombine.high %v14473_v31, %v14473_v31  ;;  %v5870_v13 = vcombine.high %v14476_v63, %v14476_v63  ;;  %7124 = vmatprep.subr.bf16.mxu0 %v12423_v2 }
 0x519   :  { %v5820_v15 = vcombine.high %v5818_v17, %v5818_v17  ;;  %v5837_v57 = vcombine.high %v5835_v40, %v5835_v40  ;;  %v5854_v5 = vcombine.high %v14481_v9, %v14481_v9  ;;  %v6056_v4 = vsel %vm2065_vm2, %v5811_v19, -inf  ;;  %7167 = vmatprep.subr.bf16.mxu1 %v12426_v0 }
 0x51a   :  { %v6063_v22 = vsel %vm2065_vm2, %v5819_v38, -inf  ;;  %v6070_v33 = vsel %vm2065_vm2, %v5818_v17, -inf  ;;  %v6084_v18 = vsel %vm2065_vm2, %v5828_v24, -inf  ;;  %v6057_v61 = vrot.slane %v6056_v4, 4  ;;  %7125 = vmatpush1.bf16.msra.mxu0 %v12421_v30 }
 0x51b   :  { %v6064_v45 = vrot.slane %v6063_v22, 4  ;;  %v6071_v50 = vrot.slane %v6070_v33, 4  ;;  %v6077_v37 = vsel %vm2065_vm2, %v5820_v15, -inf  ;;  %v6085_v26 = vrot.slane %v6084_v18, 4  ;;  %7126 = vmatprep.subr.bf16.mxu0 %v12429_v7 }
 0x51c   :  { %v6078_v58 = vrot.slane %v6077_v37, 4  ;;  %v6091_v12 = vsel %vm2065_vm2, %v5836_v10, -inf  ;;  %v6098_v56 = vsel %vm2065_vm2, %v5835_v40, -inf  ;;  %v6058_v44 = vmax.f32 %v6056_v4, %v6057_v61  ;;  %v12424_v40 = vld [vmem:[#allocation14 + $0x388] ss:$16 sps:$4 sm:$0xff]  }
 0x51d   :  { %v6065_v52 = vmax.f32 %v6063_v22, %v6064_v45  ;;  %v6072_v11 = vmax.f32 %v6070_v33, %v6071_v50  ;;  %v6092_v55 = vrot.slane %v6091_v12, 4  ;;  %v6086_v21 = vmax.f32 %v6084_v18, %v6085_v26  ;;  %v12427_v26 = vld [vmem:[#allocation14 + $0x3a0] ss:$16 sps:$4 sm:$0xff]   ;;  %7168 = vmatpush1.bf16.msra.mxu1 %v12424_v40 }
 0x51e   :  { %v6079_v51 = vmax.f32 %v6077_v37, %v6078_v58  ;;  %v6099_v19 = vrot.slane %v6098_v56, 4  ;;  %v6105_v24 = vsel %vm2065_vm2, %v5837_v57, -inf  ;;  %v6059_v17 = vrot.slane %v6058_v44, 2  ;;  %v12432_v57 = vld [vmem:[#allocation14 + $0x3ac] ss:$16 sps:$4 sm:$0xff]   ;;  %7127 = vmatpush1.bf16.msra.mxu0 %v12427_v26 }
 0x51f   :  { %v6066_v27 = vrot.slane %v6065_v52, 2  ;;  %v6073_v38 = vrot.slane %v6072_v11, 2  ;;  %v6093_v10 = vmax.f32 %v6091_v12, %v6092_v55  ;;  %v6087_v59 = vrot.slane %v6086_v21, 2  ;;  %7169 = vmatprep.subr.bf16.mxu1 %v12432_v57 }
 0x520   :  { %v6080_v46 = vrot.slane %v6079_v51, 2  ;;  %v6100_v15 = vmax.f32 %v6098_v56, %v6099_v19  ;;  %v6106_v4 = vrot.slane %v6105_v24, 4  ;;  %v6060_v22 = vmax.f32 %v6058_v44, %v6059_v17  ;;  %v12430_v56 = vld [vmem:[#allocation14 + $0x3a8] ss:$16 sps:$4 sm:$0xff]  }
 0x521   :  { %v6067_v33 = vmax.f32 %v6065_v52, %v6066_v27  ;;  %v6074_v18 = vmax.f32 %v6072_v11, %v6073_v38  ;;  %v6094_v61 = vrot.slane %v6093_v10, 2  ;;  %v6088_v50 = vmax.f32 %v6086_v21, %v6087_v59  ;;  %v12435_v52 = vld [vmem:[#allocation14 + $0x3c4] ss:$16 sps:$4 sm:$0xff]   ;;  %7170 = vmatpush1.bf16.msra.mxu1 %v12430_v56 }
 0x522   :  { %v6081_v45 = vmax.f32 %v6079_v51, %v6080_v46  ;;  %v6101_v37 = vrot.slane %v6100_v15, 2  ;;  %v6107_v58 = vmax.f32 %v6105_v24, %v6106_v4  ;;  %v6061_v32 = vrot.slane %v6060_v22, 1  ;;  %v12438_v24 = vld [vmem:[#allocation14 + $0x3cc] ss:$16 sps:$4 sm:$0xff]   ;;  %v12436_v4 = vld [vmem:[#allocation14 + $0x3c8] ss:$16 sps:$4 sm:$0xff]   ;;  %7128 = vmatprep.subr.bf16.mxu0 %v12435_v52 }
 0x523   :  { %v6068_v12 = vrot.slane %v6067_v33, 1  ;;  %v6075_v55 = vrot.slane %v6074_v18, 1  ;;  %v6095_v39 = vmax.f32 %v6093_v10, %v6094_v61  ;;  %v6089_v2 = vrot.slane %v6088_v50, 1  ;;  %v12433_v10 = vld [vmem:[#allocation14 + $0x3c0] ss:$16 sps:$4 sm:$0xff]   ;;  %7171 = vmatprep.subr.bf16.mxu1 %v12438_v24 }
 0x524   :  { %v6082_v3 = vrot.slane %v6081_v45, 1  ;;  %v6102_v19 = vmax.f32 %v6100_v15, %v6101_v37  ;;  %v6108_v44 = vrot.slane %v6107_v58, 2  ;;  %v14502_v11 = vmax.f32 %v6060_v22, %v6061_v32  ;;  %7129 = vmatpush1.bf16.msra.mxu0 %v12433_v10 }
 0x525   :  { %v14504_v0 = vmax.f32 %v6067_v33, %v6068_v12  ;;  %v14506_v51 = vmax.f32 %v6074_v18, %v6075_v55  ;;  %v6096_v21 = vrot.slane %v6095_v39, 1  ;;  %v14510_v30 = vmax.f32 %v6088_v50, %v6089_v2  ;;  %v12439_v55 = vld [vmem:[#allocation14 + $0x3e0] ss:$16 sps:$4 sm:$0xff]   ;;  %7172 = vmatpush1.bf16.msra.mxu1 %v12436_v4 }
 0x526   :  { %v14508_v17 = vmax.f32 %v6081_v45, %v6082_v3  ;;  %v6103_v27 = vrot.slane %v6102_v19, 1  ;;  %v6109_v38 = vmax.f32 %v6107_v58, %v6108_v44  ;;  %v6112_v40 = vsel %vm2065_vm2, %v14473_v31, -inf  ;;  %v12444_v45 = vld [vmem:[#allocation14 + $0x3ec] ss:$16 sps:$4 sm:$0xff]  }
 0x527   :  { %v14512_v46 = vmax.f32 %v6095_v39, %v6096_v21  ;;  %v6119_v59 = vsel %vm2065_vm2, %v5853_v23, -inf  ;;  %v6126_v15 = vsel %vm2065_vm2, %v14481_v9, -inf  ;;  %v6113_v33 = vrot.slane %v6112_v40, 4  ;;  %v12441_v39 = vld [vmem:[#allocation14 + $0x3e4] ss:$16 sps:$4 sm:$0xff]   ;;  %7173 = vmatprep.subr.bf16.mxu1 %v12444_v45 }
 0x528   :  { %v14522_v7 = vmax.f32 %v6102_v19, %v6103_v27  ;;  %v6110_v22 = vrot.slane %v6109_v38, 1  ;;  %v6120_v18 = vrot.slane %v6119_v59, 4  ;;  %v6127_v61 = vrot.slane %v6126_v15, 4  ;;  %7130 = vmatprep.subr.bf16.mxu0 %v12441_v39 }
 0x529   :  { %v6133_v31 = vsel %vm2065_vm2, %v5854_v5, -inf  ;;  %v6140_v23 = vsel %vm2065_vm2, %v14476_v63, -inf  ;;  %v6147_v57 = vsel %vm2065_vm2, %v5870_v13, -inf  ;;  %v6114_v37 = vmax.f32 %v6112_v40, %v6113_v33  ;;  %v12442_v13 = vld [vmem:[#allocation14 + $0x3e8] ss:$16 sps:$4 sm:$0xff]   ;;  %7131 = vmatpush1.bf16.msra.mxu0 %v12439_v55 }
 0x52a   :  { %v14534_v50 = vmax.f32 %v6109_v38, %v6110_v22  ;;  %v6121_v58 = vmax.f32 %v6119_v59, %v6120_v18  ;;  %v6134_v26 = vrot.slane %v6133_v31, 4  ;;  %v6128_v32 = vmax.f32 %v6126_v15, %v6127_v61  ;;  %v12453_v59 = vld [vmem:[#allocation14 + $0x4] ss:$16 sps:$4 sm:$0xff]   ;;  %7174 = vmatpush1.bf16.msra.mxu1 %v12442_v13 }
 0x52b   :  { %v6141_v12 = vrot.slane %v6140_v23, 4  ;;  %v6148_v9 = vrot.slane %v6147_v57, 4  ;;  %v6154_v5 = vsel %vm2065_vm2, %v14484_v43, -inf  ;;  %v6115_v56 = vrot.slane %v6114_v37, 2  ;;  %7506 = vmatprep.subr.bf16.mxu0 %v12453_v59 }
 0x52c   :  { %v6122_v3 = vrot.slane %v6121_v58, 2  ;;  %v6135_v63 = vmax.f32 %v6133_v31, %v6134_v26  ;;  %v6155_v2 = vrot.slane %v6154_v5, 4  ;;  %v6129_v19 = vrot.slane %v6128_v32, 2 }
 0x52d   :  { %v6142_v44 = vmax.f32 %v6140_v23, %v6141_v12  ;;  %v6149_v52 = vmax.f32 %v6147_v57, %v6148_v9  ;;  %v15139_v21 = vcombine.high %v14484_v43, %v14484_v43  ;;  %v6116_v27 = vmax.f32 %v6114_v37, %v6115_v56  ;;  %v12456_v43 = vld [vmem:[#allocation14 + $0xc] ss:$16 sps:$4 sm:$0xff]  }
 0x52e   :  { %v6123_v38 = vmax.f32 %v6121_v58, %v6122_v3  ;;  %v6136_v10 = vrot.slane %v6135_v63, 2  ;;  %v6156_v40 = vmax.f32 %v6154_v5, %v6155_v2  ;;  %v6130_v15 = vmax.f32 %v6128_v32, %v6129_v19  ;;  %7549 = vmatprep.subr.bf16.mxu1 %v12456_v43 }
 0x52f   :  { %v6161_v24 = vsel %vm2065_vm2, %v15139_v21, -inf  ;;  %v6143_v22 = vrot.slane %v6142_v44, 2  ;;  %v6150_v33 = vrot.slane %v6149_v52, 2  ;;  %v6117_v18 = vrot.slane %v6116_v27, 1 }
 0x530   :  { %v6162_v4 = vrot.slane %v6161_v24, 4  ;;  %v6124_v39 = vrot.slane %v6123_v38, 1  ;;  %v6137_v61 = vmax.f32 %v6135_v63, %v6136_v10  ;;  %v6157_v31 = vrot.slane %v6156_v40, 2 }
 0x531   :  { %v6131_v23 = vrot.slane %v6130_v15, 1  ;;  %v6144_v57 = vmax.f32 %v6142_v44, %v6143_v22  ;;  %v6151_v45 = vmax.f32 %v6149_v52, %v6150_v33  ;;  %v6118_v58 = vmax.f32 %v6116_v27, %v6117_v18 }
 0x532   :  { %v6163_v37 = vmax.f32 %v6161_v24, %v6162_v4  ;;  %v6125_v26 = vmax.f32 %v6123_v38, %v6124_v39  ;;  %v6138_v12 = vrot.slane %v6137_v61, 1  ;;  %v6158_v9 = vmax.f32 %v6156_v40, %v6157_v31 }
 0x533   :  { %v6132_v32 = vmax.f32 %v6130_v15, %v6131_v23  ;;  %v6145_v5 = vrot.slane %v6144_v57, 1  ;;  %v6152_v56 = vrot.slane %v6151_v45, 1  ;;  %v6392_v63 = vmax.f32 %v14502_v11, %v14506_v51 }
 0x534   :  { %v6164_v55 = vrot.slane %v6163_v37, 2  ;;  %v6139_v3 = vmax.f32 %v6137_v61, %v6138_v12  ;;  %v6159_v2 = vrot.slane %v6158_v9, 1  ;;  %v6393_v13 = vmax.f32 %v14504_v0, %v14508_v17 }
 0x535   :  { %v6146_v19 = vmax.f32 %v6144_v57, %v6145_v5  ;;  %v6153_v44 = vmax.f32 %v6151_v45, %v6152_v56  ;;  %v6394_v21 = vmax.f32 %v14510_v30, %v14522_v7  ;;  %v6395_v27 = vmax.f32 %v14512_v46, %v14534_v50 }
 0x536   :  { %v6165_v52 = vmax.f32 %v6163_v37, %v6164_v55  ;;  %v6160_v24 = vmax.f32 %v6158_v9, %v6159_v2  ;;  %v6396_v38 = vmax.f32 %v6118_v58, %v6132_v32  ;;  %v6397_v10 = vmax.f32 %v6125_v26, %v6139_v3 }
 0x537   :  { %v6448_v59 = vsel %vm2842_vm3, %v6394_v21, %v6392_v63  ;;  %v5742_v11 = vrot.slane %v14458_v36, %v13619_v62  ;;  %v5749_v0 = vrot.slane %v14460_v35, %v13619_v62  ;;  %v6453_v30 = vsel %vm2842_vm3, %v6395_v27, %v6393_v13 }
 0x538   :  { %v6166_v40 = vrot.slane %v6165_v52, 1  ;;  %v6398_v51 = vmax.f32 %v6146_v19, %v6160_v24  ;;  %v6449_v17 = vsel %vm2844_vm4, %v6396_v38, %v6448_v59  ;;  %v5756_v7 = vrot.slane %v14462_v29, %v13619_v62 }
 0x539   :  { %v6454_v50 = vsel %vm2844_vm4, %v6397_v10, %v6453_v30  ;;  %v5763_v15 = vrot.slane %v14464_v20, %v13619_v62  ;;  %v14564_v36 = vadd.f32 %v14454_v60, %v14422_v42 }
 0x53a   :  { %v6167_v46 = vmax.f32 %v6165_v52, %v6166_v40  ;;  %v14567_v35 = vsel %vm2846_vm5, %v6398_v51, %v6449_v17  ;;  %v5764_v22 = vcombine.low %v5742_v11, %v5756_v7  ;;  %v5765_v33 = vcombine.high %v5742_v11, %v5756_v7 }
 0x53b   :  { %v11070_v4 = vcombine.low %v5756_v7, %v5756_v7  ;;  %v5766_v39 = vcombine.low %v5749_v0, %v5763_v15  ;;  %v5767_v61 = vcombine.high %v5749_v0, %v5763_v15  ;;  %v11071_v29 = vcombine.high %v5756_v7, %v5756_v7 }
 0x53c   :  { %v6399_v18 = vmax.f32 %v6153_v44, %v6167_v46  ;;  %v5879_v31 = vrot.slane %v5764_v22, %v13619_v62  ;;  %v5896_v20 = vrot.slane %v5765_v33, %v13619_v62  ;;  %v11072_v23 = vcombine.low %v5763_v15, %v5763_v15 }
 0x53d   :  { %v5886_v43 = vrot.slane %v11070_v4, %v13619_v62  ;;  %v5903_v60 = vrot.slane %v11071_v29, %v13619_v62  ;;  %v14577_v57 = vrot.slane %v5766_v39, %v13619_v62  ;;  %v11073_v45 = vcombine.high %v5763_v15, %v5763_v15 }
 0x53e   :  { %v14573_v42 = vsel %vm2846_vm5, %v6399_v18, %v6454_v50  ;;  %v5887_v37 = vcombine.high %v5879_v31, %v5879_v31  ;;  %v5904_v26 = vcombine.high %v5896_v20, %v5896_v20  ;;  %v14580_v12 = vrot.slane %v11072_v23, %v13619_v62 }
 0x53f   :  { %v5888_v58 = vcombine.high %v5886_v43, %v5886_v43  ;;  %v5905_v9 = vcombine.high %v5903_v60, %v5903_v60  ;;  %v5921_v32 = vcombine.high %v14577_v57, %v14577_v57  ;;  %v14585_v5 = vrot.slane %v5767_v61, %v13619_v62 }
 0x540   :  { %v14588_v56 = vrot.slane %v11073_v45, %v13619_v62  ;;  %v5922_v55 = vcombine.high %v14580_v12, %v14580_v12  ;;  %v6168_v3 = vsel %vm2065_vm2, %v5879_v31, -inf  ;;  %v6175_v2 = vsel %vm2065_vm2, %v5887_v37, -inf }
 0x541   :  { %v6182_v63 = vsel %vm2065_vm2, %v5886_v43, -inf  ;;  %v5938_v13 = vcombine.high %v14585_v5, %v14585_v5  ;;  %v6169_v44 = vrot.slane %v6168_v3, 4  ;;  %v6176_v52 = vrot.slane %v6175_v2, 4 }
 0x542   :  { %v5939_v19 = vcombine.high %v14588_v56, %v14588_v56  ;;  %v6183_v21 = vrot.slane %v6182_v63, 4  ;;  %v6189_v24 = vsel %vm2065_vm2, %v5888_v58, -inf  ;;  %v6196_v27 = vsel %vm2065_vm2, %v5896_v20, -inf }
 0x543   :  { %v6203_v38 = vsel %vm2065_vm2, %v5904_v26, -inf  ;;  %v6170_v10 = vmax.f32 %v6168_v3, %v6169_v44  ;;  %v6177_v40 = vmax.f32 %v6175_v2, %v6176_v52  ;;  %v6190_v59 = vrot.slane %v6189_v24, 4 }
 0x544   :  { %v6197_v11 = vrot.slane %v6196_v27, 4  ;;  %v6184_v0 = vmax.f32 %v6182_v63, %v6183_v21  ;;  %v6204_v51 = vrot.slane %v6203_v38, 4  ;;  %v6210_v17 = vsel %vm2065_vm2, %v5903_v60, -inf }
 0x545   :  { %v6217_v30 = vsel %vm2065_vm2, %v5905_v9, -inf  ;;  %v6171_v7 = vrot.slane %v6170_v10, 2  ;;  %v6178_v46 = vrot.slane %v6177_v40, 2  ;;  %v6191_v50 = vmax.f32 %v6189_v24, %v6190_v59 }
 0x546   :  { %v6198_v15 = vmax.f32 %v6196_v27, %v6197_v11  ;;  %v6185_v22 = vrot.slane %v6184_v0, 2  ;;  %v6205_v33 = vmax.f32 %v6203_v38, %v6204_v51  ;;  %v6211_v4 = vrot.slane %v6210_v17, 4 }
 0x547   :  { %v6218_v18 = vrot.slane %v6217_v30, 4  ;;  %v6172_v39 = vmax.f32 %v6170_v10, %v6171_v7  ;;  %v6179_v61 = vmax.f32 %v6177_v40, %v6178_v46  ;;  %v6192_v29 = vrot.slane %v6191_v50, 2 }
 0x548   :  { %v6199_v31 = vrot.slane %v6198_v15, 2  ;;  %v6186_v43 = vmax.f32 %v6184_v0, %v6185_v22  ;;  %v6206_v20 = vrot.slane %v6205_v33, 2  ;;  %v6212_v23 = vmax.f32 %v6210_v17, %v6211_v4 }
 0x549   :  { %v6219_v45 = vmax.f32 %v6217_v30, %v6218_v18  ;;  %v6173_v37 = vrot.slane %v6172_v39, 1  ;;  %v6180_v60 = vrot.slane %v6179_v61, 1  ;;  %v6193_v58 = vmax.f32 %v6191_v50, %v6192_v29 }
 0x54a   :  { %v6200_v26 = vmax.f32 %v6198_v15, %v6199_v31  ;;  %v6187_v9 = vrot.slane %v6186_v43, 1  ;;  %v6207_v3 = vmax.f32 %v6205_v33, %v6206_v20  ;;  %v6213_v2 = vrot.slane %v6212_v23, 2 }
 0x54b   :  { %v6220_v63 = vrot.slane %v6219_v45, 2  ;;  %v14604_v44 = vmax.f32 %v6172_v39, %v6173_v37  ;;  %v14606_v52 = vmax.f32 %v6179_v61, %v6180_v60  ;;  %v6194_v21 = vrot.slane %v6193_v58, 1 }
 0x54c   :  { %v6201_v24 = vrot.slane %v6200_v26, 1  ;;  %v14608_v27 = vmax.f32 %v6186_v43, %v6187_v9  ;;  %v6208_v38 = vrot.slane %v6207_v3, 1  ;;  %v6214_v10 = vmax.f32 %v6212_v23, %v6213_v2 }
 0x54d   :  { %v6221_v40 = vmax.f32 %v6219_v45, %v6220_v63  ;;  %v14610_v59 = vmax.f32 %v6193_v58, %v6194_v21  ;;  %v6224_v0 = vsel %vm2065_vm2, %v14577_v57, -inf  ;;  %v6231_v51 = vsel %vm2065_vm2, %v5921_v32, -inf }
 0x54e   :  { %v14612_v11 = vmax.f32 %v6200_v26, %v6201_v24  ;;  %v14617_v17 = vmax.f32 %v6207_v3, %v6208_v38  ;;  %v6215_v30 = vrot.slane %v6214_v10, 1  ;;  %v6225_v46 = vrot.slane %v6224_v0, 4 }
 0x54f   :  { %v6222_v7 = vrot.slane %v6221_v40, 1  ;;  %v6232_v50 = vrot.slane %v6231_v51, 4  ;;  %v6238_v15 = vsel %vm2065_vm2, %v14580_v12, -inf  ;;  %v6245_v22 = vsel %vm2065_vm2, %v5922_v55, -inf }
 0x550   :  { %v6252_v33 = vsel %vm2065_vm2, %v14585_v5, -inf  ;;  %v6216_v4 = vmax.f32 %v6214_v10, %v6215_v30  ;;  %v6226_v39 = vmax.f32 %v6224_v0, %v6225_v46  ;;  %v6239_v57 = vrot.slane %v6238_v15, 4 }
 0x551   :  { %v6223_v18 = vmax.f32 %v6221_v40, %v6222_v7  ;;  %v6233_v61 = vmax.f32 %v6231_v51, %v6232_v50  ;;  %v6246_v32 = vrot.slane %v6245_v22, 4  ;;  %v6253_v29 = vrot.slane %v6252_v33, 4 }
 0x552   :  { %v6259_v31 = vsel %vm2065_vm2, %v5938_v13, -inf  ;;  %v6227_v43 = vrot.slane %v6226_v39, 2  ;;  %v6240_v20 = vmax.f32 %v6238_v15, %v6239_v57  ;;  %v6266_v55 = vsel %vm2065_vm2, %v14588_v56, -inf }
 0x553   :  { %v6260_v12 = vrot.slane %v6259_v31, 4  ;;  %v6234_v23 = vrot.slane %v6233_v61, 2  ;;  %v6247_v45 = vmax.f32 %v6245_v22, %v6246_v32  ;;  %v6254_v37 = vmax.f32 %v6252_v33, %v6253_v29 }
 0x554   :  { %v6267_v60 = vrot.slane %v6266_v55, 4  ;;  %v6228_v58 = vmax.f32 %v6226_v39, %v6227_v43  ;;  %v6241_v26 = vrot.slane %v6240_v20, 2  ;;  %v6273_v5 = vsel %vm2065_vm2, %v5939_v19, -inf }
 0x555   :  { %v6261_v9 = vmax.f32 %v6259_v31, %v6260_v12  ;;  %v6235_v3 = vmax.f32 %v6233_v61, %v6234_v23  ;;  %v6248_v13 = vrot.slane %v6247_v45, 2  ;;  %v6255_v2 = vrot.slane %v6254_v37, 2 }
 0x556   :  { %v6268_v63 = vmax.f32 %v6266_v55, %v6267_v60  ;;  %v6229_v21 = vrot.slane %v6228_v58, 1  ;;  %v6242_v24 = vmax.f32 %v6240_v20, %v6241_v26  ;;  %v6274_v10 = vrot.slane %v6273_v5, 4 }
 0x557   :  { %v6262_v38 = vrot.slane %v6261_v9, 2  ;;  %v6236_v40 = vrot.slane %v6235_v3, 1  ;;  %v6249_v0 = vmax.f32 %v6247_v45, %v6248_v13  ;;  %v6256_v51 = vmax.f32 %v6254_v37, %v6255_v2 }
 0x558   :  { %v6269_v30 = vrot.slane %v6268_v63, 2  ;;  %v6230_v7 = vmax.f32 %v6228_v58, %v6229_v21  ;;  %v6243_v46 = vrot.slane %v6242_v24, 1  ;;  %v6275_v15 = vmax.f32 %v6273_v5, %v6274_v10 }
 0x559   :  { %v6263_v50 = vmax.f32 %v6261_v9, %v6262_v38  ;;  %v6237_v22 = vmax.f32 %v6235_v3, %v6236_v40  ;;  %v6250_v56 = vrot.slane %v6249_v0, 1  ;;  %v6257_v33 = vrot.slane %v6256_v51, 1 }
 0x55a   :  { %v6270_v19 = vmax.f32 %v6268_v63, %v6269_v30  ;;  %v6244_v39 = vmax.f32 %v6242_v24, %v6243_v46  ;;  %v6276_v61 = vrot.slane %v6275_v15, 2  ;;  %v6400_v32 = vmax.f32 %v14604_v44, %v14608_v27 }
 0x55b   :  { %v6264_v57 = vrot.slane %v6263_v50, 1  ;;  %v6251_v29 = vmax.f32 %v6249_v0, %v6250_v56  ;;  %v6258_v31 = vmax.f32 %v6256_v51, %v6257_v33  ;;  %v6401_v20 = vmax.f32 %v14606_v52, %v14610_v59 }
 0x55c   :  { %v6271_v43 = vrot.slane %v6270_v19, 1  ;;  %v6277_v55 = vmax.f32 %v6275_v15, %v6276_v61  ;;  %v6402_v23 = vmax.f32 %v14612_v11, %v6216_v4  ;;  %v6403_v45 = vmax.f32 %v14617_v17, %v6223_v18 }
 0x55d   :  { %v6265_v12 = vmax.f32 %v6263_v50, %v6264_v57  ;;  %v6404_v60 = vmax.f32 %v6230_v7, %v6244_v39  ;;  %v6405_v58 = vmax.f32 %v6237_v22, %v6251_v29  ;;  %v6451_v26 = vsel %vm2848_vm6, %v6400_v32, %v14567_v35 }
 0x55e   :  { %v6272_v37 = vmax.f32 %v6270_v19, %v6271_v43  ;;  %v6278_v9 = vrot.slane %v6277_v55, 1  ;;  %v6452_v44 = vsel %vm2850_vm7, %v6402_v23, %v6451_v26  ;;  %v6456_v27 = vsel %vm2848_vm6, %v6401_v20, %v14573_v42 }
 0x55f   :  { %v5668_v52 = vadd.f32 %v14431_v8, %v14564_v36  ;;  %v6457_v11 = vsel %vm2850_vm7, %v6403_v45, %v6456_v27  ;;  %6472 = vst [vmem:[#allocation4] sm:$0xfc] %v6452_v44  ;;  %v5636_v17 = vadd.f32 %v14456_v14, %v14424_v41  ;;  %v5635_v4 = vadd.f32 %v14466_v47, %v14426_v6 }
 0x560   :  { %v6406_v59 = vmax.f32 %v6258_v31, %v6272_v37  ;;  %v6279_v35 = vmax.f32 %v6277_v55, %v6278_v9  ;;  %6473 = vst [vmem:[#allocation4 + $0x8] sm:$0xfc] %v6457_v11  ;;  %v5637_v18 = vadd.f32 %v14468_v1, %v14428_v34 }
 0x561   :  { %v5680_v5 = vmax.f32 %v5668_v52, 0.0  ;;  %v5670_v8 = vadd.f32 %v14434_v16, %v5636_v17  ;;  %v5669_v36 = vadd.f32 %v14437_v53, %v5635_v4 }
 0x562   :  { %v14655_v42 = vsel %vm2842_vm3, %v6406_v59, %v6404_v60  ;;  %v6407_v3 = vmax.f32 %v6265_v12, %v6279_v35  ;;  %v5671_v13 = vadd.f32 %v14440_v25, %v5637_v18 }
 0x563   :  { %v5682_v41 = vmax.f32 %v5670_v8, 0.0  ;;  %v5681_v14 = vmax.f32 %v5669_v36, 0.0 }
 0x564   :  { %v14661_v6 = vsel %vm2842_vm3, %v6407_v3, %v6405_v58  ;;  %v5683_v47 = vmax.f32 %v5671_v13, 0.0  ;;  %vm6660_vm3 = vmor %vm6659_vm1, %vm2844_vm4 }
 0x565   :  { %v5768_v2 = vcombine.low %v5680_v5, %v5681_v14  ;;  %v5769_v63 = vcombine.high %v5680_v5, %v5681_v14 }
 0x566   :  { %v5770_v34 = vcombine.low %v5682_v41, %v5683_v47  ;;  %v5771_v1 = vcombine.high %v5682_v41, %v5683_v47 }
 0x567   :  { %v5778_v21 = vrot.slane %v5768_v2, %v13619_v62  ;;  %v5785_v24 = vrot.slane %v5769_v63, %v13619_v62  ;;  %v12445_v16 = vld [vmem:[#allocation4] ss:$8 sps:$4 sm:$0xee]  }
 0x568   :  { %v5792_v53 = vrot.slane %v5770_v34, %v13619_v62  ;;  %v5799_v38 = vrot.slane %v5771_v1, %v13619_v62  ;;  %v14668_v25 = vrot.slane %v12445_v16, %v13619_v62 }
 0x56a   :  { %v5800_v10 = vcombine.low %v5778_v21, %v5792_v53  ;;  %v5801_v40 = vcombine.high %v5778_v21, %v5792_v53  ;;  %v5802_v0 = vcombine.low %v5785_v24, %v5799_v38  ;;  %v5803_v51 = vcombine.high %v5785_v24, %v5799_v38 }
 0x56b   :  { %v11074_v30 = vcombine.low %v5792_v53, %v5792_v53  ;;  %v11075_v7 = vcombine.high %v5792_v53, %v5792_v53  ;;  %v11076_v46 = vcombine.low %v5799_v38, %v5799_v38  ;;  %v11077_v50 = vcombine.high %v5799_v38, %v5799_v38 }
 0x56c   :  { %v5947_v15 = vrot.slane %v5800_v10, %v13619_v62  ;;  %v5964_v22 = vrot.slane %v5801_v40, %v13619_v62  ;;  %v14673_v56 = vrot.slane %v5802_v0, %v13619_v62  ;;  %v14676_v33 = vrot.slane %v5803_v51, %v13619_v62 }
 0x56d   :  { %v5954_v19 = vrot.slane %v11074_v30, %v13619_v62  ;;  %v5971_v39 = vrot.slane %v11075_v7, %v13619_v62  ;;  %v14681_v57 = vrot.slane %v11076_v46, %v13619_v62  ;;  %v14684_v61 = vrot.slane %v11077_v50, %v13619_v62 }
 0x56e   :  { %v5955_v32 = vcombine.high %v5947_v15, %v5947_v15  ;;  %v5972_v29 = vcombine.high %v5964_v22, %v5964_v22  ;;  %v5989_v31 = vcombine.high %v14673_v56, %v14673_v56  ;;  %v6006_v43 = vcombine.high %v14676_v33, %v14676_v33 }
 0x56f   :  { %v5956_v20 = vcombine.high %v5954_v19, %v5954_v19  ;;  %v5973_v12 = vcombine.high %v5971_v39, %v5971_v39  ;;  %v5990_v55 = vcombine.high %v14681_v57, %v14681_v57  ;;  %v6007_v23 = vcombine.high %v14684_v61, %v14684_v61 }
 0x570   :  { %v6280_v45 = vsel %vm2065_vm2, %v5947_v15, -inf  ;;  %v6287_v37 = vsel %vm2065_vm2, %v5955_v32, -inf  ;;  %v6294_v60 = vsel %vm2065_vm2, %v5954_v19, -inf  ;;  %v6308_v58 = vsel %vm2065_vm2, %v5964_v22, -inf }
 0x571   :  { %v6281_v26 = vrot.slane %v6280_v45, 4  ;;  %v6288_v9 = vrot.slane %v6287_v37, 4  ;;  %v6295_v44 = vrot.slane %v6294_v60, 4  ;;  %v6301_v27 = vsel %vm2065_vm2, %v5956_v20, -inf }
 0x572   :  { %v6302_v52 = vrot.slane %v6301_v27, 4  ;;  %v6309_v59 = vrot.slane %v6308_v58, 4  ;;  %v6315_v11 = vsel %vm2065_vm2, %v5972_v29, -inf  ;;  %v6322_v17 = vsel %vm2065_vm2, %v5971_v39, -inf }
 0x573   :  { %v6282_v4 = vmax.f32 %v6280_v45, %v6281_v26  ;;  %v6289_v35 = vmax.f32 %v6287_v37, %v6288_v9  ;;  %v6296_v18 = vmax.f32 %v6294_v60, %v6295_v44  ;;  %v6316_v5 = vrot.slane %v6315_v11, 4 }
 0x574   :  { %v6303_v8 = vmax.f32 %v6301_v27, %v6302_v52  ;;  %v6310_v36 = vmax.f32 %v6308_v58, %v6309_v59  ;;  %v6323_v3 = vrot.slane %v6322_v17, 4  ;;  %v6329_v13 = vsel %vm2065_vm2, %v5973_v12, -inf }
 0x575   :  { %v6283_v41 = vrot.slane %v6282_v4, 2  ;;  %v6290_v14 = vrot.slane %v6289_v35, 2  ;;  %v6297_v47 = vrot.slane %v6296_v18, 2  ;;  %v6317_v2 = vmax.f32 %v6315_v11, %v6316_v5 }
 0x576   :  { %v6304_v63 = vrot.slane %v6303_v8, 2  ;;  %v6311_v34 = vrot.slane %v6310_v36, 2  ;;  %v6324_v1 = vmax.f32 %v6322_v17, %v6323_v3  ;;  %v6330_v21 = vrot.slane %v6329_v13, 4 }
 0x577   :  { %v6284_v24 = vmax.f32 %v6282_v4, %v6283_v41  ;;  %v6291_v16 = vmax.f32 %v6289_v35, %v6290_v14  ;;  %v6298_v53 = vmax.f32 %v6296_v18, %v6297_v47  ;;  %v6318_v38 = vrot.slane %v6317_v2, 2 }
 0x578   :  { %v6305_v10 = vmax.f32 %v6303_v8, %v6304_v63  ;;  %v6312_v40 = vmax.f32 %v6310_v36, %v6311_v34  ;;  %v6325_v0 = vrot.slane %v6324_v1, 2  ;;  %v6331_v51 = vmax.f32 %v6329_v13, %v6330_v21 }
 0x579   :  { %v6285_v30 = vrot.slane %v6284_v24, 1  ;;  %v6292_v7 = vrot.slane %v6291_v16, 1  ;;  %v6299_v46 = vrot.slane %v6298_v53, 1  ;;  %v6319_v50 = vmax.f32 %v6317_v2, %v6318_v38 }
 0x57a   :  { %v6306_v15 = vrot.slane %v6305_v10, 1  ;;  %v6313_v22 = vrot.slane %v6312_v40, 1  ;;  %v6326_v19 = vmax.f32 %v6324_v1, %v6325_v0  ;;  %v6332_v39 = vrot.slane %v6331_v51, 2 }
 0x57b   :  { %v14702_v32 = vmax.f32 %v6284_v24, %v6285_v30  ;;  %v14704_v29 = vmax.f32 %v6291_v16, %v6292_v7  ;;  %v14706_v20 = vmax.f32 %v6298_v53, %v6299_v46  ;;  %v6320_v12 = vrot.slane %v6319_v50, 1 }
 0x57c   :  { %v14708_v45 = vmax.f32 %v6305_v10, %v6306_v15  ;;  %v14710_v37 = vmax.f32 %v6312_v40, %v6313_v22  ;;  %v6327_v60 = vrot.slane %v6326_v19, 1  ;;  %v6333_v58 = vmax.f32 %v6331_v51, %v6332_v39 }
 0x57d   :  { %v14712_v26 = vmax.f32 %v6319_v50, %v6320_v12  ;;  %v6336_v9 = vsel %vm2065_vm2, %v14673_v56, -inf  ;;  %v6343_v44 = vsel %vm2065_vm2, %v5989_v31, -inf  ;;  %v6350_v27 = vsel %vm2065_vm2, %v14681_v57, -inf }
 0x57e   :  { %v14719_v52 = vmax.f32 %v6326_v19, %v6327_v60  ;;  %v6334_v59 = vrot.slane %v6333_v58, 1  ;;  %v6337_v11 = vrot.slane %v6336_v9, 4  ;;  %v6344_v17 = vrot.slane %v6343_v44, 4 }
 0x57f   :  { %v6351_v4 = vrot.slane %v6350_v27, 4  ;;  %v6357_v35 = vsel %vm2065_vm2, %v5990_v55, -inf  ;;  %v6364_v18 = vsel %vm2065_vm2, %v14676_v33, -inf  ;;  %v6371_v56 = vsel %vm2065_vm2, %v6006_v43, -inf }
 0x580   :  { %v6335_v31 = vmax.f32 %v6333_v58, %v6334_v59  ;;  %v6338_v5 = vmax.f32 %v6336_v9, %v6337_v11  ;;  %v6345_v8 = vmax.f32 %v6343_v44, %v6344_v17  ;;  %v6358_v36 = vrot.slane %v6357_v35, 4 }
 0x581   :  { %v6352_v3 = vmax.f32 %v6350_v27, %v6351_v4  ;;  %v6365_v13 = vrot.slane %v6364_v18, 4  ;;  %v6372_v41 = vrot.slane %v6371_v56, 4  ;;  %v6378_v57 = vsel %vm2065_vm2, %v14684_v61, -inf }
 0x582   :  { %v6339_v14 = vrot.slane %v6338_v5, 2  ;;  %v6346_v55 = vrot.slane %v6345_v8, 2  ;;  %v6359_v47 = vmax.f32 %v6357_v35, %v6358_v36  ;;  %v6379_v2 = vrot.slane %v6378_v57, 4 }
 0x583   :  { %v6353_v63 = vrot.slane %v6352_v3, 2  ;;  %v6366_v34 = vmax.f32 %v6364_v18, %v6365_v13  ;;  %v6373_v1 = vmax.f32 %v6371_v56, %v6372_v41  ;;  %v6385_v33 = vsel %vm2065_vm2, %v6007_v23, -inf }
 0x584   :  { %v6340_v43 = vmax.f32 %v6338_v5, %v6339_v14  ;;  %v6347_v21 = vmax.f32 %v6345_v8, %v6346_v55  ;;  %v6360_v24 = vrot.slane %v6359_v47, 2  ;;  %v6380_v16 = vmax.f32 %v6378_v57, %v6379_v2  ;;  %v12457_v55 = vld [vmem:[#allocation4] ss:$8 sps:$4 sm:$0xff]  }
 0x585   :  { %v6354_v53 = vmax.f32 %v6352_v3, %v6353_v63  ;;  %v6367_v38 = vrot.slane %v6366_v34, 2  ;;  %v6374_v10 = vrot.slane %v6373_v1, 2  ;;  %v6386_v40 = vrot.slane %v6385_v33, 4  ;;  %v12664_v63 = vld [vmem:[#allocation4 + $0x10] ss:$8 sps:$4 sm:$0x11]  }
 0x586   :  { %v6341_v0 = vrot.slane %v6340_v43, 1  ;;  %v6348_v51 = vrot.slane %v6347_v21, 1  ;;  %v6361_v30 = vmax.f32 %v6359_v47, %v6360_v24  ;;  %v6381_v7 = vrot.slane %v6380_v16, 2  ;;  %v12559_v47 = vld [vmem:[#allocation4] ss:$8 sps:$4 sm:$0xcc]  }
 0x587   :  { %v6355_v46 = vrot.slane %v6354_v53, 1  ;;  %v6368_v50 = vmax.f32 %v6366_v34, %v6367_v38  ;;  %v6375_v15 = vmax.f32 %v6373_v1, %v6374_v10  ;;  %v6387_v22 = vmax.f32 %v6385_v33, %v6386_v40  ;;  %v12668_v34 = vld [vmem:[#allocation4 + $0x30] ss:$8 sps:$4 sm:$0x11]   ;;  %v12663_v38 = vld [vmem:[#allocation4 + $0x4] ss:$8 sps:$4 sm:$0xff]  }
 0x588   :  { %v6342_v19 = vmax.f32 %v6340_v43, %v6341_v0  ;;  %v6349_v61 = vmax.f32 %v6347_v21, %v6348_v51  ;;  %v6362_v39 = vrot.slane %v6361_v30, 1  ;;  %v6382_v23 = vmax.f32 %v6380_v16, %v6381_v7  ;;  %v12661_v16 = vld [vmem:[#allocation4] ss:$8 sps:$4 sm:$0x88]  }
 0x589   :  { %v6356_v12 = vmax.f32 %v6354_v53, %v6355_v46  ;;  %v6369_v60 = vrot.slane %v6368_v50, 1  ;;  %v6376_v58 = vrot.slane %v6375_v15, 1  ;;  %v6388_v9 = vrot.slane %v6387_v22, 2  ;;  %v12561_v53 = vld [vmem:[#allocation4 + $0x4] ss:$8 sps:$4 sm:$0xff]  }
 0x58a   :  { %v6363_v44 = vmax.f32 %v6361_v30, %v6362_v39  ;;  %v6383_v27 = vrot.slane %v6382_v23, 1  ;;  %v6408_v59 = vmax.f32 %v14702_v32, %v14706_v20  ;;  %v6409_v11 = vmax.f32 %v14704_v29, %v14708_v45  ;;  %v12447_v20 = vld [vmem:[#allocation4 + $0x4] ss:$8 sps:$4 sm:$0x77]  }
 0x58b   :  { %v6370_v17 = vmax.f32 %v6368_v50, %v6369_v60  ;;  %v6389_v4 = vmax.f32 %v6387_v22, %v6388_v9  ;;  %v6410_v35 = vmax.f32 %v14710_v37, %v14719_v52  ;;  %v6411_v56 = vmax.f32 %v14712_v26, %v6335_v31  ;;  %v12459_v46 = vld [vmem:[#allocation4 + $0x4] ss:$8 sps:$4 sm:$0x33]  }
 0x58c   :  { %v6384_v18 = vmax.f32 %v6382_v23, %v6383_v27  ;;  %v6412_v5 = vmax.f32 %v6342_v19, %v6356_v12  ;;  %v6413_v8 = vmax.f32 %v6349_v61, %v6363_v44  ;;  %v6377_v36 = vmax.f32 %v6375_v15, %v6376_v58 }
 0x58d   :  { %v6390_v3 = vrot.slane %v6389_v4, 1  ;;  %v6459_v13 = vsel %vm2844_vm4, %v6408_v59, %v14655_v42  ;;  %v6464_v32 = vsel %vm2844_vm4, %v6409_v11, %v14661_v6  ;;  %v6639_v37 = vcombine.high %v14668_v25, %v14668_v25 }
 0x58e   :  { %v6414_v29 = vmax.f32 %v6370_v17, %v6384_v18  ;;  %v6460_v45 = vsel %vm2846_vm5, %v6410_v35, %v6459_v13  ;;  %v6465_v41 = vsel %vm2846_vm5, %v6411_v56, %v6464_v32  ;;  %v6638_v6 = vrot.slane %v12447_v20, %v13619_v62  ;;  %vm14765_vm5 = vmor %vm6660_vm3, %vm2848_vm6 }
 0x58f   :  { %v6391_v26 = vmax.f32 %v6389_v4, %v6390_v3  ;;  %v6461_v52 = vsel %vm2848_vm6, %v6412_v5, %v6460_v45  ;;  %v6466_v31 = vsel %vm2848_vm6, %v6413_v8, %v6465_v41  ;;  %v6664_v14 = vrot.slane %v6639_v37, 7 }
 0x590   :  { %v6462_v57 = vsel %vm2850_vm7, %v6414_v29, %v6461_v52  ;;  %v6640_v1 = vcombine.high %v6638_v6, %v6638_v6  ;;  %v6667_v33 = vrot.slane %v6638_v6, 7  ;;  %v6492_v21 = vrot.slane %v12457_v55, %v13619_v62 }
 0x591   :  { %v6415_v42 = vmax.f32 %v6377_v36, %v6391_v26  ;;  %6474 = vst [vmem:[#allocation4 + $0x20] sm:$0xfc] %v6462_v57  ;;  %v6666_v43 = vrot.slane %v6664_v14, 2  ;;  %v7608_v24 = vrot.slane %v12559_v47, %v13619_v62  ;;  %v8189_v10 = vrot.slane %v12664_v63, %v13619_v62 }
 0x592   :  { %v8215_v40 = vrot.slane %v12668_v34, %v13619_v62  ;;  %v11078_v51 = vrot.slane %v14668_v25, 9  ;;  %v6669_v30 = vrot.slane %v6667_v33, 2  ;;  %v6670_v7 = vrot.slane %v6640_v1, 7 }
 0x593   :  { %v6467_v2 = vsel %vm2850_vm7, %v6415_v42, %v6466_v31  ;;  %v6668_v50 = vsel %vm14765_vm5, %v6666_v43, %v6667_v33  ;;  %v6500_v15 = vcombine.high %v6492_v21, %v6492_v21  ;;  %v7616_v22 = vcombine.high %v7608_v24, %v7608_v24 }
 0x594   :  { %6475 = vst [vmem:[#allocation4 + $0x28] sm:$0xfc] %v6467_v2  ;;  %v8172_v19 = vrot.slane %v12661_v16, %v13619_v62  ;;  %v8179_v39 = vrot.slane %v12663_v38, %v13619_v62  ;;  %v14774_v23 = vrot.slane %v8189_v10, 7  ;;  %v6665_v60 = vsel %vm14765_vm5, %v11078_v51, %v6664_v14 }
 0x595   :  { %v7615_v25 = vrot.slane %v12561_v53, %v13619_v62  ;;  %v14779_v58 = vrot.slane %v8215_v40, 7  ;;  %v6671_v44 = vsel %vm14765_vm5, %v6669_v30, %v6670_v7  ;;  %v6682_v27 = vcombine.low %v6665_v60, %v6668_v50 }
 0x596   :  { %v6499_v59 = vrot.slane %v12459_v46, %v13619_v62  ;;  %v6518_v35 = vcombine.low %v6492_v21, %v6500_v15  ;;  %v8180_v5 = vcombine.high %v8172_v19, %v8172_v19  ;;  %v8181_v13 = vcombine.high %v8179_v39, %v8179_v39 }
 0x597   :  { %v7636_v56 = vcombine.low %v7616_v22, %v7615_v25  ;;  %v8218_v32 = vrot.slane %v8179_v39, 7  ;;  %v6690_v40 = vrot.slane %v6682_v27, %v13619_v62 }
 0x598   :  { %v11273_v14 = vrot.slane %v8180_v5, 9  ;;  %v8221_v63 = vrot.slane %v8181_v13, 7 }
 0x599   :  { %v14800_v53 = vrot.slane %v7636_v56, %v13619_v62  ;;  %v8220_v10 = vrot.slane %v8218_v32, 2 }
 0x59a   :  { %v8219_v22 = vsel %vm14765_vm5, %v11273_v14, %v8218_v32 }
 0x59b   :  { %v12448_v61 = vld [vmem:[#allocation4 + $0x20] ss:$8 sps:$4 sm:$0xee]   ;;  %v12450_v12 = vld [vmem:[#allocation4 + $0x24] ss:$8 sps:$4 sm:$0x77]  }
 0x59c   :  { %v6649_v9 = vrot.slane %v12448_v61, %v13619_v62  ;;  %v12460_v11 = vld [vmem:[#allocation4 + $0x20] ss:$8 sps:$4 sm:$0xff]   ;;  %v12462_v17 = vld [vmem:[#allocation4 + $0x24] ss:$8 sps:$4 sm:$0x33]   ;;  %v6656_v4 = vrot.slane %v12450_v12, %v13619_v62  ;;  %v8223_v12 = vrot.slane %v8221_v63, 2 }
 0x59d   :  { %v12562_v18 = vld [vmem:[#allocation4 + $0x20] ss:$8 sps:$4 sm:$0xcc]   ;;  %v6509_v36 = vrot.slane %v12460_v11, %v13619_v62  ;;  %v12564_v3 = vld [vmem:[#allocation4 + $0x24] ss:$8 sps:$4 sm:$0xff]   ;;  %v6516_v26 = vrot.slane %v12462_v17, %v13619_v62  ;;  %v14823_v11 = vrot.slane %v6518_v35, %v13619_v62 }
 0x59e   :  { %v6657_v8 = vcombine.high %v6649_v9, %v6649_v9  ;;  %v6658_v20 = vcombine.high %v6656_v4, %v6656_v4  ;;  %v11079_v29 = vrot.slane %v6649_v9, 9  ;;  %v6677_v45 = vrot.slane %v6656_v4, 7  ;;  %v12665_v21 = vld [vmem:[#allocation4 + $0x20] ss:$8 sps:$4 sm:$0x88]  }
 0x59f   :  { %v7626_v41 = vrot.slane %v12562_v18, %v13619_v62  ;;  %v6517_v52 = vcombine.high %v6509_v36, %v6509_v36  ;;  %v7633_v31 = vrot.slane %v12564_v3, %v13619_v62  ;;  %v6519_v1 = vcombine.low %v6499_v59, %v6509_v36  ;;  %v12667_v38 = vld [vmem:[#allocation4 + $0x24] ss:$8 sps:$4 sm:$0xff]   ;;  %v12451_v36 = vld [vmem:[#allocation14] ss:$16 sps:$4 sm:$0xff]   ;;  %v12454_v3 = vld [vmem:[#allocation14 + $0x8] ss:$16 sps:$4 sm:$0xff]  }
 0x5a0   :  { %v6674_v37 = vrot.slane %v6657_v8, 7  ;;  %v6679_v57 = vrot.slane %v6677_v45, 2  ;;  %v6680_v42 = vrot.slane %v6658_v20, 7  ;;  %v8198_v15 = vrot.slane %v12665_v21, %v13619_v62  ;;  %v12472_v21 = vld [vmem:[#allocation14 + $0x48] ss:$16 sps:$4 sm:$0xff]  }
 0x5a1   :  { %v11208_v6 = vcombine.high %v7615_v25, %v7626_v41  ;;  %v6536_v2 = vcombine.low %v6517_v52, %v6516_v26  ;;  %v7635_v33 = vcombine.high %v7633_v31, %v7633_v31  ;;  %v14814_v61 = vrot.slane %v6519_v1, %v13619_v62  ;;  %v12468_v26 = vld [vmem:[#allocation14 + $0x2c] ss:$16 sps:$4 sm:$0xff]  }
 0x5a2   :  { %v6675_v55 = vsel %vm14765_vm5, %v11079_v29, %v6674_v37  ;;  %v6676_v47 = vrot.slane %v6674_v37, 2  ;;  %v6681_v16 = vsel %vm14765_vm5, %v6679_v57, %v6680_v42  ;;  %v8205_v25 = vrot.slane %v12667_v38, %v13619_v62  ;;  %v12465_v37 = vld [vmem:[#allocation14 + $0x24] ss:$16 sps:$4 sm:$0xff]   ;;  %v12463_v42 = vld [vmem:[#allocation14 + $0x20] ss:$16 sps:$4 sm:$0xff]  }
 0x5a3   :  { %v6683_v34 = vcombine.low %v6671_v44, %v6675_v55  ;;  %v14793_v43 = vrot.slane %v11208_v6, %v13619_v62  ;;  %v7654_v7 = vcombine.low %v7633_v31, %v7635_v33  ;;  %v14805_v46 = vrot.slane %v6536_v2, %v13619_v62  ;;  %v12471_v55 = vld [vmem:[#allocation14 + $0x44] ss:$16 sps:$4 sm:$0xff]   ;;  %v12469_v33 = vld [vmem:[#allocation14 + $0x40] ss:$16 sps:$4 sm:$0xff]   ;;  %v12480_v38 = vld [vmem:[#allocation14 + $0x6c] ss:$16 sps:$4 sm:$0xff]  }
 0x5a4   :  { %v6678_v24 = vsel %vm14765_vm5, %v6676_v47, %v6677_v45  ;;  %v8206_v9 = vcombine.high %v8198_v15, %v8198_v15  ;;  %v8222_v44 = vsel %vm14765_vm5, %v8220_v10, %v8221_v63  ;;  %v8207_v18 = vcombine.high %v8205_v25, %v8205_v25  ;;  %v12474_v47 = vld [vmem:[#allocation14 + $0x4c] ss:$16 sps:$4 sm:$0xff]   ;;  %v12478_v10 = vld [vmem:[#allocation14 + $0x68] ss:$16 sps:$4 sm:$0xff]  }
 0x5a5   :  { %v6697_v51 = vrot.slane %v6683_v34, %v13619_v62  ;;  %v6700_v30 = vcombine.low %v6678_v24, %v6681_v16  ;;  %v7652_v50 = vcombine.low %v14800_v53, %v14793_v43  ;;  %v14817_v39 = vrot.slane %v7654_v7, %v13619_v62  ;;  %v12477_v16 = vld [vmem:[#allocation14 + $0x64] ss:$16 sps:$4 sm:$0xff]   ;;  %v12484_v7 = vld [vmem:[#allocation14 + $0x88] ss:$16 sps:$4 sm:$0xff]   ;;  %v12492_v15 = vld [vmem:[#allocation14 + $0xac] ss:$16 sps:$4 sm:$0xff]  }
 0x5a6   :  { %v6544_v4 = vcombine.high %v14805_v46, %v14805_v46  ;;  %v11274_v56 = vrot.slane %v8206_v9, 9  ;;  %v8228_v5 = vrot.slane %v8205_v25, 7  ;;  %v6535_v13 = vcombine.high %v14823_v11, %v14814_v61  ;;  %v12493_v25 = vld [vmem:[#allocation14 + $0xc0] ss:$16 sps:$4 sm:$0xff]   ;;  %v12496_v9 = vld [vmem:[#allocation14 + $0xc8] ss:$16 sps:$4 sm:$0xff]  }
 0x5a7   :  { %v6707_v19 = vrot.slane %v6700_v30, %v13619_v62  ;;  %v6698_v60 = vcombine.low %v6690_v40, %v6697_v51  ;;  %v6699_v27 = vcombine.high %v6690_v40, %v6697_v51  ;;  %v14826_v17 = vpack.c.bf16 %v14817_v39, %v7652_v50  ;;  %v12483_v40 = vld [vmem:[#allocation14 + $0x84] ss:$16 sps:$4 sm:$0xff]   ;;  %v12486_v51 = vld [vmem:[#allocation14 + $0x8c] ss:$16 sps:$4 sm:$0xff]   ;;  %v12481_v30 = vld [vmem:[#allocation14 + $0x80] ss:$16 sps:$4 sm:$0xff]  }
 0x5a8   :  { %v8225_v35 = vsel %vm14765_vm5, %v8223_v12, %v14774_v23  ;;  %v8236_v32 = vcombine.low %v8219_v22, %v8222_v44  ;;  %v8229_v29 = vsel %vm14765_vm5, %v11274_v56, %v8228_v5  ;;  %v8230_v45 = vrot.slane %v8228_v5, 2  ;;  %v12466_v23 = vld [vmem:[#allocation14 + $0x28] ss:$16 sps:$4 sm:$0xff]   ;;  %v12489_v50 = vld [vmem:[#allocation14 + $0xa4] ss:$16 sps:$4 sm:$0xff]  }
 0x5a9   :  { %v6708_v59 = vcombine.high %v6707_v19, %v6707_v19  ;;  %v6713_v20 = vpack.c.bf16 %v6707_v19, %v6698_v60  ;;  %v8231_v41 = vrot.slane %v8207_v18, 7  ;;  %v8237_v52 = vcombine.low %v8225_v35, %v8229_v29  ;;  %v12487_v22 = vld [vmem:[#allocation14 + $0xa0] ss:$16 sps:$4 sm:$0xff]   ;;  %v12490_v19 = vld [vmem:[#allocation14 + $0xa8] ss:$16 sps:$4 sm:$0xff]  }
 0x5aa   :  { %v6550_v31 = vpack.c.bf16 %v6544_v4, %v6535_v13  ;;  %v14838_v6 = vrot.slane %v8236_v32, %v13619_v62  ;;  %v12495_v12 = vld [vmem:[#allocation14 + $0xc4] ss:$16 sps:$4 sm:$0xff]   ;;  %v12498_v60 = vld [vmem:[#allocation14 + $0xcc] ss:$16 sps:$4 sm:$0xff]   ;;  %v12502_v4 = vld [vmem:[#allocation14 + $0xe8] ss:$16 sps:$4 sm:$0xff]  }
 0x5ab   :  { %v6714_v8 = vpack.c.bf16 %v6708_v59, %v6699_v27  ;;  %v8233_v57 = vrot.slane %v8231_v41, 2  ;;  %v14841_v14 = vrot.slane %v8237_v52, %v13619_v62  ;;  %v8232_v2 = vsel %vm14765_vm5, %v8230_v45, %v8231_v41  ;;  %v12501_v44 = vld [vmem:[#allocation14 + $0xe4] ss:$16 sps:$4 sm:$0xff]   ;;  %v12504_v27 = vld [vmem:[#allocation14 + $0xec] ss:$16 sps:$4 sm:$0xff]  }
 0x5ac   :  { %v12499_v59 = vld [vmem:[#allocation14 + $0xe0] ss:$16 sps:$4 sm:$0xff]   ;;  %v12507_v18 = vld [vmem:[#allocation14 + $0x104] ss:$16 sps:$4 sm:$0xff]   ;;  %v12510_v56 = vld [vmem:[#allocation14 + $0x10c] ss:$16 sps:$4 sm:$0xff]  }
 0x5ad   :  { %7132 = vmatprep.mubr.bf16.mxu0 %v6714_v8  ;;  %7175 = vmatprep.mubr.bf16.mxu1 %v6714_v8  ;;  %v8235_v63 = vsel %vm14765_vm5, %v8233_v57, %v14779_v58  ;;  %v8252_v1 = vcombine.low %v14838_v6, %v14841_v14  ;;  %v12475_v58 = vld [vmem:[#allocation14 + $0x60] ss:$16 sps:$4 sm:$0xff]   ;;  %v12508_v8 = vld [vmem:[#allocation14 + $0x108] ss:$16 sps:$4 sm:$0xff]   ;;  %v12519_v32 = vld [vmem:[#allocation14 + $0x144] ss:$16 sps:$4 sm:$0xff]  }
 0x5ae   :  { %7133 = vmatmul.mubr.bf16.vlgmr.msra.gmra.mrb[36].mxu0 %v6713_v20  ;;  %7176 = vmatmul.mubr.bf16.vlgmr.msra.gmra.mrb[44].mxu1 %v6713_v20  ;;  %v8254_v34 = vcombine.low %v8232_v2, %v8235_v63  ;;  %v12505_v5 = vld [vmem:[#allocation14 + $0x100] ss:$16 sps:$4 sm:$0xff]   ;;  %v12514_v35 = vld [vmem:[#allocation14 + $0x128] ss:$16 sps:$4 sm:$0xff]   ;;  %v12522_v20 = vld [vmem:[#allocation14 + $0x14c] ss:$16 sps:$4 sm:$0xff]  }
 0x5af   :  { %7507 = vmatpush1.bf16.msra.mxu0 %v12451_v36  ;;  %7550 = vmatpush1.bf16.msra.mxu1 %v12454_v3  ;;  %v12513_v36 = vld [vmem:[#allocation14 + $0x124] ss:$16 sps:$4 sm:$0xff]   ;;  %v12516_v3 = vld [vmem:[#allocation14 + $0x12c] ss:$16 sps:$4 sm:$0xff]   ;;  %v12511_v13 = vld [vmem:[#allocation14 + $0x120] ss:$16 sps:$4 sm:$0xff]  }
 0x5b0   :  { %7538 = vmatprep.mubr.bf16.mxu0 %v6550_v31  ;;  %7581 = vmatprep.mubr.bf16.mxu1 %v6550_v31  ;;  %v14851_v24 = vrot.slane %v8254_v34, %v13619_v62  ;;  %v12517_v29 = vld [vmem:[#allocation14 + $0x140] ss:$16 sps:$4 sm:$0xff]   ;;  %v12520_v45 = vld [vmem:[#allocation14 + $0x148] ss:$16 sps:$4 sm:$0xff]   ;;  %v12525_v41 = vld [vmem:[#allocation14 + $0x164] ss:$16 sps:$4 sm:$0xff]  }
 0x5b1   :  { %7508 = vmatprep.subr.bf16.mxu0 %v12465_v37  ;;  %7551 = vmatprep.subr.bf16.mxu1 %v12468_v26  ;;  %v12528_v37 = vld [vmem:[#allocation14 + $0x16c] ss:$16 sps:$4 sm:$0xff]   ;;  %v12523_v26 = vld [vmem:[#allocation14 + $0x160] ss:$16 sps:$4 sm:$0xff]   ;;  %v12526_v52 = vld [vmem:[#allocation14 + $0x168] ss:$16 sps:$4 sm:$0xff]  }
 0x5b2   :  { %v14854_v0 = vpack.c.bf16 %v14851_v24, %v8252_v1  ;;  %v12531_v31 = vld [vmem:[#allocation14 + $0x184] ss:$16 sps:$4 sm:$0xff]   ;;  %v12534_v57 = vld [vmem:[#allocation14 + $0x18c] ss:$16 sps:$4 sm:$0xff]   ;;  %v12535_v2 = vld [vmem:[#allocation14 + $0x1a0] ss:$16 sps:$4 sm:$0xff]  }
 0x5b3   :  { %7509 = vmatpush1.bf16.msra.mxu0 %v12463_v42  ;;  %7552 = vmatpush1.bf16.msra.mxu1 %v12466_v23  ;;  %v12529_v42 = vld [vmem:[#allocation14 + $0x180] ss:$16 sps:$4 sm:$0xff]   ;;  %v12532_v23 = vld [vmem:[#allocation14 + $0x188] ss:$16 sps:$4 sm:$0xff]   ;;  %v12543_v34 = vld [vmem:[#allocation14 + $0x1c4] ss:$16 sps:$4 sm:$0xff]  }
 0x5b4   :  { %7510 = vmatprep.subr.bf16.mxu0 %v12471_v55  ;;  %7553 = vmatprep.subr.bf16.mxu1 %v12474_v47  ;;  %v12537_v55 = vld [vmem:[#allocation14 + $0x1a4] ss:$16 sps:$4 sm:$0xff]   ;;  %v12540_v47 = vld [vmem:[#allocation14 + $0x1ac] ss:$16 sps:$4 sm:$0xff]   ;;  %v12538_v63 = vld [vmem:[#allocation14 + $0x1a8] ss:$16 sps:$4 sm:$0xff]  }
 0x5b5   :  { %v12546_v1 = vld [vmem:[#allocation14 + $0x1cc] ss:$16 sps:$4 sm:$0xff]  }
 0x5b7   :  { %7511 = vmatpush1.bf16.msra.mxu0 %v12469_v33  ;;  %7554 = vmatpush1.bf16.msra.mxu1 %v12472_v21  ;;  %v12541_v33 = vld [vmem:[#allocation14 + $0x1c0] ss:$16 sps:$4 sm:$0xff]   ;;  %v12544_v21 = vld [vmem:[#allocation14 + $0x1c8] ss:$16 sps:$4 sm:$0xff]  }
 0x5b8   :  { %7512 = vmatprep.subr.bf16.mxu0 %v12477_v16  ;;  %7555 = vmatprep.subr.bf16.mxu1 %v12480_v38  ;;  %v12549_v16 = vld [vmem:[#allocation14 + $0x1e4] ss:$16 sps:$4 sm:$0xff]   ;;  %v12552_v38 = vld [vmem:[#allocation14 + $0x1ec] ss:$16 sps:$4 sm:$0xff]  }
 0x5bb   :  { %7513 = vmatpush1.bf16.msra.mxu0 %v12475_v58  ;;  %7556 = vmatpush1.bf16.msra.mxu1 %v12478_v10  ;;  %v12547_v58 = vld [vmem:[#allocation14 + $0x1e0] ss:$16 sps:$4 sm:$0xff]   ;;  %v12550_v10 = vld [vmem:[#allocation14 + $0x1e8] ss:$16 sps:$4 sm:$0xff]  }
 0x5bc   :  { %7514 = vmatprep.subr.bf16.mxu0 %v12483_v40  ;;  %7557 = vmatprep.subr.bf16.mxu1 %v12486_v51  ;;  %v6534_v40 = vcombine.low %v14823_v11, %v14814_v61  ;;  %v12555_v51 = vld [vmem:[#allocation14 + $0x404] ss:$16 sps:$4 sm:$0xff]   ;;  %v12565_v61 = vld [vmem:[#allocation14 + $0x420] ss:$16 sps:$4 sm:$0xff]  }
 0x5bd   :  { %v12573_v11 = vld [vmem:[#allocation14 + $0x444] ss:$16 sps:$4 sm:$0xff]  }
 0x5bf   :  { %7515 = vmatpush1.bf16.msra.mxu0 %v12481_v30  ;;  %7558 = vmatpush1.bf16.msra.mxu1 %v12484_v7  ;;  %v12558_v30 = vld [vmem:[#allocation14 + $0x40c] ss:$16 sps:$4 sm:$0xff]   ;;  %v7662_v7 = vcombine.high %v14817_v39, %v14817_v39  ;;  %v12568_v39 = vld [vmem:[#allocation14 + $0x428] ss:$16 sps:$4 sm:$0xff]  }
 0x5c0   :  { %7516 = vmatprep.subr.bf16.mxu0 %v12489_v50  ;;  %7559 = vmatprep.subr.bf16.mxu1 %v12492_v15  ;;  %v12553_v50 = vld [vmem:[#allocation14 + $0x400] ss:$16 sps:$4 sm:$0xff]   ;;  %v7653_v15 = vcombine.high %v14800_v53, %v14793_v43  ;;  %v12576_v43 = vld [vmem:[#allocation14 + $0x44c] ss:$16 sps:$4 sm:$0xff]  }
 0x5c1   :  { %v12571_v53 = vld [vmem:[#allocation14 + $0x440] ss:$16 sps:$4 sm:$0xff]  }
 0x5c3   :  { %7517 = vmatpush1.bf16.msra.mxu0 %v12487_v22  ;;  %7560 = vmatpush1.bf16.msra.mxu1 %v12490_v19  ;;  %v6549_v22 = vpack.c.bf16 %v14805_v46, %v6534_v40  ;;  %v12556_v19 = vld [vmem:[#allocation14 + $0x408] ss:$16 sps:$4 sm:$0xff]   ;;  %v12636_v40 = vld [vmem:[#allocation14 + $0x58c] ss:$16 sps:$4 sm:$0xff]  }
 0x5c4   :  { %7518 = vmatprep.subr.bf16.mxu0 %v12495_v12  ;;  %7561 = vmatprep.subr.bf16.mxu1 %v12498_v60  ;;  %v7668_v12 = vpack.c.bf16 %v7662_v7, %v7653_v15  ;;  %v12567_v60 = vld [vmem:[#allocation14 + $0x424] ss:$16 sps:$4 sm:$0xff]   ;;  %v12574_v46 = vld [vmem:[#allocation14 + $0x448] ss:$16 sps:$4 sm:$0xff]   ;;  %v12637_v15 = vld [vmem:[#allocation14 + $0x5a0] ss:$16 sps:$4 sm:$0xff]  }
 0x5c5   :  { %v12639_v7 = vld [vmem:[#allocation14 + $0x5a4] ss:$16 sps:$4 sm:$0xff]  }
 0x5c7   :  { %7519 = vmatpush1.bf16.msra.mxu0 %v12493_v25  ;;  %7562 = vmatpush1.bf16.msra.mxu1 %v12496_v9  ;;  %v12570_v25 = vld [vmem:[#allocation14 + $0x42c] ss:$16 sps:$4 sm:$0xff]   ;;  %v12579_v9 = vld [vmem:[#allocation14 + $0x464] ss:$16 sps:$4 sm:$0xff]  }
 0x5c8   :  { %7520 = vmatprep.subr.bf16.mxu0 %v12501_v44  ;;  %7563 = vmatprep.subr.bf16.mxu1 %v12504_v27  ;;  %v12582_v44 = vld [vmem:[#allocation14 + $0x46c] ss:$16 sps:$4 sm:$0xff]   ;;  %v12577_v27 = vld [vmem:[#allocation14 + $0x460] ss:$16 sps:$4 sm:$0xff]  }
 0x5cb   :  { %7521 = vmatpush1.bf16.msra.mxu0 %v12499_v59  ;;  %7564 = vmatpush1.bf16.msra.mxu1 %v12502_v4  ;;  %v12580_v59 = vld [vmem:[#allocation14 + $0x468] ss:$16 sps:$4 sm:$0xff]   ;;  %v12585_v4 = vld [vmem:[#allocation14 + $0x484] ss:$16 sps:$4 sm:$0xff]  }
 0x5cc   :  { %7522 = vmatprep.subr.bf16.mxu0 %v12507_v18  ;;  %7565 = vmatprep.subr.bf16.mxu1 %v12510_v56  ;;  %v12588_v18 = vld [vmem:[#allocation14 + $0x48c] ss:$16 sps:$4 sm:$0xff]   ;;  %v12583_v56 = vld [vmem:[#allocation14 + $0x480] ss:$16 sps:$4 sm:$0xff]  }
 0x5cf   :  { %7523 = vmatpush1.bf16.msra.mxu0 %v12505_v5  ;;  %7566 = vmatpush1.bf16.msra.mxu1 %v12508_v8  ;;  %v12586_v5 = vld [vmem:[#allocation14 + $0x488] ss:$16 sps:$4 sm:$0xff]   ;;  %v12591_v8 = vld [vmem:[#allocation14 + $0x4a4] ss:$16 sps:$4 sm:$0xff]  }
 0x5d0   :  { %7524 = vmatprep.subr.bf16.mxu0 %v12513_v36  ;;  %7567 = vmatprep.subr.bf16.mxu1 %v12516_v3  ;;  %v12594_v36 = vld [vmem:[#allocation14 + $0x4ac] ss:$16 sps:$4 sm:$0xff]   ;;  %v12589_v3 = vld [vmem:[#allocation14 + $0x4a0] ss:$16 sps:$4 sm:$0xff]  }
 0x5d3   :  { %7525 = vmatpush1.bf16.msra.mxu0 %v12511_v13  ;;  %7568 = vmatpush1.bf16.msra.mxu1 %v12514_v35  ;;  %v12592_v13 = vld [vmem:[#allocation14 + $0x4a8] ss:$16 sps:$4 sm:$0xff]   ;;  %v12597_v35 = vld [vmem:[#allocation14 + $0x4c4] ss:$16 sps:$4 sm:$0xff]  }
 0x5d4   :  { %7526 = vmatprep.subr.bf16.mxu0 %v12519_v32  ;;  %7569 = vmatprep.subr.bf16.mxu1 %v12522_v20  ;;  %v12600_v32 = vld [vmem:[#allocation14 + $0x4cc] ss:$16 sps:$4 sm:$0xff]   ;;  %v12595_v20 = vld [vmem:[#allocation14 + $0x4c0] ss:$16 sps:$4 sm:$0xff]  }
 0x5d7   :  { %7527 = vmatpush1.bf16.msra.mxu0 %v12517_v29  ;;  %7570 = vmatpush1.bf16.msra.mxu1 %v12520_v45  ;;  %v12598_v29 = vld [vmem:[#allocation14 + $0x4c8] ss:$16 sps:$4 sm:$0xff]   ;;  %v12603_v45 = vld [vmem:[#allocation14 + $0x4e4] ss:$16 sps:$4 sm:$0xff]  }
 0x5d8   :  { %7528 = vmatprep.subr.bf16.mxu0 %v12525_v41  ;;  %7571 = vmatprep.subr.bf16.mxu1 %v12528_v37  ;;  %v12606_v41 = vld [vmem:[#allocation14 + $0x4ec] ss:$16 sps:$4 sm:$0xff]   ;;  %v12601_v37 = vld [vmem:[#allocation14 + $0x4e0] ss:$16 sps:$4 sm:$0xff]  }
 0x5db   :  { %7529 = vmatpush1.bf16.msra.mxu0 %v12523_v26  ;;  %7572 = vmatpush1.bf16.msra.mxu1 %v12526_v52  ;;  %v12604_v26 = vld [vmem:[#allocation14 + $0x4e8] ss:$16 sps:$4 sm:$0xff]   ;;  %v12609_v52 = vld [vmem:[#allocation14 + $0x504] ss:$16 sps:$4 sm:$0xff]  }
 0x5dc   :  { %7530 = vmatprep.subr.bf16.mxu0 %v12531_v31  ;;  %7573 = vmatprep.subr.bf16.mxu1 %v12534_v57  ;;  %v12612_v31 = vld [vmem:[#allocation14 + $0x50c] ss:$16 sps:$4 sm:$0xff]   ;;  %v12607_v57 = vld [vmem:[#allocation14 + $0x500] ss:$16 sps:$4 sm:$0xff]  }
 0x5df   :  { %7531 = vmatpush1.bf16.msra.mxu0 %v12529_v42  ;;  %7574 = vmatpush1.bf16.msra.mxu1 %v12532_v23  ;;  %v12610_v42 = vld [vmem:[#allocation14 + $0x508] ss:$16 sps:$4 sm:$0xff]   ;;  %v12615_v23 = vld [vmem:[#allocation14 + $0x524] ss:$16 sps:$4 sm:$0xff]  }
 0x5e0   :  { %7532 = vmatprep.subr.bf16.mxu0 %v12537_v55  ;;  %7575 = vmatprep.subr.bf16.mxu1 %v12540_v47  ;;  %v12618_v55 = vld [vmem:[#allocation14 + $0x52c] ss:$16 sps:$4 sm:$0xff]   ;;  %v12613_v47 = vld [vmem:[#allocation14 + $0x520] ss:$16 sps:$4 sm:$0xff]  }
 0x5e3   :  { %7533 = vmatpush1.bf16.msra.mxu0 %v12535_v2  ;;  %7576 = vmatpush1.bf16.msra.mxu1 %v12538_v63  ;;  %v12616_v2 = vld [vmem:[#allocation14 + $0x528] ss:$16 sps:$4 sm:$0xff]   ;;  %v12621_v63 = vld [vmem:[#allocation14 + $0x544] ss:$16 sps:$4 sm:$0xff]  }
 0x5e4   :  { %7534 = vmatprep.subr.bf16.mxu0 %v12543_v34  ;;  %7577 = vmatprep.subr.bf16.mxu1 %v12546_v1  ;;  %v12624_v34 = vld [vmem:[#allocation14 + $0x54c] ss:$16 sps:$4 sm:$0xff]   ;;  %v12619_v1 = vld [vmem:[#allocation14 + $0x540] ss:$16 sps:$4 sm:$0xff]  }
 0x5e7   :  { %7535 = vmatpush1.bf16.msra.mxu0 %v12541_v33  ;;  %7578 = vmatpush1.bf16.msra.mxu1 %v12544_v21  ;;  %v12622_v33 = vld [vmem:[#allocation14 + $0x548] ss:$16 sps:$4 sm:$0xff]   ;;  %v12627_v21 = vld [vmem:[#allocation14 + $0x564] ss:$16 sps:$4 sm:$0xff]  }
 0x5e8   :  { %7536 = vmatprep.subr.bf16.mxu0 %v12549_v16  ;;  %7579 = vmatprep.subr.bf16.mxu1 %v12552_v38  ;;  %v12630_v16 = vld [vmem:[#allocation14 + $0x56c] ss:$16 sps:$4 sm:$0xff]   ;;  %v12625_v38 = vld [vmem:[#allocation14 + $0x560] ss:$16 sps:$4 sm:$0xff]  }
 0x5eb   :  { %7537 = vmatpush1.bf16.msra.mxu0 %v12547_v58  ;;  %7580 = vmatpush1.bf16.msra.mxu1 %v12550_v10  ;;  %v12628_v58 = vld [vmem:[#allocation14 + $0x568] ss:$16 sps:$4 sm:$0xff]   ;;  %v12633_v10 = vld [vmem:[#allocation14 + $0x584] ss:$16 sps:$4 sm:$0xff]  }
 0x5ec   :  { %8054 = vmatprep.subr.bf16.mxu0 %v12555_v51  ;;  %8097 = vmatprep.subr.bf16.mxu1 %v12558_v30  ;;  %v12631_v51 = vld [vmem:[#allocation14 + $0x580] ss:$16 sps:$4 sm:$0xff]   ;;  %v12634_v30 = vld [vmem:[#allocation14 + $0x588] ss:$16 sps:$4 sm:$0xff]  }
 0x5ee   :  { %7539 = vmatmul.mubr.bf16.vlgmr.msra.gmra.mrb[36].mxu0 %v6549_v22  ;;  %7582 = vmatmul.mubr.bf16.vlgmr.msra.gmra.mrb[44].mxu1 %v6549_v22  ;;  %v12640_v22 = vld [vmem:[#allocation14 + $0x5a8] ss:$16 sps:$4 sm:$0xff]  }
 0x5ef   :  { %8055 = vmatpush1.bf16.msra.mxu0 %v12553_v50  ;;  %8086 = vmatprep.mubr.bf16.mxu0 %v7668_v12  ;;  %v12642_v50 = vld [vmem:[#allocation14 + $0x5ac] ss:$16 sps:$4 sm:$0xff]  }
 0x5f0   :  { %8098 = vmatpush1.bf16.msra.mxu1 %v12556_v19  ;;  %8129 = vmatprep.mubr.bf16.mxu1 %v7668_v12  ;;  %v12645_v19 = vld [vmem:[#allocation14 + $0x5c4] ss:$16 sps:$4 sm:$0xff]   ;;  %v12648_v12 = vld [vmem:[#allocation14 + $0x5cc] ss:$16 sps:$4 sm:$0xff]  }
 0x5f1   :  { %8056 = vmatprep.subr.bf16.mxu0 %v12567_v60  ;;  %8099 = vmatprep.subr.bf16.mxu1 %v12570_v25  ;;  %v12643_v60 = vld [vmem:[#allocation14 + $0x5c0] ss:$16 sps:$4 sm:$0xff]   ;;  %v12646_v25 = vld [vmem:[#allocation14 + $0x5c8] ss:$16 sps:$4 sm:$0xff]  }
 0x5f3   :  { %8057 = vmatpush1.bf16.msra.mxu0 %v12565_v61  ;;  %v12651_v61 = vld [vmem:[#allocation14 + $0x5e4] ss:$16 sps:$4 sm:$0xff]  }
 0x5f4   :  { %8100 = vmatpush1.bf16.msra.mxu1 %v12568_v39  ;;  %8058 = vmatprep.subr.bf16.mxu0 %v12573_v11  ;;  %v12654_v39 = vld [vmem:[#allocation14 + $0x5ec] ss:$16 sps:$4 sm:$0xff]   ;;  %v12649_v11 = vld [vmem:[#allocation14 + $0x5e0] ss:$16 sps:$4 sm:$0xff]  }
 0x5f5   :  { %8101 = vmatprep.subr.bf16.mxu1 %v12576_v43  ;;  %v12652_v43 = vld [vmem:[#allocation14 + $0x5e8] ss:$16 sps:$4 sm:$0xff]  }
 0x5f7   :  { %8059 = vmatpush1.bf16.msra.mxu0 %v12571_v53  ;;  %v12657_v53 = vld [vmem:[#allocation14 + $0x604] ss:$16 sps:$4 sm:$0xff]  }
 0x5f8   :  { %8102 = vmatpush1.bf16.msra.mxu1 %v12574_v46  ;;  %8060 = vmatprep.subr.bf16.mxu0 %v12579_v9  ;;  %v12660_v46 = vld [vmem:[#allocation14 + $0x60c] ss:$16 sps:$4 sm:$0xff]   ;;  %v8262_v9 = vcombine.high %v14851_v24, %v14851_v24  ;;  %v12672_v24 = vld [vmem:[#allocation14 + $0x628] ss:$16 sps:$4 sm:$0xff]  }
 0x5f9   :  { %8103 = vmatprep.subr.bf16.mxu1 %v12582_v44  ;;  %v12655_v44 = vld [vmem:[#allocation14 + $0x600] ss:$16 sps:$4 sm:$0xff]  }
 0x5fb   :  { %8061 = vmatpush1.bf16.msra.mxu0 %v12577_v27  ;;  %v12658_v27 = vld [vmem:[#allocation14 + $0x608] ss:$16 sps:$4 sm:$0xff]  }
 0x5fc   :  { %8104 = vmatpush1.bf16.msra.mxu1 %v12580_v59  ;;  %8062 = vmatprep.subr.bf16.mxu0 %v12585_v4  ;;  %v8253_v59 = vcombine.high %v14838_v6, %v14841_v14  ;;  %v12671_v4 = vld [vmem:[#allocation14 + $0x624] ss:$16 sps:$4 sm:$0xff]   ;;  %v12675_v6 = vld [vmem:[#allocation14 + $0x640] ss:$16 sps:$4 sm:$0xff]   ;;  %v12678_v14 = vld [vmem:[#allocation14 + $0x648] ss:$16 sps:$4 sm:$0xff]  }
 0x5fd   :  { %8105 = vmatprep.subr.bf16.mxu1 %v12588_v18 }
 0x5fe   :  { %v8268_v18 = vpack.c.bf16 %v8262_v9, %v8253_v59  ;;  %v12743_v9 = vld [vmem:[#allocation14 + $0x7a4] ss:$16 sps:$4 sm:$0xff]  }
 0x5ff   :  { %8063 = vmatpush1.bf16.msra.mxu0 %v12583_v56  ;;  %v12674_v56 = vld [vmem:[#allocation14 + $0x62c] ss:$16 sps:$4 sm:$0xff]  }
 0x600   :  { %8106 = vmatpush1.bf16.msra.mxu1 %v12586_v5  ;;  %8064 = vmatprep.subr.bf16.mxu0 %v12591_v8  ;;  %v12669_v5 = vld [vmem:[#allocation14 + $0x620] ss:$16 sps:$4 sm:$0xff]   ;;  %v12677_v8 = vld [vmem:[#allocation14 + $0x644] ss:$16 sps:$4 sm:$0xff]  }
 0x601   :  { %8107 = vmatprep.subr.bf16.mxu1 %v12594_v36  ;;  %v12680_v36 = vld [vmem:[#allocation14 + $0x64c] ss:$16 sps:$4 sm:$0xff]  }
 0x603   :  { %8065 = vmatpush1.bf16.msra.mxu0 %v12589_v3  ;;  %v12683_v3 = vld [vmem:[#allocation14 + $0x664] ss:$16 sps:$4 sm:$0xff]  }
 0x604   :  { %8108 = vmatpush1.bf16.msra.mxu1 %v12592_v13  ;;  %8066 = vmatprep.subr.bf16.mxu0 %v12597_v35  ;;  %v12686_v13 = vld [vmem:[#allocation14 + $0x66c] ss:$16 sps:$4 sm:$0xff]   ;;  %v12684_v35 = vld [vmem:[#allocation14 + $0x668] ss:$16 sps:$4 sm:$0xff]  }
 0x605   :  { %8109 = vmatprep.subr.bf16.mxu1 %v12600_v32  ;;  %v12689_v32 = vld [vmem:[#allocation14 + $0x684] ss:$16 sps:$4 sm:$0xff]  }
 0x607   :  { %8067 = vmatpush1.bf16.msra.mxu0 %v12595_v20  ;;  %v12692_v20 = vld [vmem:[#allocation14 + $0x68c] ss:$16 sps:$4 sm:$0xff]  }
 0x608   :  { %8110 = vmatpush1.bf16.msra.mxu1 %v12598_v29  ;;  %8068 = vmatprep.subr.bf16.mxu0 %v12603_v45  ;;  %v12687_v29 = vld [vmem:[#allocation14 + $0x680] ss:$16 sps:$4 sm:$0xff]   ;;  %v12690_v45 = vld [vmem:[#allocation14 + $0x688] ss:$16 sps:$4 sm:$0xff]  }
 0x609   :  { %8111 = vmatprep.subr.bf16.mxu1 %v12606_v41  ;;  %v12695_v41 = vld [vmem:[#allocation14 + $0x6a4] ss:$16 sps:$4 sm:$0xff]  }
 0x60b   :  { %8069 = vmatpush1.bf16.msra.mxu0 %v12601_v37  ;;  %v12698_v37 = vld [vmem:[#allocation14 + $0x6ac] ss:$16 sps:$4 sm:$0xff]  }
 0x60c   :  { %8112 = vmatpush1.bf16.msra.mxu1 %v12604_v26  ;;  %8070 = vmatprep.subr.bf16.mxu0 %v12609_v52  ;;  %v12693_v26 = vld [vmem:[#allocation14 + $0x6a0] ss:$16 sps:$4 sm:$0xff]   ;;  %v12696_v52 = vld [vmem:[#allocation14 + $0x6a8] ss:$16 sps:$4 sm:$0xff]  }
 0x60d   :  { %8113 = vmatprep.subr.bf16.mxu1 %v12612_v31  ;;  %v12701_v31 = vld [vmem:[#allocation14 + $0x6c4] ss:$16 sps:$4 sm:$0xff]  }
 0x60f   :  { %8071 = vmatpush1.bf16.msra.mxu0 %v12607_v57  ;;  %v12704_v57 = vld [vmem:[#allocation14 + $0x6cc] ss:$16 sps:$4 sm:$0xff]  }
 0x610   :  { %8114 = vmatpush1.bf16.msra.mxu1 %v12610_v42  ;;  %8072 = vmatprep.subr.bf16.mxu0 %v12615_v23  ;;  %v12699_v42 = vld [vmem:[#allocation14 + $0x6c0] ss:$16 sps:$4 sm:$0xff]   ;;  %v12702_v23 = vld [vmem:[#allocation14 + $0x6c8] ss:$16 sps:$4 sm:$0xff]  }
 0x611   :  { %8115 = vmatprep.subr.bf16.mxu1 %v12618_v55  ;;  %v12707_v55 = vld [vmem:[#allocation14 + $0x6e4] ss:$16 sps:$4 sm:$0xff]  }
 0x613   :  { %8073 = vmatpush1.bf16.msra.mxu0 %v12613_v47  ;;  %v12710_v47 = vld [vmem:[#allocation14 + $0x6ec] ss:$16 sps:$4 sm:$0xff]  }
 0x614   :  { %8116 = vmatpush1.bf16.msra.mxu1 %v12616_v2  ;;  %8074 = vmatprep.subr.bf16.mxu0 %v12621_v63  ;;  %v12705_v2 = vld [vmem:[#allocation14 + $0x6e0] ss:$16 sps:$4 sm:$0xff]   ;;  %v12708_v63 = vld [vmem:[#allocation14 + $0x6e8] ss:$16 sps:$4 sm:$0xff]  }
 0x615   :  { %8117 = vmatprep.subr.bf16.mxu1 %v12624_v34  ;;  %v12713_v34 = vld [vmem:[#allocation14 + $0x704] ss:$16 sps:$4 sm:$0xff]  }
 0x617   :  { %8075 = vmatpush1.bf16.msra.mxu0 %v12619_v1  ;;  %v12716_v1 = vld [vmem:[#allocation14 + $0x70c] ss:$16 sps:$4 sm:$0xff]  }
 0x618   :  { %8118 = vmatpush1.bf16.msra.mxu1 %v12622_v33  ;;  %8076 = vmatprep.subr.bf16.mxu0 %v12627_v21  ;;  %v12711_v33 = vld [vmem:[#allocation14 + $0x700] ss:$16 sps:$4 sm:$0xff]   ;;  %v12714_v21 = vld [vmem:[#allocation14 + $0x708] ss:$16 sps:$4 sm:$0xff]  }
 0x619   :  { %8119 = vmatprep.subr.bf16.mxu1 %v12630_v16  ;;  %v12719_v16 = vld [vmem:[#allocation14 + $0x724] ss:$16 sps:$4 sm:$0xff]  }
 0x61b   :  { %8077 = vmatpush1.bf16.msra.mxu0 %v12625_v38  ;;  %v12722_v38 = vld [vmem:[#allocation14 + $0x72c] ss:$16 sps:$4 sm:$0xff]  }
 0x61c   :  { %8120 = vmatpush1.bf16.msra.mxu1 %v12628_v58  ;;  %8078 = vmatprep.subr.bf16.mxu0 %v12633_v10  ;;  %v12717_v58 = vld [vmem:[#allocation14 + $0x720] ss:$16 sps:$4 sm:$0xff]   ;;  %v12720_v10 = vld [vmem:[#allocation14 + $0x728] ss:$16 sps:$4 sm:$0xff]  }
 0x61d   :  { %8121 = vmatprep.subr.bf16.mxu1 %v12636_v40  ;;  %v12725_v40 = vld [vmem:[#allocation14 + $0x744] ss:$16 sps:$4 sm:$0xff]  }
 0x61f   :  { %8079 = vmatpush1.bf16.msra.mxu0 %v12631_v51  ;;  %v12728_v51 = vld [vmem:[#allocation14 + $0x74c] ss:$16 sps:$4 sm:$0xff]  }
 0x620   :  { %8122 = vmatpush1.bf16.msra.mxu1 %v12634_v30  ;;  %8080 = vmatprep.subr.bf16.mxu0 %v12639_v7  ;;  %v12723_v30 = vld [vmem:[#allocation14 + $0x740] ss:$16 sps:$4 sm:$0xff]   ;;  %v12726_v7 = vld [vmem:[#allocation14 + $0x748] ss:$16 sps:$4 sm:$0xff]  }
 0x621   :  { %8123 = vmatprep.subr.bf16.mxu1 %v12642_v50  ;;  %v12731_v50 = vld [vmem:[#allocation14 + $0x764] ss:$16 sps:$4 sm:$0xff]  }
 0x623   :  { %8081 = vmatpush1.bf16.msra.mxu0 %v12637_v15  ;;  %v12734_v15 = vld [vmem:[#allocation14 + $0x76c] ss:$16 sps:$4 sm:$0xff]  }
 0x624   :  { %8124 = vmatpush1.bf16.msra.mxu1 %v12640_v22  ;;  %8082 = vmatprep.subr.bf16.mxu0 %v12645_v19  ;;  %v12767_v22 = vld [vmem:[#allocation4 + $0x24] ss:$8 sps:$4 sm:$0xff]   ;;  %v12729_v19 = vld [vmem:[#allocation14 + $0x760] ss:$16 sps:$4 sm:$0xff]  }
 0x625   :  { %8125 = vmatprep.subr.bf16.mxu1 %v12648_v12  ;;  %v12732_v12 = vld [vmem:[#allocation14 + $0x768] ss:$16 sps:$4 sm:$0xff]  }
 0x627   :  { %8083 = vmatpush1.bf16.msra.mxu0 %v12643_v60  ;;  %v12737_v60 = vld [vmem:[#allocation14 + $0x784] ss:$16 sps:$4 sm:$0xff]  }
 0x628   :  { %8126 = vmatpush1.bf16.msra.mxu1 %v12646_v25  ;;  %8084 = vmatprep.subr.bf16.mxu0 %v12651_v61  ;;  %v12740_v25 = vld [vmem:[#allocation14 + $0x78c] ss:$16 sps:$4 sm:$0xff]  }
 0x629   :  { %8127 = vmatprep.subr.bf16.mxu1 %v12654_v39  ;;  %v12765_v61 = vld [vmem:[#allocation4 + $0x4] ss:$8 sps:$4 sm:$0xff]   ;;  %v8788_v39 = vrot.slane %v12767_v22, %v13619_v62  ;;  %v12793_v22 = vld [vmem:[#allocation14 + $0x8a0] ss:$16 sps:$4 sm:$0xff]  }
 0x62b   :  { %8085 = vmatpush1.bf16.msra.mxu0 %v12649_v11  ;;  %v12768_v11 = vld [vmem:[#allocation4 + $0x30] ss:$8 sps:$4 sm:$0x33]   ;;  %v8789_v59 = vcombine.high %v8788_v39, %v8788_v39 }
 0x62c   :  { %8128 = vmatpush1.bf16.msra.mxu1 %v12652_v43  ;;  %8654 = vmatprep.subr.bf16.mxu0 %v12657_v53  ;;  %v12735_v43 = vld [vmem:[#allocation14 + $0x780] ss:$16 sps:$4 sm:$0xff]  }
 0x62d   :  { %8697 = vmatprep.subr.bf16.mxu1 %v12660_v46  ;;  %v12766_v53 = vld [vmem:[#allocation4 + $0x10] ss:$8 sps:$4 sm:$0x33]  }
 0x62e   :  { %8087 = vmatmul.mubr.bf16.vlgmr.msra.gmra.mrb[36].mxu0 %v14826_v17  ;;  %v12738_v46 = vld [vmem:[#allocation14 + $0x788] ss:$16 sps:$4 sm:$0xff]  }
 0x62f   :  { %8130 = vmatmul.mubr.bf16.vlgmr.msra.gmra.mrb[44].mxu1 %v14826_v17  ;;  %8655 = vmatpush1.bf16.msra.mxu0 %v12655_v44  ;;  %v12681_v17 = vld [vmem:[#allocation14 + $0x660] ss:$16 sps:$4 sm:$0xff]   ;;  %v12746_v44 = vld [vmem:[#allocation14 + $0x7ac] ss:$16 sps:$4 sm:$0xff]  }
 0x630   :  { %8686 = vmatprep.mubr.bf16.mxu0 %v8268_v18  ;;  %8698 = vmatpush1.bf16.msra.mxu1 %v12658_v27  ;;  %v8771_v27 = vrot.slane %v12765_v61, %v13619_v62  ;;  %v12802_v61 = vld [vmem:[#allocation14 + $0x8c8] ss:$16 sps:$4 sm:$0xff]  }
 0x631   :  { %8729 = vmatprep.mubr.bf16.mxu1 %v8268_v18  ;;  %8656 = vmatprep.subr.bf16.mxu0 %v12671_v4  ;;  %v8797_v4 = vrot.slane %v12768_v11, %v13619_v62  ;;  %v12741_v18 = vld [vmem:[#allocation14 + $0x7a0] ss:$16 sps:$4 sm:$0xff]   ;;  %v12810_v11 = vld [vmem:[#allocation14 + $0x8ec] ss:$16 sps:$4 sm:$0xff]  }
 0x632   :  { %8699 = vmatprep.subr.bf16.mxu1 %v12674_v56  ;;  %v12744_v56 = vld [vmem:[#allocation14 + $0x7a8] ss:$16 sps:$4 sm:$0xff]  }
 0x633   :  { %8657 = vmatpush1.bf16.msra.mxu0 %v12669_v5  ;;  %v12749_v5 = vld [vmem:[#allocation14 + $0x7c4] ss:$16 sps:$4 sm:$0xff]  }
 0x634   :  { %8700 = vmatpush1.bf16.msra.mxu1 %v12672_v24  ;;  %8658 = vmatprep.subr.bf16.mxu0 %v12677_v8  ;;  %v8780_v24 = vrot.slane %v12766_v53, %v13619_v62  ;;  %v12752_v8 = vld [vmem:[#allocation14 + $0x7cc] ss:$16 sps:$4 sm:$0xff]   ;;  %v12808_v53 = vld [vmem:[#allocation14 + $0x8e8] ss:$16 sps:$4 sm:$0xff]  }
 0x635   :  { %8701 = vmatprep.subr.bf16.mxu1 %v12680_v36  ;;  %v8772_v36 = vcombine.high %v8771_v27, %v8771_v27 }
 0x637   :  { %8659 = vmatpush1.bf16.msra.mxu0 %v12675_v6  ;;  %v8816_v6 = vcombine.low %v8789_v59, %v8797_v4  ;;  %v12819_v59 = vld [vmem:[#allocation14 + $0x924] ss:$16 sps:$4 sm:$0xff]   ;;  %v12822_v4 = vld [vmem:[#allocation14 + $0x92c] ss:$16 sps:$4 sm:$0xff]  }
 0x638   :  { %8702 = vmatpush1.bf16.msra.mxu1 %v12678_v14  ;;  %8660 = vmatprep.subr.bf16.mxu0 %v12683_v3  ;;  %v12747_v14 = vld [vmem:[#allocation14 + $0x7c0] ss:$16 sps:$4 sm:$0xff]   ;;  %v12750_v3 = vld [vmem:[#allocation14 + $0x7c8] ss:$16 sps:$4 sm:$0xff]  }
 0x639   :  { %8703 = vmatprep.subr.bf16.mxu1 %v12686_v13  ;;  %v12755_v13 = vld [vmem:[#allocation14 + $0x7e4] ss:$16 sps:$4 sm:$0xff]  }
 0x63b   :  { %8661 = vmatpush1.bf16.msra.mxu0 %v12681_v17  ;;  %v8799_v17 = vcombine.low %v8780_v24, %v8788_v39  ;;  %v12807_v39 = vld [vmem:[#allocation14 + $0x8e4] ss:$16 sps:$4 sm:$0xff]   ;;  %v12828_v24 = vld [vmem:[#allocation14 + $0x94c] ss:$16 sps:$4 sm:$0xff]  }
 0x63c   :  { %8704 = vmatpush1.bf16.msra.mxu1 %v12684_v35  ;;  %8662 = vmatprep.subr.bf16.mxu0 %v12689_v32  ;;  %v12758_v35 = vld [vmem:[#allocation14 + $0x7ec] ss:$16 sps:$4 sm:$0xff]   ;;  %v8798_v32 = vcombine.low %v8771_v27, %v8772_v36  ;;  %v12814_v27 = vld [vmem:[#allocation14 + $0x908] ss:$16 sps:$4 sm:$0xff]  }
 0x63d   :  { %8705 = vmatprep.subr.bf16.mxu1 %v12692_v20  ;;  %v14874_v20 = vrot.slane %v8816_v6, %v13619_v62  ;;  %v12826_v36 = vld [vmem:[#allocation14 + $0x948] ss:$16 sps:$4 sm:$0xff]   ;;  %v12831_v6 = vld [vmem:[#allocation14 + $0x964] ss:$16 sps:$4 sm:$0xff]  }
 0x63f   :  { %8663 = vmatpush1.bf16.msra.mxu0 %v12687_v29  ;;  %v12753_v29 = vld [vmem:[#allocation14 + $0x7e0] ss:$16 sps:$4 sm:$0xff]  }
 0x640   :  { %8706 = vmatpush1.bf16.msra.mxu1 %v12690_v45  ;;  %8664 = vmatprep.subr.bf16.mxu0 %v12695_v41  ;;  %v12756_v45 = vld [vmem:[#allocation14 + $0x7e8] ss:$16 sps:$4 sm:$0xff]   ;;  %v12761_v41 = vld [vmem:[#allocation14 + $0x804] ss:$16 sps:$4 sm:$0xff]  }
 0x641   :  { %8707 = vmatprep.subr.bf16.mxu1 %v12698_v37  ;;  %v14877_v37 = vrot.slane %v8799_v17, %v13619_v62  ;;  %v12837_v17 = vld [vmem:[#allocation14 + $0x984] ss:$16 sps:$4 sm:$0xff]  }
 0x643   :  { %8665 = vmatpush1.bf16.msra.mxu0 %v12693_v26  ;;  %v12764_v26 = vld [vmem:[#allocation14 + $0x80c] ss:$16 sps:$4 sm:$0xff]  }
 0x644   :  { %8708 = vmatpush1.bf16.msra.mxu1 %v12696_v52  ;;  %8666 = vmatprep.subr.bf16.mxu0 %v12701_v31  ;;  %v14880_v52 = vrot.slane %v8798_v32, %v13619_v62  ;;  %v8824_v31 = vcombine.high %v14874_v20, %v14874_v20  ;;  %v12835_v32 = vld [vmem:[#allocation14 + $0x980] ss:$16 sps:$4 sm:$0xff]  }
 0x645   :  { %8709 = vmatprep.subr.bf16.mxu1 %v12704_v57  ;;  %v12759_v57 = vld [vmem:[#allocation14 + $0x800] ss:$16 sps:$4 sm:$0xff]  }
 0x647   :  { %8667 = vmatpush1.bf16.msra.mxu0 %v12699_v42  ;;  %v12762_v42 = vld [vmem:[#allocation14 + $0x808] ss:$16 sps:$4 sm:$0xff]  }
 0x648   :  { %8710 = vmatpush1.bf16.msra.mxu1 %v12702_v23  ;;  %8668 = vmatprep.subr.bf16.mxu0 %v12707_v55  ;;  %v8815_v23 = vcombine.high %v14880_v52, %v14877_v37  ;;  %v12771_v55 = vld [vmem:[#allocation14 + $0x824] ss:$16 sps:$4 sm:$0xff]  }
 0x649   :  { %8711 = vmatprep.subr.bf16.mxu1 %v12710_v47 }
 0x64a   :  { %v8830_v47 = vpack.c.bf16 %v8824_v31, %v8815_v23  ;;  %v12844_v31 = vld [vmem:[#allocation14 + $0x9a8] ss:$16 sps:$4 sm:$0xff]   ;;  %v12847_v23 = vld [vmem:[#allocation14 + $0x9c0] ss:$16 sps:$4 sm:$0xff]  }
 0x64b   :  { %8669 = vmatpush1.bf16.msra.mxu0 %v12705_v2  ;;  %v12774_v2 = vld [vmem:[#allocation14 + $0x82c] ss:$16 sps:$4 sm:$0xff]  }
 0x64c   :  { %8712 = vmatpush1.bf16.msra.mxu1 %v12708_v63  ;;  %8670 = vmatprep.subr.bf16.mxu0 %v12713_v34  ;;  %v12769_v63 = vld [vmem:[#allocation14 + $0x820] ss:$16 sps:$4 sm:$0xff]   ;;  %v12772_v34 = vld [vmem:[#allocation14 + $0x828] ss:$16 sps:$4 sm:$0xff]  }
 0x64d   :  { %8713 = vmatprep.subr.bf16.mxu1 %v12716_v1  ;;  %v12777_v1 = vld [vmem:[#allocation14 + $0x844] ss:$16 sps:$4 sm:$0xff]  }
 0x64f   :  { %8671 = vmatpush1.bf16.msra.mxu0 %v12711_v33  ;;  %v12780_v33 = vld [vmem:[#allocation14 + $0x84c] ss:$16 sps:$4 sm:$0xff]  }
 0x650   :  { %8714 = vmatpush1.bf16.msra.mxu1 %v12714_v21  ;;  %8672 = vmatprep.subr.bf16.mxu0 %v12719_v16  ;;  %v12775_v21 = vld [vmem:[#allocation14 + $0x840] ss:$16 sps:$4 sm:$0xff]   ;;  %v12778_v16 = vld [vmem:[#allocation14 + $0x848] ss:$16 sps:$4 sm:$0xff]  }
 0x651   :  { %8715 = vmatprep.subr.bf16.mxu1 %v12722_v38  ;;  %v12783_v38 = vld [vmem:[#allocation14 + $0x864] ss:$16 sps:$4 sm:$0xff]  }
 0x653   :  { %8673 = vmatpush1.bf16.msra.mxu0 %v12717_v58  ;;  %v12786_v58 = vld [vmem:[#allocation14 + $0x86c] ss:$16 sps:$4 sm:$0xff]  }
 0x654   :  { %8716 = vmatpush1.bf16.msra.mxu1 %v12720_v10  ;;  %8674 = vmatprep.subr.bf16.mxu0 %v12725_v40  ;;  %v12784_v10 = vld [vmem:[#allocation14 + $0x868] ss:$16 sps:$4 sm:$0xff]   ;;  %v12789_v40 = vld [vmem:[#allocation14 + $0x884] ss:$16 sps:$4 sm:$0xff]  }
 0x655   :  { %8717 = vmatprep.subr.bf16.mxu1 %v12728_v51  ;;  %v12792_v51 = vld [vmem:[#allocation14 + $0x88c] ss:$16 sps:$4 sm:$0xff]  }
 0x657   :  { %8675 = vmatpush1.bf16.msra.mxu0 %v12723_v30  ;;  %v12787_v30 = vld [vmem:[#allocation14 + $0x880] ss:$16 sps:$4 sm:$0xff]  }
 0x658   :  { %8718 = vmatpush1.bf16.msra.mxu1 %v12726_v7  ;;  %8676 = vmatprep.subr.bf16.mxu0 %v12731_v50  ;;  %v12790_v7 = vld [vmem:[#allocation14 + $0x888] ss:$16 sps:$4 sm:$0xff]   ;;  %v12795_v50 = vld [vmem:[#allocation14 + $0x8a4] ss:$16 sps:$4 sm:$0xff]  }
 0x659   :  { %8719 = vmatprep.subr.bf16.mxu1 %v12734_v15  ;;  %v12798_v15 = vld [vmem:[#allocation14 + $0x8ac] ss:$16 sps:$4 sm:$0xff]  }
 0x65b   :  { %8677 = vmatpush1.bf16.msra.mxu0 %v12729_v19  ;;  %v12796_v19 = vld [vmem:[#allocation14 + $0x8a8] ss:$16 sps:$4 sm:$0xff]  }
 0x65c   :  { %8720 = vmatpush1.bf16.msra.mxu1 %v12732_v12  ;;  %8678 = vmatprep.subr.bf16.mxu0 %v12737_v60  ;;  %v12801_v12 = vld [vmem:[#allocation14 + $0x8c4] ss:$16 sps:$4 sm:$0xff]   ;;  %v12804_v60 = vld [vmem:[#allocation14 + $0x8cc] ss:$16 sps:$4 sm:$0xff]  }
 0x65d   :  { %8721 = vmatprep.subr.bf16.mxu1 %v12740_v25  ;;  %v12799_v25 = vld [vmem:[#allocation14 + $0x8c0] ss:$16 sps:$4 sm:$0xff]  }
 0x65f   :  { %8679 = vmatpush1.bf16.msra.mxu0 %v12735_v43  ;;  %v12805_v43 = vld [vmem:[#allocation14 + $0x8e0] ss:$16 sps:$4 sm:$0xff]  }
 0x660   :  { %8722 = vmatpush1.bf16.msra.mxu1 %v12738_v46  ;;  %8680 = vmatprep.subr.bf16.mxu0 %v12743_v9  ;;  %v12813_v46 = vld [vmem:[#allocation14 + $0x904] ss:$16 sps:$4 sm:$0xff]   ;;  %v12816_v9 = vld [vmem:[#allocation14 + $0x90c] ss:$16 sps:$4 sm:$0xff]  }
 0x661   :  { %8723 = vmatprep.subr.bf16.mxu1 %v12746_v44  ;;  %v12811_v44 = vld [vmem:[#allocation14 + $0x900] ss:$16 sps:$4 sm:$0xff]  }
 0x663   :  { %8681 = vmatpush1.bf16.msra.mxu0 %v12741_v18  ;;  %v12817_v18 = vld [vmem:[#allocation14 + $0x920] ss:$16 sps:$4 sm:$0xff]  }
 0x664   :  { %8724 = vmatpush1.bf16.msra.mxu1 %v12744_v56  ;;  %8682 = vmatprep.subr.bf16.mxu0 %v12749_v5  ;;  %v12820_v56 = vld [vmem:[#allocation14 + $0x928] ss:$16 sps:$4 sm:$0xff]   ;;  %v12825_v5 = vld [vmem:[#allocation14 + $0x944] ss:$16 sps:$4 sm:$0xff]  }
 0x665   :  { %8725 = vmatprep.subr.bf16.mxu1 %v12752_v8  ;;  %v12823_v8 = vld [vmem:[#allocation14 + $0x940] ss:$16 sps:$4 sm:$0xff]  }
 0x667   :  { %8683 = vmatpush1.bf16.msra.mxu0 %v12747_v14  ;;  %v12834_v14 = vld [vmem:[#allocation14 + $0x96c] ss:$16 sps:$4 sm:$0xff]  }
 0x668   :  { %8726 = vmatpush1.bf16.msra.mxu1 %v12750_v3  ;;  %8684 = vmatprep.subr.bf16.mxu0 %v12755_v13  ;;  %v12829_v3 = vld [vmem:[#allocation14 + $0x960] ss:$16 sps:$4 sm:$0xff]   ;;  %v12832_v13 = vld [vmem:[#allocation14 + $0x968] ss:$16 sps:$4 sm:$0xff]  }
 0x669   :  { %8727 = vmatprep.subr.bf16.mxu1 %v12758_v35  ;;  %v12840_v35 = vld [vmem:[#allocation14 + $0x98c] ss:$16 sps:$4 sm:$0xff]  }
 0x66b   :  { %8685 = vmatpush1.bf16.msra.mxu0 %v12753_v29  ;;  %v12838_v29 = vld [vmem:[#allocation14 + $0x988] ss:$16 sps:$4 sm:$0xff]  }
 0x66c   :  { %8728 = vmatpush1.bf16.msra.mxu1 %v12756_v45  ;;  %9216 = vmatprep.subr.bf16.mxu0 %v12761_v41  ;;  %v12843_v45 = vld [vmem:[#allocation14 + $0x9a4] ss:$16 sps:$4 sm:$0xff]   ;;  %v12846_v41 = vld [vmem:[#allocation14 + $0x9ac] ss:$16 sps:$4 sm:$0xff]  }
 0x66d   :  { %9259 = vmatprep.subr.bf16.mxu1 %v12764_v26  ;;  %v12841_v26 = vld [vmem:[#allocation14 + $0x9a0] ss:$16 sps:$4 sm:$0xff]  }
 0x66e   :  { %8687 = vmatmul.mubr.bf16.vlgmr.msra.gmra.mrb[36].mxu0 %v14854_v0 }
 0x66f   :  { %8730 = vmatmul.mubr.bf16.vlgmr.msra.gmra.mrb[44].mxu1 %v14854_v0  ;;  %9217 = vmatpush1.bf16.msra.mxu0 %v12759_v57  ;;  %v12781_v0 = vld [vmem:[#allocation14 + $0x860] ss:$16 sps:$4 sm:$0xff]   ;;  %v12849_v57 = vld [vmem:[#allocation14 + $0x9c4] ss:$16 sps:$4 sm:$0xff]  }
 0x670   :  { %9248 = vmatprep.mubr.bf16.mxu0 %v8830_v47  ;;  %9260 = vmatpush1.bf16.msra.mxu1 %v12762_v42  ;;  %v12852_v42 = vld [vmem:[#allocation14 + $0x9cc] ss:$16 sps:$4 sm:$0xff]  }
 0x671   :  { %9291 = vmatprep.mubr.bf16.mxu1 %v8830_v47  ;;  %9218 = vmatprep.subr.bf16.mxu0 %v12771_v55  ;;  %v12850_v55 = vld [vmem:[#allocation14 + $0x9c8] ss:$16 sps:$4 sm:$0xff]   ;;  %v12855_v47 = vld [vmem:[#allocation14 + $0x9e4] ss:$16 sps:$4 sm:$0xff]  }
 0x672   :  { %9261 = vmatprep.subr.bf16.mxu1 %v12774_v2  ;;  %v12858_v2 = vld [vmem:[#allocation14 + $0x9ec] ss:$16 sps:$4 sm:$0xff]  }
 0x673   :  { %9219 = vmatpush1.bf16.msra.mxu0 %v12769_v63  ;;  %v12853_v63 = vld [vmem:[#allocation14 + $0x9e0] ss:$16 sps:$4 sm:$0xff]  }
 0x674   :  { %9262 = vmatpush1.bf16.msra.mxu1 %v12772_v34  ;;  %9220 = vmatprep.subr.bf16.mxu0 %v12777_v1  ;;  %v12856_v34 = vld [vmem:[#allocation14 + $0x9e8] ss:$16 sps:$4 sm:$0xff]   ;;  %v8814_v1 = vcombine.low %v14880_v52, %v14877_v37  ;;  %v12866_v37 = vld [vmem:[#allocation17 + $0x88] sm:$0xff]  }
 0x675   :  { %9263 = vmatprep.subr.bf16.mxu1 %v12780_v33  ;;  %v12867_v52 = vld [vmem:[#allocation17 + $0x50] sm:$0xff]  }
 0x676   :  { %v8829_v33 = vpack.c.bf16 %v14874_v20, %v8814_v1  ;;  %v12868_v20 = vld [vmem:[#allocation17 + $0xd0] sm:$0xff]  }
 0x677   :  { %9221 = vmatpush1.bf16.msra.mxu0 %v12775_v21  ;;  %v12859_v21 = vld [vmem:[#allocation17 + $0x40] sm:$0xff]  }
 0x678   :  { %9264 = vmatpush1.bf16.msra.mxu1 %v12778_v16  ;;  %9222 = vmatprep.subr.bf16.mxu0 %v12783_v38  ;;  %v12860_v16 = vld [vmem:[#allocation17 + $0xc0] sm:$0xff]  }
 0x679   :  { %9265 = vmatprep.subr.bf16.mxu1 %v12786_v58  ;;  %v12861_v38 = vld [vmem:[#allocation17] sm:$0xff]  }
 0x67a   :  { %v12862_v58 = vld [vmem:[#allocation17 + $0x80] sm:$0xff]  }
 0x67b   :  { %9223 = vmatpush1.bf16.msra.mxu0 %v12781_v0  ;;  %v12863_v0 = vld [vmem:[#allocation17 + $0x48] sm:$0xff]  }
 0x67c   :  { %9266 = vmatpush1.bf16.msra.mxu1 %v12784_v10  ;;  %9224 = vmatprep.subr.bf16.mxu0 %v12789_v40  ;;  %v12864_v10 = vld [vmem:[#allocation17 + $0xc8] sm:$0xff]  }
 0x67d   :  { %9267 = vmatprep.subr.bf16.mxu1 %v12792_v51  ;;  %v12865_v40 = vld [vmem:[#allocation17 + $0x8] sm:$0xff]   ;;  %v12869_v51 = vld [vmem:[#allocation17 + $0x10] sm:$0xff]  }
 0x67f   :  { %9225 = vmatpush1.bf16.msra.mxu0 %v12787_v30  ;;  %v12870_v30 = vld [vmem:[#allocation17 + $0x90] sm:$0xff]  }
 0x680   :  { %9268 = vmatpush1.bf16.msra.mxu1 %v12790_v7  ;;  %9226 = vmatprep.subr.bf16.mxu0 %v12795_v50  ;;  %v12871_v7 = vld [vmem:[#allocation17 + $0x58] sm:$0xff]  }
 0x681   :  { %9269 = vmatprep.subr.bf16.mxu1 %v12798_v15  ;;  %v12872_v50 = vld [vmem:[#allocation17 + $0xd8] sm:$0xff]  }
 0x682   :  { %v12873_v15 = vld [vmem:[#allocation17 + $0x18] sm:$0xff]  }
 0x683   :  { %9227 = vmatpush1.bf16.msra.mxu0 %v12793_v22  ;;  %v12874_v22 = vld [vmem:[#allocation17 + $0x98] sm:$0xff]  }
 0x684   :  { %9270 = vmatpush1.bf16.msra.mxu1 %v12796_v19  ;;  %9228 = vmatprep.subr.bf16.mxu0 %v12801_v12  ;;  %v12875_v19 = vld [vmem:[#allocation17 + $0x60] sm:$0xff]  }
 0x685   :  { %9271 = vmatprep.subr.bf16.mxu1 %v12804_v60  ;;  %v12876_v12 = vld [vmem:[#allocation17 + $0xe0] sm:$0xff]  }
 0x686   :  { %v12877_v60 = vld [vmem:[#allocation17 + $0x20] sm:$0xff]  }
 0x687   :  { %9229 = vmatpush1.bf16.msra.mxu0 %v12799_v25  ;;  %v12878_v25 = vld [vmem:[#allocation17 + $0xa0] sm:$0xff]  }
 0x688   :  { %9272 = vmatpush1.bf16.msra.mxu1 %v12802_v61  ;;  %9230 = vmatprep.subr.bf16.mxu0 %v12807_v39  ;;  %v12879_v61 = vld [vmem:[#allocation17 + $0x68] sm:$0xff]  }
 0x689   :  { %9273 = vmatprep.subr.bf16.mxu1 %v12810_v11  ;;  %v12880_v39 = vld [vmem:[#allocation17 + $0xe8] sm:$0xff]  }
 0x68a   :  { %v12881_v11 = vld [vmem:[#allocation17 + $0x28] sm:$0xff]  }
 0x68b   :  { %9231 = vmatpush1.bf16.msra.mxu0 %v12805_v43  ;;  %v12882_v43 = vld [vmem:[#allocation17 + $0xa8] sm:$0xff]  }
 0x68c   :  { %9274 = vmatpush1.bf16.msra.mxu1 %v12808_v53  ;;  %9232 = vmatprep.subr.bf16.mxu0 %v12813_v46  ;;  %v12883_v53 = vld [vmem:[#allocation17 + $0x70] sm:$0xff]  }
 0x68d   :  { %9275 = vmatprep.subr.bf16.mxu1 %v12816_v9  ;;  %v12884_v46 = vld [vmem:[#allocation17 + $0xf0] sm:$0xff]  }
 0x68e   :  { %v12885_v9 = vld [vmem:[#allocation17 + $0x30] sm:$0xff]  }
 0x68f   :  { %9233 = vmatpush1.bf16.msra.mxu0 %v12811_v44  ;;  %v12886_v44 = vld [vmem:[#allocation17 + $0xb0] sm:$0xff]  }
 0x690   :  { %9276 = vmatpush1.bf16.msra.mxu1 %v12814_v27  ;;  %9234 = vmatprep.subr.bf16.mxu0 %v12819_v59  ;;  %v12887_v27 = vld [vmem:[#allocation17 + $0x78] sm:$0xff]  }
 0x691   :  { %9277 = vmatprep.subr.bf16.mxu1 %v12822_v4  ;;  %v12888_v59 = vld [vmem:[#allocation17 + $0xf8] sm:$0xff]  }
 0x692   :  { %v12889_v4 = vld [vmem:[#allocation17 + $0x38] sm:$0xff]  }
 0x693   :  { %9235 = vmatpush1.bf16.msra.mxu0 %v12817_v18  ;;  %v12890_v18 = vld [vmem:[#allocation17 + $0xb8] sm:$0xff]  }
 0x694   :  { %9278 = vmatpush1.bf16.msra.mxu1 %v12820_v56  ;;  %9236 = vmatprep.subr.bf16.mxu0 %v12825_v5  ;;  %v12891_v56 = vld [vmem:[#allocation17 + $0x140] sm:$0xff]   ;;  %v9310_v5 = vld [vmem:[#allocation16] sm:$0xf] }
 0x695   :  { %9279 = vmatprep.subr.bf16.mxu1 %v12828_v24  ;;  %v9315_v24 = vrot.slane %v9310_v5, %v13576_v48 }
 0x697   :  { %9237 = vmatpush1.bf16.msra.mxu0 %v12823_v8  ;;  %v9323_v8 = vrot.slane %v9310_v5, %v13599_v54 }
 0x698   :  { %9280 = vmatpush1.bf16.msra.mxu1 %v12826_v36  ;;  %9238 = vmatprep.subr.bf16.mxu0 %v12831_v6  ;;  %v9319_v36 = vrot.slane %v9310_v5, %v13579_v49  ;;  %v9327_v6 = vrot.slane %v9310_v5, %v15138_v28 }
 0x699   :  { %9281 = vmatprep.subr.bf16.mxu1 %v12834_v14 }
 0x69b   :  { %9239 = vmatpush1.bf16.msra.mxu0 %v12829_v3 }
 0x69c   :  { %9282 = vmatpush1.bf16.msra.mxu1 %v12832_v13  ;;  %9240 = vmatprep.subr.bf16.mxu0 %v12837_v17 }
 0x69d   :  { %9283 = vmatprep.subr.bf16.mxu1 %v12840_v35 }
 0x69f   :  { %9241 = vmatpush1.bf16.msra.mxu0 %v12835_v32 }
 0x6a0   :  { %9284 = vmatpush1.bf16.msra.mxu1 %v12838_v29  ;;  %9242 = vmatprep.subr.bf16.mxu0 %v12843_v45 }
 0x6a1   :  { %9285 = vmatprep.subr.bf16.mxu1 %v12846_v41 }
 0x6a3   :  { %9243 = vmatpush1.bf16.msra.mxu0 %v12841_v26 }
 0x6a4   :  { %9286 = vmatpush1.bf16.msra.mxu1 %v12844_v31  ;;  %9244 = vmatprep.subr.bf16.mxu0 %v12849_v57 }
 0x6a5   :  { %9287 = vmatprep.subr.bf16.mxu1 %v12852_v42 }
 0x6a7   :  { %9245 = vmatpush1.bf16.msra.mxu0 %v12847_v23 }
 0x6a8   :  { %9288 = vmatpush1.bf16.msra.mxu1 %v12850_v55  ;;  %9246 = vmatprep.subr.bf16.mxu0 %v12855_v47 }
 0x6a9   :  { %9289 = vmatprep.subr.bf16.mxu1 %v12858_v2 }
 0x6ab   :  { %9247 = vmatpush1.bf16.msra.mxu0 %v12853_v63 }
 0x6ac   :  { %9290 = vmatpush1.bf16.msra.mxu1 %v12856_v34  ;;  %11491 = vmatprep.subr.bf16.mxu0 %v12860_v16 }
 0x6ad   :  { %11513 = vmatprep.subr.bf16.mxu1 %v12859_v21 }
 0x6ae   :  { %9249 = vmatmul.mubr.bf16.vlgmr.msra.gmra.mrb[36].mxu0 %v8829_v33 }
 0x6af   :  { %9292 = vmatmul.mubr.bf16.vlgmr.msra.gmra.mrb[44].mxu1 %v8829_v33  ;;  %11492 = vmatpush3.bf16.msra.mxu0 %v12862_v58 }
 0x6b0   :  { %11514 = vmatpush3.bf16.msra.mxu1 %v12861_v38  ;;  %11493 = vmatprep.subr.bf16.mxu0 %v12864_v10 }
 0x6b1   :  { %11515 = vmatprep.subr.bf16.mxu1 %v12863_v0 }
 0x6b3   :  { %11494 = vmatpush3.bf16.msra.mxu0 %v12866_v37 }
 0x6b4   :  { %11516 = vmatpush3.bf16.msra.mxu1 %v12865_v40  ;;  %11495 = vmatprep.subr.bf16.mxu0 %v12868_v20 }
 0x6b5   :  { %11517 = vmatprep.subr.bf16.mxu1 %v12867_v52 }
 0x6b7   :  { %11496 = vmatpush3.bf16.msra.mxu0 %v12870_v30 }
 0x6b8   :  { %11518 = vmatpush3.bf16.msra.mxu1 %v12869_v51  ;;  %11497 = vmatprep.subr.bf16.mxu0 %v12872_v50 }
 0x6b9   :  { %11519 = vmatprep.subr.bf16.mxu1 %v12871_v7 }
 0x6bb   :  { %11498 = vmatpush3.bf16.msra.mxu0 %v12874_v22 }
 0x6bc   :  { %11520 = vmatpush3.bf16.msra.mxu1 %v12873_v15  ;;  %11499 = vmatprep.subr.bf16.mxu0 %v12876_v12 }
 0x6bd   :  { %11521 = vmatprep.subr.bf16.mxu1 %v12875_v19 }
 0x6bf   :  { %11500 = vmatpush3.bf16.msra.mxu0 %v12878_v25 }
 0x6c0   :  { %11522 = vmatpush3.bf16.msra.mxu1 %v12877_v60  ;;  %11501 = vmatprep.subr.bf16.mxu0 %v12880_v39 }
 0x6c1   :  { %11523 = vmatprep.subr.bf16.mxu1 %v12879_v61 }
 0x6c3   :  { %11502 = vmatpush3.bf16.msra.mxu0 %v12882_v43 }
 0x6c4   :  { %11524 = vmatpush3.bf16.msra.mxu1 %v12881_v11  ;;  %11503 = vmatprep.subr.bf16.mxu0 %v12884_v46 }
 0x6c5   :  { %11525 = vmatprep.subr.bf16.mxu1 %v12883_v53 }
 0x6c7   :  { %11504 = vmatpush3.bf16.msra.mxu0 %v12886_v44 }
 0x6c8   :  { %11526 = vmatpush3.bf16.msra.mxu1 %v12885_v9  ;;  %11505 = vmatprep.subr.bf16.mxu0 %v12888_v59 }
 0x6c9   :  { %11527 = vmatprep.subr.bf16.mxu1 %v12887_v27 }
 0x6cb   :  { %11506 = vmatpush3.bf16.msra.mxu0 %v12890_v18 }
 0x6cc   :  { %11528 = vmatpush3.bf16.msra.mxu1 %v12889_v4  ;;  %11535 = vmatprep.subr.bf16.mxu0 %v12891_v56 }
 0x781   :  { %v9250_v14 = vpop.f32.mrb[36].mxu0 }
 0x782   :  { %v9332_v3 = vadd.f32 %v9315_v24, %v9250_v14  ;;  %v9293_v13 = vpop.f32.mrb[44].mxu1  ;;  %v9252_v17 = vpop.f32.mrb[37].mxu0 }
 0x783   :  { %v9334_v35 = vadd.f32 %v9323_v8, %v9293_v13  ;;  %v9333_v32 = vadd.f32 %v9319_v36, %v9252_v17  ;;  %v9295_v29 = vpop.f32.mrb[45].mxu1  ;;  %v9254_v45 = vpop.f32.mrb[38].mxu0 }
 0x784   :  { %v9340_v41 = vmax.f32 %v9332_v3, 0.0  ;;  %v9335_v26 = vadd.f32 %v9327_v6, %v9295_v29  ;;  %v9336_v31 = vadd.f32 %v9315_v24, %v9254_v45  ;;  %v9297_v57 = vpop.f32.mrb[46].mxu1  ;;  %v9256_v42 = vpop.f32.mrb[39].mxu0 }
 0x785   :  { %v9342_v23 = vmax.f32 %v9334_v35, 0.0  ;;  %v9341_v55 = vmax.f32 %v9333_v32, 0.0  ;;  %v9338_v54 = vadd.f32 %v9323_v8, %v9297_v57  ;;  %v9337_v47 = vadd.f32 %v9319_v36, %v9256_v42  ;;  %v9299_v2 = vpop.f32.mrb[47].mxu1 }
 0x786   :  { %v9343_v63 = vmax.f32 %v9335_v26, 0.0  ;;  %v9344_v28 = vmax.f32 %v9336_v31, 0.0  ;;  %v9339_v34 = vadd.f32 %v9327_v6, %v9299_v2 }
 0x787   :  { %v9356_v1 = vcombine.low %v9340_v41, %v9341_v55  ;;  %v9357_v33 = vcombine.high %v9340_v41, %v9341_v55  ;;  %v9346_v21 = vmax.f32 %v9338_v54, 0.0  ;;  %v9345_v16 = vmax.f32 %v9337_v47, 0.0 }
 0x788   :  { %v9358_v38 = vcombine.low %v9342_v23, %v9343_v63  ;;  %v9359_v58 = vcombine.high %v9342_v23, %v9343_v63  ;;  %v9347_v0 = vmax.f32 %v9339_v34, 0.0 }
 0x789   :  { %v9366_v10 = vrot.slane %v9356_v1, %v13619_v62  ;;  %v9373_v40 = vrot.slane %v9357_v33, %v13619_v62  ;;  %v9392_v37 = vcombine.low %v9344_v28, %v9345_v16 }
 0x78a   :  { %v9380_v52 = vrot.slane %v9358_v38, %v13619_v62  ;;  %v9387_v20 = vrot.slane %v9359_v58, %v13619_v62  ;;  %v9393_v51 = vcombine.low %v9346_v21, %v9347_v0 }
 0x78b   :  { %v14900_v30 = vrot.slane %v9392_v37, %v13619_v62 }
 0x78c   :  { %v9388_v7 = vcombine.low %v9366_v10, %v9380_v52  ;;  %v9389_v50 = vcombine.high %v9366_v10, %v9380_v52  ;;  %v9390_v15 = vcombine.low %v9373_v40, %v9387_v20  ;;  %v9391_v22 = vcombine.high %v9373_v40, %v9387_v20 }
 0x78d   :  { %v11403_v19 = vcombine.low %v9380_v52, %v9380_v52  ;;  %v11404_v12 = vcombine.high %v9380_v52, %v9380_v52  ;;  %v11405_v60 = vcombine.low %v9387_v20, %v9387_v20  ;;  %v11406_v25 = vcombine.high %v9387_v20, %v9387_v20 }
 0x78e   :  { %v9417_v61 = vrot.slane %v9388_v7, %v13619_v62  ;;  %v14904_v39 = vrot.slane %v9389_v50, %v13619_v62  ;;  %v14907_v11 = vrot.slane %v9390_v15, %v13619_v62  ;;  %v9468_v43 = vrot.slane %v9391_v22, %v13619_v62 }
 0x78f   :  { %v9424_v53 = vrot.slane %v11403_v19, %v13619_v62  ;;  %v14912_v46 = vrot.slane %v11404_v12, %v13619_v62  ;;  %v14915_v9 = vrot.slane %v11405_v60, %v13619_v62  ;;  %v9475_v44 = vrot.slane %v11406_v25, %v13619_v62 }
 0x790   :  { %v9425_v27 = vcombine.high %v9417_v61, %v9417_v61  ;;  %v9442_v59 = vcombine.high %v14904_v39, %v14904_v39  ;;  %v9459_v4 = vcombine.high %v14907_v11, %v14907_v11  ;;  %v9476_v18 = vcombine.high %v9468_v43, %v9468_v43 }
 0x791   :  { %v9426_v56 = vcombine.high %v9424_v53, %v9424_v53  ;;  %v9443_v5 = vcombine.high %v14912_v46, %v14912_v46  ;;  %v9460_v24 = vcombine.high %v14915_v9, %v14915_v9  ;;  %v9477_v8 = vcombine.high %v9475_v44, %v9475_v44 }
 0x792   :  { %v9536_v36 = vsel %vm2065_vm2, %v9417_v61, -inf  ;;  %v9550_v6 = vsel %vm2065_vm2, %v9424_v53, -inf  ;;  %v9564_v14 = vsel %vm2065_vm2, %v14904_v39, -inf  ;;  %v9578_v3 = vsel %vm2065_vm2, %v14912_v46, -inf }
 0x793   :  { %v9537_v13 = vrot.slane %v9536_v36, 4  ;;  %v9551_v17 = vrot.slane %v9550_v6, 4  ;;  %v9565_v35 = vrot.slane %v9564_v14, 4  ;;  %v9579_v32 = vrot.slane %v9578_v3, 4 }
 0x794   :  { %v9592_v29 = vsel %vm2065_vm2, %v14907_v11, -inf  ;;  %v9606_v45 = vsel %vm2065_vm2, %v14915_v9, -inf  ;;  %v9620_v41 = vsel %vm2065_vm2, %v9468_v43, -inf  ;;  %v9634_v26 = vsel %vm2065_vm2, %v9475_v44, -inf }
 0x795   :  { %v14938_v31 = vmax.f32 %v9536_v36, %v9537_v13  ;;  %v14940_v57 = vmax.f32 %v9550_v6, %v9551_v17  ;;  %v14942_v42 = vmax.f32 %v9564_v14, %v9565_v35  ;;  %v14944_v23 = vmax.f32 %v9578_v3, %v9579_v32 }
 0x796   :  { %v9593_v55 = vrot.slane %v9592_v29, 4  ;;  %v9607_v54 = vrot.slane %v9606_v45, 4  ;;  %v9621_v47 = vrot.slane %v9620_v41, 4  ;;  %v9635_v2 = vrot.slane %v9634_v26, 4 }
 0x797   :  { %v9407_v63 = vrot.slane %v9393_v51, %v13619_v62  ;;  %v9543_v28 = vsel %vm2065_vm2, %v9425_v27, -inf  ;;  %v9557_v34 = vsel %vm2065_vm2, %v9426_v56, -inf  ;;  %v9627_v1 = vsel %vm2065_vm2, %v9476_v18, -inf }
 0x798   :  { %v14950_v33 = vmax.f32 %v9592_v29, %v9593_v55  ;;  %v14952_v21 = vmax.f32 %v9606_v45, %v9607_v54  ;;  %v9622_v16 = vmax.f32 %v9620_v41, %v9621_v47  ;;  %v9636_v38 = vmax.f32 %v9634_v26, %v9635_v2 }
 0x799   :  { %v9408_v58 = vcombine.low %v14900_v30, %v9407_v63  ;;  %v9409_v0 = vcombine.high %v14900_v30, %v9407_v63  ;;  %v11407_v10 = vcombine.low %v9407_v63, %v9407_v63  ;;  %v11408_v40 = vcombine.high %v9407_v63, %v9407_v63 }
 0x79a   :  { %v9544_v37 = vrot.slane %v9543_v28, 4  ;;  %v9558_v52 = vrot.slane %v9557_v34, 4  ;;  %v9628_v20 = vrot.slane %v9627_v1, 4  ;;  %v9641_v51 = vsel %vm2065_vm2, %v9477_v8, -inf }
 0x79b   :  { %v14958_v7 = vrot.slane %v9408_v58, %v13619_v62  ;;  %v14961_v50 = vrot.slane %v11407_v10, %v13619_v62  ;;  %v14964_v15 = vrot.slane %v9409_v0, %v13619_v62  ;;  %v14967_v22 = vrot.slane %v11408_v40, %v13619_v62 }
 0x79c   :  { %v9545_v30 = vmax.f32 %v9543_v28, %v9544_v37  ;;  %v9559_v19 = vmax.f32 %v9557_v34, %v9558_v52  ;;  %v9629_v12 = vmax.f32 %v9627_v1, %v9628_v20  ;;  %v9642_v60 = vrot.slane %v9641_v51, 4 }
 0x79d   :  { %v9493_v25 = vcombine.high %v14958_v7, %v14958_v7  ;;  %v9494_v61 = vcombine.high %v14961_v50, %v14961_v50  ;;  %v9510_v43 = vcombine.high %v14964_v15, %v14964_v15  ;;  %v9511_v53 = vcombine.high %v14967_v22, %v14967_v22 }
 0x79e   :  { %v9648_v62 = vsel %vm2065_vm2, %v14958_v7, -inf  ;;  %v9662_v44 = vsel %vm2065_vm2, %v14961_v50, -inf  ;;  %v9676_v27 = vsel %vm2065_vm2, %v14964_v15, -inf  ;;  %v9690_v18 = vsel %vm2065_vm2, %v14967_v22, -inf }
 0x79f   :  { %v9649_v56 = vrot.slane %v9648_v62, 4  ;;  %v9663_v8 = vrot.slane %v9662_v44, 4  ;;  %v9677_v36 = vrot.slane %v9676_v27, 4  ;;  %v9691_v6 = vrot.slane %v9690_v18, 4 }
 0x7a0   :  { %v9546_v14 = vrot.slane %v9545_v30, 2  ;;  %v9560_v3 = vrot.slane %v9559_v19, 2  ;;  %v9630_v13 = vrot.slane %v9629_v12, 2  ;;  %v9643_v17 = vmax.f32 %v9641_v51, %v9642_v60 }
 0x7a1   :  { %v14985_v35 = vmax.f32 %v9648_v62, %v9649_v56  ;;  %v14987_v32 = vmax.f32 %v9662_v44, %v9663_v8  ;;  %v14989_v29 = vmax.f32 %v9676_v27, %v9677_v36  ;;  %v14991_v45 = vmax.f32 %v9690_v18, %v9691_v6 }
 0x7a2   :  { %v9547_v41 = vmax.f32 %v9545_v30, %v9546_v14  ;;  %v9561_v26 = vmax.f32 %v9559_v19, %v9560_v3  ;;  %v9631_v55 = vmax.f32 %v9629_v12, %v9630_v13  ;;  %v9644_v54 = vrot.slane %v9643_v17, 2 }
 0x7a3   :  { %v9539_v47 = vrot.slane %v14938_v31, 2  ;;  %v9553_v2 = vrot.slane %v14940_v57, 2  ;;  %v9623_v63 = vrot.slane %v9622_v16, 2  ;;  %v9637_v28 = vrot.slane %v9636_v38, 2 }
 0x7a4   :  { %v9548_v34 = vrot.slane %v9547_v41, 1  ;;  %v9562_v1 = vrot.slane %v9561_v26, 1  ;;  %v9632_v58 = vrot.slane %v9631_v55, 1  ;;  %v9645_v0 = vmax.f32 %v9643_v17, %v9644_v54 }
 0x7a5   :  { %v9540_v10 = vmax.f32 %v14938_v31, %v9539_v47  ;;  %v9554_v40 = vmax.f32 %v14940_v57, %v9553_v2  ;;  %v9624_v37 = vmax.f32 %v9622_v16, %v9623_v63  ;;  %v9638_v52 = vmax.f32 %v9636_v38, %v9637_v28 }
 0x7a6   :  { %v9549_v20 = vmax.f32 %v9547_v41, %v9548_v34  ;;  %v9563_v51 = vmax.f32 %v9561_v26, %v9562_v1  ;;  %v9633_v7 = vmax.f32 %v9631_v55, %v9632_v58  ;;  %v9646_v50 = vrot.slane %v9645_v0, 1 }
 0x7a7   :  { %v9541_v30 = vrot.slane %v9540_v10, 1  ;;  %v9555_v19 = vrot.slane %v9554_v40, 1  ;;  %v9625_v12 = vrot.slane %v9624_v37, 1  ;;  %v9639_v60 = vrot.slane %v9638_v52, 1 }
 0x7a8   :  { %v9647_v62 = vmax.f32 %v9645_v0, %v9646_v50  ;;  %v9705_v44 = vmax.f32 %v9549_v20, %v9563_v51  ;;  %v9571_v27 = vsel %vm2065_vm2, %v9442_v59, -inf  ;;  %v9585_v31 = vsel %vm2065_vm2, %v9443_v5, -inf }
 0x7a9   :  { %v9542_v57 = vmax.f32 %v9540_v10, %v9541_v30  ;;  %v9556_v16 = vmax.f32 %v9554_v40, %v9555_v19  ;;  %v9626_v38 = vmax.f32 %v9624_v37, %v9625_v12  ;;  %v9640_v18 = vmax.f32 %v9638_v52, %v9639_v60 }
 0x7aa   :  { %v9711_v56 = vmax.f32 %v9633_v7, %v9647_v62  ;;  %v9717_v8 = vpack.c.bf16 %v9705_v44, %v9705_v44  ;;  %v9572_v36 = vrot.slane %v9571_v27, 4  ;;  %v9586_v6 = vrot.slane %v9585_v31, 4 }
 0x7ab   :  { %v9704_v14 = vmax.f32 %v9542_v57, %v9556_v16  ;;  %v9710_v3 = vmax.f32 %v9626_v38, %v9640_v18  ;;  %v9655_v13 = vsel %vm2065_vm2, %v9493_v25, -inf  ;;  %v9669_v39 = vsel %vm2065_vm2, %v9494_v61, -inf }
 0x7ac   :  { %v9723_v59 = vpack.c.bf16 %v9711_v56, %v9711_v56  ;;  %v9948_v17 = vunpack.c.l.b16 %v9717_v8  ;;  %v9573_v41 = vmax.f32 %v9571_v27, %v9572_v36  ;;  %v9587_v46 = vmax.f32 %v9585_v31, %v9586_v6 }
 0x7ad   :  { %v9716_v26 = vpack.c.bf16 %v9704_v14, %v9704_v14  ;;  %v9722_v5 = vpack.c.bf16 %v9710_v3, %v9710_v3  ;;  %v9656_v55 = vrot.slane %v9655_v13, 4  ;;  %v9670_v54 = vrot.slane %v9669_v39, 4 }
 0x7ae   :  { %v9950_v47 = vunpack.c.l.b16 %v9723_v59  ;;  %v9574_v2 = vrot.slane %v9573_v41, 2  ;;  %v9588_v63 = vrot.slane %v9587_v46, 2  ;;  %v9567_v28 = vrot.slane %v14942_v42, 2 }
 0x7af   :  { %v9947_v34 = vunpack.c.l.b16 %v9716_v26  ;;  %v9949_v1 = vunpack.c.l.b16 %v9722_v5  ;;  %v9657_v58 = vmax.f32 %v9655_v13, %v9656_v55  ;;  %v9671_v0 = vmax.f32 %v9669_v39, %v9670_v54 }
 0x7b0   :  { %v9952_v25 = vsel %vm2857_vm8, %v9950_v47, %v9948_v17  ;;  %v9575_v61 = vmax.f32 %v9573_v41, %v9574_v2  ;;  %v9589_v10 = vmax.f32 %v9587_v46, %v9588_v63  ;;  %v9568_v40 = vmax.f32 %v14942_v42, %v9567_v28 }
 0x7b1   :  { %v9954_v37 = vpack.c.b16 %v9952_v25, %v9952_v25  ;;  %v9951_v52 = vsel %vm2857_vm8, %v9949_v1, %v9947_v34  ;;  %v9658_v20 = vrot.slane %v9657_v58, 2  ;;  %v9672_v51 = vrot.slane %v9671_v0, 2 }
 0x7b2   :  { %v9953_v7 = vpack.c.b16 %v9951_v52, %v9951_v52  ;;  %v9576_v50 = vrot.slane %v9575_v61, 1  ;;  %v9590_v30 = vrot.slane %v9589_v10, 1  ;;  %v9569_v19 = vrot.slane %v9568_v40, 1 }
 0x7b3   :  { %10085 = vmatprep.mubr.bf16.mxu1 %v9954_v37  ;;  %v9659_v12 = vmax.f32 %v9657_v58, %v9658_v20  ;;  %v9673_v60 = vmax.f32 %v9671_v0, %v9672_v51  ;;  %v9581_v62 = vrot.slane %v14944_v23, 2  ;;  %v9651_v44 = vrot.slane %v14985_v35, 2 }
 0x7b4   :  { %10086 = vmatmul.mubr.bf16.vlgmr.msra.gmra.mrb[48].mxu1 %v9953_v7  ;;  %v9577_v27 = vmax.f32 %v9575_v61, %v9576_v50  ;;  %v9591_v31 = vmax.f32 %v9589_v10, %v9590_v30  ;;  %v9570_v42 = vmax.f32 %v9568_v40, %v9569_v19  ;;  %v9665_v57 = vrot.slane %v14987_v32, 2 }
 0x7b5   :  { %v9660_v16 = vrot.slane %v9659_v12, 1  ;;  %v9674_v38 = vrot.slane %v9673_v60, 1  ;;  %v9582_v18 = vmax.f32 %v14944_v23, %v9581_v62  ;;  %v9652_v56 = vmax.f32 %v14985_v35, %v9651_v44 }
 0x7b6   :  { %v15142_v8 = vmov 0   ;;  %v9707_v36 = vmax.f32 %v9577_v27, %v9591_v31  ;;  %v9666_v6 = vmax.f32 %v14987_v32, %v9665_v57  ;;  %v9599_v14 = vsel %vm2065_vm2, %v9459_v4, -inf  ;;  %v12892_v27 = vld [vmem:[#allocation17 + $0x100] sm:$0xff]  }
 0x7b7   :  { %10427 = vmatprep.mubr.bf16.mxu1 %v15142_v8  ;;  %v9613_v3 = vsel %vm2065_vm2, %v9460_v24, -inf  ;;  %v9661_v13 = vmax.f32 %v9659_v12, %v9660_v16  ;;  %v9675_v39 = vmax.f32 %v9673_v60, %v9674_v38  ;;  %v9583_v23 = vrot.slane %v9582_v18, 1 }
 0x7b8   :  { %v9653_v59 = vrot.slane %v9652_v56, 1  ;;  %v9719_v35 = vpack.c.bf16 %v9707_v36, %v9707_v36  ;;  %v9667_v17 = vrot.slane %v9666_v6, 1  ;;  %v9600_v41 = vrot.slane %v9599_v14, 4 }
 0x7b9   :  { %v9614_v46 = vrot.slane %v9613_v3, 4  ;;  %v9713_v26 = vmax.f32 %v9661_v13, %v9675_v39  ;;  %v9584_v32 = vmax.f32 %v9582_v18, %v9583_v23  ;;  %v9683_v11 = vsel %vm2065_vm2, %v9510_v43, -inf  ;;  %v12893_v18 = vld [vmem:[#allocation17 + $0x148] sm:$0xff]  }
 0x7ba   :  { %v9654_v5 = vmax.f32 %v9652_v56, %v9653_v59  ;;  %v9798_v4 = vunpack.c.l.b16 %v9719_v35  ;;  %v9668_v9 = vmax.f32 %v9666_v6, %v9667_v17  ;;  %v9601_v55 = vmax.f32 %v9599_v14, %v9600_v41  ;;  %v12894_v13 = vld [vmem:[#allocation17 + $0x108] sm:$0xff]   ;;  %v12895_v41 = vld [vmem:[#allocation17 + $0x150] sm:$0xff]  }
 0x7bb   :  { %v9615_v24 = vmax.f32 %v9613_v3, %v9614_v46  ;;  %v9725_v54 = vpack.c.bf16 %v9713_v26, %v9713_v26  ;;  %v9706_v47 = vmax.f32 %v9570_v42, %v9584_v32  ;;  %v9684_v2 = vrot.slane %v9683_v11, 4 }
 0x7bc   :  { %v9697_v63 = vsel %vm2065_vm2, %v9511_v53, -inf  ;;  %v9712_v28 = vmax.f32 %v9654_v5, %v9668_v9  ;;  %v9602_v34 = vrot.slane %v9601_v55, 2  ;;  %v9595_v43 = vrot.slane %v14950_v33, 2  ;;  %v12896_v5 = vld [vmem:[#allocation17 + $0x110] sm:$0xff]  }
 0x7bd   :  { %v9616_v1 = vrot.slane %v9615_v24, 2  ;;  %v9698_v58 = vrot.slane %v9697_v63, 4  ;;  %v9800_v0 = vunpack.c.l.b16 %v9725_v54  ;;  %v9718_v15 = vpack.c.bf16 %v9706_v47, %v9706_v47 }
 0x7be   :  { %v9685_v25 = vmax.f32 %v9683_v11, %v9684_v2  ;;  %v9724_v61 = vpack.c.bf16 %v9712_v28, %v9712_v28  ;;  %v9603_v10 = vmax.f32 %v9601_v55, %v9602_v34  ;;  %v9596_v22 = vmax.f32 %v14950_v33, %v9595_v43  ;;  %v12897_v55 = vld [vmem:[#allocation17 + $0x158] sm:$0xff]   ;;  %v12899_v34 = vld [vmem:[#allocation17 + $0x160] sm:$0xff]   ;;  %v12901_v43 = vld [vmem:[#allocation17 + $0x168] sm:$0xff]  }
 0x7bf   :  { %v9617_v40 = vmax.f32 %v9615_v24, %v9616_v1  ;;  %v9699_v37 = vmax.f32 %v9697_v63, %v9698_v58  ;;  %v9802_v52 = vsel %vm2857_vm8, %v9800_v0, %v9798_v4  ;;  %v9797_v20 = vunpack.c.l.b16 %v9718_v15  ;;  %v12900_v15 = vld [vmem:[#allocation17 + $0x120] sm:$0xff]  }
 0x7c0   :  { %v9686_v51 = vrot.slane %v9685_v25, 2  ;;  %v9804_v53 = vpack.c.b16 %v9802_v52, %v9802_v52  ;;  %v9799_v7 = vunpack.c.l.b16 %v9724_v61  ;;  %v9604_v50 = vrot.slane %v9603_v10, 1  ;;  %v12902_v61 = vld [vmem:[#allocation17 + $0x128] sm:$0xff]   ;;  %v12906_v52 = vld [vmem:[#allocation17 + $0x138] sm:$0xff]  }
 0x7c1   :  { %v9618_v30 = vrot.slane %v9617_v40, 1  ;;  %v9700_v12 = vrot.slane %v9699_v37, 2  ;;  %v9597_v60 = vrot.slane %v9596_v22, 1  ;;  %v9609_v62 = vrot.slane %v14952_v21, 2 }
 0x7c2   :  { %v9687_v19 = vmax.f32 %v9685_v25, %v9686_v51  ;;  %9935 = vmatprep.mubr.bf16.mxu0 %v9804_v53  ;;  %v9801_v44 = vsel %vm2857_vm8, %v9799_v7, %v9797_v20  ;;  %v9605_v31 = vmax.f32 %v9603_v10, %v9604_v50  ;;  %v9679_v57 = vrot.slane %v14989_v29, 2  ;;  %v12903_v10 = vld [vmem:[#allocation17 + $0x170] sm:$0xff]   ;;  %v12907_v51 = vld [vmem:[#allocation20] ss:$8 sps:$4 sm:$0xff]  }
 0x7c3   :  { %v9619_v42 = vmax.f32 %v9617_v40, %v9618_v30  ;;  %v9803_v16 = vpack.c.b16 %v9801_v44, %v9801_v44  ;;  %v9701_v33 = vmax.f32 %v9699_v37, %v9700_v12  ;;  %v9610_v8 = vmax.f32 %v14952_v21, %v9609_v62  ;;  %v12904_v40 = vld [vmem:[#allocation17 + $0x130] sm:$0xff]   ;;  %v12905_v37 = vld [vmem:[#allocation17 + $0x178] sm:$0xff]   ;;  %v12913_v30 = vld [vmem:[#allocation20 + $0x20] ss:$8 sps:$4 sm:$0xff]  }
 0x7c4   :  { %v9688_v38 = vrot.slane %v9687_v19, 1  ;;  %v9680_v36 = vmax.f32 %v14989_v29, %v9679_v57  ;;  %v9693_v6 = vrot.slane %v14991_v45, 2  ;;  %v9598_v39 = vmax.f32 %v9596_v22, %v9597_v60  ;;  %v12909_v22 = vld [vmem:[#allocation20 + $0x4] ss:$8 sps:$4 sm:$0xff]   ;;  %v12912_v53 = vld [vmem:[#allocation20 + $0x14] ss:$8 sps:$4 sm:$0xff]  }
 0x7c5   :  { %v9709_v56 = vmax.f32 %v9605_v31, %v9619_v42  ;;  %9936 = vmatmul.mubr.bf16.vlgmr.msra.gmra.mrb[40].mxu0 %v9803_v16  ;;  %v9702_v3 = vrot.slane %v9701_v33, 1  ;;  %v9611_v23 = vrot.slane %v9610_v8, 1  ;;  %10395 = vmatprep.subr.bf16.mxu1 %v12909_v22  ;;  %v12910_v7 = vld [vmem:[#allocation20 + $0x10] ss:$8 sps:$4 sm:$0xff]   ;;  %v12915_v50 = vld [vmem:[#allocation20 + $0x24] ss:$8 sps:$4 sm:$0xff]  }
 0x7c6   :  { %v9689_v14 = vmax.f32 %v9687_v19, %v9688_v38  ;;  %11536 = vmatpush3.bf16.msra.mxu0 %v12892_v27  ;;  %v9681_v59 = vrot.slane %v9680_v36, 1  ;;  %v9694_v35 = vmax.f32 %v14991_v45, %v9693_v6  ;;  %v12898_v45 = vld [vmem:[#allocation17 + $0x118] sm:$0xff]   ;;  %10396 = vmatpush1.bf16.msra.mxu1 %v12907_v51  ;;  %v12921_v60 = vld [vmem:[#allocation20 + $0x44] ss:$8 sps:$4 sm:$0xff]   ;;  %v12919_v62 = vld [vmem:[#allocation20 + $0x40] ss:$8 sps:$4 sm:$0xff]  }
 0x7c7   :  { %v9703_v17 = vmax.f32 %v9701_v33, %v9702_v3  ;;  %11537 = vmatprep.subr.bf16.mxu0 %v12893_v18  ;;  %v9612_v46 = vmax.f32 %v9610_v8, %v9611_v23  ;;  %v9721_v29 = vpack.c.bf16 %v9709_v56, %v9709_v56  ;;  %10397 = vmatprep.subr.bf16.mxu1 %v12912_v53  ;;  %v12918_v19 = vld [vmem:[#allocation20 + $0x34] ss:$8 sps:$4 sm:$0xff]   ;;  %v12916_v12 = vld [vmem:[#allocation20 + $0x30] ss:$8 sps:$4 sm:$0xff]   ;;  %v12925_v31 = vld [vmem:[#allocation20 + $0x60] ss:$8 sps:$4 sm:$0xff]  }
 0x7c8   :  { %v9682_v26 = vmax.f32 %v9680_v36, %v9681_v59  ;;  %v9695_v21 = vrot.slane %v9694_v35, 1  ;;  %v12922_v44 = vld [vmem:[#allocation20 + $0x50] ss:$8 sps:$4 sm:$0xff]   ;;  %v12924_v27 = vld [vmem:[#allocation20 + $0x54] ss:$8 sps:$4 sm:$0xff]   ;;  %v12931_v16 = vld [vmem:[%s15119_s11 + $0x40] sm:$0xff]  }
 0x7c9   :  { %v9715_v32 = vmax.f32 %v9689_v14, %v9703_v17  ;;  %v9708_v4 = vmax.f32 %v9598_v39, %v9612_v46  ;;  %v10131_v47 = vunpack.c.l.b16 %v9721_v29  ;;  %v12927_v42 = vld [vmem:[#allocation20 + $0x64] ss:$8 sps:$4 sm:$0xff]   ;;  %v12930_v57 = vld [vmem:[#allocation20 + $0x74] ss:$8 sps:$4 sm:$0xff]   ;;  %v12928_v18 = vld [vmem:[#allocation20 + $0x70] ss:$8 sps:$4 sm:$0xff]  }
 0x7ca   :  { %11538 = vmatpush3.bf16.msra.mxu0 %v12894_v13  ;;  %v9696_v11 = vmax.f32 %v9694_v35, %v9695_v21  ;;  %10398 = vmatpush1.bf16.msra.mxu1 %v12910_v7  ;;  %v12932_v38 = vld [vmem:[%s15119_s11] sm:$0xff]   ;;  %v12933_v33 = vld [vmem:[%s15119_s11 + $0x48] sm:$0xff]   ;;  %v12935_v8 = vld [vmem:[%s15119_s11 + $0x50] sm:$0xff]   ;;  %vm10615_vm2 = vcmask 74752  }
 0x7cb   :  { %v9727_v9 = vpack.c.bf16 %v9715_v32, %v9715_v32  ;;  %11539 = vmatprep.subr.bf16.mxu0 %v12895_v41  ;;  %v9720_v54 = vpack.c.bf16 %v9708_v4, %v9708_v4  ;;  %10399 = vmatprep.subr.bf16.mxu1 %v12915_v50  ;;  %v12934_v56 = vld [vmem:[%s15119_s11 + $0x8] sm:$0xff]   ;;  %v12936_v36 = vld [vmem:[%s15119_s11 + $0x10] sm:$0xff]   ;;  %v12937_v6 = vld [vmem:[%s15119_s11 + $0x58] sm:$0xff]  }
 0x7cc   :  { %v9714_v24 = vmax.f32 %v9682_v26, %v9696_v11  ;;  %v12938_v14 = vld [vmem:[%s15119_s11 + $0x18] sm:$0xff]   ;;  %v12939_v3 = vld [vmem:[%s15119_s11 + $0x60] sm:$0xff]   ;;  %v12941_v39 = vld [vmem:[%s15119_s11 + $0x68] sm:$0xff]  }
 0x7cd   :  { %v10133_v2 = vunpack.c.l.b16 %v9727_v9  ;;  %v10130_v58 = vunpack.c.l.b16 %v9720_v54  ;;  %v12940_v13 = vld [vmem:[%s15119_s11 + $0x20] sm:$0xff]   ;;  %v12942_v23 = vld [vmem:[%s15119_s11 + $0x28] sm:$0xff]   ;;  %v11457_v54 = vld [vmem:[#allocation19] ss:$0 sm:$0xff] }
 0x7ce   :  { %11540 = vmatpush3.bf16.msra.mxu0 %v12896_v5  ;;  %v9726_v63 = vpack.c.bf16 %v9714_v24, %v9714_v24  ;;  %10400 = vmatpush1.bf16.msra.mxu1 %v12913_v30  ;;  %v11474_v30 = vld [vmem:[#allocation23] ss:$0 sm:$0xff] }
 0x7cf   :  { %v10135_v28 = vsel %vm2857_vm8, %v10133_v2, %v10131_v47  ;;  %11541 = vmatprep.subr.bf16.mxu0 %v12897_v55  ;;  %10401 = vmatprep.subr.bf16.mxu1 %v12918_v19 }
 0x7d0   :  { %v10137_v1 = vpack.c.b16 %v10135_v28, %v10135_v28  ;;  %v10132_v0 = vunpack.c.l.b16 %v9726_v63 }
 0x7d2   :  { %10268 = vmatprep.mubr.bf16.mxu0 %v10137_v1  ;;  %11542 = vmatpush3.bf16.msra.mxu0 %v12898_v45  ;;  %v10134_v25 = vsel %vm2857_vm8, %v10132_v0, %v10130_v58  ;;  %v12944_v1 = vld [vmem:[%s15119_s11 + $0x30] sm:$0xff]   ;;  %v12945_v58 = vld [vmem:[%s15119_s11 + $0x78] sm:$0xff]  }
 0x7d3   :  { %11543 = vmatprep.subr.bf16.mxu0 %v12899_v34  ;;  %v10136_v20 = vpack.c.b16 %v10134_v25, %v10134_v25  ;;  %10402 = vmatpush1.bf16.msra.mxu1 %v12916_v12  ;;  %v12943_v34 = vld [vmem:[%s15119_s11 + $0x70] sm:$0xff]   ;;  %v12946_v0 = vld [vmem:[%s15119_s11 + $0x38] sm:$0xff]   ;;  %s13270_s11 = smov [#allocation25]  }
 0x7d4   :  { %10403 = vmatprep.subr.bf16.mxu1 %v12921_v60  ;;  %s10623_s2 = sshll.u32 %s13270_s11, 4  ;;  %s10624_s2 = int_to_ptr.vmem [resolvable:$true] %s10623_s2 }
 0x7d5   :  { %s13211_s28 = scalar_lea.vmem %s10624_s2, 32  ;;  %p13216_p13 = scmp.lt.s32.totalorder %s10624_s2, %s10624_s2 }
 0x7d6   :  { %11544 = vmatpush3.bf16.msra.mxu0 %v12900_v15  ;;  %v10303_v15 = vld [vmem:[#allocation22] sm:$0x3]  ;;  %p13212_p12 = scmp.ne.s32.totalorder %s10624_s2, %s13211_s28  ;;  %p13217_p0 = scmp.lt.s32.totalorder %s13211_s28, %s13211_s28 }
 0x7d7   :  { %11545 = vmatprep.subr.bf16.mxu0 %v12901_v43  ;;  %10404 = vmatpush1.bf16.msra.mxu1 %v12919_v62  ;;  %v10308_v25 = vrot.slane %v10303_v15, %v13576_v48  ;;  %v10312_v43 = vrot.slane %v10303_v15, %v13579_v49 }
 0x7d8   :  { %10405 = vmatprep.subr.bf16.mxu1 %v12924_v27  ;;  %p13218_p1 = por %p13217_p0, %p13216_p13 }
 0x7da   :  { %11546 = vmatpush3.bf16.msra.mxu0 %v12902_v61  ;;  %p13219_p2 = pnand %p13218_p1, %p13212_p12 }
 0x7db   :  { %11547 = vmatprep.subr.bf16.mxu0 %v12903_v10  ;;  %10406 = vmatpush1.bf16.msra.mxu1 %v12922_v44 }
 0x7dc   :  { %10407 = vmatprep.subr.bf16.mxu1 %v12927_v42 }
 0x7de   :  { %11548 = vmatpush3.bf16.msra.mxu0 %v12904_v40 }
 0x7df   :  { %11549 = vmatprep.subr.bf16.mxu0 %v12905_v37  ;;  %10408 = vmatpush1.bf16.msra.mxu1 %v12925_v31 }
 0x7e0   :  { %10409 = vmatprep.subr.bf16.mxu1 %v12930_v57 }
 0x7e2   :  { %11550 = vmatpush3.bf16.msra.mxu0 %v12906_v52 }
 0x7e3   :  { %11557 = vmatprep.subr.bf16.mxu0 %v12931_v16  ;;  %10410 = vmatpush1.bf16.msra.mxu1 %v12928_v18 }
 0x7e5   :  { %10269 = vmatmul.mubr.bf16.vlgmr.msra.gmra.mrb[44].mxu0 %v10136_v20 }
 0x7e6   :  { %11558 = vmatpush3.bf16.msra.mxu0 %v12932_v38 }
 0x7e7   :  { %11559 = vmatprep.subr.bf16.mxu0 %v12933_v33 }
 0x7ea   :  { %11560 = vmatpush3.bf16.msra.mxu0 %v12934_v56 }
 0x7eb   :  { %11561 = vmatprep.subr.bf16.mxu0 %v12935_v8 }
 0x7ee   :  { %11562 = vmatpush3.bf16.msra.mxu0 %v12936_v36 }
 0x7ef   :  { %11563 = vmatprep.subr.bf16.mxu0 %v12937_v6 }
 0x7f2   :  { %11564 = vmatpush3.bf16.msra.mxu0 %v12938_v14 }
 0x7f3   :  { %11565 = vmatprep.subr.bf16.mxu0 %v12939_v3 }
 0x7f6   :  { %11566 = vmatpush3.bf16.msra.mxu0 %v12940_v13 }
 0x7f7   :  { %11567 = vmatprep.subr.bf16.mxu0 %v12941_v39 }
 0x7fa   :  { %11568 = vmatpush3.bf16.msra.mxu0 %v12942_v23 }
 0x7fb   :  { %11569 = vmatprep.subr.bf16.mxu0 %v12943_v34 }
 0x7fe   :  { %11570 = vmatpush3.bf16.msra.mxu0 %v12944_v1 }
 0x7ff   :  { %11571 = vmatprep.subr.bf16.mxu0 %v12945_v58 }
 0x802   :  { %11572 = vmatpush3.bf16.msra.mxu0 %v12946_v0 }
 0x887   :  { %v11529_v59 = vpop.f32.mrb[48].mxu1 }
 0x888   :  { %v11530_v35 = vpop.f32.mrb[49].mxu1 }
 0x889   :  { %v11531_v17 = vadd.f32 %v11530_v35, %v11529_v59  ;;  %v11532_v41 = vpop.f32.mrb[50].mxu1 }
 0x88a   :  { %v11533_v46 = vpop.f32.mrb[51].mxu1 }
 0x898   :  { %v11507_v26 = vpop.f32.mrb[40].mxu0 }
 0x899   :  { %v11508_v21 = vpop.f32.mrb[41].mxu0 }
 0x89a   :  { %v11509_v32 = vadd.f32 %v11508_v21, %v11507_v26  ;;  %v11510_v29 = vpop.f32.mrb[42].mxu0 }
 0x89b   :  { %v11511_v5 = vpop.f32.mrb[43].mxu0 }
 0x89c   :  { %v10088_v11 = vadd.f32 %v11531_v17, %v11509_v32 }
 0x8b8   :  { %v11551_v4 = vpop.f32.mrb[44].mxu0 }
 0x8b9   :  { %v11552_v9 = vpop.f32.mrb[45].mxu0 }
 0x8ba   :  { %v11553_v55 = vadd.f32 %v11552_v9, %v11551_v4  ;;  %v11554_v24 = vpop.f32.mrb[46].mxu0 }
 0x8bb   :  { %v11555_v47 = vpop.f32.mrb[47].mxu0 }
 0x8bc   :  { %v10276_v2 = vadd.f32 %v11553_v55, %v10088_v11 }
 0x8be   :  { %v10284_v45 = vadd.f32 %v11457_v54, %v10276_v2 }
 0x8c0   :  { %v10285_v63 = vmax.f32 %v10284_v45, 0.0 }
 0x8c2   :  { %v10286_v28 = vpack.c.bf16 %v10285_v63, %v10285_v63 }
 0x8c4   :  { %10428 = vmatmul.mubr.bf16.vlgmr.msra.gmra.mrb[52].mxu1 %v10286_v28 }
 0x997   :  { %v10429_v61 = vpop.f32.mrb[52].mxu1 }
 0x998   :  { %v10430_v10 = vadd.f32 %v10429_v61, %v10308_v25  ;;  %v10431_v40 = vpop.f32.mrb[53].mxu1 }
 0x999   :  { %v10432_v37 = vadd.f32 %v10431_v40, %v10312_v43  ;;  %v10433_v52 = vpop.f32.mrb[54].mxu1 }
 0x99a   :  { %v10436_v20 = vmax.f32 %v10430_v10, 0.0  ;;  %v10434_v51 = vpop.f32.mrb[55].mxu1 }
 0x99b   :  { %v10437_v22 = vmax.f32 %v10432_v37, 0.0 }
 0x99c   :  { %v10438_v7 = vpack.c.bf16 %v10436_v20, %v10436_v20 }
 0x99d   :  { %v10439_v53 = vpack.c.bf16 %v10437_v22, %v10437_v22 }
 0x99f   :  { %10607 = vmatprep.mubr.bf16.mxu0 %v10439_v53 }
 0x9a0   :  { %10608 = vmatmul.mubr.bf16.vlgmr.msra.gmra.mrb[48].mxu0 %v10438_v7 }
 0xa73   :  { %v11573_v50 = vpop.f32.mrb[48].mxu0 }
 0xa74   :  { %v11574_v19 = vpop.f32.mrb[49].mxu0 }
 0xa75   :  { %v11575_v48 = vadd.f32 %v11574_v19, %v11573_v50  ;;  %v11576_v12 = vpop.f32.mrb[50].mxu0 }
 0xa76   :  { %v11577_v49 = vpop.f32.mrb[51].mxu0 }
 0xa77   :  { %v10610_v60 = vadd.f32 %v11575_v48, %v11474_v30 }
 0xa79   :  { %10616 = vst.msk [vmem:[#allocation25] sm:$0x3] %vm10615_vm2, %v10610_v60 }
 0xa7a   :  { %13222 = shalt.err (!%p13219_p2)
}
 0xa7b   :  { %s13223_s16 = scalar_lea.hbm %s15121_s13, 32 }
 0xa7c   :  { %p13224_p3 = scmp.ne.s32.totalorder %s15121_s13, %s13223_s16  ;;  %p13227_p4 = scmp.lt.u32.totalorder %s13223_s16, %s15121_s13 }
 0xa7e   :  { %p13229_p5 = pnand %p13227_p4, %p13224_p3 }
 0xa80   :  { %13232 = shalt.err (!%p13229_p5)
}
 0xa81   :  { %10626 = dma.vmem_to_hbm [thread:$0]  %s10624_s2, 32, %s15121_s13, [#allocation7]  }
 0xa82   :  { %13247 = dma.done.wait [#allocation7], 32  }
 0xa83   :  { %13248 = vsyncadd [#allocation7], 4294967264 }
 0xa84   :  { %10630 = vsyncpa [#allocation6], 1 }
 0xa85   :  { %10631 = vsyncpa [#allocation9], 1 }
 0xa86   :  { %10632 = vsyncpa [#allocation12], 1 }
 0xa87   :  { %10633 = vsyncpa [#allocation15], 1 }
 0xa88   :  { %10634 = vsyncpa [#allocation18], 1 }
 0xa89   :  { %10635 = vsyncpa [#allocation21], 1 }
 0xa8a   :  { %10636 = vsyncpa [#allocation24], 1 }
 0xa8b   :  { %10637 = vsyncpa [#allocation7], 1 }

</bundles_post_ra>
